<compile_context>
chip_gen: v7x
topology: tpu7x:2x2x1
jax: 0.10.0
libtpu: 0.0.40
codegen_flags: <defaults>
</compile_context>

<pallas_src>
import math

import jax
import jax.numpy as jnp
from jax.experimental import pallas as pl
from jax.experimental.pallas import tpu as pltpu

# ---- module hyper-parameters (consistent with __init__) ---------------------
E = 32                       # embedding_dim
NUM_HEADS = 2                # num_heads
ATTN_DS = 2                  # attention_downsample_rate
I_DIM = E // ATTN_DS         # internal dim of the cross attention (16)
HEAD_DIM = I_DIM // NUM_HEADS
MLP_HID = E // 4             # MLP hidden dim (8)


# =============================== fused kernel ================================

def _fused_kernel(
    # per-batch data (leading batch dim squeezed by BlockSpec)
    g_ref, keys_ref, kpe_ref, q_ref, qpe_ref,
    # cross-attention weights
    wq_ref, bq_ref, wkt_ref, bk_ref, wvt_ref, bv_ref, wo_ref, bo_ref,
    # static tokens
    su_ref, sr_ref,
    # uncertain MLP
    uw1_ref, ub1_ref, uw2_ref, ub2_ref, uw3_ref, ub3_ref,
    # refined MLP
    rw1_ref, rb1_ref, rw2_ref, rb2_ref, rw3_ref, rb3_ref,
    # outputs
    oq_ref, og_ref, om_ref,
):
    f32 = jnp.float32

    # ---- stage 1: guiding = guiding_embedding * keys      (C, HW) lane-dense
    guiding = g_ref[...] * keys_ref[...]                     # (E, HW)
    og_ref[...] = guiding                                    # stays in VMEM for reuse

    # ---- stage 2: cross attention token -> image (downsample_rate = 2)
    q_in = q_ref[...] + qpe_ref[...]                         # (Nt, E)
    k_in = guiding + kpe_ref[...]                            # (E, HW)

    q = jnp.dot(q_in, wq_ref[...], preferred_element_type=f32) + bq_ref[...]      # (Nt, I)
    k = jnp.dot(wkt_ref[...], k_in, preferred_element_type=f32) + bk_ref[...]     # (I, HW)
    v = jnp.dot(wvt_ref[...], guiding, preferred_element_type=f32) + bv_ref[...]  # (I, HW)

    scale = 1.0 / math.sqrt(HEAD_DIM)
    contract_lane = (((1,), (1,)), ((), ()))                 # A @ B^T: contract lane dims
    attn_out = bo_ref[...]                                   # (1, E) bias, broadcasts up
    for hd in range(NUM_HEADS):
        sl = slice(hd * HEAD_DIM, (hd + 1) * HEAD_DIM)
        logits = jnp.dot(q[:, sl], k[sl, :], preferred_element_type=f32) * scale  # (Nt, HW)
        logits = logits - jnp.max(logits, axis=-1, keepdims=True)
        p = jnp.exp(logits)
        p = p * pl.reciprocal(jnp.sum(p, axis=-1, keepdims=True), approx=True)
        # (Nt, HW) x (HEAD_DIM, HW) contracted over HW -> (Nt, HEAD_DIM)
        o_h = jax.lax.dot_general(p, v[sl, :], contract_lane, preferred_element_type=f32)
        # fold the output projection per head: no head concat, no scratch.
        attn_out = attn_out + jnp.dot(o_h, wo_ref[sl, :], preferred_element_type=f32)

    q1 = attn_out[1:2, :]                                    # (1, E)

    # ---- stage 3: uncertain / refined tokens via 3-layer MLPs (ReLU, ReLU, linear)
    def mlp3(static_tok, w1_ref, b1_ref, w2_ref, b2_ref, w3_ref, b3_ref):
        # input is concat([static_tok, q1], -1); split w1 rows to avoid a lane concat
        h1 = (jnp.dot(static_tok, w1_ref[0:E, :], preferred_element_type=f32)
              + jnp.dot(q1, w1_ref[E:2 * E, :], preferred_element_type=f32)
              + b1_ref[...])
        h1 = jnp.maximum(h1, 0.0)
        h2 = jnp.maximum(
            jnp.dot(h1, w2_ref[...], preferred_element_type=f32) + b2_ref[...], 0.0)
        return jnp.dot(h2, w3_ref[...], preferred_element_type=f32) + b3_ref[...]

    u_tok = mlp3(su_ref[...], uw1_ref, ub1_ref, uw2_ref, ub2_ref, uw3_ref, ub3_ref)  # (1, E)
    r_tok = mlp3(sr_ref[...], rw1_ref, rb1_ref, rw2_ref, rb2_ref, rw3_ref, rb3_ref)  # (1, E)

    # ---- stage 4: mask heads — one MXU pass over guiding for all three tokens
    toks = jnp.concatenate([u_tok, r_tok, q1], axis=0)       # (3, E)
    masks3 = jnp.dot(toks, guiding, preferred_element_type=f32)   # (3, HW) lane-dense
    umap_sig = jax.nn.sigmoid(masks3[0:1, :])
    rmask = masks3[1:2, :]
    cmask = masks3[2:3, :]
    om_ref[0:1, :] = umap_sig
    om_ref[1:2, :] = rmask
    om_ref[2:3, :] = cmask
    om_ref[3:4, :] = jnp.where(umap_sig >= 0.5, rmask, cmask)

    # ---- stage 5: output queries with token 1 replaced by the refined token
    row_ids = jax.lax.broadcasted_iota(jnp.int32, attn_out.shape, 0)
    oq_ref[...] = jnp.where(row_ids == 1, r_tok, attn_out)   # single lane-full store


# =============================== wrappers =====================================

def _pa_core(params, queries, keys, query_pe, key_pe, guiding_embedding):
    b, c, h, w = guiding_embedding.shape
    hw = h * w
    nt = queries.shape[1]

    # NCHW -> (B, C, HW): a free reshape (== .flatten(2), keeping HW on lanes).
    g_chw = guiding_embedding.reshape(b, c, hw)
    # keys / key_pe arrive (B, HW, C); swap once so kernel math is lane-dense.
    keys_chw = jnp.swapaxes(keys, 1, 2)
    kpe_chw = jnp.swapaxes(key_pe, 1, 2)

    aw = params["attn"]
    um = params["uncertain_mlp"]
    rm = params["refined_mlp"]
    weights = (
        aw["wq"], aw["bq"], aw["wk_t"], aw["bk_col"], aw["wv_t"], aw["bv_col"],
        aw["wo"], aw["bo"],
        params["static_uncertain"], params["static_refined"],
        um["w1"], um["b1"], um["w2"], um["b2"], um["w3"], um["b3"],
        rm["w1"], rm["b1"], rm["w2"], rm["b2"], rm["w3"], rm["b3"],
    )

    per_img = pl.BlockSpec((None, c, hw), lambda i: (i, 0, 0))
    per_tok = pl.BlockSpec((None, nt, c), lambda i: (i, 0, 0))
    per_msk = pl.BlockSpec((None, 4, hw), lambda i: (i, 0, 0))
    w_specs = [pl.BlockSpec(wt.shape, lambda i: (0, 0)) for wt in weights]

    out_shape = (
        jax.ShapeDtypeStruct((b, nt, c), jnp.float32),   # queries_out
        jax.ShapeDtypeStruct((b, c, hw), jnp.float32),   # guiding (C, HW)
        jax.ShapeDtypeStruct((b, 4, hw), jnp.float32),   # [umap, refined, coarse, final]
    )

    queries_out, guiding_chw, masks = pl.pallas_call(
        _fused_kernel,
        out_shape=out_shape,
        grid=(b,),
        in_specs=[per_img, per_img, per_img, per_tok, per_tok] + w_specs,
        out_specs=(per_tok, per_img, per_msk),
        compiler_params=pltpu.CompilerParams(dimension_semantics=("parallel",)),
    )(g_chw, keys_chw, kpe_chw, queries, query_pe, *weights)

    # Back to the torch-facing (B, HW, C) layout for the returned guiding tensor.
    guiding = jnp.swapaxes(guiding_chw, 1, 2)

    mask = {
        "unceratinty_map": masks[:, 0].reshape(b, 1, h, w),
        "refined_mask": masks[:, 1].reshape(b, 1, h, w),
        "coarse_mask": masks[:, 2].reshape(b, 1, h, w),
        "final_mask": masks[:, 3].reshape(b, 1, h, w),
    }
    return queries_out, guiding, mask


_pa_core_jit = jax.jit(_pa_core)


def prompt_adapter_forward(params, queries, keys, query_pe, key_pe,
                           guiding_embedding, image_record=None):
    # NOTE: torch's `queries[:,1,:] @ image_embedding` coarse-mask line is only
    # well-defined for B==1; we compute the per-batch equivalent (identical for B==1).
    queries_out, guiding, mask = _pa_core_jit(
        params, queries, keys, query_pe, key_pe, guiding_embedding)
    boxes = None if image_record is None else image_record.get("boxes", None)
    # (queries, guiding_embedding, query_pe, mask, boxes, None, None)
    return queries_out, guiding, query_pe, mask, boxes, None, None


# =============================== parameters ===================================

def init_params(key):
    ks = list(jax.random.split(key, 12))

    def lin(k, din, dout):
        kw, kb = jax.random.split(k)
        s = 1.0 / math.sqrt(din)
        wgt = jax.random.uniform(kw, (din, dout), jnp.float32, -s, s)
        bias = jax.random.uniform(kb, (1, dout), jnp.float32, -s, s)
        return wgt, bias

    def mlp_params(k3):
        w1, b1 = lin(k3[0], 2 * E, MLP_HID)
        w2, b2 = lin(k3[1], MLP_HID, MLP_HID)
        w3, b3 = lin(k3[2], MLP_HID, E)
        return {"w1": w1, "b1": b1, "w2": w2, "b2": b2, "w3": w3, "b3": b3}

    p = {
        "static_uncertain": jax.random.normal(ks[0], (1, E), jnp.float32),
        "static_refined": jax.random.normal(ks[1], (1, E), jnp.float32),
        "uncertain_mlp": mlp_params(ks[2:5]),
        "refined_mlp": mlp_params(ks[5:8]),
    }
    wq, bq = lin(ks[8], E, I_DIM)
    wk, bk = lin(ks[9], E, I_DIM)
    wv, bv = lin(ks[10], E, I_DIM)
    wo, bo = lin(ks[11], I_DIM, E)
    # k/v projections stored pre-transposed so the kernel computes them in the
    # lane-dense (I, HW) orientation; biases stored in the broadcast shape used.
    p["attn"] = {
        "wq": wq, "bq": bq,
        "wk_t": wk.T, "bk_col": bk.T,     # (I, E), (I, 1)
        "wv_t": wv.T, "bv_col": bv.T,     # (I, E), (I, 1)
        "wo": wo, "bo": bo,               # (I, E), (1, E)
    }
    return p


# ================================= demo =======================================

if __name__ == "__main__":
    key = jax.random.PRNGKey(0)
    kp, kq, kk, kqpe, kkpe, kg = jax.random.split(key, 6)

    b, nt, h, w = 2, 8, 64, 64      # 64x64 spatial is hard-coded by the module
    hw = h * w

    params = init_params(kp)
    queries = jax.random.normal(kq, (b, nt, E), jnp.float32)
    keys = jax.random.normal(kk, (b, hw, E), jnp.float32)
    query_pe = jax.random.normal(kqpe, (b, nt, E), jnp.float32)
    key_pe = jax.random.normal(kkpe, (b, hw, E), jnp.float32)
    guiding_embedding = jax.random.normal(kg, (b, E, h, w), jnp.float32)
    image_record = {"boxes": None}

    out = prompt_adapter_forward(params, queries, keys, query_pe, key_pe,
                                 guiding_embedding, image_record)
    jax.block_until_ready((out[0], out[1], out[3]))

    assert out[0].shape == (b, nt, E)
    assert out[1].shape == (b, hw, E)
    assert out[3]["final_mask"].shape == (b, 1, 64, 64)
    print("KERNEL_OK")
</pallas_src>

<mosaic_0001>
module attributes {stable_mosaic.version = 11 : i64} {
  func.func @_fused_kernel(%arg0: i32, %arg1: memref<1x32x4096xf32, #tpu.memory_space<vmem>>, %arg2: memref<1x32x4096xf32, #tpu.memory_space<vmem>>, %arg3: memref<1x32x4096xf32, #tpu.memory_space<vmem>>, %arg4: memref<1x8x32xf32, #tpu.memory_space<vmem>>, %arg5: memref<1x8x32xf32, #tpu.memory_space<vmem>>, %arg6: memref<32x16xf32, #tpu.memory_space<vmem>>, %arg7: memref<1x16xf32, #tpu.memory_space<vmem>>, %arg8: memref<16x32xf32, #tpu.memory_space<vmem>>, %arg9: memref<16x1xf32, #tpu.memory_space<vmem>>, %arg10: memref<16x32xf32, #tpu.memory_space<vmem>>, %arg11: memref<16x1xf32, #tpu.memory_space<vmem>>, %arg12: memref<16x32xf32, #tpu.memory_space<vmem>>, %arg13: memref<1x32xf32, #tpu.memory_space<vmem>>, %arg14: memref<1x32xf32, #tpu.memory_space<vmem>>, %arg15: memref<1x32xf32, #tpu.memory_space<vmem>>, %arg16: memref<64x8xf32, #tpu.memory_space<vmem>>, %arg17: memref<1x8xf32, #tpu.memory_space<vmem>>, %arg18: memref<8x8xf32, #tpu.memory_space<vmem>>, %arg19: memref<1x8xf32, #tpu.memory_space<vmem>>, %arg20: memref<8x32xf32, #tpu.memory_space<vmem>>, %arg21: memref<1x32xf32, #tpu.memory_space<vmem>>, %arg22: memref<64x8xf32, #tpu.memory_space<vmem>>, %arg23: memref<1x8xf32, #tpu.memory_space<vmem>>, %arg24: memref<8x8xf32, #tpu.memory_space<vmem>>, %arg25: memref<1x8xf32, #tpu.memory_space<vmem>>, %arg26: memref<8x32xf32, #tpu.memory_space<vmem>>, %arg27: memref<1x32xf32, #tpu.memory_space<vmem>>, %arg28: memref<1x8x32xf32, #tpu.memory_space<vmem>>, %arg29: memref<1x32x4096xf32, #tpu.memory_space<vmem>>, %arg30: memref<1x4x4096xf32, #tpu.memory_space<vmem>>) attributes {dimension_semantics = [#tpu.dimension_semantics<parallel>], iteration_bounds = array<i64: 2>, scalar_prefetch = 0 : i64, scratch_operands = 0 : i64, tpu.core_type = #tpu.core_type<tc>, window_params = [{transform_indices = @transform_0, window_bounds = array<i64: 1, 32, 4096>}, {transform_indices = @transform_1, window_bounds = array<i64: 1, 32, 4096>}, {transform_indices = @transform_2, window_bounds = array<i64: 1, 32, 4096>}, {transform_indices = @transform_3, window_bounds = array<i64: 1, 8, 32>}, {transform_indices = @transform_4, window_bounds = array<i64: 1, 8, 32>}, {pipeline_mode = #tpu.pipeline_mode<synchronous>, transform_indices = @transform_5, window_bounds = array<i64: 32, 16>}, {pipeline_mode = #tpu.pipeline_mode<synchronous>, transform_indices = @transform_6, window_bounds = array<i64: 1, 16>}, {pipeline_mode = #tpu.pipeline_mode<synchronous>, transform_indices = @transform_7, window_bounds = array<i64: 16, 32>}, {pipeline_mode = #tpu.pipeline_mode<synchronous>, transform_indices = @transform_8, window_bounds = array<i64: 16, 1>}, {pipeline_mode = #tpu.pipeline_mode<synchronous>, transform_indices = @transform_9, window_bounds = array<i64: 16, 32>}, {pipeline_mode = #tpu.pipeline_mode<synchronous>, transform_indices = @transform_10, window_bounds = array<i64: 16, 1>}, {pipeline_mode = #tpu.pipeline_mode<synchronous>, transform_indices = @transform_11, window_bounds = array<i64: 16, 32>}, {pipeline_mode = #tpu.pipeline_mode<synchronous>, transform_indices = @transform_12, window_bounds = array<i64: 1, 32>}, {pipeline_mode = #tpu.pipeline_mode<synchronous>, transform_indices = @transform_13, window_bounds = array<i64: 1, 32>}, {pipeline_mode = #tpu.pipeline_mode<synchronous>, transform_indices = @transform_14, window_bounds = array<i64: 1, 32>}, {pipeline_mode = #tpu.pipeline_mode<synchronous>, transform_indices = @transform_15, window_bounds = array<i64: 64, 8>}, {pipeline_mode = #tpu.pipeline_mode<synchronous>, transform_indices = @transform_16, window_bounds = array<i64: 1, 8>}, {pipeline_mode = #tpu.pipeline_mode<synchronous>, transform_indices = @transform_17, window_bounds = array<i64: 8, 8>}, {pipeline_mode = #tpu.pipeline_mode<synchronous>, transform_indices = @transform_18, window_bounds = array<i64: 1, 8>}, {pipeline_mode = #tpu.pipeline_mode<synchronous>, transform_indices = @transform_19, window_bounds = array<i64: 8, 32>}, {pipeline_mode = #tpu.pipeline_mode<synchronous>, transform_indices = @transform_20, window_bounds = array<i64: 1, 32>}, {pipeline_mode = #tpu.pipeline_mode<synchronous>, transform_indices = @transform_21, window_bounds = array<i64: 64, 8>}, {pipeline_mode = #tpu.pipeline_mode<synchronous>, transform_indices = @transform_22, window_bounds = array<i64: 1, 8>}, {pipeline_mode = #tpu.pipeline_mode<synchronous>, transform_indices = @transform_23, window_bounds = array<i64: 8, 8>}, {pipeline_mode = #tpu.pipeline_mode<synchronous>, transform_indices = @transform_24, window_bounds = array<i64: 1, 8>}, {pipeline_mode = #tpu.pipeline_mode<synchronous>, transform_indices = @transform_25, window_bounds = array<i64: 8, 32>}, {pipeline_mode = #tpu.pipeline_mode<synchronous>, transform_indices = @transform_26, window_bounds = array<i64: 1, 32>}, {transform_indices = @transform_27, window_bounds = array<i64: 1, 8, 32>}, {transform_indices = @transform_28, window_bounds = array<i64: 1, 32, 4096>}, {transform_indices = @transform_29, window_bounds = array<i64: 1, 4, 4096>}]} {
    %c0 = arith.constant 0 : index
    %c0_0 = arith.constant 0 : index
    %c0_1 = arith.constant 0 : index
    %0 = vector.load %arg1[%c0, %c0_0, %c0_1] : memref<1x32x4096xf32, #tpu.memory_space<vmem>>, vector<1x32x4096xf32>
    %1 = vector.shape_cast %0 : vector<1x32x4096xf32> to vector<32x4096xf32>
    %c0_2 = arith.constant 0 : index
    %c0_3 = arith.constant 0 : index
    %c0_4 = arith.constant 0 : index
    %2 = vector.load %arg2[%c0_2, %c0_3, %c0_4] : memref<1x32x4096xf32, #tpu.memory_space<vmem>>, vector<1x32x4096xf32>
    %3 = vector.shape_cast %2 : vector<1x32x4096xf32> to vector<32x4096xf32>
    %4 = arith.mulf %1, %3 : vector<32x4096xf32>
    %c0_5 = arith.constant 0 : index
    %c0_6 = arith.constant 0 : index
    %c0_7 = arith.constant 0 : index
    %5 = vector.load %arg29[%c0_5, %c0_6, %c0_7] : memref<1x32x4096xf32, #tpu.memory_space<vmem>>, vector<1x32x4096xf32>
    %6 = vector.shape_cast %5 : vector<1x32x4096xf32> to vector<32x4096xf32>
    %7 = vector.shape_cast %4 : vector<32x4096xf32> to vector<1x32x4096xf32>
    tpu.vector_store %arg29[%c0_5, %c0_6, %c0_7], %7 {strides = array<i32>} : memref<1x32x4096xf32, #tpu.memory_space<vmem>>, vector<1x32x4096xf32>,
    %c0_8 = arith.constant 0 : index
    %c0_9 = arith.constant 0 : index
    %c0_10 = arith.constant 0 : index
    %8 = vector.load %arg4[%c0_8, %c0_9, %c0_10] : memref<1x8x32xf32, #tpu.memory_space<vmem>>, vector<1x8x32xf32>
    %9 = vector.shape_cast %8 : vector<1x8x32xf32> to vector<8x32xf32>
    %c0_11 = arith.constant 0 : index
    %c0_12 = arith.constant 0 : index
    %c0_13 = arith.constant 0 : index
    %10 = vector.load %arg5[%c0_11, %c0_12, %c0_13] : memref<1x8x32xf32, #tpu.memory_space<vmem>>, vector<1x8x32xf32>
    %11 = vector.shape_cast %10 : vector<1x8x32xf32> to vector<8x32xf32>
    %12 = arith.addf %9, %11 : vector<8x32xf32>
    %c0_14 = arith.constant 0 : index
    %c0_15 = arith.constant 0 : index
    %c0_16 = arith.constant 0 : index
    %13 = vector.load %arg3[%c0_14, %c0_15, %c0_16] : memref<1x32x4096xf32, #tpu.memory_space<vmem>>, vector<1x32x4096xf32>
    %14 = vector.shape_cast %13 : vector<1x32x4096xf32> to vector<32x4096xf32>
    %15 = arith.addf %4, %14 : vector<32x4096xf32>
    %c0_17 = arith.constant 0 : index
    %c0_18 = arith.constant 0 : index
    %16 = vector.load %arg6[%c0_17, %c0_18] : memref<32x16xf32, #tpu.memory_space<vmem>>, vector<32x16xf32>
    %cst = arith.constant dense<0.000000e+00> : vector<8x16xf32>
    %17 = tpu.matmul %12, %16, %cst {dimension_numbers = #tpu.dot_dimension_numbers<[1], [0], [0], [1], [0, 0, 1, 1], [], []>} : vector<8x32xf32>, vector<32x16xf32>, vector<8x16xf32> -> vector<8x16xf32>
    %c0_19 = arith.constant 0 : index
    %c0_20 = arith.constant 0 : index
    %18 = vector.load %arg7[%c0_19, %c0_20] : memref<1x16xf32, #tpu.memory_space<vmem>>, vector<1x16xf32>
    %19 = vector.broadcast %18 : vector<1x16xf32> to vector<8x16xf32>
    %20 = arith.addf %17, %19 : vector<8x16xf32>
    %c0_21 = arith.constant 0 : index
    %c0_22 = arith.constant 0 : index
    %21 = vector.load %arg8[%c0_21, %c0_22] : memref<16x32xf32, #tpu.memory_space<vmem>>, vector<16x32xf32>
    %cst_23 = arith.constant dense<0.000000e+00> : vector<16x4096xf32>
    %22 = tpu.matmul %21, %15, %cst_23 {dimension_numbers = #tpu.dot_dimension_numbers<[1], [0], [0], [1], [0, 0, 1, 1], [], []>} : vector<16x32xf32>, vector<32x4096xf32>, vector<16x4096xf32> -> vector<16x4096xf32>
    %c0_24 = arith.constant 0 : index
    %c0_25 = arith.constant 0 : index
    %23 = vector.load %arg9[%c0_24, %c0_25] : memref<16x1xf32, #tpu.memory_space<vmem>>, vector<16x1xf32>
    %24 = vector.broadcast %23 : vector<16x1xf32> to vector<16x4096xf32>
    %25 = arith.addf %22, %24 : vector<16x4096xf32>
    %c0_26 = arith.constant 0 : index
    %c0_27 = arith.constant 0 : index
    %26 = vector.load %arg10[%c0_26, %c0_27] : memref<16x32xf32, #tpu.memory_space<vmem>>, vector<16x32xf32>
    %cst_28 = arith.constant dense<0.000000e+00> : vector<16x4096xf32>
    %27 = tpu.matmul %26, %4, %cst_28 {dimension_numbers = #tpu.dot_dimension_numbers<[1], [0], [0], [1], [0, 0, 1, 1], [], []>} : vector<16x32xf32>, vector<32x4096xf32>, vector<16x4096xf32> -> vector<16x4096xf32>
    %c0_29 = arith.constant 0 : index
    %c0_30 = arith.constant 0 : index
    %28 = vector.load %arg11[%c0_29, %c0_30] : memref<16x1xf32, #tpu.memory_space<vmem>>, vector<16x1xf32>
    %29 = vector.broadcast %28 : vector<16x1xf32> to vector<16x4096xf32>
    %30 = arith.addf %27, %29 : vector<16x4096xf32>
    %c0_31 = arith.constant 0 : index
    %c0_32 = arith.constant 0 : index
    %31 = vector.load %arg13[%c0_31, %c0_32] : memref<1x32xf32, #tpu.memory_space<vmem>>, vector<1x32xf32>
    %32 = vector.extract_strided_slice %20 {offsets = [0, 0], sizes = [8, 8], strides = [1, 1]} : vector<8x16xf32> to vector<8x8xf32>
    %33 = vector.extract_strided_slice %25 {offsets = [0, 0], sizes = [8, 4096], strides = [1, 1]} : vector<16x4096xf32> to vector<8x4096xf32>
    %cst_33 = arith.constant dense<0.000000e+00> : vector<8x4096xf32>
    %34 = tpu.matmul %32, %33, %cst_33 {dimension_numbers = #tpu.dot_dimension_numbers<[1], [0], [0], [1], [0, 0, 1, 1], [], []>} : vector<8x8xf32>, vector<8x4096xf32>, vector<8x4096xf32> -> vector<8x4096xf32>
    %cst_34 = arith.constant 0.353553385 : f32
    %35 = vector.broadcast %cst_34 : f32 to vector<8x4096xf32>
    %36 = arith.mulf %34, %35 : vector<8x4096xf32>
    %cst_35 = arith.constant dense<0xFF800000> : vector<8xf32>
    %37 = vector.multi_reduction <maximumf>, %36, %cst_35 [1] : vector<8x4096xf32> to vector<8xf32>
    %38 = vector.shape_cast %37 : vector<8xf32> to vector<8x1xf32>
    %39 = vector.broadcast %38 : vector<8x1xf32> to vector<8x4096xf32>
    %40 = arith.subf %36, %39 : vector<8x4096xf32>
    %41 = math.exp %40 : vector<8x4096xf32>
    %cst_36 = arith.constant dense<0.000000e+00> : vector<8xf32>
    %42 = vector.multi_reduction <add>, %41, %cst_36 [1] : vector<8x4096xf32> to vector<8xf32>
    %43 = vector.shape_cast %42 : vector<8xf32> to vector<8x1xf32>
    %44 = tpu.reciprocal %43 {approx = true} : vector<8x1xf32> -> vector<8x1xf32>
    %45 = vector.broadcast %44 : vector<8x1xf32> to vector<8x4096xf32>
    %46 = arith.mulf %41, %45 : vector<8x4096xf32>
    %47 = vector.extract_strided_slice %30 {offsets = [0, 0], sizes = [8, 4096], strides = [1, 1]} : vector<16x4096xf32> to vector<8x4096xf32>
    %cst_37 = arith.constant dense<0.000000e+00> : vector<8x8xf32>
    %48 = tpu.matmul %46, %47, %cst_37 {dimension_numbers = #tpu.dot_dimension_numbers<[1], [1], [0], [0], [0, 0, 1, 0], [], []>} : vector<8x4096xf32>, vector<8x4096xf32>, vector<8x8xf32> -> vector<8x8xf32>
    %c0_38 = arith.constant 0 : index
    %c0_39 = arith.constant 0 : index
    %49 = vector.load %arg12[%c0_38, %c0_39] : memref<16x32xf32, #tpu.memory_space<vmem>>, vector<8x32xf32>
    %cst_40 = arith.constant dense<0.000000e+00> : vector<8x32xf32>
    %50 = tpu.matmul %48, %49, %cst_40 {dimension_numbers = #tpu.dot_dimension_numbers<[1], [0], [0], [1], [0, 0, 1, 1], [], []>} : vector<8x8xf32>, vector<8x32xf32>, vector<8x32xf32> -> vector<8x32xf32>
    %51 = vector.broadcast %31 : vector<1x32xf32> to vector<8x32xf32>
    %52 = arith.addf %51, %50 : vector<8x32xf32>
    %53 = vector.extract_strided_slice %20 {offsets = [0, 8], sizes = [8, 8], strides = [1, 1]} : vector<8x16xf32> to vector<8x8xf32>
    %54 = vector.extract_strided_slice %25 {offsets = [8, 0], sizes = [8, 4096], strides = [1, 1]} : vector<16x4096xf32> to vector<8x4096xf32>
    %cst_41 = arith.constant dense<0.000000e+00> : vector<8x4096xf32>
    %55 = tpu.matmul %53, %54, %cst_41 {dimension_numbers = #tpu.dot_dimension_numbers<[1], [0], [0], [1], [0, 0, 1, 1], [], []>} : vector<8x8xf32>, vector<8x4096xf32>, vector<8x4096xf32> -> vector<8x4096xf32>
    %cst_42 = arith.constant 0.353553385 : f32
    %56 = vector.broadcast %cst_42 : f32 to vector<8x4096xf32>
    %57 = arith.mulf %55, %56 : vector<8x4096xf32>
    %cst_43 = arith.constant dense<0xFF800000> : vector<8xf32>
    %58 = vector.multi_reduction <maximumf>, %57, %cst_43 [1] : vector<8x4096xf32> to vector<8xf32>
    %59 = vector.shape_cast %58 : vector<8xf32> to vector<8x1xf32>
    %60 = vector.broadcast %59 : vector<8x1xf32> to vector<8x4096xf32>
    %61 = arith.subf %57, %60 : vector<8x4096xf32>
    %62 = math.exp %61 : vector<8x4096xf32>
    %cst_44 = arith.constant dense<0.000000e+00> : vector<8xf32>
    %63 = vector.multi_reduction <add>, %62, %cst_44 [1] : vector<8x4096xf32> to vector<8xf32>
    %64 = vector.shape_cast %63 : vector<8xf32> to vector<8x1xf32>
    %65 = tpu.reciprocal %64 {approx = true} : vector<8x1xf32> -> vector<8x1xf32>
    %66 = vector.broadcast %65 : vector<8x1xf32> to vector<8x4096xf32>
    %67 = arith.mulf %62, %66 : vector<8x4096xf32>
    %68 = vector.extract_strided_slice %30 {offsets = [8, 0], sizes = [8, 4096], strides = [1, 1]} : vector<16x4096xf32> to vector<8x4096xf32>
    %cst_45 = arith.constant dense<0.000000e+00> : vector<8x8xf32>
    %69 = tpu.matmul %67, %68, %cst_45 {dimension_numbers = #tpu.dot_dimension_numbers<[1], [1], [0], [0], [0, 0, 1, 0], [], []>} : vector<8x4096xf32>, vector<8x4096xf32>, vector<8x8xf32> -> vector<8x8xf32>
    %c8 = arith.constant 8 : index
    %c0_46 = arith.constant 0 : index
    %70 = vector.load %arg12[%c8, %c0_46] : memref<16x32xf32, #tpu.memory_space<vmem>>, vector<8x32xf32>
    %cst_47 = arith.constant dense<0.000000e+00> : vector<8x32xf32>
    %71 = tpu.matmul %69, %70, %cst_47 {dimension_numbers = #tpu.dot_dimension_numbers<[1], [0], [0], [1], [0, 0, 1, 1], [], []>} : vector<8x8xf32>, vector<8x32xf32>, vector<8x32xf32> -> vector<8x32xf32>
    %72 = arith.addf %52, %71 : vector<8x32xf32>
    %73 = vector.extract_strided_slice %72 {offsets = [1, 0], sizes = [1, 32], strides = [1, 1]} : vector<8x32xf32> to vector<1x32xf32>
    %c0_48 = arith.constant 0 : index
    %c0_49 = arith.constant 0 : index
    %74 = vector.load %arg14[%c0_48, %c0_49] : memref<1x32xf32, #tpu.memory_space<vmem>>, vector<1x32xf32>
    %c0_50 = arith.constant 0 : index
    %c0_51 = arith.constant 0 : index
    %75 = vector.load %arg16[%c0_50, %c0_51] : memref<64x8xf32, #tpu.memory_space<vmem>>, vector<32x8xf32>
    %cst_52 = arith.constant dense<0.000000e+00> : vector<1x8xf32>
    %76 = tpu.matmul %74, %75, %cst_52 {dimension_numbers = #tpu.dot_dimension_numbers<[1], [0], [0], [1], [0, 0, 1, 1], [], []>} : vector<1x32xf32>, vector<32x8xf32>, vector<1x8xf32> -> vector<1x8xf32>
    %c32 = arith.constant 32 : index
    %c0_53 = arith.constant 0 : index
    %77 = vector.load %arg16[%c32, %c0_53] : memref<64x8xf32, #tpu.memory_space<vmem>>, vector<32x8xf32>
    %cst_54 = arith.constant dense<0.000000e+00> : vector<1x8xf32>
    %78 = tpu.matmul %73, %77, %cst_54 {dimension_numbers = #tpu.dot_dimension_numbers<[1], [0], [0], [1], [0, 0, 1, 1], [], []>} : vector<1x32xf32>, vector<32x8xf32>, vector<1x8xf32> -> vector<1x8xf32>
    %79 = arith.addf %76, %78 : vector<1x8xf32>
    %c0_55 = arith.constant 0 : index
    %c0_56 = arith.constant 0 : index
    %80 = vector.load %arg17[%c0_55, %c0_56] : memref<1x8xf32, #tpu.memory_space<vmem>>, vector<1x8xf32>
    %81 = arith.addf %79, %80 : vector<1x8xf32>
    %cst_57 = arith.constant 0.000000e+00 : f32
    %82 = vector.broadcast %cst_57 : f32 to vector<1x8xf32>
    %83 = arith.maximumf %81, %82 : vector<1x8xf32>
    %c0_58 = arith.constant 0 : index
    %c0_59 = arith.constant 0 : index
    %84 = vector.load %arg18[%c0_58, %c0_59] : memref<8x8xf32, #tpu.memory_space<vmem>>, vector<8x8xf32>
    %cst_60 = arith.constant dense<0.000000e+00> : vector<1x8xf32>
    %85 = tpu.matmul %83, %84, %cst_60 {dimension_numbers = #tpu.dot_dimension_numbers<[1], [0], [0], [1], [0, 0, 1, 1], [], []>} : vector<1x8xf32>, vector<8x8xf32>, vector<1x8xf32> -> vector<1x8xf32>
    %c0_61 = arith.constant 0 : index
    %c0_62 = arith.constant 0 : index
    %86 = vector.load %arg19[%c0_61, %c0_62] : memref<1x8xf32, #tpu.memory_space<vmem>>, vector<1x8xf32>
    %87 = arith.addf %85, %86 : vector<1x8xf32>
    %cst_63 = arith.constant 0.000000e+00 : f32
    %88 = vector.broadcast %cst_63 : f32 to vector<1x8xf32>
    %89 = arith.maximumf %87, %88 : vector<1x8xf32>
    %c0_64 = arith.constant 0 : index
    %c0_65 = arith.constant 0 : index
    %90 = vector.load %arg20[%c0_64, %c0_65] : memref<8x32xf32, #tpu.memory_space<vmem>>, vector<8x32xf32>
    %cst_66 = arith.constant dense<0.000000e+00> : vector<1x32xf32>
    %91 = tpu.matmul %89, %90, %cst_66 {dimension_numbers = #tpu.dot_dimension_numbers<[1], [0], [0], [1], [0, 0, 1, 1], [], []>} : vector<1x8xf32>, vector<8x32xf32>, vector<1x32xf32> -> vector<1x32xf32>
    %c0_67 = arith.constant 0 : index
    %c0_68 = arith.constant 0 : index
    %92 = vector.load %arg21[%c0_67, %c0_68] : memref<1x32xf32, #tpu.memory_space<vmem>>, vector<1x32xf32>
    %93 = arith.addf %91, %92 : vector<1x32xf32>
    %c0_69 = arith.constant 0 : index
    %c0_70 = arith.constant 0 : index
    %94 = vector.load %arg15[%c0_69, %c0_70] : memref<1x32xf32, #tpu.memory_space<vmem>>, vector<1x32xf32>
    %c0_71 = arith.constant 0 : index
    %c0_72 = arith.constant 0 : index
    %95 = vector.load %arg22[%c0_71, %c0_72] : memref<64x8xf32, #tpu.memory_space<vmem>>, vector<32x8xf32>
    %cst_73 = arith.constant dense<0.000000e+00> : vector<1x8xf32>
    %96 = tpu.matmul %94, %95, %cst_73 {dimension_numbers = #tpu.dot_dimension_numbers<[1], [0], [0], [1], [0, 0, 1, 1], [], []>} : vector<1x32xf32>, vector<32x8xf32>, vector<1x8xf32> -> vector<1x8xf32>
    %c32_74 = arith.constant 32 : index
    %c0_75 = arith.constant 0 : index
    %97 = vector.load %arg22[%c32_74, %c0_75] : memref<64x8xf32, #tpu.memory_space<vmem>>, vector<32x8xf32>
    %cst_76 = arith.constant dense<0.000000e+00> : vector<1x8xf32>
    %98 = tpu.matmul %73, %97, %cst_76 {dimension_numbers = #tpu.dot_dimension_numbers<[1], [0], [0], [1], [0, 0, 1, 1], [], []>} : vector<1x32xf32>, vector<32x8xf32>, vector<1x8xf32> -> vector<1x8xf32>
    %99 = arith.addf %96, %98 : vector<1x8xf32>
    %c0_77 = arith.constant 0 : index
    %c0_78 = arith.constant 0 : index
    %100 = vector.load %arg23[%c0_77, %c0_78] : memref<1x8xf32, #tpu.memory_space<vmem>>, vector<1x8xf32>
    %101 = arith.addf %99, %100 : vector<1x8xf32>
    %cst_79 = arith.constant 0.000000e+00 : f32
    %102 = vector.broadcast %cst_79 : f32 to vector<1x8xf32>
    %103 = arith.maximumf %101, %102 : vector<1x8xf32>
    %c0_80 = arith.constant 0 : index
    %c0_81 = arith.constant 0 : index
    %104 = vector.load %arg24[%c0_80, %c0_81] : memref<8x8xf32, #tpu.memory_space<vmem>>, vector<8x8xf32>
    %cst_82 = arith.constant dense<0.000000e+00> : vector<1x8xf32>
    %105 = tpu.matmul %103, %104, %cst_82 {dimension_numbers = #tpu.dot_dimension_numbers<[1], [0], [0], [1], [0, 0, 1, 1], [], []>} : vector<1x8xf32>, vector<8x8xf32>, vector<1x8xf32> -> vector<1x8xf32>
    %c0_83 = arith.constant 0 : index
    %c0_84 = arith.constant 0 : index
    %106 = vector.load %arg25[%c0_83, %c0_84] : memref<1x8xf32, #tpu.memory_space<vmem>>, vector<1x8xf32>
    %107 = arith.addf %105, %106 : vector<1x8xf32>
    %cst_85 = arith.constant 0.000000e+00 : f32
    %108 = vector.broadcast %cst_85 : f32 to vector<1x8xf32>
    %109 = arith.maximumf %107, %108 : vector<1x8xf32>
    %c0_86 = arith.constant 0 : index
    %c0_87 = arith.constant 0 : index
    %110 = vector.load %arg26[%c0_86, %c0_87] : memref<8x32xf32, #tpu.memory_space<vmem>>, vector<8x32xf32>
    %cst_88 = arith.constant dense<0.000000e+00> : vector<1x32xf32>
    %111 = tpu.matmul %109, %110, %cst_88 {dimension_numbers = #tpu.dot_dimension_numbers<[1], [0], [0], [1], [0, 0, 1, 1], [], []>} : vector<1x8xf32>, vector<8x32xf32>, vector<1x32xf32> -> vector<1x32xf32>
    %c0_89 = arith.constant 0 : index
    %c0_90 = arith.constant 0 : index
    %112 = vector.load %arg27[%c0_89, %c0_90] : memref<1x32xf32, #tpu.memory_space<vmem>>, vector<1x32xf32>
    %113 = arith.addf %111, %112 : vector<1x32xf32>
    %114 = tpu.concatenate %93, %113, %73 in 0 : vector<1x32xf32>, vector<1x32xf32>, vector<1x32xf32> -> vector<3x32xf32>
    %cst_91 = arith.constant dense<0.000000e+00> : vector<3x4096xf32>
    %115 = tpu.matmul %114, %4, %cst_91 {dimension_numbers = #tpu.dot_dimension_numbers<[1], [0], [0], [1], [0, 0, 1, 1], [], []>} : vector<3x32xf32>, vector<32x4096xf32>, vector<3x4096xf32> -> vector<3x4096xf32>
    %116 = vector.extract_strided_slice %115 {offsets = [0, 0], sizes = [1, 4096], strides = [1, 1]} : vector<3x4096xf32> to vector<1x4096xf32>
    %117 = arith.negf %116 : vector<1x4096xf32>
    %118 = math.exp %117 : vector<1x4096xf32>
    %cst_92 = arith.constant 1.000000e+00 : f32
    %119 = vector.broadcast %cst_92 : f32 to vector<1x4096xf32>
    %120 = arith.addf %119, %118 : vector<1x4096xf32>
    %121 = arith.divf %119, %120 : vector<1x4096xf32>
    %122 = vector.extract_strided_slice %115 {offsets = [1, 0], sizes = [1, 4096], strides = [1, 1]} : vector<3x4096xf32> to vector<1x4096xf32>
    %123 = vector.extract_strided_slice %115 {offsets = [2, 0], sizes = [1, 4096], strides = [1, 1]} : vector<3x4096xf32> to vector<1x4096xf32>
    %c0_93 = arith.constant 0 : index
    %c0_94 = arith.constant 0 : index
    %c0_95 = arith.constant 0 : index
    %124 = vector.load %arg30[%c0_93, %c0_94, %c0_95] : memref<1x4x4096xf32, #tpu.memory_space<vmem>>, vector<1x1x4096xf32>
    %125 = vector.shape_cast %124 : vector<1x1x4096xf32> to vector<1x4096xf32>
    %126 = vector.shape_cast %121 : vector<1x4096xf32> to vector<1x1x4096xf32>
    tpu.vector_store %arg30[%c0_93, %c0_94, %c0_95], %126 {strides = array<i32>} : memref<1x4x4096xf32, #tpu.memory_space<vmem>>, vector<1x1x4096xf32>,
    %c0_96 = arith.constant 0 : index
    %c1 = arith.constant 1 : index
    %c0_97 = arith.constant 0 : index
    %127 = vector.load %arg30[%c0_96, %c1, %c0_97] : memref<1x4x4096xf32, #tpu.memory_space<vmem>>, vector<1x1x4096xf32>
    %128 = vector.shape_cast %127 : vector<1x1x4096xf32> to vector<1x4096xf32>
    %129 = vector.shape_cast %122 : vector<1x4096xf32> to vector<1x1x4096xf32>
    tpu.vector_store %arg30[%c0_96, %c1, %c0_97], %129 {strides = array<i32>} : memref<1x4x4096xf32, #tpu.memory_space<vmem>>, vector<1x1x4096xf32>,
    %c0_98 = arith.constant 0 : index
    %c2 = arith.constant 2 : index
    %c0_99 = arith.constant 0 : index
    %130 = vector.load %arg30[%c0_98, %c2, %c0_99] : memref<1x4x4096xf32, #tpu.memory_space<vmem>>, vector<1x1x4096xf32>
    %131 = vector.shape_cast %130 : vector<1x1x4096xf32> to vector<1x4096xf32>
    %132 = vector.shape_cast %123 : vector<1x4096xf32> to vector<1x1x4096xf32>
    tpu.vector_store %arg30[%c0_98, %c2, %c0_99], %132 {strides = array<i32>} : memref<1x4x4096xf32, #tpu.memory_space<vmem>>, vector<1x1x4096xf32>,
    %cst_100 = arith.constant 5.000000e-01 : f32
    %133 = vector.broadcast %cst_100 : f32 to vector<1x4096xf32>
    %134 = arith.cmpf oge, %121, %133 : vector<1x4096xf32>
    %135 = arith.select %134, %122, %123 : vector<1x4096xi1>, vector<1x4096xf32>
    %c0_101 = arith.constant 0 : index
    %c3 = arith.constant 3 : index
    %c0_102 = arith.constant 0 : index
    %136 = vector.load %arg30[%c0_101, %c3, %c0_102] : memref<1x4x4096xf32, #tpu.memory_space<vmem>>, vector<1x1x4096xf32>
    %137 = vector.shape_cast %136 : vector<1x1x4096xf32> to vector<1x4096xf32>
    %138 = vector.shape_cast %135 : vector<1x4096xf32> to vector<1x1x4096xf32>
    tpu.vector_store %arg30[%c0_101, %c3, %c0_102], %138 {strides = array<i32>} : memref<1x4x4096xf32, #tpu.memory_space<vmem>>, vector<1x1x4096xf32>,
    %139 = tpu.iota {dimensions = array<i32: 0>} : vector<8x32xi32>
    %c1_i32 = arith.constant 1 : i32
    %140 = vector.broadcast %c1_i32 : i32 to vector<8x32xi32>
    %141 = arith.cmpi eq, %139, %140 : vector<8x32xi32>
    %142 = vector.shape_cast %113 : vector<1x32xf32> to vector<1x32xf32>
    %143 = vector.broadcast %142 : vector<1x32xf32> to vector<8x32xf32>
    %144 = arith.select %141, %143, %72 : vector<8x32xi1>, vector<8x32xf32>
    %c0_103 = arith.constant 0 : index
    %c0_104 = arith.constant 0 : index
    %c0_105 = arith.constant 0 : index
    %145 = vector.load %arg28[%c0_103, %c0_104, %c0_105] : memref<1x8x32xf32, #tpu.memory_space<vmem>>, vector<1x8x32xf32>
    %146 = vector.shape_cast %145 : vector<1x8x32xf32> to vector<8x32xf32>
    %147 = vector.shape_cast %144 : vector<8x32xf32> to vector<1x8x32xf32>
    tpu.vector_store %arg28[%c0_103, %c0_104, %c0_105], %147 {strides = array<i32>} : memref<1x8x32xf32, #tpu.memory_space<vmem>>, vector<1x8x32xf32>,
    return
  }
  func.func @transform_0(%arg0: i32) -> (i32, i32, i32) {
    %c0_i32 = arith.constant 0 : i32
    %c0_i32_0 = arith.constant 0 : i32
    %c0_i32_1 = arith.constant 0 : i32
    return %arg0, %c0_i32, %c0_i32_0 : i32, i32, i32
  }
  func.func @transform_1(%arg0: i32) -> (i32, i32, i32) {
    %c0_i32 = arith.constant 0 : i32
    %c0_i32_0 = arith.constant 0 : i32
    %c0_i32_1 = arith.constant 0 : i32
    return %arg0, %c0_i32, %c0_i32_0 : i32, i32, i32
  }
  func.func @transform_2(%arg0: i32) -> (i32, i32, i32) {
    %c0_i32 = arith.constant 0 : i32
    %c0_i32_0 = arith.constant 0 : i32
    %c0_i32_1 = arith.constant 0 : i32
    return %arg0, %c0_i32, %c0_i32_0 : i32, i32, i32
  }
  func.func @transform_3(%arg0: i32) -> (i32, i32, i32) {
    %c0_i32 = arith.constant 0 : i32
    %c0_i32_0 = arith.constant 0 : i32
    %c0_i32_1 = arith.constant 0 : i32
    return %arg0, %c0_i32, %c0_i32_0 : i32, i32, i32
  }
  func.func @transform_4(%arg0: i32) -> (i32, i32, i32) {
    %c0_i32 = arith.constant 0 : i32
    %c0_i32_0 = arith.constant 0 : i32
    %c0_i32_1 = arith.constant 0 : i32
    return %arg0, %c0_i32, %c0_i32_0 : i32, i32, i32
  }
  func.func @transform_5(%arg0: i32) -> (i32, i32) {
    %c0_i32 = arith.constant 0 : i32
    %c0_i32_0 = arith.constant 0 : i32
    %c0_i32_1 = arith.constant 0 : i32
    return %c0_i32, %c0_i32_0 : i32, i32
  }
  func.func @transform_6(%arg0: i32) -> (i32, i32) {
    %c0_i32 = arith.constant 0 : i32
    %c0_i32_0 = arith.constant 0 : i32
    %c0_i32_1 = arith.constant 0 : i32
    return %c0_i32, %c0_i32_0 : i32, i32
  }
  func.func @transform_7(%arg0: i32) -> (i32, i32) {
    %c0_i32 = arith.constant 0 : i32
    %c0_i32_0 = arith.constant 0 : i32
    %c0_i32_1 = arith.constant 0 : i32
    return %c0_i32, %c0_i32_0 : i32, i32
  }
  func.func @transform_8(%arg0: i32) -> (i32, i32) {
    %c0_i32 = arith.constant 0 : i32
    %c0_i32_0 = arith.constant 0 : i32
    %c0_i32_1 = arith.constant 0 : i32
    return %c0_i32, %c0_i32_0 : i32, i32
  }
  func.func @transform_9(%arg0: i32) -> (i32, i32) {
    %c0_i32 = arith.constant 0 : i32
    %c0_i32_0 = arith.constant 0 : i32
    %c0_i32_1 = arith.constant 0 : i32
    return %c0_i32, %c0_i32_0 : i32, i32
  }
  func.func @transform_10(%arg0: i32) -> (i32, i32) {
    %c0_i32 = arith.constant 0 : i32
    %c0_i32_0 = arith.constant 0 : i32
    %c0_i32_1 = arith.constant 0 : i32
    return %c0_i32, %c0_i32_0 : i32, i32
  }
  func.func @transform_11(%arg0: i32) -> (i32, i32) {
    %c0_i32 = arith.constant 0 : i32
    %c0_i32_0 = arith.constant 0 : i32
    %c0_i32_1 = arith.constant 0 : i32
    return %c0_i32, %c0_i32_0 : i32, i32
  }
  func.func @transform_12(%arg0: i32) -> (i32, i32) {
    %c0_i32 = arith.constant 0 : i32
    %c0_i32_0 = arith.constant 0 : i32
    %c0_i32_1 = arith.constant 0 : i32
    return %c0_i32, %c0_i32_0 : i32, i32
  }
  func.func @transform_13(%arg0: i32) -> (i32, i32) {
    %c0_i32 = arith.constant 0 : i32
    %c0_i32_0 = arith.constant 0 : i32
    %c0_i32_1 = arith.constant 0 : i32
    return %c0_i32, %c0_i32_0 : i32, i32
  }
  func.func @transform_14(%arg0: i32) -> (i32, i32) {
    %c0_i32 = arith.constant 0 : i32
    %c0_i32_0 = arith.constant 0 : i32
    %c0_i32_1 = arith.constant 0 : i32
    return %c0_i32, %c0_i32_0 : i32, i32
  }
  func.func @transform_15(%arg0: i32) -> (i32, i32) {
    %c0_i32 = arith.constant 0 : i32
    %c0_i32_0 = arith.constant 0 : i32
    %c0_i32_1 = arith.constant 0 : i32
    return %c0_i32, %c0_i32_0 : i32, i32
  }
  func.func @transform_16(%arg0: i32) -> (i32, i32) {
    %c0_i32 = arith.constant 0 : i32
    %c0_i32_0 = arith.constant 0 : i32
    %c0_i32_1 = arith.constant 0 : i32
    return %c0_i32, %c0_i32_0 : i32, i32
  }
  func.func @transform_17(%arg0: i32) -> (i32, i32) {
    %c0_i32 = arith.constant 0 : i32
    %c0_i32_0 = arith.constant 0 : i32
    %c0_i32_1 = arith.constant 0 : i32
    return %c0_i32, %c0_i32_0 : i32, i32
  }
  func.func @transform_18(%arg0: i32) -> (i32, i32) {
    %c0_i32 = arith.constant 0 : i32
    %c0_i32_0 = arith.constant 0 : i32
    %c0_i32_1 = arith.constant 0 : i32
    return %c0_i32, %c0_i32_0 : i32, i32
  }
  func.func @transform_19(%arg0: i32) -> (i32, i32) {
    %c0_i32 = arith.constant 0 : i32
    %c0_i32_0 = arith.constant 0 : i32
    %c0_i32_1 = arith.constant 0 : i32
    return %c0_i32, %c0_i32_0 : i32, i32
  }
  func.func @transform_20(%arg0: i32) -> (i32, i32) {
    %c0_i32 = arith.constant 0 : i32
    %c0_i32_0 = arith.constant 0 : i32
    %c0_i32_1 = arith.constant 0 : i32
    return %c0_i32, %c0_i32_0 : i32, i32
  }
  func.func @transform_21(%arg0: i32) -> (i32, i32) {
    %c0_i32 = arith.constant 0 : i32
    %c0_i32_0 = arith.constant 0 : i32
    %c0_i32_1 = arith.constant 0 : i32
    return %c0_i32, %c0_i32_0 : i32, i32
  }
  func.func @transform_22(%arg0: i32) -> (i32, i32) {
    %c0_i32 = arith.constant 0 : i32
    %c0_i32_0 = arith.constant 0 : i32
    %c0_i32_1 = arith.constant 0 : i32
    return %c0_i32, %c0_i32_0 : i32, i32
  }
  func.func @transform_23(%arg0: i32) -> (i32, i32) {
    %c0_i32 = arith.constant 0 : i32
    %c0_i32_0 = arith.constant 0 : i32
    %c0_i32_1 = arith.constant 0 : i32
    return %c0_i32, %c0_i32_0 : i32, i32
  }
  func.func @transform_24(%arg0: i32) -> (i32, i32) {
    %c0_i32 = arith.constant 0 : i32
    %c0_i32_0 = arith.constant 0 : i32
    %c0_i32_1 = arith.constant 0 : i32
    return %c0_i32, %c0_i32_0 : i32, i32
  }
  func.func @transform_25(%arg0: i32) -> (i32, i32) {
    %c0_i32 = arith.constant 0 : i32
    %c0_i32_0 = arith.constant 0 : i32
    %c0_i32_1 = arith.constant 0 : i32
    return %c0_i32, %c0_i32_0 : i32, i32
  }
  func.func @transform_26(%arg0: i32) -> (i32, i32) {
    %c0_i32 = arith.constant 0 : i32
    %c0_i32_0 = arith.constant 0 : i32
    %c0_i32_1 = arith.constant 0 : i32
    return %c0_i32, %c0_i32_0 : i32, i32
  }
  func.func @transform_27(%arg0: i32) -> (i32, i32, i32) {
    %c0_i32 = arith.constant 0 : i32
    %c0_i32_0 = arith.constant 0 : i32
    %c0_i32_1 = arith.constant 0 : i32
    return %arg0, %c0_i32, %c0_i32_0 : i32, i32, i32
  }
  func.func @transform_28(%arg0: i32) -> (i32, i32, i32) {
    %c0_i32 = arith.constant 0 : i32
    %c0_i32_0 = arith.constant 0 : i32
    %c0_i32_1 = arith.constant 0 : i32
    return %arg0, %c0_i32, %c0_i32_0 : i32, i32, i32
  }
  func.func @transform_29(%arg0: i32) -> (i32, i32, i32) {
    %c0_i32 = arith.constant 0 : i32
    %c0_i32_0 = arith.constant 0 : i32
    %c0_i32_1 = arith.constant 0 : i32
    return %arg0, %c0_i32, %c0_i32_0 : i32, i32, i32
  }
}

</mosaic_0001>

<bundles_post_ra>
// kernel: squeeze.4
= control target key start
LH: loop header
LB: loop body
LE: loop exit
PB: predicated region body
PF: predicated region fallthrough
CT: control target
= control target key end

     0   :  { %vm162_vm0 = vcmask 523264   ;;  %vm385_vm1 = vcmask 1047556   ;;  %s566_s23 = smov 64   ;;  %s774_s0 = inlined_call_operand.vmem [shape: f32[2,4096], index: 0, kind: input, shape index: {}]   ;;  %s775_s1 = inlined_call_operand.hbm [shape: f32[2,1,64,64], index: 1, kind: output, shape index: {}]  }
   0x1   :  { %v533_v0 = vld [vmem:[%s774_s0 + $0xe] sm:$0x3]  ;;  %v534_v1 = vld [vmem:[%s774_s0 + $0xc] sm:$0x3]  ;;  %v535_v2 = vld [vmem:[%s774_s0 + $0xa] sm:$0x3] }
   0x2   :  { %129 = vst [vmem:[#allocation2 + $0x38] sm:$0x3] %v533_v0  ;;  %134 = vst [vmem:[#allocation2 + $0x30] sm:$0x3] %v534_v1  ;;  %v536_v3 = vld [vmem:[%s774_s0 + $0x8] sm:$0x3] }
   0x3   :  { %139 = vst [vmem:[#allocation2 + $0x28] sm:$0x3] %v535_v2  ;;  %v537_v4 = vld [vmem:[%s774_s0 + $0x6] sm:$0x3]  ;;  %v538_v5 = vld [vmem:[%s774_s0 + $0x4] sm:$0x3] }
   0x4   :  { %144 = vst [vmem:[#allocation2 + $0x20] sm:$0x3] %v536_v3  ;;  %149 = vst [vmem:[#allocation2 + $0x18] sm:$0x3] %v537_v4  ;;  %v539_v6 = vld [vmem:[%s774_s0 + $0x2] sm:$0x3] }
   0x5   :  { %154 = vst [vmem:[#allocation2 + $0x10] sm:$0x3] %v538_v5  ;;  %v159_v7 = vld [vmem:[%s774_s0] sm:$0x3]  ;;  %158 = vst [vmem:[#allocation2 + $0x8] sm:$0x3] %v539_v6 }
   0x6   :  { %160 = vst [vmem:[#allocation2] sm:$0x3] %v159_v7  ;;  %v517_v8 = vld [vmem:[%s774_s0 + $0x2e] sm:$0x3]  ;;  %v518_v9 = vld [vmem:[%s774_s0 + $0x2c] sm:$0x3] }
   0x7   :  { %49 = vst [vmem:[#allocation2 + $0xb8] sm:$0x3] %v517_v8  ;;  %54 = vst [vmem:[#allocation2 + $0xb0] sm:$0x3] %v518_v9  ;;  %v519_v10 = vld [vmem:[%s774_s0 + $0x2a] sm:$0x3] }
   0x8   :  { %v520_v11 = vld [vmem:[%s774_s0 + $0x28] sm:$0x3]  ;;  %v521_v12 = vld [vmem:[%s774_s0 + $0x26] sm:$0x3]  ;;  %59 = vst [vmem:[#allocation2 + $0xa8] sm:$0x3] %v519_v10 }
   0x9   :  { %64 = vst [vmem:[#allocation2 + $0xa0] sm:$0x3] %v520_v11  ;;  %69 = vst [vmem:[#allocation2 + $0x98] sm:$0x3] %v521_v12  ;;  %v522_v13 = vld [vmem:[%s774_s0 + $0x24] sm:$0x3] }
   0xa   :  { %v523_v14 = vld [vmem:[%s774_s0 + $0x22] sm:$0x3]  ;;  %v524_v15 = vld [vmem:[%s774_s0 + $0x20] sm:$0x3]  ;;  %74 = vst [vmem:[#allocation2 + $0x90] sm:$0x3] %v522_v13 }
   0xb   :  { %79 = vst [vmem:[#allocation2 + $0x88] sm:$0x3] %v523_v14  ;;  %84 = vst [vmem:[#allocation2 + $0x80] sm:$0x3] %v524_v15  ;;  %v525_v16 = vld [vmem:[%s774_s0 + $0x1e] sm:$0x3] }
   0xc   :  { %v526_v17 = vld [vmem:[%s774_s0 + $0x1c] sm:$0x3]  ;;  %v527_v18 = vld [vmem:[%s774_s0 + $0x1a] sm:$0x3]  ;;  %89 = vst [vmem:[#allocation2 + $0x78] sm:$0x3] %v525_v16 }
   0xd   :  { %94 = vst [vmem:[#allocation2 + $0x70] sm:$0x3] %v526_v17  ;;  %99 = vst [vmem:[#allocation2 + $0x68] sm:$0x3] %v527_v18  ;;  %v528_v19 = vld [vmem:[%s774_s0 + $0x18] sm:$0x3] }
   0xe   :  { %v529_v20 = vld [vmem:[%s774_s0 + $0x16] sm:$0x3]  ;;  %v530_v21 = vld [vmem:[%s774_s0 + $0x14] sm:$0x3]  ;;  %v195_v22 = vld [vmem:[#allocation2 + $0x28] sm:$0x3]  }
   0xf   :  { %v202_v23 = vld [vmem:[#allocation2 + $0x30] sm:$0x3]   ;;  %v209_v24 = vld [vmem:[#allocation2 + $0x38] sm:$0x3]   ;;  %104 = vst [vmem:[#allocation2 + $0x60] sm:$0x3] %v528_v19 }
  0x10   :  { %109 = vst [vmem:[#allocation2 + $0x58] sm:$0x3] %v529_v20  ;;  %114 = vst [vmem:[#allocation2 + $0x50] sm:$0x3] %v530_v21  ;;  %v174_v25 = vld [vmem:[#allocation2 + $0x10] sm:$0x3]  }
  0x11   :  { %v181_v26 = vld [vmem:[#allocation2 + $0x18] sm:$0x3]   ;;  %v188_v27 = vld [vmem:[#allocation2 + $0x20] sm:$0x3]   ;;  %198 = vst.msk [vmem:[#allocation0 + $0xa] sm:$0x1] %vm162_vm0, %v195_v22  }
  0x12   :  { %200 = vst.msk [vmem:[#allocation0 + $0x49] sm:$0x2] %vm162_vm0, %v195_v22   ;;  %205 = vst.msk [vmem:[#allocation0 + $0xc] sm:$0x1] %vm162_vm0, %v202_v23   ;;  %v161_v28 = vld [vmem:[#allocation2] sm:$0x3]  }
  0x13   :  { %207 = vst.msk [vmem:[#allocation0 + $0x4b] sm:$0x2] %vm162_vm0, %v202_v23   ;;  %212 = vst.msk [vmem:[#allocation0 + $0xe] sm:$0x1] %vm162_vm0, %v209_v24   ;;  %v167_v29 = vld [vmem:[#allocation2 + $0x8] sm:$0x3]  }
  0x14   :  { %214 = vst.msk [vmem:[#allocation0 + $0x4d] sm:$0x2] %vm162_vm0, %v209_v24   ;;  %177 = vst.msk [vmem:[#allocation0 + $0x4] sm:$0x1] %vm162_vm0, %v174_v25   ;;  %v531_v30 = vld [vmem:[%s774_s0 + $0x12] sm:$0x3] }
  0x15   :  { %179 = vst.msk [vmem:[#allocation0 + $0x43] sm:$0x2] %vm162_vm0, %v174_v25   ;;  %184 = vst.msk [vmem:[#allocation0 + $0x6] sm:$0x1] %vm162_vm0, %v181_v26   ;;  %v293_v34 = vld [vmem:[#allocation2 + $0x98] sm:$0x3]  }
  0x16   :  { %186 = vst.msk [vmem:[#allocation0 + $0x45] sm:$0x2] %vm162_vm0, %v181_v26   ;;  %191 = vst.msk [vmem:[#allocation0 + $0x8] sm:$0x1] %vm162_vm0, %v188_v27   ;;  %v300_v35 = vld [vmem:[#allocation2 + $0xa0] sm:$0x3]  }
  0x17   :  { %193 = vst.msk [vmem:[#allocation0 + $0x47] sm:$0x2] %vm162_vm0, %v188_v27   ;;  %163 = vst.msk [vmem:[#allocation0] sm:$0x1] %vm162_vm0, %v161_v28   ;;  %v307_v36 = vld [vmem:[#allocation2 + $0xa8] sm:$0x3]  }
  0x18   :  { %165 = vst.msk [vmem:[#allocation0 + $0x3f] sm:$0x2] %vm162_vm0, %v161_v28   ;;  %170 = vst.msk [vmem:[#allocation0 + $0x2] sm:$0x1] %vm162_vm0, %v167_v29   ;;  %v272_v37 = vld [vmem:[#allocation2 + $0x80] sm:$0x3]  }
  0x19   :  { %172 = vst.msk [vmem:[#allocation0 + $0x41] sm:$0x2] %vm162_vm0, %v167_v29   ;;  %v383_v31 = vld [vmem:[#allocation2] ss:$8 sm:$0xf]  }
  0x1a   :  { %v384_v32 = vld [vmem:[#allocation2] ss:$8 sm:$0xf0]   ;;  %119 = vst [vmem:[#allocation2 + $0x48] sm:$0x3] %v531_v30 }
  0x1b   :  { %v386_v33 = vsel %vm385_vm1, %v384_v32, %v383_v31  ;;  %v279_v38 = vld [vmem:[#allocation2 + $0x88] sm:$0x3]   ;;  %v286_v39 = vld [vmem:[#allocation2 + $0x90] sm:$0x3]   ;;  %296 = vst.msk [vmem:[#allocation0 + $0x26] sm:$0x1] %vm162_vm0, %v293_v34  }
  0x1c   :  { %387 = vrot.lane.b32.xlu0 %v386_v33, %s566_s23  ;;  %298 = vst.msk [vmem:[#allocation0 + $0x65] sm:$0x2] %vm162_vm0, %v293_v34   ;;  %303 = vst.msk [vmem:[#allocation0 + $0x28] sm:$0x1] %vm162_vm0, %v300_v35   ;;  %v314_v40 = vld [vmem:[#allocation2 + $0xb0] sm:$0x3]  }
  0x1d   :  { %305 = vst.msk [vmem:[#allocation0 + $0x67] sm:$0x2] %vm162_vm0, %v300_v35   ;;  %310 = vst.msk [vmem:[#allocation0 + $0x2a] sm:$0x1] %vm162_vm0, %v307_v36   ;;  %v321_v43 = vld [vmem:[#allocation2 + $0xb8] sm:$0x3]  }
  0x1e   :  { %312 = vst.msk [vmem:[#allocation0 + $0x69] sm:$0x2] %vm162_vm0, %v307_v36   ;;  %275 = vst.msk [vmem:[#allocation0 + $0x20] sm:$0x1] %vm162_vm0, %v272_v37   ;;  %v532_v51 = vld [vmem:[%s774_s0 + $0x10] sm:$0x3] }
  0x1f   :  { %277 = vst.msk [vmem:[#allocation0 + $0x5f] sm:$0x2] %vm162_vm0, %v272_v37   ;;  %282 = vst.msk [vmem:[#allocation0 + $0x22] sm:$0x1] %vm162_vm0, %v279_v38   ;;  %v230_v53 = vld [vmem:[#allocation2 + $0x50] sm:$0x3]  }
  0x20   :  { %284 = vst.msk [vmem:[#allocation0 + $0x61] sm:$0x2] %vm162_vm0, %v279_v38   ;;  %289 = vst.msk [vmem:[#allocation0 + $0x24] sm:$0x1] %vm162_vm0, %v286_v39   ;;  %v237_v54 = vld [vmem:[#allocation2 + $0x58] sm:$0x3]  }
  0x21   :  { %291 = vst.msk [vmem:[#allocation0 + $0x63] sm:$0x2] %vm162_vm0, %v286_v39   ;;  %v404_v41 = vld [vmem:[#allocation2 + $0x80] ss:$8 sm:$0xf]  }
  0x22   :  { %317 = vst.msk [vmem:[#allocation0 + $0x2c] sm:$0x1] %vm162_vm0, %v314_v40   ;;  %319 = vst.msk [vmem:[#allocation0 + $0x6b] sm:$0x2] %vm162_vm0, %v314_v40   ;;  %v223_v52 = vld [vmem:[#allocation2 + $0x48] sm:$0x3]  }
  0x23   :  { %v406_v42 = vld [vmem:[#allocation2 + $0x80] ss:$8 sm:$0xf0]   ;;  %324 = vst.msk [vmem:[#allocation0 + $0x2e] sm:$0x1] %vm162_vm0, %v321_v43  }
  0x24   :  { %v408_v44 = vsel %vm385_vm1, %v406_v42, %v404_v41  ;;  %326 = vst.msk [vmem:[#allocation0 + $0x6d] sm:$0x2] %vm162_vm0, %v321_v43   ;;  %v393_v45 = vld [vmem:[#allocation2 + $0x1] ss:$8 sm:$0xf]  }
  0x25   :  { %v395_v46 = vld [vmem:[#allocation2 + $0x1] ss:$8 sm:$0xf0]   ;;  %409 = vrot.lane.b32.xlu1 %v408_v44, %s566_s23  ;;  %124 = vst [vmem:[#allocation2 + $0x40] sm:$0x3] %v532_v51 }
  0x26   :  { %v397_v47 = vsel %vm385_vm1, %v395_v46, %v393_v45  ;;  %v415_v48 = vld [vmem:[#allocation2 + $0x81] ss:$8 sm:$0xf]   ;;  %226 = vst.msk [vmem:[#allocation0 + $0x12] sm:$0x1] %vm162_vm0, %v223_v52  }
  0x27   :  { %v417_v49 = vld [vmem:[#allocation2 + $0x81] ss:$8 sm:$0xf0]   ;;  %398 = vrot.lane.b32.xlu0 %v397_v47, %s566_s23  ;;  %228 = vst.msk [vmem:[#allocation0 + $0x51] sm:$0x2] %vm162_vm0, %v223_v52  }
  0x28   :  { %v419_v50 = vsel %vm385_vm1, %v417_v49, %v415_v48  ;;  %233 = vst.msk [vmem:[#allocation0 + $0x14] sm:$0x1] %vm162_vm0, %v230_v53   ;;  %235 = vst.msk [vmem:[#allocation0 + $0x53] sm:$0x2] %vm162_vm0, %v230_v53   ;;  %v244_v55 = vld [vmem:[#allocation2 + $0x60] sm:$0x3]  }
  0x29   :  { %v251_v56 = vld [vmem:[#allocation2 + $0x68] sm:$0x3]   ;;  %240 = vst.msk [vmem:[#allocation0 + $0x16] sm:$0x1] %vm162_vm0, %v237_v54   ;;  %242 = vst.msk [vmem:[#allocation0 + $0x55] sm:$0x2] %vm162_vm0, %v237_v54   ;;  %420 = vrot.lane.b32.xlu1 %v419_v50, %s566_s23 }
  0x2a   :  { %247 = vst.msk [vmem:[#allocation0 + $0x18] sm:$0x1] %vm162_vm0, %v244_v55   ;;  %249 = vst.msk [vmem:[#allocation0 + $0x57] sm:$0x2] %vm162_vm0, %v244_v55   ;;  %v258_v57 = vld [vmem:[#allocation2 + $0x70] sm:$0x3]  }
  0x2b   :  { %254 = vst.msk [vmem:[#allocation0 + $0x1a] sm:$0x1] %vm162_vm0, %v251_v56   ;;  %256 = vst.msk [vmem:[#allocation0 + $0x59] sm:$0x2] %vm162_vm0, %v251_v56   ;;  %v265_v58 = vld [vmem:[#allocation2 + $0x78] sm:$0x3]  }
  0x2c   :  { %261 = vst.msk [vmem:[#allocation0 + $0x1c] sm:$0x1] %vm162_vm0, %v258_v57   ;;  %263 = vst.msk [vmem:[#allocation0 + $0x5b] sm:$0x2] %vm162_vm0, %v258_v57   ;;  %v509_v60 = vld [vmem:[%s774_s0 + $0x3e] sm:$0x3] }
  0x2d   :  { %v428_v59 = vld [vmem:[#allocation2 + $0x40] ss:$8 sm:$0xf0]   ;;  %268 = vst.msk [vmem:[#allocation0 + $0x1e] sm:$0x1] %vm162_vm0, %v265_v58  }
  0x2e   :  { %270 = vst.msk [vmem:[#allocation0 + $0x5d] sm:$0x2] %vm162_vm0, %v265_v58   ;;  %v510_v61 = vld [vmem:[%s774_s0 + $0x3c] sm:$0x3]  ;;  %v511_v62 = vld [vmem:[%s774_s0 + $0x3a] sm:$0x3] }
  0x2f   :  { %9 = vst [vmem:[#allocation2 + $0xf8] sm:$0x3] %v509_v60  ;;  %14 = vst [vmem:[#allocation2 + $0xf0] sm:$0x3] %v510_v61  ;;  %v512_v63 = vld [vmem:[%s774_s0 + $0x38] sm:$0x3] }
  0x30   :  { %19 = vst [vmem:[#allocation2 + $0xe8] sm:$0x3] %v511_v62  ;;  %v513_v0 = vld [vmem:[%s774_s0 + $0x36] sm:$0x3]  ;;  %v514_v1 = vld [vmem:[%s774_s0 + $0x34] sm:$0x3] }
  0x31   :  { %24 = vst [vmem:[#allocation2 + $0xe0] sm:$0x3] %v512_v63  ;;  %29 = vst [vmem:[#allocation2 + $0xd8] sm:$0x3] %v513_v0  ;;  %v515_v2 = vld [vmem:[%s774_s0 + $0x32] sm:$0x3] }
  0x32   :  { %34 = vst [vmem:[#allocation2 + $0xd0] sm:$0x3] %v514_v1  ;;  %v516_v3 = vld [vmem:[%s774_s0 + $0x30] sm:$0x3] }
  0x33   :  { %2 = vsyncpa [#allocation1], 0  ;;  %v439_v4 = vld [vmem:[#allocation2 + $0x41] ss:$8 sm:$0xf0]   ;;  %s567_s0 = smov [#allocation0]  }
  0x34   :  { %39 = vst [vmem:[#allocation2 + $0xc8] sm:$0x3] %v515_v2  ;;  %44 = vst [vmem:[#allocation2 + $0xc0] sm:$0x3] %v516_v3  ;;  %v216_v5 = vld [vmem:[#allocation2 + $0x40] sm:$0x3]  }
  0x35   :  { %v426_v6 = vld [vmem:[#allocation2 + $0x40] ss:$8 sm:$0xf]   ;;  %219 = vst.msk [vmem:[#allocation0 + $0x10] sm:$0x1] %vm162_vm0, %v216_v5   ;;  %s473_s13 = sshll.u32 %s567_s0, 4  ;;  %s474_s13 = int_to_ptr.vmem [resolvable:$true] %s473_s13 }
  0x36   :  { %221 = vst.msk [vmem:[#allocation0 + $0x4f] sm:$0x2] %vm162_vm0, %v216_v5   ;;  %v430_v7 = vsel %vm385_vm1, %v428_v59, %v426_v6  ;;  %v437_v8 = vld [vmem:[#allocation2 + $0x41] ss:$8 sm:$0xf]   ;;  %s542_s14 = scalar_lea.vmem %s474_s13, 2048  ;;  %p547_p1 = scmp.lt.s32.totalorder %s474_s13, %s474_s13 }
  0x37   :  { %431 = vrot.lane.b32.xlu0 %v430_v7, %s566_s23  ;;  %v441_v9 = vsel %vm385_vm1, %v439_v4, %v437_v8  ;;  %v363_v10 = vld [vmem:[#allocation2 + $0xe8] sm:$0x3]   ;;  %v370_v11 = vld [vmem:[#allocation2 + $0xf0] sm:$0x3]   ;;  %v377_v12 = vld [vmem:[#allocation2 + $0xf8] sm:$0x3]   ;;  %p543_p0 = scmp.ne.s32.totalorder %s474_s13, %s542_s14  ;;  %p548_p2 = scmp.lt.s32.totalorder %s542_s14, %s542_s14 }
  0x38   :  { %442 = vrot.lane.b32.xlu1 %v441_v9, %s566_s23  ;;  %v349_v14 = vld [vmem:[#allocation2 + $0xd8] sm:$0x3]   ;;  %v356_v15 = vld [vmem:[#allocation2 + $0xe0] sm:$0x3]   ;;  %366 = vst.msk [vmem:[#allocation0 + $0x3a] sm:$0x1] %vm162_vm0, %v363_v10  }
  0x39   :  { %v342_v13 = vld [vmem:[#allocation2 + $0xd0] sm:$0x3]   ;;  %368 = vst.msk [vmem:[#allocation0 + $0x79] sm:$0x2] %vm162_vm0, %v363_v10   ;;  %373 = vst.msk [vmem:[#allocation0 + $0x3c] sm:$0x1] %vm162_vm0, %v370_v11   ;;  %p549_p3 = por %p548_p2, %p547_p1 }
  0x3a   :  { %375 = vst.msk [vmem:[#allocation0 + $0x7b] sm:$0x2] %vm162_vm0, %v370_v11   ;;  %380 = vst.msk [vmem:[#allocation0 + $0x3e] sm:$0x1] %vm162_vm0, %v377_v12  }
  0x3b   :  { %382 = vst.msk [vmem:[#allocation0 + $0x7d] sm:$0x2] %vm162_vm0, %v377_v12   ;;  %v328_v16 = vld [vmem:[#allocation2 + $0xc0] sm:$0x3]   ;;  %v335_v17 = vld [vmem:[#allocation2 + $0xc8] sm:$0x3]   ;;  %p550_p4 = pnand %p549_p3, %p543_p0 }
  0x3c   :  { %345 = vst.msk [vmem:[#allocation0 + $0x34] sm:$0x1] %vm162_vm0, %v342_v13   ;;  %347 = vst.msk [vmem:[#allocation0 + $0x73] sm:$0x2] %vm162_vm0, %v342_v13  }
  0x3d   :  { %352 = vst.msk [vmem:[#allocation0 + $0x36] sm:$0x1] %vm162_vm0, %v349_v14   ;;  %354 = vst.msk [vmem:[#allocation0 + $0x75] sm:$0x2] %vm162_vm0, %v349_v14  }
  0x3e   :  { %359 = vst.msk [vmem:[#allocation0 + $0x38] sm:$0x1] %vm162_vm0, %v356_v15   ;;  %361 = vst.msk [vmem:[#allocation0 + $0x77] sm:$0x2] %vm162_vm0, %v356_v15  }
  0x3f   :  { %331 = vst.msk [vmem:[#allocation0 + $0x30] sm:$0x1] %vm162_vm0, %v328_v16   ;;  %333 = vst.msk [vmem:[#allocation0 + $0x6f] sm:$0x2] %vm162_vm0, %v328_v16  }
  0x40   :  { %338 = vst.msk [vmem:[#allocation0 + $0x32] sm:$0x1] %vm162_vm0, %v335_v17   ;;  %340 = vst.msk [vmem:[#allocation0 + $0x71] sm:$0x2] %vm162_vm0, %v335_v17  }
  0x41   :  { %v459_v18 = vld [vmem:[#allocation2 + $0xc1] ss:$8 sm:$0xf]   ;;  %v448_v21 = vld [vmem:[#allocation2 + $0xc0] ss:$8 sm:$0xf]  }
  0x42   :  { %v461_v19 = vld [vmem:[#allocation2 + $0xc1] ss:$8 sm:$0xf0]   ;;  %v450_v22 = vld [vmem:[#allocation2 + $0xc0] ss:$8 sm:$0xf0]  }
  0x43   :  { %v463_v20 = vsel %vm385_vm1, %v461_v19, %v459_v18  ;;  %v452_v23 = vsel %vm385_vm1, %v450_v22, %v448_v21 }
  0x44   :  { %464 = vrot.lane.b32.xlu1 %v463_v20, %s566_s23  ;;  %453 = vrot.lane.b32.xlu0 %v452_v23, %s566_s23 }
  0x8e   :  { %v388_v24 = vpop.permute.xlu0 %387  }
  0x8f   :  { %391 = vst.msk [vmem:[#allocation0 + $0x1] ss:$2 sm:$0xff] %vm162_vm0, %v388_v24  }
  0x97   :  { %v410_v25 = vpop.permute.xlu1 %409  }
  0x98   :  { %413 = vst.msk [vmem:[#allocation0 + $0x21] ss:$2 sm:$0xff] %vm162_vm0, %v410_v25  }
  0x99   :  { %v399_v26 = vpop.permute.xlu0 %398  }
  0x9a   :  { %402 = vst.msk [vmem:[#allocation0 + $0x41] ss:$2 sm:$0xff] %vm162_vm0, %v399_v26  }
  0x9b   :  { %v421_v27 = vpop.permute.xlu1 %420  }
  0x9c   :  { %424 = vst.msk [vmem:[#allocation0 + $0x61] ss:$2 sm:$0xff] %vm162_vm0, %v421_v27  }
  0xa9   :  { %v432_v28 = vpop.permute.xlu0 %431  }
  0xaa   :  { %435 = vst.msk [vmem:[#allocation0 + $0x11] ss:$2 sm:$0xff] %vm162_vm0, %v432_v28   ;;  %v443_v29 = vpop.permute.xlu1 %442  }
  0xab   :  { %446 = vst.msk [vmem:[#allocation0 + $0x51] ss:$2 sm:$0xff] %vm162_vm0, %v443_v29  }
  0xb6   :  { %v465_v30 = vpop.permute.xlu1 %464   ;;  %v454_v31 = vpop.permute.xlu0 %453  }
  0xb7   :  { %468 = vst.msk [vmem:[#allocation0 + $0x71] ss:$2 sm:$0xff] %vm162_vm0, %v465_v30   ;;  %457 = vst.msk [vmem:[#allocation0 + $0x31] ss:$2 sm:$0xff] %vm162_vm0, %v454_v31  }
  0xb8   :  { %553 = shalt.err (!%p550_p4)
}
  0xb9   :  { %s554_s17 = scalar_lea.hbm %s775_s1, 2048 }
  0xba   :  { %p555_p5 = scmp.ne.s32.totalorder %s775_s1, %s554_s17  ;;  %p558_p6 = scmp.lt.u32.totalorder %s554_s17, %s775_s1 }
  0xbc   :  { %p560_p7 = pnand %p558_p6, %p555_p5 }
  0xbe   :  { %563 = shalt.err (!%p560_p7)
}
  0xbf   :  { %476 = dma.vmem_to_hbm [thread:$0]  %s474_s13, 2048, %s775_s1, [#allocation1]  }
  0xc0   :  { %564 = dma.done.wait [#allocation1], 2048  }
  0xc1   :  { %565 = vsyncadd [#allocation1], 4294965248 }
  0xc2   :  { %478 = vsyncpa [#allocation1], 1 }

// kernel: _pa_core.1
= control target key start
LH: loop header
LB: loop body
LE: loop exit
PB: predicated region body
PF: predicated region fallthrough
CT: control target
= control target key end

     0   :  { %s13921_s6 = smov 1   ;;  %s13922_s10 = smov 2   ;;  %s17327_s0 = inlined_call_operand.smem [shape: u32[30], index: -1, kind: input, shape index: {}] }
   0x1   :  { %s13968_s5 = sld [smem:[%s17327_s0]]   ;;  %s13923_s14 = smov 3  }
   0x2   :  { %s13973_s9 = sld [smem:[%s17327_s0 + %s13921_s6]]   ;;  %s13924_s18 = smov 4  }
   0x3   :  { %s13978_s13 = sld [smem:[%s17327_s0 + %s13922_s10]]   ;;  %s13925_s22 = smov 5  }
   0x4   :  { %s13983_s17 = sld [smem:[%s17327_s0 + %s13923_s14]]   ;;  %s13926_s26 = smov 6  }
   0x5   :  { %s13988_s21 = sld [smem:[%s17327_s0 + %s13924_s18]]   ;;  %s13927_s30 = smov 7  }
   0x6   :  { %s13993_s25 = sld [smem:[%s17327_s0 + %s13925_s22]]   ;;  %s13928_s4 = smov 8  }
   0x7   :  { %17405 = sst [smem:[#allocation8_spill]] %s13968_s5  ;;  %s13929_s10 = smov 9  }
   0x8   :  { %s13998_s29 = sld [smem:[%s17327_s0 + %s13926_s26]]   ;;  %s13930_s15 = smov 10  }
   0x9   :  { %s14003_s3 = sld [smem:[%s17327_s0 + %s13927_s30]]   ;;  %s13931_s20 = smov 11  }
   0xa   :  { %s14008_s8 = sld [smem:[%s17327_s0 + %s13928_s4]]   ;;  %s13932_s26 = smov 12  }
   0xb   :  { %s14013_s14 = sld [smem:[%s17327_s0 + %s13929_s10]]   ;;  %s13933_s1 = smov 13  }
   0xc   :  { %17406 = sst [smem:[#allocation9_spill]] %s13993_s25  ;;  %s13934_s7 = smov 14  }
   0xd   :  { %s14018_s19 = sld [smem:[%s17327_s0 + %s13930_s15]]   ;;  %s13935_s15 = smov 15  }
   0xe   :  { %s14023_s24 = sld [smem:[%s17327_s0 + %s13931_s20]]   ;;  %s13936_s22 = smov 16  }
   0xf   :  { %17407 = sst [smem:[#allocation10_spill]] %s14003_s3  ;;  %s13937_s28 = smov 17  }
  0x10   :  { %17408 = sst [smem:[#allocation11_spill]] %s14008_s8 }
  0x11   :  { %s14028_s30 = sld [smem:[%s17327_s0 + %s13932_s26]]  }
  0x12   :  { %s14033_s6 = sld [smem:[%s17327_s0 + %s13933_s1]]  }
  0x13   :  { %s14038_s12 = sld [smem:[%s17327_s0 + %s13934_s7]]   ;;  %s13938_s7 = smov 18  }
  0x14   :  { %s14043_s20 = sld [smem:[%s17327_s0 + %s13935_s15]]   ;;  %s13939_s15 = smov 19  }
  0x15   :  { %s14048_s27 = sld [smem:[%s17327_s0 + %s13936_s22]]   ;;  %s13940_s22 = smov 20  }
  0x16   :  { %s14053_s4 = sld [smem:[%s17327_s0 + %s13937_s28]]   ;;  %s13941_s28 = smov 21  }
  0x18   :  { %17409 = sst [smem:[#allocation12_spill]] %s14033_s6 }
  0x19   :  { %17410 = sst [smem:[#allocation13_spill]] %s14038_s12 }
  0x1a   :  { %s14058_s12 = sld [smem:[%s17327_s0 + %s13938_s7]]   ;;  %s13942_s7 = smov 22  }
  0x1b   :  { %17411 = sst [smem:[#allocation14_spill]] %s14048_s27 }
  0x1c   :  { %17412 = sst [smem:[#allocation15_spill]] %s14053_s4 }
  0x1d   :  { %s14063_s6 = sld [smem:[%s17327_s0 + %s13939_s15]]   ;;  %s13943_s15 = smov 23  }
  0x1e   :  { %s14068_s27 = sld [smem:[%s17327_s0 + %s13940_s22]]   ;;  %s13944_s22 = smov 24  }
  0x1f   :  { %s14073_s4 = sld [smem:[%s17327_s0 + %s13941_s28]]   ;;  %s13945_s28 = smov 25  }
  0x20   :  { %17413 = sst [smem:[#allocation16_spill]] %s14058_s12 }
  0x21   :  { %s14078_s12 = sld [smem:[%s17327_s0 + %s13942_s7]]   ;;  %s13946_s7 = smov 26  }
  0x23   :  { %17414 = sst [smem:[#allocation17_spill]] %s14063_s6 }
  0x24   :  { %17415 = sst [smem:[#allocation18_spill]] %s14068_s27 }
  0x25   :  { %17416 = sst [smem:[#allocation19_spill]] %s14073_s4 }
  0x26   :  { %s14083_s6 = sld [smem:[%s17327_s0 + %s13943_s15]]   ;;  %s13947_s15 = smov 27  }
  0x27   :  { %17417 = sst [smem:[#allocation20_spill]] %s14078_s12 }
  0x28   :  { %s14088_s27 = sld [smem:[%s17327_s0 + %s13944_s22]]   ;;  %s13948_s22 = smov 28  }
  0x29   :  { %s14093_s4 = sld [smem:[%s17327_s0 + %s13945_s28]]   ;;  %s13949_s28 = smov 29  }
  0x2a   :  { %s14098_s12 = sld [smem:[%s17327_s0 + %s13946_s7]]  }
  0x2c   :  { %17418 = sst [smem:[#allocation21_spill]] %s14083_s6 }
  0x2d   :  { %s14103_s6 = sld [smem:[%s17327_s0 + %s13947_s15]]  }
  0x2e   :  { %17419 = sst [smem:[#allocation22_spill]] %s14088_s27 }
  0x2f   :  { %17420 = sst [smem:[#allocation23_spill]] %s14093_s4 }
  0x30   :  { %s14108_s27 = sld [smem:[%s17327_s0 + %s13948_s22]]  }
  0x31   :  { %s14113_s4 = sld [smem:[%s17327_s0 + %s13949_s28]]  }
  0x32   :  { %65 = vsyncpa [#allocation3], 0 }
  0x33   :  { %67 = vsyncpa [#allocation3 + $0x1], 0 }
  0x34   :  { %68 = vsyncpa [#allocation5], 0 }
  0x35   :  { %70 = vsyncpa [#allocation5 + $0x1], 0  ;;  %s14115_s7 = smov 0   ;;  %s14117_s10 = smov 0  }
  0x36   :  { %s14119_s11 = smov 0   ;;  %s14121_s15 = smov 0  }
  0x37 LB: > { %s17421_s8 = sld [smem:[#allocation11_spill]]  ;;  %s17422_s3 = sld [smem:[#allocation10_spill]]  ;;  %s13915_s11 = sphi %s14119_s11, %s17800_s11   ;;  %s13911_s10 = sphi %s14117_s10, %s17799_s10   ;;  %s13907_s7 = sphi %s14115_s7, %s17798_s7   ;;  %s13919_s15 = sphi %s14121_s15, %s17797_s15  }
  0x38   : > { %s17423_s25 = sld [smem:[#allocation9_spill]]  ;;  %17424 = sst [smem:[#allocation24_spill]] %s13911_s10 }
  0x39   : > { %17425 = sst [smem:[#allocation25_spill]] %s13915_s11  ;;  %s14136_s0 = sadd.s32 4294967295, %s13919_s15  }
  0x3a   : > { %s12681_s16 = sadd.s32 4294967294, %s13919_s15   ;;  %s14140_s18 = sadd.s32 1, %s13919_s15  }
  0x3b   : > { %17426 = sst [smem:[#allocation26_spill]] %s14140_s18  ;;  %s675_s22 = sadd.s32 1, %s13915_s11 }
  0x3c   : > { %s672_s23 = ssub.s32 %s13919_s15, %s14140_s18  ;;  %p685_p0 = scmp.ne.s32.totalorder %s13915_s11, %s13911_s10 }
  0x3d   : > { %p673_p1 = scmp.eq.s32.totalorder %s672_s23, 0  ;;  %p686_p2 = scmp.eq.s32.totalorder %s14136_s0, 1 }
  0x3e   : > { %p691_p3 = scmp.ne.s32.totalorder %s13911_s10, %s13907_s7  ;;  %p692_p4 = scmp.eq.s32.totalorder %s12681_s16, 1 }
  0x3f   : > { %s14151_s26 = scalar_select %p673_p1, %s13915_s11, %s675_s22  }
  0x40   : > { %p14153_p5 = por %p686_p2, %p685_p0  ;;  %p14157_p6 = por %p692_p4, %p691_p3 }
  0x41   : > { %17427 = sst [smem:[#allocation27_spill]] %s14151_s26  ;;  %p12684_p7 = scmp.ge.s32.totalorder %s13919_s15, 1 }
  0x42   : > { %p866_p8 = scmp.lt.s32.totalorder %s13919_s15, 3 }
  0x44   : > { %p867_p9 = pnand %p12684_p7, %p866_p8 }
  0x46   : > { %870 = sbr.rel (%p867_p9) target bundleno = 4076 (0xfec), region = 128 }
  0x4d   : > { %v1769_v0 = vld [vmem:[%s17423_s25] sm:$0xff]  ;;  %v1770_v1 = vld [vmem:[%s17423_s25 + $0x8] sm:$0xff]  ;;  %v1771_v2 = vld [vmem:[%s17423_s25 + $0x10] sm:$0xff]  ;;  %v17334_v3 = vmov 0.0|0.0   ;;  %s17430_s5 = sld [smem:[#allocation8_spill]]  ;;  %vm13951_vm0 = vmmov 0  }
  0x4e   : > { %13003 = vmatprep.subr.bf16.mxu0 %v17334_v3  ;;  %v13004_v4 = vpack.c.bf16 %v1770_v1, %v1769_v0  ;;  %v1772_v5 = vld [vmem:[%s17423_s25 + $0x18] sm:$0xff]  ;;  %v17336_v6 = vmov 0.0   ;;  %p970_p10 = scmp.lt.s32.totalorder %s14136_s0, 1  ;;  %s14172_s2 = sand.u32 1, %s13911_s10   ;;  %vm1780_vm1 = vcmask 261120   ;;  %vm4359_vm2 = vcmask 64512  }
  0x4f   : > { %12926 = vmatprep.mubr.msk.f32.mxu0 %vm13951_vm0, %v17336_v6  ;;  %s12686_s16 = sshll.u32 %s14172_s2, 10  ;;  %1938 = vmatprep.mubr.f32.mxu1 %v17336_v6  ;;  %v13007_v7 = vpack.c.bf16 %v1772_v5, %v1771_v2  ;;  %vm10110_vm3 = vcmask 1040384   ;;  %vm10112_vm5 = vcmask 1041408  }
  0x50   : > { %13005 = vmatpush3.bf16.msra.mxu0 %v13004_v4  ;;  %s14177_s22 = scalar_select %p970_p10, %s14136_s0, 1 }
  0x51   : > { %13006 = vmatprep.subr.bf16.mxu0 %v17334_v3 }
  0x52   : > { %s12876_s23 = sshll.u32 %s14177_s22, 10  ;;  %s12693_s25 = sshll.u32 %s14177_s22, 3 }
  0x53   : > { %s14183_s26 = scalar_lea.vmem %s17430_s5, %s12876_s23  ;;  %s14186_s11 = scalar_lea.vmem %s13973_s9, %s12876_s23 }
  0x54   : > { %13008 = vmatpush3.bf16.msra.mxu0 %v13007_v7  ;;  %s14189_s10 = scalar_lea.vmem %s13978_s13, %s12876_s23  ;;  %s988_s18 = scalar_lea.vmem %s13983_s17, %s12693_s25  ;;  %v999_v8 = vld [vmem:[%s14183_s26 + $0x8] sm:$0xff]  ;;  %v1001_v18 = vld [vmem:[%s14183_s26 + $0x18] sm:$0xff]  ;;  %v998_v29 = vld [vmem:[%s14183_s26] sm:$0xff] }
  0x55   : > { %v1031_v9 = vld [vmem:[%s14183_s26 + $0x108] sm:$0xff]  ;;  %s992_s5 = scalar_lea.vmem %s13988_s21, %s12693_s25  ;;  %v1510_v11 = vld [vmem:[%s988_s18] sm:$0xff]  ;;  %s14204_s23 = scalar_lea.vmem [#allocation4], %s12686_s16  ;;  %v1033_v21 = vld [vmem:[%s14183_s26 + $0x118] sm:$0xff] }
  0x56   : > { %v1127_v10 = vld [vmem:[%s14186_s11 + $0x8] sm:$0xff]  ;;  %v1511_v15 = vld [vmem:[%s992_s5] sm:$0xff]  ;;  %v1129_v22 = vld [vmem:[%s14186_s11 + $0x18] sm:$0xff]  ;;  %s13954_s5 = smov 120   ;;  %s17726_s25 = sld [smem:[#allocation12_spill]] }
  0x57   : > { %v1159_v12 = vld [vmem:[%s14186_s11 + $0x108] sm:$0xff]  ;;  %v14197_v13 = vmul.f32 %v1127_v10, %v999_v8  ;;  %v1512_v19 = vadd.f32 %v1511_v15, %v1510_v11  ;;  %v1161_v23 = vld [vmem:[%s14186_s11 + $0x118] sm:$0xff]  ;;  %v14215_v25 = vmul.f32 %v1129_v22, %v1001_v18  ;;  %v1030_v30 = vld [vmem:[%s14183_s26 + $0x100] sm:$0xff]  ;;  %s17729_s18 = sld [smem:[#allocation17_spill]]  ;;  %s17731_s16 = sld [smem:[#allocation19_spill]] }
  0x58   : > { %v1514_v14 = vld [vmem:[%s14189_s10 + $0x8] sm:$0xff]  ;;  %v14200_v16 = vmul.f32 %v1159_v12, %v1031_v9  ;;  %v14217_v26 = vmul.f32 %v1161_v23, %v1033_v21  ;;  %v1516_v27 = vld [vmem:[%s14189_s10 + $0x18] sm:$0xff]  ;;  %v1126_v31 = vld [vmem:[%s14186_s11] sm:$0xff] }
  0x59   : > { %v1546_v17 = vld [vmem:[%s14189_s10 + $0x108] sm:$0xff]  ;;  %1383 = vst [vmem:[%s14204_s23 + $0x8] sm:$0xff] %v14197_v13  ;;  %v1642_v20 = vadd.f32 %v1514_v14, %v14197_v13  ;;  %v1548_v28 = vld [vmem:[%s14189_s10 + $0x118] sm:$0xff]  ;;  %12927 = vmatmul.mubr.msk.f32.vlgmr.msra.gmra.mrb[0].mxu0 %vm1780_vm1, %v1512_v19  ;;  %v1158_v32 = vld [vmem:[%s14186_s11 + $0x100] sm:$0xff]  ;;  %v1644_v34 = vadd.f32 %v1516_v27, %v14215_v25  ;;  %v1254_v36 = vmul.f32 %v1126_v31, %v998_v29  ;;  %v13953_v14 = vmov 0  }
  0x5a   : > { %1415 = vst [vmem:[%s14204_s23 + $0x108] sm:$0xff] %v14200_v16  ;;  %v1674_v24 = vadd.f32 %v1546_v17, %v14200_v16  ;;  %1385 = vst [vmem:[%s14204_s23 + $0x18] sm:$0xff] %v14215_v25  ;;  %v1676_v35 = vadd.f32 %v1548_v28, %v14217_v26  ;;  %v1513_v37 = vld [vmem:[%s14189_s10] sm:$0xff]  ;;  %v1000_v39 = vld [vmem:[%s14183_s26 + $0x10] sm:$0xff]  ;;  %2015 = vmatprep.mubr.f32.mxu0 %v17336_v6  ;;  %v1286_v40 = vmul.f32 %v1158_v32, %v1030_v30 }
  0x5b   : > { %1417 = vst [vmem:[%s14204_s23 + $0x118] sm:$0xff] %v14217_v26  ;;  %v1545_v38 = vld [vmem:[%s14189_s10 + $0x100] sm:$0xff]  ;;  %v1032_v41 = vld [vmem:[%s14183_s26 + $0x110] sm:$0xff]  ;;  %1382 = vst [vmem:[%s14204_s23] sm:$0xff] %v1254_v36  ;;  %v1641_v45 = vadd.f32 %v1513_v37, %v1254_v36  ;;  %v14257_v2 = vpack.c.bf16 %v14200_v16, %v14197_v13  ;;  %13561 = vset.pattern.permute.xlu0 %v13953_v14  ;;  %13562 = vset.pattern.permute.xlu1 %v13953_v14 }
  0x5c   : > { %v13009_v33 = vpack.c.bf16 %v1674_v24, %v1642_v20  ;;  %v1128_v42 = vld [vmem:[%s14186_s11 + $0x10] sm:$0xff]  ;;  %v13017_v44 = vpack.c.bf16 %v1676_v35, %v1644_v34  ;;  %v1063_v50 = vld [vmem:[%s14183_s26 + $0x208] sm:$0xff]  ;;  %1414 = vst [vmem:[%s14204_s23 + $0x100] sm:$0xff] %v1286_v40  ;;  %v1673_v51 = vadd.f32 %v1545_v38, %v1286_v40  ;;  %v1065_v61 = vld [vmem:[%s14183_s26 + $0x218] sm:$0xff]  ;;  %v14259_v4 = vpack.c.bf16 %v1286_v40, %v1254_v36 }
  0x5d   : > { %v1160_v43 = vld [vmem:[%s14186_s11 + $0x110] sm:$0xff]  ;;  %v1256_v46 = vmul.f32 %v1128_v42, %v1000_v39  ;;  %v1095_v52 = vld [vmem:[%s14183_s26 + $0x308] sm:$0xff]  ;;  %v1097_v63 = vld [vmem:[%s14183_s26 + $0x318] sm:$0xff]  ;;  %17431 = vst [vmem:[#allocation28_spill] sm:$0xff] %v14257_v2  ;;  %v14281_v32 = vpack.c.bf16 %v14217_v26, %v14215_v25 }
  0x5e   : > { %13010 = vmatprep.subr.bf16.mxu1 %v13009_v33  ;;  %v1288_v47 = vmul.f32 %v1160_v43, %v1032_v41  ;;  %v1515_v48 = vld [vmem:[%s14189_s10 + $0x10] sm:$0xff]  ;;  %v1191_v53 = vld [vmem:[%s14186_s11 + $0x208] sm:$0xff]  ;;  %13018 = vmatprep.subr.bf16.mxu0 %v13017_v44  ;;  %v13011_v62 = vpack.c.bf16 %v1673_v51, %v1641_v45  ;;  %v1193_v0 = vld [vmem:[%s14186_s11 + $0x218] sm:$0xff]  ;;  %17432 = vst [vmem:[#allocation29_spill] sm:$0xff] %v14259_v4 }
  0x5f   : > { %v1547_v49 = vld [vmem:[%s14189_s10 + $0x110] sm:$0xff]  ;;  %v1223_v54 = vld [vmem:[%s14186_s11 + $0x308] sm:$0xff]  ;;  %1384 = vst [vmem:[%s14204_s23 + $0x10] sm:$0xff] %v1256_v46  ;;  %v1643_v55 = vadd.f32 %v1515_v48, %v1256_v46  ;;  %v1319_v57 = vmul.f32 %v1191_v53, %v1063_v50  ;;  %v1225_v1 = vld [vmem:[%s14186_s11 + $0x318] sm:$0xff]  ;;  %v1321_v9 = vmul.f32 %v1193_v0, %v1065_v61 }
  0x60   : > { %1416 = vst [vmem:[%s14204_s23 + $0x110] sm:$0xff] %v1288_v47  ;;  %v1675_v56 = vadd.f32 %v1547_v49, %v1288_v47  ;;  %v1351_v58 = vmul.f32 %v1223_v54, %v1095_v52  ;;  %v1578_v59 = vld [vmem:[%s14189_s10 + $0x208] sm:$0xff]  ;;  %v1580_v10 = vld [vmem:[%s14189_s10 + $0x218] sm:$0xff]  ;;  %v1062_v12 = vld [vmem:[%s14183_s26 + $0x200] sm:$0xff]  ;;  %13012 = vmatpush1.bf16.msra.mxu1 %v13011_v62  ;;  %v1353_v13 = vmul.f32 %v1225_v1, %v1097_v63 }
  0x61   : > { %v1610_v60 = vld [vmem:[%s14189_s10 + $0x308] sm:$0xff]  ;;  %1447 = vst [vmem:[%s14204_s23 + $0x208] sm:$0xff] %v1319_v57  ;;  %v1706_v7 = vadd.f32 %v1578_v59, %v1319_v57  ;;  %v1612_v11 = vld [vmem:[%s14189_s10 + $0x318] sm:$0xff]  ;;  %v1094_v15 = vld [vmem:[%s14183_s26 + $0x300] sm:$0xff]  ;;  %v1708_v20 = vadd.f32 %v1580_v10, %v1321_v9  ;;  %v14283_v33 = vpack.c.bf16 %v1288_v47, %v1256_v46 }
  0x62   : > { %v13019_v5 = vpack.c.bf16 %v1675_v56, %v1643_v55  ;;  %1479 = vst [vmem:[%s14204_s23 + $0x308] sm:$0xff] %v1351_v58  ;;  %v1738_v8 = vadd.f32 %v1610_v60, %v1351_v58  ;;  %v1190_v16 = vld [vmem:[%s14186_s11 + $0x200] sm:$0xff]  ;;  %v14269_v18 = vpack.c.bf16 %v1351_v58, %v1319_v57  ;;  %1449 = vst [vmem:[%s14204_s23 + $0x218] sm:$0xff] %v1321_v9  ;;  %v1064_v27 = vld [vmem:[%s14183_s26 + $0x210] sm:$0xff] }
  0x63   : > { %v1222_v17 = vld [vmem:[%s14186_s11 + $0x300] sm:$0xff]  ;;  %v1318_v21 = vmul.f32 %v1190_v16, %v1062_v12  ;;  %1481 = vst [vmem:[%s14204_s23 + $0x318] sm:$0xff] %v1353_v13  ;;  %v1740_v28 = vadd.f32 %v1612_v11, %v1353_v13  ;;  %v1096_v29 = vld [vmem:[%s14183_s26 + $0x310] sm:$0xff]  ;;  %17434 = vst [vmem:[#allocation31_spill] sm:$0xff] %v14281_v32  ;;  %v14306_v56 = vpack.c.bf16 %v1353_v13, %v1321_v9 }
  0x64   : > { %17433 = vst [vmem:[#allocation30_spill] sm:$0xff] %v14269_v18  ;;  %13020 = vmatpush1.bf16.msra.mxu0 %v13019_v5  ;;  %v13013_v19 = vpack.c.bf16 %v1738_v8, %v1706_v7  ;;  %v1350_v22 = vmul.f32 %v1222_v17, %v1094_v15  ;;  %v1577_v23 = vld [vmem:[%s14189_s10 + $0x200] sm:$0xff]  ;;  %v1192_v30 = vld [vmem:[%s14186_s11 + $0x210] sm:$0xff]  ;;  %17435 = vst [vmem:[#allocation32_spill] sm:$0xff] %v14283_v33 }
  0x65   : > { %v1609_v24 = vld [vmem:[%s14189_s10 + $0x300] sm:$0xff]  ;;  %v1224_v31 = vld [vmem:[%s14186_s11 + $0x310] sm:$0xff]  ;;  %1446 = vst [vmem:[%s14204_s23 + $0x200] sm:$0xff] %v1318_v21  ;;  %v1705_v34 = vadd.f32 %v1577_v23, %v1318_v21  ;;  %v1320_v36 = vmul.f32 %v1192_v30, %v1064_v27  ;;  %v1003_v40 = vld [vmem:[%s14183_s26 + $0x28] sm:$0xff]  ;;  %v13021_v25 = vpack.c.bf16 %v1740_v28, %v1708_v20 }
  0x66   : > { %13014 = vmatprep.subr.bf16.mxu1 %v13013_v19  ;;  %1478 = vst [vmem:[%s14204_s23 + $0x300] sm:$0xff] %v1350_v22  ;;  %v1737_v35 = vadd.f32 %v1609_v24, %v1350_v22  ;;  %v1352_v37 = vmul.f32 %v1224_v31, %v1096_v29  ;;  %v1579_v38 = vld [vmem:[%s14189_s10 + $0x210] sm:$0xff]  ;;  %v1035_v26 = vld [vmem:[%s14183_s26 + $0x128] sm:$0xff]  ;;  %v14293_v43 = vpack.c.bf16 %v1350_v22, %v1318_v21  ;;  %v14298_v47 = vld [vmem:[%s17422_s3] sm:$0xff] }
  0x67   : > { %v1611_v39 = vld [vmem:[%s14189_s10 + $0x310] sm:$0xff]  ;;  %v1131_v41 = vld [vmem:[%s14186_s11 + $0x28] sm:$0xff]  ;;  %1448 = vst [vmem:[%s14204_s23 + $0x210] sm:$0xff] %v1320_v36  ;;  %v1707_v45 = vadd.f32 %v1579_v38, %v1320_v36  ;;  %v1005_v51 = vld [vmem:[%s14183_s26 + $0x38] sm:$0xff]  ;;  %13022 = vmatprep.subr.bf16.mxu0 %v13021_v25 }
  0x68   : > { %v1163_v42 = vld [vmem:[%s14186_s11 + $0x128] sm:$0xff]  ;;  %17436 = vst [vmem:[#allocation33_spill] sm:$0xff] %v14293_v43  ;;  %v13015_v44 = vpack.c.bf16 %v1737_v35, %v1705_v34  ;;  %1480 = vst [vmem:[%s14204_s23 + $0x310] sm:$0xff] %v1352_v37  ;;  %v1739_v46 = vadd.f32 %v1611_v39, %v1352_v37  ;;  %v1259_v48 = vmul.f32 %v1131_v41, %v1003_v40  ;;  %v1037_v53 = vld [vmem:[%s14183_s26 + $0x138] sm:$0xff] }
  0x69   : > { %v1518_v49 = vld [vmem:[%s14189_s10 + $0x28] sm:$0xff]  ;;  %v1291_v52 = vmul.f32 %v1163_v42, %v1035_v26  ;;  %v1133_v54 = vld [vmem:[%s14186_s11 + $0x38] sm:$0xff]  ;;  %17437 = vst [vmem:[#allocation34_spill] sm:$0xff] %v14306_v56  ;;  %v14308_v57 = vpack.c.bf16 %v1352_v37, %v1320_v36  ;;  %v1002_v0 = vld [vmem:[%s14183_s26 + $0x20] sm:$0xff] }
  0x6a   : > { %v1550_v50 = vld [vmem:[%s14189_s10 + $0x128] sm:$0xff]  ;;  %v1165_v55 = vld [vmem:[%s14186_s11 + $0x138] sm:$0xff]  ;;  %13016 = vmatpush1.bf16.msra.mxu1 %v13015_v44  ;;  %v13023_v58 = vpack.c.bf16 %v1739_v46, %v1707_v45  ;;  %1387 = vst [vmem:[%s14204_s23 + $0x28] sm:$0xff] %v1259_v48  ;;  %v1646_v59 = vadd.f32 %v1518_v49, %v1259_v48  ;;  %v1261_v60 = vmul.f32 %v1133_v54, %v1005_v51  ;;  %v1034_v5 = vld [vmem:[%s14183_s26 + $0x120] sm:$0xff] }
  0x6b   : > { %17438 = vst [vmem:[#allocation35_spill] sm:$0xff] %v14308_v57  ;;  %v1293_v61 = vmul.f32 %v1165_v55, %v1037_v53  ;;  %v1520_v62 = vld [vmem:[%s14189_s10 + $0x38] sm:$0xff]  ;;  %1419 = vst [vmem:[%s14204_s23 + $0x128] sm:$0xff] %v1291_v52  ;;  %v1678_v1 = vadd.f32 %v1550_v50, %v1291_v52  ;;  %v1130_v7 = vld [vmem:[%s14186_s11 + $0x20] sm:$0xff]  ;;  %v14318_v9 = vpack.c.bf16 %v1291_v52, %v1259_v48 }
  0x6c   : > { %v1552_v63 = vld [vmem:[%s14189_s10 + $0x138] sm:$0xff]  ;;  %v1162_v8 = vld [vmem:[%s14186_s11 + $0x120] sm:$0xff]  ;;  %13024 = vmatpush1.bf16.msra.mxu0 %v13023_v58  ;;  %1389 = vst [vmem:[%s14204_s23 + $0x38] sm:$0xff] %v1261_v60  ;;  %v1648_v10 = vadd.f32 %v1520_v62, %v1261_v60  ;;  %v1258_v12 = vmul.f32 %v1130_v7, %v1002_v0  ;;  %v1004_v16 = vld [vmem:[%s14183_s26 + $0x30] sm:$0xff] }
  0x6d   : > { %17439 = vst [vmem:[#allocation36_spill] sm:$0xff] %v14318_v9  ;;  %1421 = vst [vmem:[%s14204_s23 + $0x138] sm:$0xff] %v1293_v61  ;;  %v1680_v11 = vadd.f32 %v1552_v63, %v1293_v61  ;;  %v1290_v14 = vmul.f32 %v1162_v8, %v1034_v5  ;;  %v1517_v13 = vld [vmem:[%s14189_s10 + $0x20] sm:$0xff]  ;;  %v14326_v17 = vld [vmem:[%s17422_s3 + $0x8] sm:$0xff]  ;;  %12699 = vmatmul.mubr.msk.f32.vlgmr.msra.gmra.mrb[0].mxu1 %vm1780_vm1, %v14298_v47  ;;  %v13025_v19 = vpack.c.bf16 %v1678_v1, %v1646_v59 }
  0x6e   : > { %v1549_v15 = vld [vmem:[%s14189_s10 + $0x120] sm:$0xff]  ;;  %v1036_v20 = vld [vmem:[%s14183_s26 + $0x130] sm:$0xff]  ;;  %v14333_v23 = vpack.c.bf16 %v1293_v61, %v1261_v60  ;;  %1386 = vst [vmem:[%s14204_s23 + $0x20] sm:$0xff] %v1258_v12  ;;  %v1645_v27 = vadd.f32 %v1517_v13, %v1258_v12  ;;  %1944 = vmatprep.mubr.f32.mxu1 %v17336_v6  ;;  %v1067_v34 = vld [vmem:[%s14183_s26 + $0x228] sm:$0xff] }
  0x6f   : > { %v1132_v21 = vld [vmem:[%s14186_s11 + $0x30] sm:$0xff]  ;;  %v13033_v24 = vpack.c.bf16 %v1680_v11, %v1648_v10  ;;  %1418 = vst [vmem:[%s14204_s23 + $0x120] sm:$0xff] %v1290_v14  ;;  %v1677_v28 = vadd.f32 %v1549_v15, %v1290_v14  ;;  %12701 = vmatmul.mubr.msk.f32.vlgmr.msra.gmra.mrb[2].mxu0 %vm1780_vm1, %v14298_v47  ;;  %13026 = vmatprep.subr.bf16.mxu1 %v13025_v19  ;;  %v1099_v36 = vld [vmem:[%s14183_s26 + $0x328] sm:$0xff]  ;;  %v1069_v44 = vld [vmem:[%s14183_s26 + $0x238] sm:$0xff] }
  0x70   : > { %v1164_v22 = vld [vmem:[%s14186_s11 + $0x130] sm:$0xff]  ;;  %17440 = vst [vmem:[#allocation37_spill] sm:$0xff] %v14333_v23  ;;  %v1260_v29 = vmul.f32 %v1132_v21, %v1004_v16  ;;  %v1195_v37 = vld [vmem:[%s14186_s11 + $0x228] sm:$0xff]  ;;  %v14346_v39 = vpack.c.bf16 %v1290_v14, %v1258_v12  ;;  %2021 = vmatprep.mubr.f32.mxu0 %v17336_v6  ;;  %v1101_v48 = vld [vmem:[%s14183_s26 + $0x338] sm:$0xff] }
  0x71   : > { %v1519_v30 = vld [vmem:[%s14189_s10 + $0x30] sm:$0xff]  ;;  %v1292_v35 = vmul.f32 %v1164_v22, %v1036_v20  ;;  %v1227_v38 = vld [vmem:[%s14186_s11 + $0x328] sm:$0xff]  ;;  %13034 = vmatprep.subr.bf16.mxu0 %v13033_v24  ;;  %v13027_v40 = vpack.c.bf16 %v1677_v28, %v1645_v27  ;;  %v1323_v26 = vmul.f32 %v1195_v37, %v1067_v34  ;;  %12700 = vmatmul.mubr.msk.f32.gmra.mrb[2].mxu1 %vm1780_vm1, %v14326_v17  ;;  %v1197_v49 = vld [vmem:[%s14186_s11 + $0x238] sm:$0xff] }
  0x72   : > { %v1551_v31 = vld [vmem:[%s14189_s10 + $0x130] sm:$0xff]  ;;  %17441 = vst [vmem:[#allocation38_spill] sm:$0xff] %v14346_v39  ;;  %1388 = vst [vmem:[%s14204_s23 + $0x30] sm:$0xff] %v1260_v29  ;;  %v1647_v25 = vadd.f32 %v1519_v30, %v1260_v29  ;;  %v1582_v41 = vld [vmem:[%s14189_s10 + $0x228] sm:$0xff]  ;;  %v1355_v46 = vmul.f32 %v1227_v38, %v1099_v36  ;;  %v1325_v53 = vmul.f32 %v1197_v49, %v1069_v44  ;;  %2092 = vmatprep.mubr.f32.mxu1 %v17336_v6 }
  0x73   : > { %v1614_v42 = vld [vmem:[%s14189_s10 + $0x328] sm:$0xff]  ;;  %1420 = vst [vmem:[%s14204_s23 + $0x130] sm:$0xff] %v1292_v35  ;;  %v1679_v45 = vadd.f32 %v1551_v31, %v1292_v35  ;;  %v1229_v50 = vld [vmem:[%s14186_s11 + $0x338] sm:$0xff]  ;;  %v14359_v51 = vpack.c.bf16 %v1292_v35, %v1260_v29  ;;  %13028 = vmatpush1.bf16.msra.mxu1 %v13027_v40  ;;  %1451 = vst [vmem:[%s14204_s23 + $0x228] sm:$0xff] %v1323_v26  ;;  %v1710_v52 = vadd.f32 %v1582_v41, %v1323_v26 }
  0x74   : > { %v1357_v54 = vmul.f32 %v1229_v50, %v1101_v48  ;;  %v1584_v55 = vld [vmem:[%s14189_s10 + $0x238] sm:$0xff]  ;;  %v1066_v59 = vld [vmem:[%s14183_s26 + $0x220] sm:$0xff]  ;;  %12702 = vmatmul.mubr.msk.f32.gmra.mrb[4].mxu0 %vm1780_vm1, %v14326_v17  ;;  %1483 = vst [vmem:[%s14204_s23 + $0x328] sm:$0xff] %v1355_v46  ;;  %v1742_v61 = vadd.f32 %v1614_v42, %v1355_v46  ;;  %v14372_v1 = vpack.c.bf16 %v1355_v46, %v1323_v26  ;;  %1453 = vst [vmem:[%s14204_s23 + $0x238] sm:$0xff] %v1325_v53 }
  0x75   : > { %17442 = vst [vmem:[#allocation39_spill] sm:$0xff] %v14359_v51  ;;  %v1616_v58 = vld [vmem:[%s14189_s10 + $0x338] sm:$0xff]  ;;  %v13035_v60 = vpack.c.bf16 %v1679_v45, %v1647_v25  ;;  %v1098_v62 = vld [vmem:[%s14183_s26 + $0x320] sm:$0xff]  ;;  %v1712_v5 = vadd.f32 %v1584_v55, %v1325_v53  ;;  %v1068_v14 = vld [vmem:[%s14183_s26 + $0x230] sm:$0xff]  ;;  %2169 = vmatprep.mubr.f32.mxu0 %v17336_v6 }
  0x76   : > { %v1194_v63 = vld [vmem:[%s14186_s11 + $0x220] sm:$0xff]  ;;  %17443 = vst [vmem:[#allocation40_spill] sm:$0xff] %v14372_v1  ;;  %1485 = vst [vmem:[%s14204_s23 + $0x338] sm:$0xff] %v1357_v54  ;;  %v1744_v7 = vadd.f32 %v1616_v58, %v1357_v54  ;;  %v13029_v13 = vpack.c.bf16 %v1742_v61, %v1710_v52  ;;  %v1100_v15 = vld [vmem:[%s14183_s26 + $0x330] sm:$0xff]  ;;  %v14383_v20 = vpack.c.bf16 %v1357_v54, %v1325_v53 }
  0x77   : > { %v1226_v0 = vld [vmem:[%s14186_s11 + $0x320] sm:$0xff]  ;;  %v1322_v8 = vmul.f32 %v1194_v63, %v1066_v59  ;;  %13036 = vmatpush1.bf16.msra.mxu0 %v13035_v60  ;;  %v1196_v16 = vld [vmem:[%s14186_s11 + $0x230] sm:$0xff]  ;;  %v1007_v30 = vld [vmem:[%s14183_s26 + $0x48] sm:$0xff] }
  0x78   : > { %v1354_v10 = vmul.f32 %v1226_v0, %v1098_v62  ;;  %v1581_v11 = vld [vmem:[%s14189_s10 + $0x220] sm:$0xff]  ;;  %v1228_v19 = vld [vmem:[%s14186_s11 + $0x330] sm:$0xff]  ;;  %17444 = vst [vmem:[#allocation41_spill] sm:$0xff] %v14383_v20  ;;  %v13037_v21 = vpack.c.bf16 %v1744_v7, %v1712_v5  ;;  %v1324_v27 = vmul.f32 %v1196_v16, %v1068_v14  ;;  %13030 = vmatprep.subr.bf16.mxu1 %v13029_v13  ;;  %v1039_v34 = vld [vmem:[%s14183_s26 + $0x148] sm:$0xff] }
  0x79   : > { %v1613_v12 = vld [vmem:[%s14189_s10 + $0x320] sm:$0xff]  ;;  %1450 = vst [vmem:[%s14204_s23 + $0x220] sm:$0xff] %v1322_v8  ;;  %v1709_v22 = vadd.f32 %v1581_v11, %v1322_v8  ;;  %v1583_v28 = vld [vmem:[%s14189_s10 + $0x230] sm:$0xff]  ;;  %v1356_v31 = vmul.f32 %v1228_v19, %v1100_v15  ;;  %v1135_v35 = vld [vmem:[%s14186_s11 + $0x48] sm:$0xff] }
  0x7a   : > { %1482 = vst [vmem:[%s14204_s23 + $0x320] sm:$0xff] %v1354_v10  ;;  %v1741_v24 = vadd.f32 %v1613_v12, %v1354_v10  ;;  %v1615_v29 = vld [vmem:[%s14189_s10 + $0x330] sm:$0xff]  ;;  %v1167_v36 = vld [vmem:[%s14186_s11 + $0x148] sm:$0xff]  ;;  %v14393_v37 = vpack.c.bf16 %v1354_v10, %v1322_v8  ;;  %13038 = vmatprep.subr.bf16.mxu0 %v13037_v21  ;;  %1452 = vst [vmem:[%s14204_s23 + $0x230] sm:$0xff] %v1324_v27  ;;  %v1711_v40 = vadd.f32 %v1583_v28, %v1324_v27 }
  0x7b   : > { %v1263_v25 = vmul.f32 %v1135_v35, %v1007_v30  ;;  %v1295_v26 = vmul.f32 %v1167_v36, %v1039_v34  ;;  %v1522_v41 = vld [vmem:[%s14189_s10 + $0x48] sm:$0xff]  ;;  %v1009_v44 = vld [vmem:[%s14183_s26 + $0x58] sm:$0xff]  ;;  %1484 = vst [vmem:[%s14204_s23 + $0x330] sm:$0xff] %v1356_v31  ;;  %v1743_v45 = vadd.f32 %v1615_v29, %v1356_v31  ;;  %v14403_v50 = vpack.c.bf16 %v1356_v31, %v1324_v27  ;;  %v1006_v60 = vld [vmem:[%s14183_s26 + $0x40] sm:$0xff] }
  0x7c   : > { %17445 = vst [vmem:[#allocation42_spill] sm:$0xff] %v14393_v37  ;;  %v13031_v38 = vpack.c.bf16 %v1741_v24, %v1709_v22  ;;  %v1554_v42 = vld [vmem:[%s14189_s10 + $0x148] sm:$0xff]  ;;  %v1041_v46 = vld [vmem:[%s14183_s26 + $0x158] sm:$0xff]  ;;  %v1038_v62 = vld [vmem:[%s14183_s26 + $0x140] sm:$0xff] }
  0x7d   : > { %v1137_v48 = vld [vmem:[%s14186_s11 + $0x58] sm:$0xff]  ;;  %17446 = vst [vmem:[#allocation43_spill] sm:$0xff] %v14403_v50  ;;  %1391 = vst [vmem:[%s14204_s23 + $0x48] sm:$0xff] %v1263_v25  ;;  %v1650_v52 = vadd.f32 %v1522_v41, %v1263_v25  ;;  %v1682_v53 = vadd.f32 %v1554_v42, %v1295_v26  ;;  %v13039_v61 = vpack.c.bf16 %v1743_v45, %v1711_v40  ;;  %v1134_v63 = vld [vmem:[%s14186_s11 + $0x40] sm:$0xff] }
  0x7e   : > { %v1169_v49 = vld [vmem:[%s14186_s11 + $0x158] sm:$0xff]  ;;  %13032 = vmatpush1.bf16.msra.mxu1 %v13031_v38  ;;  %1423 = vst [vmem:[%s14204_s23 + $0x148] sm:$0xff] %v1295_v26  ;;  %v1265_v54 = vmul.f32 %v1137_v48, %v1009_v44  ;;  %v1166_v0 = vld [vmem:[%s14186_s11 + $0x140] sm:$0xff]  ;;  %v14413_v5 = vpack.c.bf16 %v1295_v26, %v1263_v25  ;;  %v1262_v11 = vmul.f32 %v1134_v63, %v1006_v60  ;;  %v1008_v13 = vld [vmem:[%s14183_s26 + $0x50] sm:$0xff] }
  0x7f   : > { %v1297_v55 = vmul.f32 %v1169_v49, %v1041_v46  ;;  %v1524_v58 = vld [vmem:[%s14189_s10 + $0x58] sm:$0xff]  ;;  %v13041_v7 = vpack.c.bf16 %v1682_v53, %v1650_v52  ;;  %v1521_v12 = vld [vmem:[%s14189_s10 + $0x40] sm:$0xff]  ;;  %13040 = vmatpush1.bf16.msra.mxu0 %v13039_v61  ;;  %v1294_v15 = vmul.f32 %v1166_v0, %v1038_v62  ;;  %v1040_v16 = vld [vmem:[%s14183_s26 + $0x150] sm:$0xff] }
  0x80   : > { %v1556_v59 = vld [vmem:[%s14189_s10 + $0x158] sm:$0xff]  ;;  %17447 = vst [vmem:[#allocation44_spill] sm:$0xff] %v14413_v5  ;;  %1393 = vst [vmem:[%s14204_s23 + $0x58] sm:$0xff] %v1265_v54  ;;  %v1652_v8 = vadd.f32 %v1524_v58, %v1265_v54  ;;  %v1553_v14 = vld [vmem:[%s14189_s10 + $0x140] sm:$0xff]  ;;  %v1649_v27 = vadd.f32 %v1521_v12, %v1262_v11 }
  0x81   : > { %1425 = vst [vmem:[%s14204_s23 + $0x158] sm:$0xff] %v1297_v55  ;;  %v1684_v10 = vadd.f32 %v1556_v59, %v1297_v55  ;;  %12703 = vmatmul.mubr.msk.f32.vlgmr.msra.gmra.mrb[4].mxu1 %vm1780_vm1, %v14298_v47  ;;  %v1136_v19 = vld [vmem:[%s14186_s11 + $0x50] sm:$0xff]  ;;  %v14425_v22 = vpack.c.bf16 %v1297_v55, %v1265_v54  ;;  %13042 = vmatprep.subr.bf16.mxu1 %v13041_v7  ;;  %1390 = vst [vmem:[%s14204_s23 + $0x40] sm:$0xff] %v1262_v11  ;;  %v1071_v34 = vld [vmem:[%s14183_s26 + $0x248] sm:$0xff] }
  0x82   : > { %v1168_v21 = vld [vmem:[%s14186_s11 + $0x150] sm:$0xff]  ;;  %v1264_v28 = vmul.f32 %v1136_v19, %v1008_v13  ;;  %1422 = vst [vmem:[%s14204_s23 + $0x140] sm:$0xff] %v1294_v15  ;;  %v1681_v35 = vadd.f32 %v1553_v14, %v1294_v15  ;;  %2098 = vmatprep.mubr.f32.mxu1 %v17336_v6  ;;  %v1103_v36 = vld [vmem:[%s14183_s26 + $0x348] sm:$0xff]  ;;  %v14436_v25 = vpack.c.bf16 %v1294_v15, %v1262_v11  ;;  %v1073_v46 = vld [vmem:[%s14183_s26 + $0x258] sm:$0xff] }
  0x83   : > { %17448 = vst [vmem:[#allocation45_spill] sm:$0xff] %v14425_v22  ;;  %v13049_v24 = vpack.c.bf16 %v1684_v10, %v1652_v8  ;;  %v1296_v29 = vmul.f32 %v1168_v21, %v1040_v16  ;;  %v1523_v30 = vld [vmem:[%s14189_s10 + $0x50] sm:$0xff]  ;;  %v1199_v38 = vld [vmem:[%s14186_s11 + $0x248] sm:$0xff]  ;;  %12705 = vmatmul.mubr.msk.f32.vlgmr.msra.gmra.mrb[6].mxu0 %vm1780_vm1, %v14298_v47  ;;  %v1105_v52 = vld [vmem:[%s14183_s26 + $0x358] sm:$0xff] }
  0x84   : > { %v1555_v31 = vld [vmem:[%s14189_s10 + $0x150] sm:$0xff]  ;;  %v1231_v40 = vld [vmem:[%s14186_s11 + $0x348] sm:$0xff]  ;;  %17449 = vst [vmem:[#allocation46_spill] sm:$0xff] %v14436_v25  ;;  %1392 = vst [vmem:[%s14204_s23 + $0x50] sm:$0xff] %v1264_v28  ;;  %v1651_v26 = vadd.f32 %v1523_v30, %v1264_v28  ;;  %v1327_v42 = vmul.f32 %v1199_v38, %v1071_v34  ;;  %v13043_v48 = vpack.c.bf16 %v1681_v35, %v1649_v27  ;;  %2175 = vmatprep.mubr.f32.mxu0 %v17336_v6 }
  0x85   : > { %13050 = vmatprep.subr.bf16.mxu0 %v13049_v24  ;;  %1424 = vst [vmem:[%s14204_s23 + $0x150] sm:$0xff] %v1296_v29  ;;  %v1683_v41 = vadd.f32 %v1555_v31, %v1296_v29  ;;  %v1586_v44 = vld [vmem:[%s14189_s10 + $0x248] sm:$0xff]  ;;  %12704 = vmatmul.mubr.msk.f32.gmra.mrb[6].mxu1 %vm1780_vm1, %v14326_v17  ;;  %v1359_v49 = vmul.f32 %v1231_v40, %v1103_v36  ;;  %v1201_v53 = vld [vmem:[%s14186_s11 + $0x258] sm:$0xff]  ;;  %v1070_v0 = vld [vmem:[%s14183_s26 + $0x240] sm:$0xff] }
  0x86   : > { %v1618_v45 = vld [vmem:[%s14189_s10 + $0x348] sm:$0xff]  ;;  %v1233_v54 = vld [vmem:[%s14186_s11 + $0x358] sm:$0xff]  ;;  %v14451_v55 = vpack.c.bf16 %v1296_v29, %v1264_v28  ;;  %1455 = vst [vmem:[%s14204_s23 + $0x248] sm:$0xff] %v1327_v42  ;;  %v1714_v59 = vadd.f32 %v1586_v44, %v1327_v42  ;;  %v1329_v60 = vmul.f32 %v1201_v53, %v1073_v46  ;;  %2246 = vmatprep.mubr.f32.mxu1 %v17336_v6  ;;  %v1102_v8 = vld [vmem:[%s14183_s26 + $0x340] sm:$0xff] }
  0x87   : > { %v13051_v58 = vpack.c.bf16 %v1683_v41, %v1651_v26  ;;  %v1361_v61 = vmul.f32 %v1233_v54, %v1105_v52  ;;  %v1588_v62 = vld [vmem:[%s14189_s10 + $0x258] sm:$0xff]  ;;  %13044 = vmatpush1.bf16.msra.mxu1 %v13043_v48  ;;  %1487 = vst [vmem:[%s14204_s23 + $0x348] sm:$0xff] %v1359_v49  ;;  %v1746_v7 = vadd.f32 %v1618_v45, %v1359_v49  ;;  %v1198_v10 = vld [vmem:[%s14186_s11 + $0x240] sm:$0xff]  ;;  %v1072_v24 = vld [vmem:[%s14183_s26 + $0x250] sm:$0xff] }
  0x88   : > { %17450 = vst [vmem:[#allocation47_spill] sm:$0xff] %v14451_v55  ;;  %v1620_v63 = vld [vmem:[%s14189_s10 + $0x358] sm:$0xff]  ;;  %v1230_v11 = vld [vmem:[%s14186_s11 + $0x340] sm:$0xff]  ;;  %v14462_v12 = vpack.c.bf16 %v1359_v49, %v1327_v42  ;;  %1457 = vst [vmem:[%s14204_s23 + $0x258] sm:$0xff] %v1329_v60  ;;  %v1716_v14 = vadd.f32 %v1588_v62, %v1329_v60  ;;  %v1326_v15 = vmul.f32 %v1198_v10, %v1070_v0  ;;  %12706 = vmatmul.mubr.msk.f32.gmra.mrb[8].mxu0 %vm1780_vm1, %v14326_v17 }
  0x89   : > { %13052 = vmatpush1.bf16.msra.mxu0 %v13051_v58  ;;  %1489 = vst [vmem:[%s14204_s23 + $0x358] sm:$0xff] %v1361_v61  ;;  %v1748_v13 = vadd.f32 %v1620_v63, %v1361_v61  ;;  %v1358_v16 = vmul.f32 %v1230_v11, %v1102_v8  ;;  %v1585_v19 = vld [vmem:[%s14189_s10 + $0x240] sm:$0xff]  ;;  %v13045_v27 = vpack.c.bf16 %v1746_v7, %v1714_v59  ;;  %v1104_v28 = vld [vmem:[%s14183_s26 + $0x350] sm:$0xff]  ;;  %v1011_v41 = vld [vmem:[%s14183_s26 + $0x68] sm:$0xff] }
  0x8a   : > { %17451 = vst [vmem:[#allocation48_spill] sm:$0xff] %v14462_v12  ;;  %v1617_v21 = vld [vmem:[%s14189_s10 + $0x340] sm:$0xff]  ;;  %v1200_v29 = vld [vmem:[%s14186_s11 + $0x250] sm:$0xff]  ;;  %v14474_v31 = vpack.c.bf16 %v1361_v61, %v1329_v60  ;;  %1454 = vst [vmem:[%s14204_s23 + $0x240] sm:$0xff] %v1326_v15  ;;  %v1713_v35 = vadd.f32 %v1585_v19, %v1326_v15  ;;  %2323 = vmatprep.mubr.f32.mxu0 %v17336_v6 }
  0x8b   : > { %v1232_v30 = vld [vmem:[%s14186_s11 + $0x350] sm:$0xff]  ;;  %v13053_v34 = vpack.c.bf16 %v1748_v13, %v1716_v14  ;;  %1486 = vst [vmem:[%s14204_s23 + $0x340] sm:$0xff] %v1358_v16  ;;  %v1745_v36 = vadd.f32 %v1617_v21, %v1358_v16  ;;  %v1328_v38 = vmul.f32 %v1200_v29, %v1072_v24  ;;  %13046 = vmatprep.subr.bf16.mxu1 %v13045_v27  ;;  %v1043_v44 = vld [vmem:[%s14183_s26 + $0x168] sm:$0xff]  ;;  %v1013_v60 = vld [vmem:[%s14183_s26 + $0x78] sm:$0xff] }
  0x8c   : > { %17452 = vst [vmem:[#allocation49_spill] sm:$0xff] %v14474_v31  ;;  %v1587_v40 = vld [vmem:[%s14189_s10 + $0x250] sm:$0xff]  ;;  %v1360_v42 = vmul.f32 %v1232_v30, %v1104_v28  ;;  %v1139_v45 = vld [vmem:[%s14186_s11 + $0x68] sm:$0xff]  ;;  %v14485_v48 = vpack.c.bf16 %v1358_v16, %v1326_v15  ;;  %v1045_v62 = vld [vmem:[%s14183_s26 + $0x178] sm:$0xff] }
  0x8d   : > { %v1619_v26 = vld [vmem:[%s14189_s10 + $0x350] sm:$0xff]  ;;  %v1171_v46 = vld [vmem:[%s14186_s11 + $0x168] sm:$0xff]  ;;  %13054 = vmatprep.subr.bf16.mxu0 %v13053_v34  ;;  %v13047_v49 = vpack.c.bf16 %v1745_v36, %v1713_v35  ;;  %1456 = vst [vmem:[%s14204_s23 + $0x250] sm:$0xff] %v1328_v38  ;;  %v1715_v52 = vadd.f32 %v1587_v40, %v1328_v38  ;;  %v1267_v53 = vmul.f32 %v1139_v45, %v1011_v41  ;;  %v1141_v63 = vld [vmem:[%s14186_s11 + $0x78] sm:$0xff] }
  0x8e   : > { %17453 = vst [vmem:[#allocation50_spill] sm:$0xff] %v14485_v48  ;;  %v1299_v54 = vmul.f32 %v1171_v46, %v1043_v44  ;;  %v1526_v58 = vld [vmem:[%s14189_s10 + $0x68] sm:$0xff]  ;;  %1488 = vst [vmem:[%s14204_s23 + $0x350] sm:$0xff] %v1360_v42  ;;  %v1747_v61 = vadd.f32 %v1619_v26, %v1360_v42  ;;  %v1173_v0 = vld [vmem:[%s14186_s11 + $0x178] sm:$0xff]  ;;  %v14495_v7 = vpack.c.bf16 %v1360_v42, %v1328_v38 }
  0x8f   : > { %v1558_v59 = vld [vmem:[%s14189_s10 + $0x168] sm:$0xff]  ;;  %13048 = vmatpush1.bf16.msra.mxu1 %v13047_v49  ;;  %1395 = vst [vmem:[%s14204_s23 + $0x68] sm:$0xff] %v1267_v53  ;;  %v1654_v8 = vadd.f32 %v1526_v58, %v1267_v53  ;;  %v1269_v11 = vmul.f32 %v1141_v63, %v1013_v60  ;;  %v1301_v14 = vmul.f32 %v1173_v0, %v1045_v62  ;;  %v1528_v13 = vld [vmem:[%s14189_s10 + $0x78] sm:$0xff]  ;;  %v1010_v16 = vld [vmem:[%s14183_s26 + $0x60] sm:$0xff] }
  0x90   : > { %17454 = vst [vmem:[#allocation51_spill] sm:$0xff] %v14495_v7  ;;  %1427 = vst [vmem:[%s14204_s23 + $0x168] sm:$0xff] %v1299_v54  ;;  %v1686_v10 = vadd.f32 %v1558_v59, %v1299_v54  ;;  %v1560_v15 = vld [vmem:[%s14189_s10 + $0x178] sm:$0xff]  ;;  %v13055_v19 = vpack.c.bf16 %v1747_v61, %v1715_v52  ;;  %v1042_v21 = vld [vmem:[%s14183_s26 + $0x160] sm:$0xff]  ;;  %v14505_v28 = vpack.c.bf16 %v1299_v54, %v1267_v53 }
  0x91   : > { %v1138_v24 = vld [vmem:[%s14186_s11 + $0x60] sm:$0xff]  ;;  %1397 = vst [vmem:[%s14204_s23 + $0x78] sm:$0xff] %v1269_v11  ;;  %1429 = vst [vmem:[%s14204_s23 + $0x178] sm:$0xff] %v1301_v14  ;;  %v1656_v30 = vadd.f32 %v1528_v13, %v1269_v11  ;;  %v1688_v34 = vadd.f32 %v1560_v15, %v1301_v14  ;;  %v1012_v40 = vld [vmem:[%s14183_s26 + $0x70] sm:$0xff]  ;;  %v14517_v45 = vpack.c.bf16 %v1301_v14, %v1269_v11 }
  0x92   : > { %v1170_v27 = vld [vmem:[%s14186_s11 + $0x160] sm:$0xff]  ;;  %17455 = vst [vmem:[#allocation52_spill] sm:$0xff] %v14505_v28  ;;  %v13057_v29 = vpack.c.bf16 %v1686_v10, %v1654_v8  ;;  %v1266_v35 = vmul.f32 %v1138_v24, %v1010_v16  ;;  %13056 = vmatpush1.bf16.msra.mxu0 %v13055_v19  ;;  %12707 = vmatmul.mubr.msk.f32.vlgmr.msra.gmra.mrb[8].mxu1 %vm1780_vm1, %v14298_v47  ;;  %v1044_v41 = vld [vmem:[%s14183_s26 + $0x170] sm:$0xff]  ;;  %v1075_v59 = vld [vmem:[%s14183_s26 + $0x268] sm:$0xff] }
  0x93   : > { %v1525_v36 = vld [vmem:[%s14189_s10 + $0x60] sm:$0xff]  ;;  %v1298_v26 = vmul.f32 %v1170_v27, %v1042_v21  ;;  %v1140_v42 = vld [vmem:[%s14186_s11 + $0x70] sm:$0xff]  ;;  %17456 = vst [vmem:[#allocation53_spill] sm:$0xff] %v14517_v45  ;;  %v13065_v46 = vpack.c.bf16 %v1688_v34, %v1656_v30  ;;  %2252 = vmatprep.mubr.f32.mxu1 %v17336_v6  ;;  %v1107_v61 = vld [vmem:[%s14183_s26 + $0x368] sm:$0xff] }
  0x94   : > { %v1557_v38 = vld [vmem:[%s14189_s10 + $0x160] sm:$0xff]  ;;  %v1172_v44 = vld [vmem:[%s14186_s11 + $0x170] sm:$0xff]  ;;  %13058 = vmatprep.subr.bf16.mxu1 %v13057_v29  ;;  %1394 = vst [vmem:[%s14204_s23 + $0x60] sm:$0xff] %v1266_v35  ;;  %v1653_v49 = vadd.f32 %v1525_v36, %v1266_v35  ;;  %v1268_v52 = vmul.f32 %v1140_v42, %v1012_v40  ;;  %v1203_v62 = vld [vmem:[%s14186_s11 + $0x268] sm:$0xff] }
  0x95   : > { %v1300_v53 = vmul.f32 %v1172_v44, %v1044_v41  ;;  %v1527_v54 = vld [vmem:[%s14189_s10 + $0x70] sm:$0xff]  ;;  %1426 = vst [vmem:[%s14204_s23 + $0x160] sm:$0xff] %v1298_v26  ;;  %v1685_v60 = vadd.f32 %v1557_v38, %v1298_v26  ;;  %v1235_v63 = vld [vmem:[%s14186_s11 + $0x368] sm:$0xff]  ;;  %v14528_v0 = vpack.c.bf16 %v1298_v26, %v1266_v35  ;;  %12709 = vmatmul.mubr.msk.f32.vlgmr.msra.gmra.mrb[10].mxu0 %vm1780_vm1, %v14298_v47  ;;  %v1077_v15 = vld [vmem:[%s14183_s26 + $0x278] sm:$0xff] }
  0x96   : > { %v1559_v58 = vld [vmem:[%s14189_s10 + $0x170] sm:$0xff]  ;;  %13066 = vmatprep.subr.bf16.mxu0 %v13065_v46  ;;  %1396 = vst [vmem:[%s14204_s23 + $0x70] sm:$0xff] %v1268_v52  ;;  %v1655_v8 = vadd.f32 %v1527_v54, %v1268_v52  ;;  %v1331_v11 = vmul.f32 %v1203_v62, %v1075_v59  ;;  %v1590_v14 = vld [vmem:[%s14189_s10 + $0x268] sm:$0xff]  ;;  %2329 = vmatprep.mubr.f32.mxu0 %v17336_v6  ;;  %v1109_v21 = vld [vmem:[%s14183_s26 + $0x378] sm:$0xff] }
  0x97   : > { %17457 = vst [vmem:[#allocation54_spill] sm:$0xff] %v14528_v0  ;;  %1428 = vst [vmem:[%s14204_s23 + $0x170] sm:$0xff] %v1300_v53  ;;  %v1687_v10 = vadd.f32 %v1559_v58, %v1300_v53  ;;  %v1622_v13 = vld [vmem:[%s14189_s10 + $0x368] sm:$0xff]  ;;  %v13059_v16 = vpack.c.bf16 %v1685_v60, %v1653_v49  ;;  %12708 = vmatmul.mubr.msk.f32.gmra.mrb[10].mxu1 %vm1780_vm1, %v14326_v17  ;;  %v1363_v19 = vmul.f32 %v1235_v63, %v1107_v61  ;;  %v1205_v24 = vld [vmem:[%s14186_s11 + $0x278] sm:$0xff] }
  0x98   : > { %v1237_v27 = vld [vmem:[%s14186_s11 + $0x378] sm:$0xff]  ;;  %v14543_v29 = vpack.c.bf16 %v1300_v53, %v1268_v52  ;;  %1459 = vst [vmem:[%s14204_s23 + $0x268] sm:$0xff] %v1331_v11  ;;  %v1718_v34 = vadd.f32 %v1590_v14, %v1331_v11  ;;  %v1333_v35 = vmul.f32 %v1205_v24, %v1077_v15  ;;  %v1074_v26 = vld [vmem:[%s14183_s26 + $0x260] sm:$0xff]  ;;  %2400 = vmatprep.mubr.f32.mxu1 %v17336_v6  ;;  %v1076_v61 = vld [vmem:[%s14183_s26 + $0x270] sm:$0xff] }
  0x99   : > { %v13067_v30 = vpack.c.bf16 %v1687_v10, %v1655_v8  ;;  %v1365_v36 = vmul.f32 %v1237_v27, %v1109_v21  ;;  %v1592_v38 = vld [vmem:[%s14189_s10 + $0x278] sm:$0xff]  ;;  %13060 = vmatpush1.bf16.msra.mxu1 %v13059_v16  ;;  %1491 = vst [vmem:[%s14204_s23 + $0x368] sm:$0xff] %v1363_v19  ;;  %v1750_v41 = vadd.f32 %v1622_v13, %v1363_v19  ;;  %v1106_v42 = vld [vmem:[%s14183_s26 + $0x360] sm:$0xff]  ;;  %v1108_v63 = vld [vmem:[%s14183_s26 + $0x370] sm:$0xff] }
  0x9a   : > { %17458 = vst [vmem:[#allocation55_spill] sm:$0xff] %v14543_v29  ;;  %v1624_v40 = vld [vmem:[%s14189_s10 + $0x378] sm:$0xff]  ;;  %v1202_v44 = vld [vmem:[%s14186_s11 + $0x260] sm:$0xff]  ;;  %v14554_v49 = vpack.c.bf16 %v1363_v19, %v1331_v11  ;;  %1461 = vst [vmem:[%s14204_s23 + $0x278] sm:$0xff] %v1333_v35  ;;  %v1720_v52 = vadd.f32 %v1592_v38, %v1333_v35  ;;  %12710 = vmatmul.mubr.msk.f32.gmra.mrb[12].mxu0 %vm1780_vm1, %v14326_v17 }
  0x9b   : > { %v1234_v46 = vld [vmem:[%s14186_s11 + $0x360] sm:$0xff]  ;;  %13068 = vmatpush1.bf16.msra.mxu0 %v13067_v30  ;;  %1493 = vst [vmem:[%s14204_s23 + $0x378] sm:$0xff] %v1365_v36  ;;  %v1752_v53 = vadd.f32 %v1624_v40, %v1365_v36  ;;  %v1330_v54 = vmul.f32 %v1202_v44, %v1074_v26  ;;  %v13061_v62 = vpack.c.bf16 %v1750_v41, %v1718_v34  ;;  %v1204_v8 = vld [vmem:[%s14186_s11 + $0x270] sm:$0xff]  ;;  %v1015_v24 = vld [vmem:[%s14183_s26 + $0x88] sm:$0xff] }
  0x9c   : > { %17459 = vst [vmem:[#allocation56_spill] sm:$0xff] %v14554_v49  ;;  %v1362_v58 = vmul.f32 %v1234_v46, %v1106_v42  ;;  %v1589_v59 = vld [vmem:[%s14189_s10 + $0x260] sm:$0xff]  ;;  %v1236_v10 = vld [vmem:[%s14186_s11 + $0x370] sm:$0xff]  ;;  %v14566_v11 = vpack.c.bf16 %v1365_v36, %v1333_v35  ;;  %v1332_v16 = vmul.f32 %v1204_v8, %v1076_v61  ;;  %2477 = vmatprep.mubr.f32.mxu0 %v17336_v6  ;;  %v1047_v30 = vld [vmem:[%s14183_s26 + $0x188] sm:$0xff] }
  0x9d   : > { %v1621_v60 = vld [vmem:[%s14189_s10 + $0x360] sm:$0xff]  ;;  %v13069_v14 = vpack.c.bf16 %v1752_v53, %v1720_v52  ;;  %1458 = vst [vmem:[%s14204_s23 + $0x260] sm:$0xff] %v1330_v54  ;;  %v1717_v13 = vadd.f32 %v1589_v59, %v1330_v54  ;;  %v1591_v19 = vld [vmem:[%s14189_s10 + $0x270] sm:$0xff]  ;;  %13062 = vmatprep.subr.bf16.mxu1 %v13061_v62  ;;  %v1364_v27 = vmul.f32 %v1236_v10, %v1108_v63  ;;  %v1143_v34 = vld [vmem:[%s14186_s11 + $0x88] sm:$0xff] }
  0x9e   : > { %17460 = vst [vmem:[#allocation57_spill] sm:$0xff] %v14566_v11  ;;  %1490 = vst [vmem:[%s14204_s23 + $0x360] sm:$0xff] %v1362_v58  ;;  %v1749_v15 = vadd.f32 %v1621_v60, %v1362_v58  ;;  %v1623_v21 = vld [vmem:[%s14189_s10 + $0x370] sm:$0xff]  ;;  %v1175_v35 = vld [vmem:[%s14186_s11 + $0x188] sm:$0xff]  ;;  %v14577_v36 = vpack.c.bf16 %v1362_v58, %v1330_v54  ;;  %v1719_v40 = vadd.f32 %v1591_v19, %v1332_v16 }
  0x9f   : > { %13070 = vmatprep.subr.bf16.mxu0 %v13069_v14  ;;  %1460 = vst [vmem:[%s14204_s23 + $0x270] sm:$0xff] %v1332_v16  ;;  %v1271_v26 = vmul.f32 %v1143_v34, %v1015_v24  ;;  %v1303_v41 = vmul.f32 %v1175_v35, %v1047_v30  ;;  %v1530_v42 = vld [vmem:[%s14189_s10 + $0x88] sm:$0xff]  ;;  %v1017_v46 = vld [vmem:[%s14183_s26 + $0x98] sm:$0xff]  ;;  %1492 = vst [vmem:[%s14204_s23 + $0x370] sm:$0xff] %v1364_v27  ;;  %v1751_v52 = vadd.f32 %v1623_v21, %v1364_v27 }
  0xa0   : > { %17461 = vst [vmem:[#allocation58_spill] sm:$0xff] %v14577_v36  ;;  %v13063_v38 = vpack.c.bf16 %v1749_v15, %v1717_v13  ;;  %v1562_v44 = vld [vmem:[%s14189_s10 + $0x188] sm:$0xff]  ;;  %v1049_v53 = vld [vmem:[%s14183_s26 + $0x198] sm:$0xff]  ;;  %v14587_v59 = vpack.c.bf16 %v1364_v27, %v1332_v16  ;;  %v1014_v14 = vld [vmem:[%s14183_s26 + $0x80] sm:$0xff] }
  0xa1   : > { %v1145_v54 = vld [vmem:[%s14186_s11 + $0x98] sm:$0xff]  ;;  %1399 = vst [vmem:[%s14204_s23 + $0x88] sm:$0xff] %v1271_v26  ;;  %1431 = vst [vmem:[%s14204_s23 + $0x188] sm:$0xff] %v1303_v41  ;;  %v1658_v60 = vadd.f32 %v1530_v42, %v1271_v26  ;;  %v1690_v61 = vadd.f32 %v1562_v44, %v1303_v41  ;;  %v13071_v13 = vpack.c.bf16 %v1751_v52, %v1719_v40  ;;  %v1046_v15 = vld [vmem:[%s14183_s26 + $0x180] sm:$0xff] }
  0xa2   : > { %v1177_v58 = vld [vmem:[%s14186_s11 + $0x198] sm:$0xff]  ;;  %17462 = vst [vmem:[#allocation59_spill] sm:$0xff] %v14587_v59  ;;  %13064 = vmatpush1.bf16.msra.mxu1 %v13063_v38  ;;  %v1273_v62 = vmul.f32 %v1145_v54, %v1017_v46  ;;  %v1142_v16 = vld [vmem:[%s14186_s11 + $0x80] sm:$0xff]  ;;  %v14597_v21 = vpack.c.bf16 %v1303_v41, %v1271_v26  ;;  %v1016_v40 = vld [vmem:[%s14183_s26 + $0x90] sm:$0xff] }
  0xa3   : > { %v1305_v63 = vmul.f32 %v1177_v58, %v1049_v53  ;;  %v1532_v8 = vld [vmem:[%s14189_s10 + $0x98] sm:$0xff]  ;;  %v1174_v19 = vld [vmem:[%s14186_s11 + $0x180] sm:$0xff]  ;;  %v13073_v24 = vpack.c.bf16 %v1690_v61, %v1658_v60  ;;  %v1270_v34 = vmul.f32 %v1142_v16, %v1014_v14  ;;  %13072 = vmatpush1.bf16.msra.mxu0 %v13071_v13  ;;  %v1048_v41 = vld [vmem:[%s14183_s26 + $0x190] sm:$0xff] }
  0xa4   : > { %v1564_v10 = vld [vmem:[%s14189_s10 + $0x198] sm:$0xff]  ;;  %17463 = vst [vmem:[#allocation60_spill] sm:$0xff] %v14597_v21  ;;  %1401 = vst [vmem:[%s14204_s23 + $0x98] sm:$0xff] %v1273_v62  ;;  %v1660_v27 = vadd.f32 %v1532_v8, %v1273_v62  ;;  %v1529_v35 = vld [vmem:[%s14189_s10 + $0x80] sm:$0xff]  ;;  %v1302_v26 = vmul.f32 %v1174_v19, %v1046_v15 }
  0xa5   : > { %1433 = vst [vmem:[%s14204_s23 + $0x198] sm:$0xff] %v1305_v63  ;;  %v1692_v30 = vadd.f32 %v1564_v10, %v1305_v63  ;;  %v1561_v38 = vld [vmem:[%s14189_s10 + $0x180] sm:$0xff]  ;;  %12711 = vmatmul.mubr.msk.f32.vlgmr.msra.gmra.mrb[12].mxu1 %vm1780_vm1, %v14298_v47  ;;  %v1144_v42 = vld [vmem:[%s14186_s11 + $0x90] sm:$0xff]  ;;  %v14609_v46 = vpack.c.bf16 %v1305_v63, %v1273_v62  ;;  %13074 = vmatprep.subr.bf16.mxu1 %v13073_v24  ;;  %1398 = vst [vmem:[%s14204_s23 + $0x80] sm:$0xff] %v1270_v34 }
  0xa6   : > { %v1176_v44 = vld [vmem:[%s14186_s11 + $0x190] sm:$0xff]  ;;  %v1657_v53 = vadd.f32 %v1529_v35, %v1270_v34  ;;  %v1272_v54 = vmul.f32 %v1144_v42, %v1016_v40  ;;  %v1079_v8 = vld [vmem:[%s14183_s26 + $0x288] sm:$0xff]  ;;  %1430 = vst [vmem:[%s14204_s23 + $0x180] sm:$0xff] %v1302_v26  ;;  %v1689_v10 = vadd.f32 %v1561_v38, %v1302_v26  ;;  %2406 = vmatprep.mubr.f32.mxu1 %v17336_v6  ;;  %v1113_v35 = vld [vmem:[%s14183_s26 + $0x398] sm:$0xff] }
  0xa7   : > { %17464 = vst [vmem:[#allocation61_spill] sm:$0xff] %v14609_v46  ;;  %v13081_v52 = vpack.c.bf16 %v1692_v30, %v1660_v27  ;;  %v1304_v58 = vmul.f32 %v1176_v44, %v1048_v41  ;;  %v1531_v60 = vld [vmem:[%s14189_s10 + $0x90] sm:$0xff]  ;;  %v1111_v62 = vld [vmem:[%s14183_s26 + $0x388] sm:$0xff]  ;;  %v14620_v13 = vpack.c.bf16 %v1302_v26, %v1270_v34  ;;  %12713 = vmatmul.mubr.msk.f32.vlgmr.msra.gmra.mrb[14].mxu0 %vm1780_vm1, %v14298_v47  ;;  %v1081_v30 = vld [vmem:[%s14183_s26 + $0x298] sm:$0xff] }
  0xa8   : > { %v1563_v61 = vld [vmem:[%s14189_s10 + $0x190] sm:$0xff]  ;;  %v1207_v63 = vld [vmem:[%s14186_s11 + $0x288] sm:$0xff]  ;;  %1400 = vst [vmem:[%s14204_s23 + $0x90] sm:$0xff] %v1272_v54  ;;  %v1659_v15 = vadd.f32 %v1531_v60, %v1272_v54  ;;  %v13075_v34 = vpack.c.bf16 %v1689_v10, %v1657_v53  ;;  %2483 = vmatprep.mubr.f32.mxu0 %v17336_v6  ;;  %v1209_v38 = vld [vmem:[%s14186_s11 + $0x298] sm:$0xff] }
  0xa9   : > { %v1239_v14 = vld [vmem:[%s14186_s11 + $0x388] sm:$0xff]  ;;  %17465 = vst [vmem:[#allocation62_spill] sm:$0xff] %v14620_v13  ;;  %13082 = vmatprep.subr.bf16.mxu0 %v13081_v52  ;;  %1432 = vst [vmem:[%s14204_s23 + $0x190] sm:$0xff] %v1304_v58  ;;  %v1691_v16 = vadd.f32 %v1563_v61, %v1304_v58  ;;  %v1335_v19 = vmul.f32 %v1207_v63, %v1079_v8  ;;  %12712 = vmatmul.mubr.msk.f32.gmra.mrb[14].mxu1 %vm1780_vm1, %v14326_v17  ;;  %v1241_v40 = vld [vmem:[%s14186_s11 + $0x398] sm:$0xff] }
  0xaa   : > { %v1594_v24 = vld [vmem:[%s14189_s10 + $0x288] sm:$0xff]  ;;  %v1367_v47 = vmul.f32 %v1239_v14, %v1111_v62  ;;  %v14635_v26 = vpack.c.bf16 %v1304_v58, %v1272_v54  ;;  %v1337_v44 = vmul.f32 %v1209_v38, %v1081_v30  ;;  %v1369_v52 = vmul.f32 %v1241_v40, %v1113_v35  ;;  %v1596_v53 = vld [vmem:[%s14189_s10 + $0x298] sm:$0xff]  ;;  %v1078_v61 = vld [vmem:[%s14183_s26 + $0x280] sm:$0xff]  ;;  %2554 = vmatprep.mubr.f32.mxu1 %v17336_v6 }
  0xab   : > { %v1626_v27 = vld [vmem:[%s14189_s10 + $0x388] sm:$0xff]  ;;  %v13083_v41 = vpack.c.bf16 %v1691_v16, %v1659_v15  ;;  %1463 = vst [vmem:[%s14204_s23 + $0x288] sm:$0xff] %v1335_v19  ;;  %v1722_v42 = vadd.f32 %v1594_v24, %v1335_v19  ;;  %v1628_v60 = vld [vmem:[%s14189_s10 + $0x398] sm:$0xff]  ;;  %13076 = vmatpush1.bf16.msra.mxu1 %v13075_v34  ;;  %v1110_v54 = vld [vmem:[%s14183_s26 + $0x380] sm:$0xff]  ;;  %12714 = vmatmul.mubr.msk.f32.gmra.mrb[16].mxu0 %vm1780_vm1, %v14326_v17 }
  0xac   : > { %17466 = vst [vmem:[#allocation63_spill] sm:$0xff] %v14635_v26  ;;  %1495 = vst [vmem:[%s14204_s23 + $0x388] sm:$0xff] %v1367_v47  ;;  %v1754_v8 = vadd.f32 %v1626_v27, %v1367_v47  ;;  %v1206_v58 = vld [vmem:[%s14186_s11 + $0x280] sm:$0xff]  ;;  %v14646_v62 = vpack.c.bf16 %v1367_v47, %v1335_v19  ;;  %v1724_v63 = vadd.f32 %v1596_v53, %v1337_v44  ;;  %v1080_v30 = vld [vmem:[%s14183_s26 + $0x290] sm:$0xff]  ;;  %2631 = vmatprep.mubr.f32.mxu0 %v17336_v6 }
  0xad   : > { %v1238_v10 = vld [vmem:[%s14186_s11 + $0x380] sm:$0xff]  ;;  %13084 = vmatpush1.bf16.msra.mxu0 %v13083_v41  ;;  %1465 = vst [vmem:[%s14204_s23 + $0x298] sm:$0xff] %v1337_v44  ;;  %1497 = vst [vmem:[%s14204_s23 + $0x398] sm:$0xff] %v1369_v52  ;;  %v1756_v14 = vadd.f32 %v1628_v60, %v1369_v52  ;;  %v1334_v15 = vmul.f32 %v1206_v58, %v1078_v61  ;;  %v1112_v34 = vld [vmem:[%s14183_s26 + $0x390] sm:$0xff]  ;;  %v14658_v38 = vpack.c.bf16 %v1369_v52, %v1337_v44 }
  0xae   : > { %17467 = vst [vmem:[#allocation64_spill] sm:$0xff] %v14646_v62  ;;  %v1366_v16 = vmul.f32 %v1238_v10, %v1110_v54  ;;  %v1593_v24 = vld [vmem:[%s14189_s10 + $0x280] sm:$0xff]  ;;  %v13077_v19 = vpack.c.bf16 %v1754_v8, %v1722_v42  ;;  %v1208_v47 = vld [vmem:[%s14186_s11 + $0x290] sm:$0xff]  ;;  %v1019_v17 = vld [vmem:[%s14183_s26 + $0xa8] sm:$0xff] }
  0xaf   : > { %v1625_v27 = vld [vmem:[%s14189_s10 + $0x380] sm:$0xff]  ;;  %v1240_v35 = vld [vmem:[%s14186_s11 + $0x390] sm:$0xff]  ;;  %17468 = vst [vmem:[#allocation65_spill] sm:$0xff] %v14658_v38  ;;  %v13085_v40 = vpack.c.bf16 %v1756_v14, %v1724_v63  ;;  %1462 = vst [vmem:[%s14204_s23 + $0x280] sm:$0xff] %v1334_v15  ;;  %v1721_v41 = vadd.f32 %v1593_v24, %v1334_v15  ;;  %v1336_v60 = vmul.f32 %v1208_v47, %v1080_v30 }
  0xb0   : > { %1494 = vst [vmem:[%s14204_s23 + $0x380] sm:$0xff] %v1366_v16  ;;  %v1753_v53 = vadd.f32 %v1625_v27, %v1366_v16  ;;  %v1595_v61 = vld [vmem:[%s14189_s10 + $0x290] sm:$0xff]  ;;  %13078 = vmatprep.subr.bf16.mxu1 %v13077_v19  ;;  %v1368_v42 = vmul.f32 %v1240_v35, %v1112_v34  ;;  %v1051_v44 = vld [vmem:[%s14183_s26 + $0x1a8] sm:$0xff]  ;;  %v14669_v58 = vpack.c.bf16 %v1366_v16, %v1334_v15  ;;  %v1021_v19 = vld [vmem:[%s14183_s26 + $0xb8] sm:$0xff] }
  0xb1   : > { %v1627_v54 = vld [vmem:[%s14189_s10 + $0x390] sm:$0xff]  ;;  %v1147_v52 = vld [vmem:[%s14186_s11 + $0xa8] sm:$0xff]  ;;  %13086 = vmatprep.subr.bf16.mxu0 %v13085_v40  ;;  %1464 = vst [vmem:[%s14204_s23 + $0x290] sm:$0xff] %v1336_v60  ;;  %v1723_v63 = vadd.f32 %v1595_v61, %v1336_v60  ;;  %v1053_v47 = vld [vmem:[%s14183_s26 + $0x1b8] sm:$0xff] }
  0xb2   : > { %v1179_v8 = vld [vmem:[%s14186_s11 + $0x1a8] sm:$0xff]  ;;  %17469 = vst [vmem:[#allocation66_spill] sm:$0xff] %v14669_v58  ;;  %v13079_v10 = vpack.c.bf16 %v1753_v53, %v1721_v41  ;;  %v1275_v14 = vmul.f32 %v1147_v52, %v1019_v17  ;;  %1496 = vst [vmem:[%s14204_s23 + $0x390] sm:$0xff] %v1368_v42  ;;  %v1755_v34 = vadd.f32 %v1627_v54, %v1368_v42  ;;  %v1149_v15 = vld [vmem:[%s14186_s11 + $0xb8] sm:$0xff] }
  0xb3   : > { %v1307_v24 = vmul.f32 %v1179_v8, %v1051_v44  ;;  %v1534_v27 = vld [vmem:[%s14189_s10 + $0xa8] sm:$0xff]  ;;  %v1181_v16 = vld [vmem:[%s14186_s11 + $0x1b8] sm:$0xff]  ;;  %v14679_v35 = vpack.c.bf16 %v1368_v42, %v1336_v60  ;;  %v1277_v53 = vmul.f32 %v1149_v15, %v1021_v19  ;;  %v1018_v44 = vld [vmem:[%s14183_s26 + $0xa0] sm:$0xff] }
  0xb4   : > { %v1566_v30 = vld [vmem:[%s14189_s10 + $0x1a8] sm:$0xff]  ;;  %13080 = vmatpush1.bf16.msra.mxu1 %v13079_v10  ;;  %1403 = vst [vmem:[%s14204_s23 + $0xa8] sm:$0xff] %v1275_v14  ;;  %v1662_v40 = vadd.f32 %v1534_v27, %v1275_v14  ;;  %v1309_v61 = vmul.f32 %v1181_v16, %v1053_v47  ;;  %v1536_v54 = vld [vmem:[%s14189_s10 + $0xb8] sm:$0xff]  ;;  %v13087_v52 = vpack.c.bf16 %v1755_v34, %v1723_v63  ;;  %v1050_v8 = vld [vmem:[%s14183_s26 + $0x1a0] sm:$0xff] }
  0xb5   : > { %17470 = vst [vmem:[#allocation67_spill] sm:$0xff] %v14679_v35  ;;  %1435 = vst [vmem:[%s14204_s23 + $0x1a8] sm:$0xff] %v1307_v24  ;;  %v1694_v41 = vadd.f32 %v1566_v30, %v1307_v24  ;;  %v1568_v17 = vld [vmem:[%s14189_s10 + $0x1b8] sm:$0xff]  ;;  %v1146_v60 = vld [vmem:[%s14186_s11 + $0xa0] sm:$0xff]  ;;  %v14689_v10 = vpack.c.bf16 %v1307_v24, %v1275_v14  ;;  %v1664_v30 = vadd.f32 %v1536_v54, %v1277_v53  ;;  %v17473_v35 = vmov 0.0  }
  0xb6   : > { %v1178_v42 = vld [vmem:[%s14186_s11 + $0x1a0] sm:$0xff]  ;;  %1405 = vst [vmem:[%s14204_s23 + $0xb8] sm:$0xff] %v1277_v53  ;;  %1437 = vst [vmem:[%s14204_s23 + $0x1b8] sm:$0xff] %v1309_v61  ;;  %v1696_v19 = vadd.f32 %v1568_v17, %v1309_v61  ;;  %v1274_v47 = vmul.f32 %v1146_v60, %v1018_v44  ;;  %v1020_v3 = vld [vmem:[%s14183_s26 + $0xb0] sm:$0xff]  ;;  %13088 = vmatpush1.bf16.msra.mxu0 %v13087_v52 }
  0xb7   : > { %17471 = vst [vmem:[#allocation68_spill] sm:$0xff] %v14689_v10  ;;  %v13089_v27 = vpack.c.bf16 %v1694_v41, %v1662_v40  ;;  %v1533_v15 = vld [vmem:[%s14189_s10 + $0xa0] sm:$0xff]  ;;  %v1306_v14 = vmul.f32 %v1178_v42, %v1050_v8  ;;  %v1052_v24 = vld [vmem:[%s14183_s26 + $0x1b0] sm:$0xff]  ;;  %v14704_v41 = vpack.c.bf16 %v1309_v61, %v1277_v53  ;;  %v1083_v8 = vld [vmem:[%s14183_s26 + $0x2a8] sm:$0xff] }
  0xb8   : > { %v1565_v16 = vld [vmem:[%s14189_s10 + $0x1a0] sm:$0xff]  ;;  %v1148_v34 = vld [vmem:[%s14186_s11 + $0xb0] sm:$0xff]  ;;  %v13097_v54 = vpack.c.bf16 %v1696_v19, %v1664_v30  ;;  %1402 = vst [vmem:[%s14204_s23 + $0xa0] sm:$0xff] %v1274_v47  ;;  %v1661_v17 = vadd.f32 %v1533_v15, %v1274_v47  ;;  %v1115_v53 = vld [vmem:[%s14183_s26 + $0x3a8] sm:$0xff] }
  0xb9   : > { %v14697_v63 = vld [vmem:[%s17422_s3] sm:$0xff]  ;;  %v1180_v40 = vld [vmem:[%s14186_s11 + $0x1b0] sm:$0xff]  ;;  %17472 = vst [vmem:[#allocation69_spill] sm:$0xff] %v14704_v41  ;;  %13090 = vmatprep.subr.bf16.mxu1 %v13089_v27  ;;  %v1276_v44 = vmul.f32 %v1148_v34, %v1020_v3  ;;  %1434 = vst [vmem:[%s14204_s23 + $0x1a0] sm:$0xff] %v1306_v14  ;;  %v1693_v42 = vadd.f32 %v1565_v16, %v1306_v14  ;;  %v14715_v30 = vpack.c.bf16 %v1306_v14, %v1274_v47 }
  0xba   : > { %12715 = vmatmul.mubr.msk.f32.vlgmr.msra.gmra.mrb[16].mxu1 %vm1780_vm1, %v14697_v63  ;;  %v1308_v52 = vmul.f32 %v1180_v40, %v1052_v24  ;;  %v1535_v60 = vld [vmem:[%s14189_s10 + $0xb0] sm:$0xff]  ;;  %v1211_v61 = vld [vmem:[%s14186_s11 + $0x2a8] sm:$0xff]  ;;  %12717 = vmatmul.mubr.msk.f32.vlgmr.msra.gmra.mrb[18].mxu0 %vm1780_vm1, %v14697_v63  ;;  %v1085_v34 = vld [vmem:[%s14183_s26 + $0x2b8] sm:$0xff] }
  0xbb   : > { %v1567_v6 = vld [vmem:[%s14189_s10 + $0x1b0] sm:$0xff]  ;;  %2560 = vmatprep.mubr.f32.mxu1 %v17473_v35  ;;  %v1243_v27 = vld [vmem:[%s14186_s11 + $0x3a8] sm:$0xff]  ;;  %17474 = vst [vmem:[#allocation70_spill] sm:$0xff] %v14715_v30  ;;  %13098 = vmatprep.subr.bf16.mxu0 %v13097_v54  ;;  %1404 = vst [vmem:[%s14204_s23 + $0xb0] sm:$0xff] %v1276_v44  ;;  %v1663_v3 = vadd.f32 %v1535_v60, %v1276_v44  ;;  %v1339_v15 = vmul.f32 %v1211_v61, %v1083_v8 }
  0xbc   : > { %1436 = vst [vmem:[%s14204_s23 + $0x1b0] sm:$0xff] %v1308_v52  ;;  %v1695_v19 = vadd.f32 %v1567_v6, %v1308_v52  ;;  %v1598_v16 = vld [vmem:[%s14189_s10 + $0x2a8] sm:$0xff]  ;;  %v13091_v47 = vpack.c.bf16 %v1693_v42, %v1661_v17  ;;  %2637 = vmatprep.mubr.f32.mxu0 %v17473_v35  ;;  %v1371_v40 = vmul.f32 %v1243_v27, %v1115_v53  ;;  %v1117_v54 = vld [vmem:[%s14183_s26 + $0x3b8] sm:$0xff]  ;;  %v1082_v10 = vld [vmem:[%s14183_s26 + $0x2a0] sm:$0xff] }
  0xbd   : > { %v1630_v24 = vld [vmem:[%s14189_s10 + $0x3a8] sm:$0xff]  ;;  %v1213_v6 = vld [vmem:[%s14186_s11 + $0x2b8] sm:$0xff]  ;;  %v14733_v8 = vpack.c.bf16 %v1308_v52, %v1276_v44  ;;  %1467 = vst [vmem:[%s14204_s23 + $0x2a8] sm:$0xff] %v1339_v15  ;;  %v1726_v17 = vadd.f32 %v1598_v16, %v1339_v15  ;;  %v1114_v44 = vld [vmem:[%s14183_s26 + $0x3a0] sm:$0xff] }
  0xbe   : > { %v14726_v14 = vld [vmem:[%s17422_s3 + $0x8] sm:$0xff]  ;;  %v1245_v60 = vld [vmem:[%s14186_s11 + $0x3b8] sm:$0xff]  ;;  %v13099_v61 = vpack.c.bf16 %v1695_v19, %v1663_v3  ;;  %v1341_v42 = vmul.f32 %v1213_v6, %v1085_v34  ;;  %13092 = vmatpush1.bf16.msra.mxu1 %v13091_v47  ;;  %1499 = vst [vmem:[%s14204_s23 + $0x3a8] sm:$0xff] %v1371_v40  ;;  %v1758_v53 = vadd.f32 %v1630_v24, %v1371_v40  ;;  %v1210_v52 = vld [vmem:[%s14186_s11 + $0x2a0] sm:$0xff]  ;;  %s13956_s3 = smov [#allocation2]  }
  0xbf   : > { %12716 = vmatmul.mubr.msk.f32.gmra.mrb[18].mxu1 %vm1780_vm1, %v14726_v14  ;;  %17475 = vst [vmem:[#allocation71_spill] sm:$0xff] %v14733_v8  ;;  %v1373_v41 = vmul.f32 %v1245_v60, %v1117_v54  ;;  %v1600_v30 = vld [vmem:[%s14189_s10 + $0x2b8] sm:$0xff]  ;;  %v1242_v27 = vld [vmem:[%s14186_s11 + $0x3a0] sm:$0xff]  ;;  %v14744_v3 = vpack.c.bf16 %v1371_v40, %v1339_v15  ;;  %v1338_v34 = vmul.f32 %v1210_v52, %v1082_v10  ;;  %v1084_v6 = vld [vmem:[%s14183_s26 + $0x2b0] sm:$0xff] }
  0xc0   : > { %v1632_v38 = vld [vmem:[%s14189_s10 + $0x3b8] sm:$0xff]  ;;  %2708 = vmatprep.mubr.f32.mxu1 %v17473_v35  ;;  %13100 = vmatpush1.bf16.msra.mxu0 %v13099_v61  ;;  %1469 = vst [vmem:[%s14204_s23 + $0x2b8] sm:$0xff] %v1341_v42  ;;  %v1728_v19 = vadd.f32 %v1600_v30, %v1341_v42  ;;  %v1370_v47 = vmul.f32 %v1242_v27, %v1114_v44  ;;  %v1597_v54 = vld [vmem:[%s14189_s10 + $0x2a0] sm:$0xff]  ;;  %v1116_v40 = vld [vmem:[%s14183_s26 + $0x3b0] sm:$0xff] }
  0xc1   : > { %17476 = vst [vmem:[#allocation72_spill] sm:$0xff] %v14744_v3  ;;  %1501 = vst [vmem:[%s14204_s23 + $0x3b8] sm:$0xff] %v1373_v41  ;;  %v1760_v16 = vadd.f32 %v1632_v38, %v1373_v41  ;;  %v1629_v24 = vld [vmem:[%s14189_s10 + $0x3a0] sm:$0xff]  ;;  %12718 = vmatmul.mubr.msk.f32.gmra.mrb[20].mxu0 %vm1780_vm1, %v14726_v14  ;;  %v13093_v15 = vpack.c.bf16 %v1758_v53, %v1726_v17  ;;  %v1212_v60 = vld [vmem:[%s14186_s11 + $0x2b0] sm:$0xff]  ;;  %v14756_v30 = vpack.c.bf16 %v1373_v41, %v1341_v42 }
  0xc2   : > { %v1244_v61 = vld [vmem:[%s14186_s11 + $0x3b0] sm:$0xff]  ;;  %1466 = vst [vmem:[%s14204_s23 + $0x2a0] sm:$0xff] %v1338_v34  ;;  %1498 = vst [vmem:[%s14204_s23 + $0x3a0] sm:$0xff] %v1370_v47  ;;  %v1725_v10 = vadd.f32 %v1597_v54, %v1338_v34  ;;  %v1757_v44 = vadd.f32 %v1629_v24, %v1370_v47  ;;  %v1340_v52 = vmul.f32 %v1212_v60, %v1084_v6  ;;  %2785 = vmatprep.mubr.f32.mxu0 %v17473_v35  ;;  %v1023_v17 = vld [vmem:[%s14183_s26 + $0xc8] sm:$0xff] }
  0xc3   : > { %17477 = vst [vmem:[#allocation73_spill] sm:$0xff] %v14756_v30  ;;  %v13101_v38 = vpack.c.bf16 %v1760_v16, %v1728_v19  ;;  %v1599_v27 = vld [vmem:[%s14189_s10 + $0x2b0] sm:$0xff]  ;;  %13094 = vmatprep.subr.bf16.mxu1 %v13093_v15  ;;  %v1372_v53 = vmul.f32 %v1244_v61, %v1116_v40  ;;  %v1055_v41 = vld [vmem:[%s14183_s26 + $0x1c8] sm:$0xff]  ;;  %v14767_v16 = vpack.c.bf16 %v1370_v47, %v1338_v34  ;;  %v1025_v40 = vld [vmem:[%s14183_s26 + $0xd8] sm:$0xff] }
  0xc4   : > { %v1631_v8 = vld [vmem:[%s14189_s10 + $0x3b0] sm:$0xff]  ;;  %v1151_v42 = vld [vmem:[%s14186_s11 + $0xc8] sm:$0xff]  ;;  %v13095_v54 = vpack.c.bf16 %v1757_v44, %v1725_v10  ;;  %1468 = vst [vmem:[%s14204_s23 + $0x2b0] sm:$0xff] %v1340_v52  ;;  %v1727_v24 = vadd.f32 %v1599_v27, %v1340_v52  ;;  %v1057_v3 = vld [vmem:[%s14183_s26 + $0x1d8] sm:$0xff] }
  0xc5   : > { %v1183_v19 = vld [vmem:[%s14186_s11 + $0x1c8] sm:$0xff]  ;;  %17478 = vst [vmem:[#allocation74_spill] sm:$0xff] %v14767_v16  ;;  %13102 = vmatprep.subr.bf16.mxu0 %v13101_v38  ;;  %v1279_v6 = vmul.f32 %v1151_v42, %v1023_v17  ;;  %1500 = vst [vmem:[%s14204_s23 + $0x3b0] sm:$0xff] %v1372_v53  ;;  %v1759_v61 = vadd.f32 %v1631_v8, %v1372_v53  ;;  %v1153_v34 = vld [vmem:[%s14186_s11 + $0xd8] sm:$0xff]  ;;  %v14777_v38 = vpack.c.bf16 %v1372_v53, %v1340_v52 }
  0xc6   : > { %v1311_v60 = vmul.f32 %v1183_v19, %v1055_v41  ;;  %v1538_v30 = vld [vmem:[%s14189_s10 + $0xc8] sm:$0xff]  ;;  %v1185_v47 = vld [vmem:[%s14186_s11 + $0x1d8] sm:$0xff]  ;;  %13096 = vmatpush1.bf16.msra.mxu1 %v13095_v54  ;;  %v1281_v27 = vmul.f32 %v1153_v34, %v1025_v40  ;;  %v1022_v42 = vld [vmem:[%s14183_s26 + $0xc0] sm:$0xff] }
  0xc7   : > { %v1570_v15 = vld [vmem:[%s14189_s10 + $0x1c8] sm:$0xff]  ;;  %17479 = vst [vmem:[#allocation75_spill] sm:$0xff] %v14777_v38  ;;  %1407 = vst [vmem:[%s14204_s23 + $0xc8] sm:$0xff] %v1279_v6  ;;  %v1666_v10 = vadd.f32 %v1538_v30, %v1279_v6  ;;  %v1313_v17 = vmul.f32 %v1185_v47, %v1057_v3  ;;  %v1540_v8 = vld [vmem:[%s14189_s10 + $0xd8] sm:$0xff]  ;;  %v13103_v19 = vpack.c.bf16 %v1759_v61, %v1727_v24 }
  0xc8   : > { %1439 = vst [vmem:[%s14204_s23 + $0x1c8] sm:$0xff] %v1311_v60  ;;  %v1698_v44 = vadd.f32 %v1570_v15, %v1311_v60  ;;  %v1572_v41 = vld [vmem:[%s14189_s10 + $0x1d8] sm:$0xff]  ;;  %v1054_v16 = vld [vmem:[%s14183_s26 + $0x1c0] sm:$0xff]  ;;  %v14787_v54 = vpack.c.bf16 %v1311_v60, %v1279_v6  ;;  %1409 = vst [vmem:[%s14204_s23 + $0xd8] sm:$0xff] %v1281_v27  ;;  %v1668_v30 = vadd.f32 %v1540_v8, %v1281_v27 }
  0xc9   : > { %v1150_v52 = vld [vmem:[%s14186_s11 + $0xc0] sm:$0xff]  ;;  %1441 = vst [vmem:[%s14204_s23 + $0x1d8] sm:$0xff] %v1313_v17  ;;  %v1700_v3 = vadd.f32 %v1572_v41, %v1313_v17  ;;  %v1024_v24 = vld [vmem:[%s14183_s26 + $0xd0] sm:$0xff]  ;;  %13104 = vmatpush1.bf16.msra.mxu0 %v13103_v19  ;;  %12719 = vmatmul.mubr.msk.f32.vlgmr.msra.gmra.mrb[20].mxu1 %vm1780_vm1, %v14697_v63 }
  0xca   : > { %v1182_v53 = vld [vmem:[%s14186_s11 + $0x1c0] sm:$0xff]  ;;  %17480 = vst [vmem:[#allocation76_spill] sm:$0xff] %v14787_v54  ;;  %v13105_v38 = vpack.c.bf16 %v1698_v44, %v1666_v10  ;;  %v1278_v15 = vmul.f32 %v1150_v52, %v1022_v42  ;;  %v1056_v60 = vld [vmem:[%s14183_s26 + $0x1d0] sm:$0xff]  ;;  %v14799_v10 = vpack.c.bf16 %v1313_v17, %v1281_v27  ;;  %2714 = vmatprep.mubr.f32.mxu1 %v17473_v35  ;;  %v1119_v27 = vld [vmem:[%s14183_s26 + $0x3c8] sm:$0xff] }
  0xcb   : > { %v1537_v40 = vld [vmem:[%s14189_s10 + $0xc0] sm:$0xff]  ;;  %v1310_v6 = vmul.f32 %v1182_v53, %v1054_v16  ;;  %v1152_v61 = vld [vmem:[%s14186_s11 + $0xd0] sm:$0xff]  ;;  %v13113_v44 = vpack.c.bf16 %v1700_v3, %v1668_v30  ;;  %v1087_v16 = vld [vmem:[%s14183_s26 + $0x2c8] sm:$0xff] }
  0xcc   : > { %v1569_v34 = vld [vmem:[%s14189_s10 + $0x1c0] sm:$0xff]  ;;  %v1184_v47 = vld [vmem:[%s14186_s11 + $0x1d0] sm:$0xff]  ;;  %17481 = vst [vmem:[#allocation77_spill] sm:$0xff] %v14799_v10  ;;  %13106 = vmatprep.subr.bf16.mxu1 %v13105_v38  ;;  %1406 = vst [vmem:[%s14204_s23 + $0xc0] sm:$0xff] %v1278_v15  ;;  %v1665_v8 = vadd.f32 %v1537_v40, %v1278_v15  ;;  %v1280_v41 = vmul.f32 %v1152_v61, %v1024_v24  ;;  %12721 = vmatmul.mubr.msk.f32.vlgmr.msra.gmra.mrb[22].mxu0 %vm1780_vm1, %v14697_v63 }
  0xcd   : > { %v1312_v42 = vmul.f32 %v1184_v47, %v1056_v60  ;;  %v1539_v19 = vld [vmem:[%s14189_s10 + $0xd0] sm:$0xff]  ;;  %1438 = vst [vmem:[%s14204_s23 + $0x1c0] sm:$0xff] %v1310_v6  ;;  %v1697_v53 = vadd.f32 %v1569_v34, %v1310_v6  ;;  %v1215_v17 = vld [vmem:[%s14186_s11 + $0x2c8] sm:$0xff]  ;;  %v14810_v30 = vpack.c.bf16 %v1310_v6, %v1278_v15  ;;  %13114 = vmatprep.subr.bf16.mxu0 %v13113_v44  ;;  %v1089_v61 = vld [vmem:[%s14183_s26 + $0x2d8] sm:$0xff] }
  0xce   : > { %v1571_v52 = vld [vmem:[%s14189_s10 + $0x1d0] sm:$0xff]  ;;  %v1247_v38 = vld [vmem:[%s14186_s11 + $0x3c8] sm:$0xff]  ;;  %1408 = vst [vmem:[%s14204_s23 + $0xd0] sm:$0xff] %v1280_v41  ;;  %v1667_v3 = vadd.f32 %v1539_v19, %v1280_v41  ;;  %v1343_v34 = vmul.f32 %v1215_v17, %v1087_v16  ;;  %2791 = vmatprep.mubr.f32.mxu0 %v17473_v35  ;;  %12720 = vmatmul.mubr.msk.f32.gmra.mrb[22].mxu1 %vm1780_vm1, %v14726_v14  ;;  %v1121_v47 = vld [vmem:[%s14183_s26 + $0x3d8] sm:$0xff] }
  0xcf   : > { %17482 = vst [vmem:[#allocation78_spill] sm:$0xff] %v14810_v30  ;;  %1440 = vst [vmem:[%s14204_s23 + $0x1d0] sm:$0xff] %v1312_v42  ;;  %v1699_v40 = vadd.f32 %v1571_v52, %v1312_v42  ;;  %v1602_v24 = vld [vmem:[%s14189_s10 + $0x2c8] sm:$0xff]  ;;  %v13107_v15 = vpack.c.bf16 %v1697_v53, %v1665_v8  ;;  %v1375_v6 = vmul.f32 %v1247_v38, %v1119_v27  ;;  %v1217_v44 = vld [vmem:[%s14186_s11 + $0x2d8] sm:$0xff]  ;;  %2862 = vmatprep.mubr.f32.mxu1 %v17473_v35 }
  0xd0   : > { %v1634_v60 = vld [vmem:[%s14189_s10 + $0x3c8] sm:$0xff]  ;;  %v1249_v19 = vld [vmem:[%s14186_s11 + $0x3d8] sm:$0xff]  ;;  %v14825_v52 = vpack.c.bf16 %v1312_v42, %v1280_v41  ;;  %1471 = vst [vmem:[%s14204_s23 + $0x2c8] sm:$0xff] %v1343_v34  ;;  %v1730_v17 = vadd.f32 %v1602_v24, %v1343_v34  ;;  %v1345_v8 = vmul.f32 %v1217_v44, %v1089_v61  ;;  %v1086_v54 = vld [vmem:[%s14183_s26 + $0x2c0] sm:$0xff]  ;;  %12722 = vmatmul.mubr.msk.f32.gmra.mrb[24].mxu0 %vm1780_vm1, %v14726_v14 }
  0xd1   : > { %v13115_v16 = vpack.c.bf16 %v1699_v40, %v1667_v3  ;;  %v1377_v53 = vmul.f32 %v1249_v19, %v1121_v47  ;;  %v1604_v10 = vld [vmem:[%s14189_s10 + $0x2d8] sm:$0xff]  ;;  %13108 = vmatpush1.bf16.msra.mxu1 %v13107_v15  ;;  %1503 = vst [vmem:[%s14204_s23 + $0x3c8] sm:$0xff] %v1375_v6  ;;  %v1762_v27 = vadd.f32 %v1634_v60, %v1375_v6  ;;  %v1118_v41 = vld [vmem:[%s14183_s26 + $0x3c0] sm:$0xff]  ;;  %v1088_v44 = vld [vmem:[%s14183_s26 + $0x2d0] sm:$0xff] }
  0xd2   : > { %17483 = vst [vmem:[#allocation79_spill] sm:$0xff] %v14825_v52  ;;  %v1636_v30 = vld [vmem:[%s14189_s10 + $0x3d8] sm:$0xff]  ;;  %v1214_v42 = vld [vmem:[%s14186_s11 + $0x2c0] sm:$0xff]  ;;  %v14836_v3 = vpack.c.bf16 %v1375_v6, %v1343_v34  ;;  %1473 = vst [vmem:[%s14204_s23 + $0x2d8] sm:$0xff] %v1345_v8  ;;  %v1732_v40 = vadd.f32 %v1604_v10, %v1345_v8  ;;  %2939 = vmatprep.mubr.f32.mxu0 %v17473_v35 }
  0xd3   : > { %v1246_v38 = vld [vmem:[%s14186_s11 + $0x3c0] sm:$0xff]  ;;  %13116 = vmatpush1.bf16.msra.mxu0 %v13115_v16  ;;  %1505 = vst [vmem:[%s14204_s23 + $0x3d8] sm:$0xff] %v1377_v53  ;;  %v1764_v24 = vadd.f32 %v1636_v30, %v1377_v53  ;;  %v1342_v61 = vmul.f32 %v1214_v42, %v1086_v54  ;;  %v13109_v34 = vpack.c.bf16 %v1762_v27, %v1730_v17  ;;  %v1120_v6 = vld [vmem:[%s14183_s26 + $0x3d0] sm:$0xff]  ;;  %v1027_v17 = vld [vmem:[%s14183_s26 + $0xe8] sm:$0xff] }
  0xd4   : > { %17484 = vst [vmem:[#allocation80_spill] sm:$0xff] %v14836_v3  ;;  %v1374_v15 = vmul.f32 %v1246_v38, %v1118_v41  ;;  %v1601_v47 = vld [vmem:[%s14189_s10 + $0x2c0] sm:$0xff]  ;;  %v1216_v19 = vld [vmem:[%s14186_s11 + $0x2d0] sm:$0xff]  ;;  %v14848_v10 = vpack.c.bf16 %v1377_v53, %v1345_v8  ;;  %v1059_v8 = vld [vmem:[%s14183_s26 + $0x1e8] sm:$0xff] }
  0xd5   : > { %v1633_v60 = vld [vmem:[%s14189_s10 + $0x3c0] sm:$0xff]  ;;  %v1248_v16 = vld [vmem:[%s14186_s11 + $0x3d0] sm:$0xff]  ;;  %v13117_v54 = vpack.c.bf16 %v1764_v24, %v1732_v40  ;;  %1470 = vst [vmem:[%s14204_s23 + $0x2c0] sm:$0xff] %v1342_v61  ;;  %v1729_v30 = vadd.f32 %v1601_v47, %v1342_v61  ;;  %v1344_v42 = vmul.f32 %v1216_v19, %v1088_v44  ;;  %13110 = vmatprep.subr.bf16.mxu1 %v13109_v34  ;;  %v1155_v53 = vld [vmem:[%s14186_s11 + $0xe8] sm:$0xff] }
  0xd6   : > { %17485 = vst [vmem:[#allocation81_spill] sm:$0xff] %v14848_v10  ;;  %1502 = vst [vmem:[%s14204_s23 + $0x3c0] sm:$0xff] %v1374_v15  ;;  %v1761_v41 = vadd.f32 %v1633_v60, %v1374_v15  ;;  %v1603_v38 = vld [vmem:[%s14189_s10 + $0x2d0] sm:$0xff]  ;;  %v1376_v27 = vmul.f32 %v1248_v16, %v1120_v6  ;;  %v1187_v40 = vld [vmem:[%s14186_s11 + $0x1e8] sm:$0xff]  ;;  %v14859_v24 = vpack.c.bf16 %v1374_v15, %v1342_v61 }
  0xd7   : > { %v1635_v52 = vld [vmem:[%s14189_s10 + $0x3d0] sm:$0xff]  ;;  %13118 = vmatprep.subr.bf16.mxu0 %v13117_v54  ;;  %1472 = vst [vmem:[%s14204_s23 + $0x2d0] sm:$0xff] %v1344_v42  ;;  %v1731_v60 = vadd.f32 %v1603_v38, %v1344_v42  ;;  %v1283_v44 = vmul.f32 %v1155_v53, %v1027_v17  ;;  %v1315_v19 = vmul.f32 %v1187_v40, %v1059_v8  ;;  %v1542_v10 = vld [vmem:[%s14189_s10 + $0xe8] sm:$0xff]  ;;  %v1029_v6 = vld [vmem:[%s14183_s26 + $0xf8] sm:$0xff] }
  0xd8   : > { %17486 = vst [vmem:[#allocation82_spill] sm:$0xff] %v14859_v24  ;;  %v13111_v47 = vpack.c.bf16 %v1761_v41, %v1729_v30  ;;  %v1574_v34 = vld [vmem:[%s14189_s10 + $0x1e8] sm:$0xff]  ;;  %1504 = vst [vmem:[%s14204_s23 + $0x3d0] sm:$0xff] %v1376_v27  ;;  %v1763_v16 = vadd.f32 %v1635_v52, %v1376_v27  ;;  %v1061_v3 = vld [vmem:[%s14183_s26 + $0x1f8] sm:$0xff]  ;;  %v14869_v54 = vpack.c.bf16 %v1376_v27, %v1344_v42 }
  0xd9   : > { %v1157_v61 = vld [vmem:[%s14186_s11 + $0xf8] sm:$0xff]  ;;  %1411 = vst [vmem:[%s14204_s23 + $0xe8] sm:$0xff] %v1283_v44  ;;  %1443 = vst [vmem:[%s14204_s23 + $0x1e8] sm:$0xff] %v1315_v19  ;;  %v1670_v30 = vadd.f32 %v1542_v10, %v1283_v44  ;;  %v1702_v41 = vadd.f32 %v1574_v34, %v1315_v19  ;;  %v1026_v53 = vld [vmem:[%s14183_s26 + $0xe0] sm:$0xff] }
  0xda   : > { %v1189_v15 = vld [vmem:[%s14186_s11 + $0x1f8] sm:$0xff]  ;;  %17487 = vst [vmem:[#allocation83_spill] sm:$0xff] %v14869_v54  ;;  %13112 = vmatpush1.bf16.msra.mxu1 %v13111_v47  ;;  %v1285_v38 = vmul.f32 %v1157_v61, %v1029_v6  ;;  %v13119_v40 = vpack.c.bf16 %v1763_v16, %v1731_v60  ;;  %v1058_v24 = vld [vmem:[%s14183_s26 + $0x1e0] sm:$0xff]  ;;  %v14879_v47 = vpack.c.bf16 %v1315_v19, %v1283_v44  ;;  %v1028_v60 = vld [vmem:[%s14183_s26 + $0xf0] sm:$0xff] }
  0xdb   : > { %v1317_v17 = vmul.f32 %v1189_v15, %v1061_v3  ;;  %v1544_v52 = vld [vmem:[%s14189_s10 + $0xf8] sm:$0xff]  ;;  %v1154_v42 = vld [vmem:[%s14186_s11 + $0xe0] sm:$0xff]  ;;  %v13121_v54 = vpack.c.bf16 %v1702_v41, %v1670_v30  ;;  %v1060_v19 = vld [vmem:[%s14183_s26 + $0x1f0] sm:$0xff] }
  0xdc   : > { %v1576_v8 = vld [vmem:[%s14189_s10 + $0x1f8] sm:$0xff]  ;;  %v1186_v27 = vld [vmem:[%s14186_s11 + $0x1e0] sm:$0xff]  ;;  %17488 = vst [vmem:[#allocation84_spill] sm:$0xff] %v14879_v47  ;;  %1413 = vst [vmem:[%s14204_s23 + $0xf8] sm:$0xff] %v1285_v38  ;;  %v1672_v10 = vadd.f32 %v1544_v52, %v1285_v38  ;;  %v1282_v34 = vmul.f32 %v1154_v42, %v1026_v53  ;;  %13120 = vmatpush1.bf16.msra.mxu0 %v13119_v40 }
  0xdd   : > { %1445 = vst [vmem:[%s14204_s23 + $0x1f8] sm:$0xff] %v1317_v17  ;;  %v1704_v3 = vadd.f32 %v1576_v8, %v1317_v17  ;;  %v1541_v6 = vld [vmem:[%s14189_s10 + $0xe0] sm:$0xff]  ;;  %12723 = vmatmul.mubr.msk.f32.vlgmr.msra.gmra.mrb[24].mxu1 %vm1780_vm1, %v14697_v63  ;;  %v1314_v44 = vmul.f32 %v1186_v27, %v1058_v24  ;;  %v1156_v16 = vld [vmem:[%s14186_s11 + $0xf0] sm:$0xff]  ;;  %v14891_v30 = vpack.c.bf16 %v1317_v17, %v1285_v38  ;;  %v1091_v24 = vld [vmem:[%s14183_s26 + $0x2e8] sm:$0xff] }
  0xde   : > { %v1573_v61 = vld [vmem:[%s14189_s10 + $0x1e0] sm:$0xff]  ;;  %v1188_v15 = vld [vmem:[%s14186_s11 + $0x1f0] sm:$0xff]  ;;  %13122 = vmatprep.subr.bf16.mxu1 %v13121_v54  ;;  %1410 = vst [vmem:[%s14204_s23 + $0xe0] sm:$0xff] %v1282_v34  ;;  %v1669_v52 = vadd.f32 %v1541_v6, %v1282_v34  ;;  %v1284_v8 = vmul.f32 %v1156_v16, %v1028_v60  ;;  %2868 = vmatprep.mubr.f32.mxu1 %v17473_v35  ;;  %v1123_v38 = vld [vmem:[%s14183_s26 + $0x3e8] sm:$0xff] }
  0xdf   : > { %17489 = vst [vmem:[#allocation85_spill] sm:$0xff] %v14891_v30  ;;  %v13129_v41 = vpack.c.bf16 %v1704_v3, %v1672_v10  ;;  %v1316_v53 = vmul.f32 %v1188_v15, %v1060_v19  ;;  %v1543_v40 = vld [vmem:[%s14189_s10 + $0xf0] sm:$0xff]  ;;  %1442 = vst [vmem:[%s14204_s23 + $0x1e0] sm:$0xff] %v1314_v44  ;;  %v1701_v27 = vadd.f32 %v1573_v61, %v1314_v44  ;;  %v1219_v17 = vld [vmem:[%s14186_s11 + $0x2e8] sm:$0xff]  ;;  %12725 = vmatmul.mubr.msk.f32.vlgmr.msra.gmra.mrb[26].mxu0 %vm1780_vm1, %v14697_v63 }
  0xe0   : > { %v1575_v42 = vld [vmem:[%s14189_s10 + $0x1f0] sm:$0xff]  ;;  %v1251_v54 = vld [vmem:[%s14186_s11 + $0x3e8] sm:$0xff]  ;;  %v14902_v10 = vpack.c.bf16 %v1314_v44, %v1282_v34  ;;  %1412 = vst [vmem:[%s14204_s23 + $0xf0] sm:$0xff] %v1284_v8  ;;  %v1671_v3 = vadd.f32 %v1543_v40, %v1284_v8  ;;  %v1347_v61 = vmul.f32 %v1219_v17, %v1091_v24  ;;  %v1093_v16 = vld [vmem:[%s14183_s26 + $0x2f8] sm:$0xff]  ;;  %2945 = vmatprep.mubr.f32.mxu0 %v17473_v35 }
  0xe1   : > { %13130 = vmatprep.subr.bf16.mxu0 %v13129_v41  ;;  %1444 = vst [vmem:[%s14204_s23 + $0x1f0] sm:$0xff] %v1316_v53  ;;  %v1703_v6 = vadd.f32 %v1575_v42, %v1316_v53  ;;  %v1606_v60 = vld [vmem:[%s14189_s10 + $0x2e8] sm:$0xff]  ;;  %v13123_v34 = vpack.c.bf16 %v1701_v27, %v1669_v52  ;;  %12724 = vmatmul.mubr.msk.f32.gmra.mrb[26].mxu1 %vm1780_vm1, %v14726_v14  ;;  %v1125_v15 = vld [vmem:[%s14183_s26 + $0x3f8] sm:$0xff]  ;;  %v1090_v47 = vld [vmem:[%s14183_s26 + $0x2e0] sm:$0xff] }
  0xe2   : > { %17490 = vst [vmem:[#allocation86_spill] sm:$0xff] %v14902_v10  ;;  %v1638_v19 = vld [vmem:[%s14189_s10 + $0x3e8] sm:$0xff]  ;;  %v1379_v44 = vmul.f32 %v1251_v54, %v1123_v38  ;;  %v1221_v41 = vld [vmem:[%s14186_s11 + $0x2f8] sm:$0xff]  ;;  %v14917_v42 = vpack.c.bf16 %v1316_v53, %v1284_v8  ;;  %1475 = vst [vmem:[%s14204_s23 + $0x2e8] sm:$0xff] %v1347_v61  ;;  %v1734_v17 = vadd.f32 %v1606_v60, %v1347_v61  ;;  %3016 = vmatprep.mubr.f32.mxu1 %v17473_v35 }
  0xe3   : > { %v1253_v40 = vld [vmem:[%s14186_s11 + $0x3f8] sm:$0xff]  ;;  %v13131_v24 = vpack.c.bf16 %v1703_v6, %v1671_v3  ;;  %v1349_v52 = vmul.f32 %v1221_v41, %v1093_v16  ;;  %13124 = vmatpush1.bf16.msra.mxu1 %v13123_v34  ;;  %v1122_v8 = vld [vmem:[%s14183_s26 + $0x3e0] sm:$0xff]  ;;  %v1092_v41 = vld [vmem:[%s14183_s26 + $0x2f0] sm:$0xff]  ;;  %12726 = vmatmul.mubr.msk.f32.gmra.mrb[28].mxu0 %vm1780_vm1, %v14726_v14 }
  0xe4   : > { %17491 = vst [vmem:[#allocation87_spill] sm:$0xff] %v14917_v42  ;;  %v1381_v27 = vmul.f32 %v1253_v40, %v1125_v15  ;;  %v1608_v30 = vld [vmem:[%s14189_s10 + $0x2f8] sm:$0xff]  ;;  %1507 = vst [vmem:[%s14204_s23 + $0x3e8] sm:$0xff] %v1379_v44  ;;  %v1766_v38 = vadd.f32 %v1638_v19, %v1379_v44  ;;  %v1218_v53 = vld [vmem:[%s14186_s11 + $0x2e0] sm:$0xff]  ;;  %v14928_v3 = vpack.c.bf16 %v1379_v44, %v1347_v61  ;;  %3093 = vmatprep.mubr.f32.mxu0 %v17473_v35 }
  0xe5   : > { %v1640_v10 = vld [vmem:[%s14189_s10 + $0x3f8] sm:$0xff]  ;;  %v1250_v54 = vld [vmem:[%s14186_s11 + $0x3e0] sm:$0xff]  ;;  %13132 = vmatpush1.bf16.msra.mxu0 %v13131_v24  ;;  %1477 = vst [vmem:[%s14204_s23 + $0x2f8] sm:$0xff] %v1349_v52  ;;  %v1736_v6 = vadd.f32 %v1608_v30, %v1349_v52  ;;  %v1346_v16 = vmul.f32 %v1218_v53, %v1090_v47  ;;  %v1124_v44 = vld [vmem:[%s14183_s26 + $0x3f0] sm:$0xff]  ;;  %s17730_s26 = sld [smem:[#allocation16_spill]] }
  0xe6   : > { %17492 = vst [vmem:[#allocation88_spill] sm:$0xff] %v14928_v3  ;;  %1509 = vst [vmem:[%s14204_s23 + $0x3f8] sm:$0xff] %v1381_v27  ;;  %v1768_v60 = vadd.f32 %v1640_v10, %v1381_v27  ;;  %v1378_v34 = vmul.f32 %v1250_v54, %v1122_v8  ;;  %v1605_v19 = vld [vmem:[%s14189_s10 + $0x2e0] sm:$0xff]  ;;  %v13125_v61 = vpack.c.bf16 %v1766_v38, %v1734_v17  ;;  %v1220_v40 = vld [vmem:[%s14186_s11 + $0x2f0] sm:$0xff] }
  0xe7   : > { %v1637_v15 = vld [vmem:[%s14189_s10 + $0x3e0] sm:$0xff]  ;;  %v1252_v24 = vld [vmem:[%s14186_s11 + $0x3f0] sm:$0xff]  ;;  %1474 = vst [vmem:[%s14204_s23 + $0x2e0] sm:$0xff] %v1346_v16  ;;  %v1733_v30 = vadd.f32 %v1605_v19, %v1346_v16  ;;  %v1348_v10 = vmul.f32 %v1220_v40, %v1092_v41  ;;  %v14948_v38 = vpack.c.bf16 %v1381_v27, %v1349_v52  ;;  %v17497_v52 = vld [vmem:[#allocation65_spill] sm:$0xff]  ;;  %s17728_s11 = sld [smem:[#allocation14_spill]] }
  0xe8   : > { %v13133_v42 = vpack.c.bf16 %v1768_v60, %v1736_v6  ;;  %1506 = vst [vmem:[%s14204_s23 + $0x3e0] sm:$0xff] %v1378_v34  ;;  %v1765_v47 = vadd.f32 %v1637_v15, %v1378_v34  ;;  %v1607_v8 = vld [vmem:[%s14189_s10 + $0x2f0] sm:$0xff]  ;;  %v1856_v54 = vld [vmem:[%s17421_s8] sm:$0xff]  ;;  %13126 = vmatprep.subr.bf16.mxu1 %v13125_v61  ;;  %v1380_v3 = vmul.f32 %v1252_v24, %v1124_v44  ;;  %v17498_v27 = vld [vmem:[#allocation67_spill] sm:$0xff] }
  0xe9   : > { %v1639_v53 = vld [vmem:[%s14189_s10 + $0x3f0] sm:$0xff]  ;;  %1860 = vperm.xlu0 %13561, %v1856_v54   ;;  %v14946_v17 = vpack.c.bf16 %v1378_v34, %v1346_v16  ;;  %17494 = vst [vmem:[#allocation90_spill] sm:$0xff] %v14948_v38  ;;  %1476 = vst [vmem:[%s14204_s23 + $0x2f0] sm:$0xff] %v1348_v10  ;;  %v1735_v60 = vadd.f32 %v1607_v8, %v1348_v10  ;;  %v17501_v34 = vld [vmem:[#allocation69_spill] sm:$0xff]  ;;  %s17727_s10 = sld [smem:[#allocation15_spill]] }
  0xea   : > { %13134 = vmatprep.subr.bf16.mxu0 %v13133_v42  ;;  %v13127_v6 = vpack.c.bf16 %v1765_v47, %v1733_v30  ;;  %1508 = vst [vmem:[%s14204_s23 + $0x3f0] sm:$0xff] %v1380_v3  ;;  %v1767_v19 = vadd.f32 %v1639_v53, %v1380_v3  ;;  %v14952_v15 = vpack.c.bf16 %v1380_v3, %v1348_v10  ;;  %v14969_v42 = vld [vmem:[%s14013_s14] sm:$0xff]  ;;  %v17500_v16 = vld [vmem:[#allocation72_spill] sm:$0xff]  ;;  %v17502_v61 = vld [vmem:[#allocation71_spill] sm:$0xff] }
  0xeb   : > { %17493 = vst [vmem:[#allocation89_spill] sm:$0xff] %v14946_v17  ;;  %v17499_v3 = vld [vmem:[#allocation70_spill] sm:$0xff]  ;;  %v17504_v40 = vld [vmem:[#allocation76_spill] sm:$0xff]  ;;  %v17505_v24 = vld [vmem:[#allocation73_spill] sm:$0xff] }
  0xec   : > { %17495 = vst [vmem:[#allocation91_spill] sm:$0xff] %v14952_v15  ;;  %13128 = vmatpush1.bf16.msra.mxu1 %v13127_v6  ;;  %v13135_v41 = vpack.c.bf16 %v1767_v19, %v1735_v60  ;;  %v17503_v44 = vld [vmem:[#allocation74_spill] sm:$0xff]  ;;  %v17506_v30 = vld [vmem:[#allocation75_spill] sm:$0xff]  ;;  %v17508_v10 = vld [vmem:[#allocation80_spill] sm:$0xff] }
  0xed   : > { %13138 = vmatprep.subr.bf16.mxu1 %v14257_v2  ;;  %v17507_v47 = vld [vmem:[#allocation78_spill] sm:$0xff]  ;;  %v17509_v8 = vld [vmem:[#allocation77_spill] sm:$0xff]  ;;  %v17510_v53 = vld [vmem:[#allocation79_spill] sm:$0xff] }
  0xee   : > { %13136 = vmatpush1.bf16.msra.mxu0 %v13135_v41  ;;  %v17511_v54 = vld [vmem:[#allocation82_spill] sm:$0xff]  ;;  %v17512_v6 = vld [vmem:[#allocation84_spill] sm:$0xff]  ;;  %v17513_v60 = vld [vmem:[#allocation81_spill] sm:$0xff] }
  0xef   : > { %12727 = vmatmul.mubr.msk.f32.vlgmr.msra.gmra.mrb[28].mxu1 %vm1780_vm1, %v14697_v63  ;;  %13146 = vmatprep.subr.bf16.mxu0 %v14281_v32  ;;  %v17514_v19 = vld [vmem:[#allocation83_spill] sm:$0xff]  ;;  %v17515_v41 = vld [vmem:[#allocation86_spill] sm:$0xff] }
  0xf0   : > { %13140 = vmatpush1.bf16.msra.mxu1 %v14259_v4  ;;  %3022 = vmatprep.mubr.f32.mxu1 %v17473_v35 }
  0xf1   : > { %13142 = vmatprep.subr.bf16.mxu1 %v14269_v18  ;;  %12729 = vmatmul.mubr.msk.f32.vlgmr.msra.gmra.mrb[30].mxu0 %vm1780_vm1, %v14697_v63  ;;  %v14982_v63 = vld [vmem:[%s14013_s14 + $0x8] sm:$0xff] }
  0xf2   : > { %13148 = vmatpush1.bf16.msra.mxu0 %v14283_v33  ;;  %3099 = vmatprep.mubr.f32.mxu0 %v17473_v35 }
  0xf3   : > { %12728 = vmatmul.mubr.msk.f32.gmra.mrb[30].mxu1 %vm1780_vm1, %v14726_v14  ;;  %13150 = vmatprep.subr.bf16.mxu0 %v14306_v56 }
  0xf4   : > { %13144 = vmatpush1.bf16.msra.mxu1 %v14293_v43  ;;  %3190 = vmatprep.mubr.f32.mxu1 %v17473_v35 }
  0xf5   : > { %13154 = vmatprep.subr.bf16.mxu1 %v14318_v9  ;;  %12730 = vmatmul.mubr.msk.f32.gmra.mrb[32].mxu0 %vm1780_vm1, %v14726_v14  ;;  %v17496_v14 = vld [vmem:[#allocation68_spill] sm:$0xff] }
  0xf6   : > { %13152 = vmatpush1.bf16.msra.mxu0 %v14308_v57  ;;  %3267 = vmatprep.mubr.f32.mxu0 %v17473_v35 }
  0xf7   : > { %12731 = vmatmul.mubr.msk.f32.vlgmr.msra.gmra.mrb[32].mxu1 %vm1780_vm1, %v14969_v42  ;;  %13162 = vmatprep.subr.bf16.mxu0 %v14333_v23 }
  0xf8   : > { %13156 = vmatpush1.bf16.msra.mxu1 %v14346_v39  ;;  %3196 = vmatprep.mubr.f32.mxu1 %v17473_v35 }
  0xf9   : > { %13158 = vmatprep.subr.bf16.mxu1 %v14372_v1  ;;  %12733 = vmatmul.mubr.msk.f32.vlgmr.msra.gmra.mrb[34].mxu0 %vm1780_vm1, %v14969_v42 }
  0xfa   : > { %13164 = vmatpush1.bf16.msra.mxu0 %v14359_v51  ;;  %3273 = vmatprep.mubr.f32.mxu0 %v17473_v35 }
  0xfb   : > { %12732 = vmatmul.mubr.msk.f32.gmra.mrb[34].mxu1 %vm1780_vm1, %v14982_v63  ;;  %13166 = vmatprep.subr.bf16.mxu0 %v14383_v20 }
  0xfc   : > { %13160 = vmatpush1.bf16.msra.mxu1 %v14393_v37  ;;  %3344 = vmatprep.mubr.f32.mxu1 %v17473_v35 }
  0xfd   : > { %13170 = vmatprep.subr.bf16.mxu1 %v14413_v5  ;;  %12734 = vmatmul.mubr.msk.f32.gmra.mrb[36].mxu0 %vm1780_vm1, %v14982_v63 }
  0xfe   : > { %13168 = vmatpush1.bf16.msra.mxu0 %v14403_v50  ;;  %3421 = vmatprep.mubr.f32.mxu0 %v17473_v35 }
  0xff   : > { %12735 = vmatmul.mubr.msk.f32.vlgmr.msra.gmra.mrb[36].mxu1 %vm1780_vm1, %v14969_v42  ;;  %13178 = vmatprep.subr.bf16.mxu0 %v14425_v22 }
 0x100   : > { %13172 = vmatpush1.bf16.msra.mxu1 %v14436_v25  ;;  %3350 = vmatprep.mubr.f32.mxu1 %v17473_v35 }
 0x101   : > { %13174 = vmatprep.subr.bf16.mxu1 %v14462_v12  ;;  %12737 = vmatmul.mubr.msk.f32.vlgmr.msra.gmra.mrb[38].mxu0 %vm1780_vm1, %v14969_v42 }
 0x102   : > { %13180 = vmatpush1.bf16.msra.mxu0 %v14451_v55  ;;  %3427 = vmatprep.mubr.f32.mxu0 %v17473_v35 }
 0x103   : > { %12736 = vmatmul.mubr.msk.f32.gmra.mrb[38].mxu1 %vm1780_vm1, %v14982_v63  ;;  %13182 = vmatprep.subr.bf16.mxu0 %v14474_v31 }
 0x104   : > { %13176 = vmatpush1.bf16.msra.mxu1 %v14485_v48  ;;  %3498 = vmatprep.mubr.f32.mxu1 %v17473_v35 }
 0x105   : > { %13186 = vmatprep.subr.bf16.mxu1 %v14505_v28  ;;  %12738 = vmatmul.mubr.msk.f32.gmra.mrb[40].mxu0 %vm1780_vm1, %v14982_v63 }
 0x106   : > { %13184 = vmatpush1.bf16.msra.mxu0 %v14495_v7  ;;  %3575 = vmatprep.mubr.f32.mxu0 %v17473_v35 }
 0x107   : > { %12739 = vmatmul.mubr.msk.f32.vlgmr.msra.gmra.mrb[40].mxu1 %vm1780_vm1, %v14969_v42  ;;  %13194 = vmatprep.subr.bf16.mxu0 %v14517_v45 }
 0x108   : > { %13188 = vmatpush1.bf16.msra.mxu1 %v14528_v0  ;;  %3504 = vmatprep.mubr.f32.mxu1 %v17473_v35 }
 0x109   : > { %13190 = vmatprep.subr.bf16.mxu1 %v14554_v49  ;;  %12741 = vmatmul.mubr.msk.f32.vlgmr.msra.gmra.mrb[42].mxu0 %vm1780_vm1, %v14969_v42 }
 0x10a   : > { %13196 = vmatpush1.bf16.msra.mxu0 %v14543_v29  ;;  %3581 = vmatprep.mubr.f32.mxu0 %v17473_v35 }
 0x10b   : > { %12740 = vmatmul.mubr.msk.f32.gmra.mrb[42].mxu1 %vm1780_vm1, %v14982_v63  ;;  %13198 = vmatprep.subr.bf16.mxu0 %v14566_v11 }
 0x10c   : > { %13192 = vmatpush1.bf16.msra.mxu1 %v14577_v36  ;;  %3652 = vmatprep.mubr.f32.mxu1 %v17473_v35 }
 0x10d   : > { %13202 = vmatprep.subr.bf16.mxu1 %v14597_v21  ;;  %12742 = vmatmul.mubr.msk.f32.gmra.mrb[44].mxu0 %vm1780_vm1, %v14982_v63 }
 0x10e   : > { %13200 = vmatpush1.bf16.msra.mxu0 %v14587_v59  ;;  %3729 = vmatprep.mubr.f32.mxu0 %v17473_v35 }
 0x10f   : > { %12743 = vmatmul.mubr.msk.f32.vlgmr.msra.gmra.mrb[44].mxu1 %vm1780_vm1, %v14969_v42  ;;  %13210 = vmatprep.subr.bf16.mxu0 %v14609_v46 }
 0x110   : > { %13204 = vmatpush1.bf16.msra.mxu1 %v14620_v13  ;;  %3658 = vmatprep.mubr.f32.mxu1 %v17473_v35 }
 0x111   : > { %13206 = vmatprep.subr.bf16.mxu1 %v14646_v62  ;;  %12745 = vmatmul.mubr.msk.f32.vlgmr.msra.gmra.mrb[46].mxu0 %vm1780_vm1, %v14969_v42 }
 0x112   : > { %13212 = vmatpush1.bf16.msra.mxu0 %v14635_v26  ;;  %3735 = vmatprep.mubr.f32.mxu0 %v17473_v35 }
 0x113   : > { %12744 = vmatmul.mubr.msk.f32.gmra.mrb[46].mxu1 %vm1780_vm1, %v14982_v63  ;;  %13214 = vmatprep.subr.bf16.mxu0 %v17497_v52 }
 0x114   : > { %13208 = vmatpush1.bf16.msra.mxu1 %v14669_v58  ;;  %3806 = vmatprep.mubr.f32.mxu1 %v17473_v35 }
 0x115   : > { %13218 = vmatprep.subr.bf16.mxu1 %v17496_v14  ;;  %12746 = vmatmul.mubr.msk.f32.gmra.mrb[48].mxu0 %vm1780_vm1, %v14982_v63 }
 0x116   : > { %13216 = vmatpush1.bf16.msra.mxu0 %v17498_v27  ;;  %3883 = vmatprep.mubr.f32.mxu0 %v17473_v35 }
 0x117   : > { %12747 = vmatmul.mubr.msk.f32.vlgmr.msra.gmra.mrb[48].mxu1 %vm1780_vm1, %v14969_v42  ;;  %13226 = vmatprep.subr.bf16.mxu0 %v17501_v34 }
 0x118   : > { %13220 = vmatpush1.bf16.msra.mxu1 %v17499_v3  ;;  %3812 = vmatprep.mubr.f32.mxu1 %v17473_v35 }
 0x119   : > { %13222 = vmatprep.subr.bf16.mxu1 %v17500_v16  ;;  %12749 = vmatmul.mubr.msk.f32.vlgmr.msra.gmra.mrb[50].mxu0 %vm1780_vm1, %v14969_v42 }
 0x11a   : > { %13228 = vmatpush1.bf16.msra.mxu0 %v17502_v61  ;;  %3889 = vmatprep.mubr.f32.mxu0 %v17473_v35 }
 0x11b   : > { %12748 = vmatmul.mubr.msk.f32.gmra.mrb[50].mxu1 %vm1780_vm1, %v14982_v63  ;;  %13230 = vmatprep.subr.bf16.mxu0 %v17505_v24 }
 0x11c   : > { %13224 = vmatpush1.bf16.msra.mxu1 %v17503_v44  ;;  %3960 = vmatprep.mubr.f32.mxu1 %v17473_v35 }
 0x11d   : > { %13234 = vmatprep.subr.bf16.mxu1 %v17504_v40  ;;  %12750 = vmatmul.mubr.msk.f32.gmra.mrb[52].mxu0 %vm1780_vm1, %v14982_v63 }
 0x11e   : > { %13232 = vmatpush1.bf16.msra.mxu0 %v17506_v30  ;;  %4037 = vmatprep.mubr.f32.mxu0 %v17473_v35 }
 0x11f   : > { %12751 = vmatmul.mubr.msk.f32.vlgmr.msra.gmra.mrb[52].mxu1 %vm1780_vm1, %v14969_v42  ;;  %13242 = vmatprep.subr.bf16.mxu0 %v17509_v8 }
 0x120   : > { %13236 = vmatpush1.bf16.msra.mxu1 %v17507_v47  ;;  %3966 = vmatprep.mubr.f32.mxu1 %v17473_v35 }
 0x121   : > { %13238 = vmatprep.subr.bf16.mxu1 %v17508_v10  ;;  %12753 = vmatmul.mubr.msk.f32.vlgmr.msra.gmra.mrb[54].mxu0 %vm1780_vm1, %v14969_v42  ;;  %v17518_v10 = vld [vmem:[#allocation87_spill] sm:$0xff] }
 0x122   : > { %13244 = vmatpush1.bf16.msra.mxu0 %v17510_v53  ;;  %4043 = vmatprep.mubr.f32.mxu0 %v17473_v35 }
 0x123   : > { %12752 = vmatmul.mubr.msk.f32.gmra.mrb[54].mxu1 %vm1780_vm1, %v14982_v63  ;;  %13246 = vmatprep.subr.bf16.mxu0 %v17513_v60 }
 0x124   : > { %13240 = vmatpush1.bf16.msra.mxu1 %v17511_v54  ;;  %4114 = vmatprep.mubr.f32.mxu1 %v17473_v35  ;;  %v17516_v54 = vld [vmem:[#allocation88_spill] sm:$0xff] }
 0x125   : > { %13250 = vmatprep.subr.bf16.mxu1 %v17512_v6  ;;  %12754 = vmatmul.mubr.msk.f32.gmra.mrb[56].mxu0 %vm1780_vm1, %v14982_v63  ;;  %v17517_v6 = vld [vmem:[#allocation85_spill] sm:$0xff] }
 0x126   : > { %13248 = vmatpush1.bf16.msra.mxu0 %v17514_v19  ;;  %4191 = vmatprep.mubr.f32.mxu0 %v17473_v35 }
 0x127   : > { %12755 = vmatmul.mubr.msk.f32.vlgmr.msra.gmra.mrb[56].mxu1 %vm1780_vm1, %v14969_v42  ;;  %13258 = vmatprep.subr.bf16.mxu0 %v17517_v6 }
 0x128   : > { %13252 = vmatpush1.bf16.msra.mxu1 %v17515_v41  ;;  %4120 = vmatprep.mubr.f32.mxu1 %v17473_v35 }
 0x129   : > { %13254 = vmatprep.subr.bf16.mxu1 %v17516_v54  ;;  %12757 = vmatmul.mubr.msk.f32.vlgmr.msra.gmra.mrb[58].mxu0 %vm1780_vm1, %v14969_v42 }
 0x12a   : > { %13260 = vmatpush1.bf16.msra.mxu0 %v17518_v10  ;;  %4197 = vmatprep.mubr.f32.mxu0 %v17473_v35 }
 0x12b   : > { %12756 = vmatmul.mubr.msk.f32.gmra.mrb[58].mxu1 %vm1780_vm1, %v14982_v63  ;;  %13262 = vmatprep.subr.bf16.mxu0 %v14948_v38 }
 0x12c   : > { %13256 = vmatpush1.bf16.msra.mxu1 %v14946_v17  ;;  %4268 = vmatprep.mubr.f32.mxu1 %v17473_v35  ;;  %v1850_v17 = vpop.f32.mrb[0].mxu0 }
 0x12d   : > { %12758 = vmatmul.mubr.msk.f32.gmra.mrb[60].mxu0 %vm1780_vm1, %v14982_v63  ;;  %v12928_v54 = vpop.f32.mrb[1].mxu0 }
 0x12e   : > { %13264 = vmatpush1.bf16.msra.mxu0 %v14952_v15  ;;  %4345 = vmatprep.mubr.f32.mxu0 %v17473_v35  ;;  %v12697_v54 = vld [vmem:[%s13998_s29] ss:$0 sm:$0xff] }
 0x12f   : > { %12759 = vmatmul.mubr.msk.f32.vlgmr.msra.gmra.mrb[60].mxu1 %vm1780_vm1, %v14969_v42  ;;  %v15152_v8 = vadd.f32 %v12697_v54, %v1850_v17 }
 0x130   : > { %4274 = vmatprep.mubr.f32.mxu1 %v17473_v35 }
 0x131   : > { %12761 = vmatmul.mubr.msk.f32.vlgmr.msra.gmra.mrb[62].mxu0 %vm1780_vm1, %v14969_v42 }
 0x132   : > { %4351 = vmatprep.mubr.f32.mxu0 %v17473_v35 }
 0x133   : > { %12760 = vmatmul.mubr.msk.f32.gmra.mrb[62].mxu1 %vm1780_vm1, %v14982_v63 }
 0x134   : > { %4427 = vmatprep.mubr.f32.mxu1 %v17473_v35 }
 0x135   : > { %12762 = vmatmul.mubr.msk.f32.gmra.mrb[64].mxu0 %vm1780_vm1, %v14982_v63 }
 0x136   : > { %4569 = vmatprep.mubr.f32.mxu0 %v17473_v35 }
 0x140   : > { %v1940_v41 = vpop.f32.mrb[0].mxu1 }
 0x141   : > { %v1942_v47 = vpop.f32.mrb[1].mxu1 }
 0x142   : > { %v2017_v40 = vpop.f32.mrb[2].mxu0 }
 0x143   : > { %v2019_v15 = vpop.f32.mrb[3].mxu0 }
 0x144   : > { %v15132_v42 = vpop.f32.mrb[2].mxu1 }
 0x145   : > { %17519 = vst [vmem:[#allocation92_spill] sm:$0xff] %v15132_v42  ;;  %v15134_v44 = vpop.f32.mrb[3].mxu1 }
 0x147   : > { %v15136_v38 = vpop.f32.mrb[4].mxu0 }
 0x148   : > { %17520 = vst [vmem:[#allocation93_spill] sm:$0xff] %v15136_v38  ;;  %v15138_v16 = vpop.f32.mrb[5].mxu0 }
 0x149   : > { %17521 = vst [vmem:[#allocation94_spill] sm:$0xff] %v15138_v16 }
 0x154   : > { %v2094_v10 = vpop.f32.mrb[4].mxu1 }
 0x155   : > { %v2096_v3 = vpop.f32.mrb[5].mxu1 }
 0x156   : > { %v2171_v63 = vpop.f32.mrb[6].mxu0 }
 0x157   : > { %v2173_v6 = vpop.f32.mrb[7].mxu0 }
 0x158   : > { %v15140_v14 = vpop.f32.mrb[6].mxu1 }
 0x159   : > { %17522 = vst [vmem:[#allocation95_spill] sm:$0xff] %v15140_v14  ;;  %v15142_v19 = vpop.f32.mrb[7].mxu1 }
 0x15a   : > { %17523 = vst [vmem:[#allocation96_spill] sm:$0xff] %v15142_v19 }
 0x15b   : > { %v15150_v13 = vpop.f32.mrb[8].mxu0 }
 0x15c   : > { %17524 = vst [vmem:[#allocation97_spill] sm:$0xff] %v15150_v13  ;;  %v15156_v36 = vpop.f32.mrb[9].mxu0 }
 0x15d   : > { %17525 = vst [vmem:[#allocation98_spill] sm:$0xff] %v15156_v36 }
 0x168   : > { %v15145_v58 = vpop.permute.xlu0 %1860 }
 0x169   : > { %v1943_v60 = vadd.f32 %v1942_v47, %v15145_v58  ;;  %v1941_v62 = vadd.f32 %v1940_v41, %v15145_v58  ;;  %v2097_v53 = vadd.f32 %v2096_v3, %v15145_v58  ;;  %v2020_v21 = vadd.f32 %v2019_v15, %v15145_v58 }
 0x16a   : > { %v2174_v30 = vadd.f32 %v2173_v6, %v15145_v58  ;;  %v2018_v24 = vadd.f32 %v2017_v40, %v15145_v58  ;;  %v2095_v3 = vadd.f32 %v2094_v10, %v15145_v58  ;;  %v2172_v17 = vadd.f32 %v2171_v63, %v15145_v58 }
 0x16b   : > { %4363 = vmatprep.subr.mxu1 %v1943_v60  ;;  %4505 = vmatprep.subr.mxu0 %v2097_v53 }
 0x16c   : > { %4364 = vmatpush1.msra.mxu1 %v1941_v62  ;;  %4506 = vmatpush1.msra.mxu0 %v2095_v3 }
 0x16d   : > { %12763 = vmatmul.mubr.msk.f32.vlgmr.msra.gmra.mrb[64].mxu1 %vm4359_vm2, %v15152_v8  ;;  %4434 = vmatprep.subr.mxu1 %v2020_v21  ;;  %v2248_v21 = vpop.f32.mrb[8].mxu1 }
 0x16e   : > { %4435 = vmatpush1.msra.mxu1 %v2018_v24  ;;  %4498 = vmatprep.mubr.f32.mxu1 %v17473_v35  ;;  %v2250_v62 = vpop.f32.mrb[9].mxu1  ;;  %v2249_v40 = vadd.f32 %v2248_v21, %v15145_v58  ;;  %v2325_v24 = vpop.f32.mrb[10].mxu0 }
 0x16f   : > { %4576 = vmatprep.subr.mxu1 %v2174_v30  ;;  %12765 = vmatmul.mubr.msk.f32.vlgmr.msra.gmra.mrb[66].mxu0 %vm4359_vm2, %v15152_v8  ;;  %v2251_v15 = vadd.f32 %v2250_v62, %v15145_v58  ;;  %v2327_v30 = vpop.f32.mrb[11].mxu0  ;;  %v15174_v47 = vpop.f32.mrb[10].mxu1  ;;  %v2326_v6 = vadd.f32 %v2325_v24, %v15145_v58 }
 0x170   : > { %4711 = vmatprep.mubr.f32.mxu0 %v17473_v35  ;;  %17526 = vst [vmem:[#allocation99_spill] sm:$0xff] %v15174_v47  ;;  %v2328_v10 = vadd.f32 %v2327_v30, %v15145_v58  ;;  %v15178_v53 = vpop.f32.mrb[11].mxu1  ;;  %v15184_v60 = vpop.f32.mrb[12].mxu0 }
 0x171   : > { %12764 = vmatmul.mubr.msk.f32.vlgmr.msra.gmra.mrb[66].mxu1 %vm4359_vm2, %v15152_v8  ;;  %4647 = vmatprep.subr.mxu0 %v2251_v15  ;;  %17527 = vst [vmem:[#allocation100_spill] sm:$0xff] %v15178_v53  ;;  %17528 = vst [vmem:[#allocation101_spill] sm:$0xff] %v15184_v60  ;;  %v15186_v41 = vpop.f32.mrb[13].mxu0 }
 0x172   : > { %4577 = vmatpush1.msra.mxu1 %v2172_v17  ;;  %4640 = vmatprep.mubr.f32.mxu1 %v17473_v35  ;;  %17529 = vst [vmem:[#allocation102_spill] sm:$0xff] %v15186_v41 }
 0x173   : > { %4648 = vmatpush1.msra.mxu0 %v2249_v40  ;;  %4718 = vmatprep.subr.mxu1 %v2328_v10 }
 0x174   : > { %12767 = vmatmul.mubr.msk.f32.vlgmr.msra.gmra.mrb[68].mxu0 %vm4359_vm2, %v15152_v8 }
 0x175   : > { %12766 = vmatmul.mubr.msk.f32.vlgmr.msra.gmra.mrb[68].mxu1 %vm4359_vm2, %v15152_v8  ;;  %4853 = vmatprep.mubr.f32.mxu0 %v17473_v35 }
 0x176   : > { %4782 = vmatprep.mubr.f32.mxu1 %v17473_v35  ;;  %4719 = vmatpush1.msra.mxu1 %v2326_v6 }
 0x178   : > { %v2402_v63 = vpop.f32.mrb[12].mxu1 }
 0x179   : > { %12768 = vmatmul.mubr.msk.f32.vlgmr.msra.gmra.mrb[70].mxu1 %vm4359_vm2, %v15152_v8  ;;  %v2404_v54 = vpop.f32.mrb[13].mxu1  ;;  %v2403_v17 = vadd.f32 %v2402_v63, %v15145_v58 }
 0x17a   : > { %4924 = vmatprep.mubr.f32.mxu1 %v17473_v35  ;;  %v2405_v3 = vadd.f32 %v2404_v54, %v15145_v58  ;;  %v2479_v21 = vpop.f32.mrb[14].mxu0 }
 0x17b   : > { %v2481_v62 = vpop.f32.mrb[15].mxu0  ;;  %v2480_v30 = vadd.f32 %v2479_v21, %v15145_v58 }
 0x17c   : > { %v15193_v15 = vpop.f32.mrb[14].mxu1  ;;  %4789 = vmatprep.subr.mxu0 %v2405_v3  ;;  %v2482_v40 = vadd.f32 %v2481_v62, %v15145_v58 }
 0x17d   : > { %17530 = vst [vmem:[#allocation103_spill] sm:$0xff] %v15193_v15  ;;  %v15196_v24 = vpop.f32.mrb[15].mxu1  ;;  %4790 = vmatpush1.msra.mxu0 %v2403_v17 }
 0x17e   : > { %17531 = vst [vmem:[#allocation104_spill] sm:$0xff] %v15196_v24  ;;  %12769 = vmatmul.mubr.msk.f32.vlgmr.msra.gmra.mrb[70].mxu0 %vm4359_vm2, %v15152_v8  ;;  %4860 = vmatprep.subr.mxu1 %v2482_v40  ;;  %v15202_v10 = vpop.f32.mrb[16].mxu0 }
 0x17f   : > { %4995 = vmatprep.mubr.f32.mxu0 %v17473_v35  ;;  %17532 = vst [vmem:[#allocation105_spill] sm:$0xff] %v15202_v10  ;;  %4861 = vmatpush1.msra.mxu1 %v2480_v30  ;;  %v15204_v6 = vpop.f32.mrb[17].mxu0 }
 0x180   : > { %17533 = vst [vmem:[#allocation106_spill] sm:$0xff] %v15204_v6  ;;  %12770 = vmatmul.mubr.msk.f32.vlgmr.msra.gmra.mrb[72].mxu1 %vm4359_vm2, %v15152_v8 }
 0x181   : > { %5066 = vmatprep.mubr.f32.mxu1 %v17473_v35 }
 0x18d   : > { %v2556_v63 = vpop.f32.mrb[16].mxu1  ;;  %v2633_v21 = vpop.f32.mrb[18].mxu0 }
 0x18e   : > { %v2558_v54 = vpop.f32.mrb[17].mxu1  ;;  %v2557_v17 = vadd.f32 %v2556_v63, %v15145_v58  ;;  %v2635_v62 = vpop.f32.mrb[19].mxu0  ;;  %v2634_v61 = vadd.f32 %v2633_v21, %v15145_v58 }
 0x18f   : > { %v2559_v3 = vadd.f32 %v2558_v54, %v15145_v58  ;;  %v2636_v30 = vadd.f32 %v2635_v62, %v15145_v58 }
 0x191   : > { %4931 = vmatprep.subr.mxu0 %v2559_v3  ;;  %5002 = vmatprep.subr.mxu1 %v2636_v30 }
 0x192   : > { %v15211_v40 = vpop.f32.mrb[18].mxu1  ;;  %4932 = vmatpush1.msra.mxu0 %v2557_v17  ;;  %5003 = vmatpush1.msra.mxu1 %v2634_v61 }
 0x193   : > { %17534 = vst [vmem:[#allocation107_spill] sm:$0xff] %v15211_v40  ;;  %v15214_v49 = vpop.f32.mrb[19].mxu1  ;;  %12771 = vmatmul.mubr.msk.f32.vlgmr.msra.gmra.mrb[72].mxu0 %vm4359_vm2, %v15152_v8  ;;  %12772 = vmatmul.mubr.msk.f32.vlgmr.msra.gmra.mrb[74].mxu1 %vm4359_vm2, %v15152_v8 }
 0x194   : > { %17535 = vst [vmem:[#allocation108_spill] sm:$0xff] %v15214_v49  ;;  %5137 = vmatprep.mubr.f32.mxu0 %v17473_v35  ;;  %v15220_v54 = vpop.f32.mrb[20].mxu0  ;;  %5208 = vmatprep.mubr.f32.mxu1 %v17473_v35 }
 0x195   : > { %17536 = vst [vmem:[#allocation109_spill] sm:$0xff] %v15220_v54  ;;  %v15222_v63 = vpop.f32.mrb[21].mxu0 }
 0x196   : > { %17537 = vst [vmem:[#allocation110_spill] sm:$0xff] %v15222_v63 }
 0x19c   : > { %v2710_v3 = vpop.f32.mrb[20].mxu1 }
 0x19d   : > { %v2712_v17 = vpop.f32.mrb[21].mxu1  ;;  %v2711_v62 = vadd.f32 %v2710_v3, %v15145_v58 }
 0x19e   : > { %v2713_v21 = vadd.f32 %v2712_v17, %v15145_v58 }
 0x19f   : > { %v2787_v0 = vpop.f32.mrb[22].mxu0 }
 0x1a0   : > { %v2789_v30 = vpop.f32.mrb[23].mxu0  ;;  %5073 = vmatprep.subr.mxu0 %v2713_v21  ;;  %v2788_v27 = vadd.f32 %v2787_v0, %v15145_v58 }
 0x1a1   : > { %v15229_v34 = vpop.f32.mrb[22].mxu1  ;;  %v2790_v61 = vadd.f32 %v2789_v30, %v15145_v58  ;;  %5074 = vmatpush1.msra.mxu0 %v2711_v62 }
 0x1a2   : > { %17538 = vst [vmem:[#allocation111_spill] sm:$0xff] %v15229_v34  ;;  %v15232_v28 = vpop.f32.mrb[23].mxu1  ;;  %12773 = vmatmul.mubr.msk.f32.vlgmr.msra.gmra.mrb[74].mxu0 %vm4359_vm2, %v15152_v8 }
 0x1a3   : > { %17539 = vst [vmem:[#allocation112_spill] sm:$0xff] %v15232_v28  ;;  %5144 = vmatprep.subr.mxu1 %v2790_v61  ;;  %5279 = vmatprep.mubr.f32.mxu0 %v17473_v35  ;;  %v15238_v17 = vpop.f32.mrb[24].mxu0 }
 0x1a4   : > { %17540 = vst [vmem:[#allocation113_spill] sm:$0xff] %v15238_v17  ;;  %5145 = vmatpush1.msra.mxu1 %v2788_v27  ;;  %v15240_v3 = vpop.f32.mrb[25].mxu0 }
 0x1a5   : > { %17541 = vst [vmem:[#allocation114_spill] sm:$0xff] %v15240_v3  ;;  %12774 = vmatmul.mubr.msk.f32.vlgmr.msra.gmra.mrb[76].mxu1 %vm4359_vm2, %v15152_v8 }
 0x1a6   : > { %5350 = vmatprep.mubr.f32.mxu1 %v17473_v35 }
 0x1b0   : > { %v2864_v21 = vpop.f32.mrb[24].mxu1 }
 0x1b1   : > { %v2866_v62 = vpop.f32.mrb[25].mxu1  ;;  %v2865_v30 = vadd.f32 %v2864_v21, %v15145_v58 }
 0x1b2   : > { %v2867_v0 = vadd.f32 %v2866_v62, %v15145_v58  ;;  %v2941_v48 = vpop.f32.mrb[26].mxu0 }
 0x1b3   : > { %v2943_v61 = vpop.f32.mrb[27].mxu0  ;;  %v2942_v26 = vadd.f32 %v2941_v48, %v15145_v58 }
 0x1b4   : > { %v15247_v52 = vpop.f32.mrb[26].mxu1  ;;  %5215 = vmatprep.subr.mxu0 %v2867_v0  ;;  %v2944_v27 = vadd.f32 %v2943_v61, %v15145_v58 }
 0x1b5   : > { %17542 = vst [vmem:[#allocation115_spill] sm:$0xff] %v15247_v52  ;;  %v15250_v12 = vpop.f32.mrb[27].mxu1  ;;  %5216 = vmatpush1.msra.mxu0 %v2865_v30 }
 0x1b6   : > { %17543 = vst [vmem:[#allocation116_spill] sm:$0xff] %v15250_v12  ;;  %12775 = vmatmul.mubr.msk.f32.vlgmr.msra.gmra.mrb[76].mxu0 %vm4359_vm2, %v15152_v8  ;;  %5286 = vmatprep.subr.mxu1 %v2944_v27  ;;  %v15256_v62 = vpop.f32.mrb[28].mxu0 }
 0x1b7   : > { %5421 = vmatprep.mubr.f32.mxu0 %v17473_v35  ;;  %17544 = vst [vmem:[#allocation117_spill] sm:$0xff] %v15256_v62  ;;  %5287 = vmatpush1.msra.mxu1 %v2942_v26  ;;  %v15258_v21 = vpop.f32.mrb[29].mxu0 }
 0x1b8   : > { %17545 = vst [vmem:[#allocation118_spill] sm:$0xff] %v15258_v21  ;;  %12776 = vmatmul.mubr.msk.f32.vlgmr.msra.gmra.mrb[78].mxu1 %vm4359_vm2, %v15152_v8 }
 0x1b9   : > { %5492 = vmatprep.mubr.f32.mxu1 %v17473_v35 }
 0x1c2   : > { %v3018_v0 = vpop.f32.mrb[28].mxu1 }
 0x1c3   : > { %v3020_v30 = vpop.f32.mrb[29].mxu1  ;;  %v3019_v61 = vadd.f32 %v3018_v0, %v15145_v58 }
 0x1c4   : > { %v3021_v48 = vadd.f32 %v3020_v30, %v15145_v58  ;;  %v3095_v25 = vpop.f32.mrb[30].mxu0 }
 0x1c5   : > { %v3097_v27 = vpop.f32.mrb[31].mxu0  ;;  %v3096_v59 = vadd.f32 %v3095_v25, %v15145_v58 }
 0x1c6   : > { %5357 = vmatprep.subr.mxu0 %v3021_v48  ;;  %v15265_v46 = vpop.f32.mrb[30].mxu1  ;;  %v3098_v26 = vadd.f32 %v3097_v27, %v15145_v58 }
 0x1c7   : > { %17546 = vst [vmem:[#allocation119_spill] sm:$0xff] %v15265_v46  ;;  %5358 = vmatpush1.msra.mxu0 %v3019_v61  ;;  %v15268_v5 = vpop.f32.mrb[31].mxu1 }
 0x1c8   : > { %17547 = vst [vmem:[#allocation120_spill] sm:$0xff] %v15268_v5  ;;  %12777 = vmatmul.mubr.msk.f32.vlgmr.msra.gmra.mrb[78].mxu0 %vm4359_vm2, %v15152_v8  ;;  %5428 = vmatprep.subr.mxu1 %v3098_v26  ;;  %v15273_v37 = vpop.f32.mrb[32].mxu0 }
 0x1c9   : > { %17548 = vst [vmem:[#allocation121_spill] sm:$0xff] %v15273_v37  ;;  %5429 = vmatpush1.msra.mxu1 %v3096_v59  ;;  %v15277_v30 = vpop.f32.mrb[33].mxu0 }
 0x1ca   : > { %v15275_v0 = vpop.f32.mrb[32].mxu1  ;;  %17549 = vst [vmem:[#allocation122_spill] sm:$0xff] %v15277_v30  ;;  %12778 = vmatmul.mubr.msk.f32.vlgmr.msra.gmra.mrb[80].mxu1 %vm4359_vm2, %v15152_v8  ;;  %12929 = vmatprep.subr.mxu1 %v17473_v35 }
 0x1cb   : > { %v15281_v48 = vpop.f32.mrb[33].mxu1  ;;  %12931 = vmatprep.mubr.msk.f32.mxu1 %vm13951_vm0, %v17473_v35 }
 0x1cc   : > { %v15286_v25 = vpop.f32.mrb[34].mxu0 }
 0x1cd   : > { %v15290_v61 = vpop.f32.mrb[35].mxu0 }
 0x1ce   : > { %v15288_v58 = vpop.f32.mrb[34].mxu1 }
 0x1cf   : > { %17550 = vst [vmem:[#allocation123_spill] sm:$0xff] %v15288_v58  ;;  %v15292_v59 = vpop.f32.mrb[35].mxu1 }
 0x1d0   : > { %17551 = vst [vmem:[#allocation124_spill] sm:$0xff] %v15292_v59  ;;  %v15294_v27 = vpop.f32.mrb[36].mxu0 }
 0x1d1   : > { %17552 = vst [vmem:[#allocation125_spill] sm:$0xff] %v15294_v27  ;;  %v15298_v11 = vpop.f32.mrb[37].mxu0 }
 0x1d2   : > { %v15296_v26 = vpop.f32.mrb[36].mxu1  ;;  %17554 = vst [vmem:[#allocation127_spill] sm:$0xff] %v15298_v11 }
 0x1d3   : > { %17553 = vst [vmem:[#allocation126_spill] sm:$0xff] %v15296_v26  ;;  %v15300_v1 = vpop.f32.mrb[37].mxu1 }
 0x1d4   : > { %v15302_v29 = vpop.f32.mrb[38].mxu0 }
 0x1d5   : > { %17555 = vst [vmem:[#allocation128_spill] sm:$0xff] %v15302_v29  ;;  %v15306_v45 = vpop.f32.mrb[39].mxu0 }
 0x1d6   : > { %v15304_v39 = vpop.f32.mrb[38].mxu1  ;;  %17557 = vst [vmem:[#allocation130_spill] sm:$0xff] %v15306_v45 }
 0x1d7   : > { %17556 = vst [vmem:[#allocation129_spill] sm:$0xff] %v15304_v39  ;;  %v15308_v9 = vpop.f32.mrb[39].mxu1 }
 0x1d8   : > { %17558 = vst [vmem:[#allocation131_spill] sm:$0xff] %v15308_v9  ;;  %v15310_v7 = vpop.f32.mrb[40].mxu0 }
 0x1d9   : > { %17559 = vst [vmem:[#allocation132_spill] sm:$0xff] %v15310_v7  ;;  %v15314_v31 = vpop.f32.mrb[41].mxu0 }
 0x1da   : > { %v15312_v57 = vpop.f32.mrb[40].mxu1  ;;  %17561 = vst [vmem:[#allocation134_spill] sm:$0xff] %v15314_v31 }
 0x1db   : > { %17560 = vst [vmem:[#allocation133_spill] sm:$0xff] %v15312_v57  ;;  %v15316_v56 = vpop.f32.mrb[41].mxu1 }
 0x1dc   : > { %17562 = vst [vmem:[#allocation135_spill] sm:$0xff] %v15316_v56  ;;  %v15318_v55 = vpop.f32.mrb[42].mxu0 }
 0x1dd   : > { %17563 = vst [vmem:[#allocation136_spill] sm:$0xff] %v15318_v55  ;;  %v15322_v32 = vpop.f32.mrb[43].mxu0 }
 0x1de   : > { %v15320_v33 = vpop.f32.mrb[42].mxu1  ;;  %17565 = vst [vmem:[#allocation138_spill] sm:$0xff] %v15322_v32 }
 0x1df   : > { %17564 = vst [vmem:[#allocation137_spill] sm:$0xff] %v15320_v33  ;;  %v15324_v43 = vpop.f32.mrb[43].mxu1 }
 0x1e0   : > { %17566 = vst [vmem:[#allocation139_spill] sm:$0xff] %v15324_v43  ;;  %v15326_v18 = vpop.f32.mrb[44].mxu0 }
 0x1e1   : > { %17567 = vst [vmem:[#allocation140_spill] sm:$0xff] %v15326_v18  ;;  %v15330_v2 = vpop.f32.mrb[45].mxu0 }
 0x1e2   : > { %v15328_v4 = vpop.f32.mrb[44].mxu1  ;;  %17569 = vst [vmem:[#allocation142_spill] sm:$0xff] %v15330_v2 }
 0x1e3   : > { %17568 = vst [vmem:[#allocation141_spill] sm:$0xff] %v15328_v4  ;;  %v15332_v22 = vpop.f32.mrb[45].mxu1 }
 0x1e4   : > { %17570 = vst [vmem:[#allocation143_spill] sm:$0xff] %v15332_v22  ;;  %v15334_v50 = vpop.f32.mrb[46].mxu0 }
 0x1e5   : > { %17571 = vst [vmem:[#allocation144_spill] sm:$0xff] %v15334_v50  ;;  %v15338_v51 = vpop.f32.mrb[47].mxu0 }
 0x1e6   : > { %v15336_v20 = vpop.f32.mrb[46].mxu1  ;;  %17573 = vst [vmem:[#allocation146_spill] sm:$0xff] %v15338_v51 }
 0x1e7   : > { %17572 = vst [vmem:[#allocation145_spill] sm:$0xff] %v15336_v20  ;;  %v15340_v23 = vpop.f32.mrb[47].mxu1 }
 0x1e8   : > { %17574 = vst [vmem:[#allocation147_spill] sm:$0xff] %v15340_v23  ;;  %v15342_v33 = vpop.f32.mrb[48].mxu0 }
 0x1e9   : > { %17575 = vst [vmem:[#allocation148_spill] sm:$0xff] %v15342_v33  ;;  %v15346_v43 = vpop.f32.mrb[49].mxu0 }
 0x1ea   : > { %v15344_v7 = vpop.f32.mrb[48].mxu1  ;;  %17576 = vst [vmem:[#allocation149_spill] sm:$0xff] %v15346_v43 }
 0x1eb   : > { %v15348_v18 = vpop.f32.mrb[49].mxu1 }
 0x1ec   : > { %17577 = vst [vmem:[#allocation150_spill] sm:$0xff] %v15348_v18  ;;  %v15350_v31 = vpop.f32.mrb[50].mxu0 }
 0x1ed   : > { %v15354_v39 = vpop.f32.mrb[51].mxu0 }
 0x1ee   : > { %v15352_v2 = vpop.f32.mrb[50].mxu1 }
 0x1ef   : > { %17578 = vst [vmem:[#allocation151_spill] sm:$0xff] %v15352_v2  ;;  %v15356_v9 = vpop.f32.mrb[51].mxu1 }
 0x1f0   : > { %17579 = vst [vmem:[#allocation152_spill] sm:$0xff] %v15356_v9  ;;  %v15358_v20 = vpop.f32.mrb[52].mxu0 }
 0x1f1   : > { %17580 = vst [vmem:[#allocation153_spill] sm:$0xff] %v15358_v20  ;;  %v15362_v23 = vpop.f32.mrb[53].mxu0 }
 0x1f2   : > { %v15360_v27 = vpop.f32.mrb[52].mxu1  ;;  %17581 = vst [vmem:[#allocation154_spill] sm:$0xff] %v15362_v23 }
 0x1f3   : > { %v15364_v33 = vpop.f32.mrb[53].mxu1 }
 0x1f4   : > { %v15366_v11 = vpop.f32.mrb[54].mxu0 }
 0x1f5   : > { %v15370_v58 = vpop.f32.mrb[55].mxu0 }
 0x1f6   : > { %v15368_v43 = vpop.f32.mrb[54].mxu1 }
 0x1f7   : > { %17582 = vst [vmem:[#allocation155_spill] sm:$0xff] %v15368_v43  ;;  %v15372_v59 = vpop.f32.mrb[55].mxu1 }
 0x1f8   : > { %17583 = vst [vmem:[#allocation156_spill] sm:$0xff] %v15372_v59  ;;  %v15374_v2 = vpop.f32.mrb[56].mxu0 }
 0x1f9   : > { %17584 = vst [vmem:[#allocation157_spill] sm:$0xff] %v15374_v2  ;;  %v15378_v9 = vpop.f32.mrb[57].mxu0 }
 0x1fa   : > { %v15376_v35 = vpop.f32.mrb[56].mxu1  ;;  %17585 = vst [vmem:[#allocation158_spill] sm:$0xff] %v15378_v9 }
 0x1fb   : > { %v15380_v20 = vpop.f32.mrb[57].mxu1 }
 0x1fc   : > { %v15382_v18 = vpop.f32.mrb[58].mxu0 }
 0x1fd   : > { %17586 = vst [vmem:[#allocation159_spill] sm:$0xff] %v15382_v18  ;;  %v15386_v50 = vpop.f32.mrb[59].mxu0 }
 0x1fe   : > { %v15384_v23 = vpop.f32.mrb[58].mxu1 }
 0x1ff   : > { %17587 = vst [vmem:[#allocation160_spill] sm:$0xff] %v15384_v23  ;;  %v15388_v51 = vpop.f32.mrb[59].mxu1 }
 0x200   : > { %17588 = vst [vmem:[#allocation161_spill] sm:$0xff] %v15388_v51  ;;  %v15390_v43 = vpop.f32.mrb[60].mxu0 }
 0x201   : > { %17589 = vst [vmem:[#allocation162_spill] sm:$0xff] %v15390_v43  ;;  %v15394_v59 = vpop.f32.mrb[61].mxu0 }
 0x202   : > { %v15392_v4 = vpop.f32.mrb[60].mxu1  ;;  %17591 = vst [vmem:[#allocation164_spill] sm:$0xff] %v15394_v59 }
 0x203   : > { %17590 = vst [vmem:[#allocation163_spill] sm:$0xff] %v15392_v4  ;;  %v15396_v2 = vpop.f32.mrb[61].mxu1 }
 0x204   : > { %17592 = vst [vmem:[#allocation165_spill] sm:$0xff] %v15396_v2  ;;  %v15398_v22 = vpop.f32.mrb[62].mxu0 }
 0x205   : > { %17593 = vst [vmem:[#allocation166_spill] sm:$0xff] %v15398_v22  ;;  %v15402_v55 = vpop.f32.mrb[63].mxu0 }
 0x206   : > { %v15400_v9 = vpop.f32.mrb[62].mxu1  ;;  %17595 = vst [vmem:[#allocation168_spill] sm:$0xff] %v15402_v55 }
 0x207   : > { %17594 = vst [vmem:[#allocation167_spill] sm:$0xff] %v15400_v9  ;;  %v15404_v32 = vpop.f32.mrb[63].mxu1 }
 0x208   : > { %17596 = vst [vmem:[#allocation169_spill] sm:$0xff] %v15404_v32  ;;  %v15406_v23 = vpop.f32.mrb[64].mxu0 }
 0x209   : > { %17597 = vst [vmem:[#allocation170_spill] sm:$0xff] %v15406_v23  ;;  %v15408_v57 = vpop.f32.mrb[65].mxu0 }
 0x20a   : > { %17598 = vst [vmem:[#allocation171_spill] sm:$0xff] %v15408_v57 }
 0x240   : > { %v4429_v51 = vpop.f32.mrb[64].mxu1 }
 0x241   : > { %v4431_v43 = vpop.f32.mrb[65].mxu1  ;;  %v15414_v53 = vmul.f32 0.35355338, %v4429_v51 }
 0x242   : > { %v4571_v56 = vpop.f32.mrb[66].mxu0  ;;  %v15418_v36 = vmul.f32 0.35355338, %v4431_v43 }
 0x243   : > { %v4573_v46 = vpop.f32.mrb[67].mxu0  ;;  %v15410_v24 = vmul.f32 0.35355338, %v4571_v56 }
 0x244   : > { %v4500_v29 = vpop.f32.mrb[66].mxu1  ;;  %v15412_v41 = vmul.f32 0.35355338, %v4573_v46 }
 0x245   : > { %v4502_v59 = vpop.f32.mrb[67].mxu1  ;;  %v5531_v38 = vmax.f32 %v15414_v53, %v15410_v24  ;;  %v15430_v46 = vmul.f32 0.35355338, %v4500_v29 }
 0x246   : > { %v5532_v51 = vmax.f32 %v15418_v36, %v15412_v41 }
 0x247   : > { %v4713_v21 = vpop.f32.mrb[68].mxu0 }
 0x248   : > { %v4642_v5 = vpop.f32.mrb[68].mxu1  ;;  %v4715_v52 = vpop.f32.mrb[69].mxu0  ;;  %v15416_v13 = vmul.f32 0.35355338, %v4713_v21 }
 0x249   : > { %v4644_v62 = vpop.f32.mrb[69].mxu1  ;;  %v15420_v14 = vmul.f32 0.35355338, %v4642_v5  ;;  %v15422_v19 = vmul.f32 0.35355338, %v4715_v52 }
 0x24a   : > { %v15426_v16 = vmul.f32 0.35355338, %v4644_v62  ;;  %v15438_v5 = vmul.f32 0.35355338, %v4502_v59  ;;  %v5535_v52 = vmax.f32 %v5531_v38, %v15416_v13 }
 0x24b   : > { %v5536_v29 = vmax.f32 %v5532_v51, %v15422_v19 }
 0x24c   : > { %v4784_v12 = vpop.f32.mrb[70].mxu1 }
 0x24d   : > { %v4786_v9 = vpop.f32.mrb[71].mxu1  ;;  %v15434_v21 = vmul.f32 0.35355338, %v4784_v12  ;;  %v5534_v12 = vmax.f32 %v15438_v5, %v15426_v16 }
 0x24e   : > { %v15441_v42 = vmul.f32 0.35355338, %v4786_v9 }
 0x251   : > { %v4855_v17 = vpop.f32.mrb[70].mxu0 }
 0x252   : > { %v4857_v3 = vpop.f32.mrb[71].mxu0  ;;  %v15428_v56 = vmul.f32 0.35355338, %v4855_v17  ;;  %v5533_v17 = vmax.f32 %v15430_v46, %v15420_v14 }
 0x253   : > { %v4926_v34 = vpop.f32.mrb[72].mxu1  ;;  %v15436_v43 = vmul.f32 0.35355338, %v4857_v3 }
 0x254   : > { %v4928_v32 = vpop.f32.mrb[73].mxu1  ;;  %v15448_v62 = vmul.f32 0.35355338, %v4926_v34  ;;  %v5539_v3 = vmax.f32 %v5535_v52, %v15428_v56 }
 0x255   : > { %v15455_v59 = vmul.f32 0.35355338, %v4928_v32  ;;  %v5540_v38 = vmax.f32 %v5536_v29, %v15436_v43 }
 0x266   : > { %v4997_v28 = vpop.f32.mrb[72].mxu0  ;;  %v5068_v54 = vpop.f32.mrb[74].mxu1 }
 0x267   : > { %v4999_v23 = vpop.f32.mrb[73].mxu0  ;;  %v5070_v57 = vpop.f32.mrb[75].mxu1  ;;  %v15443_v37 = vmul.f32 0.35355338, %v4997_v28  ;;  %v5537_v28 = vmax.f32 %v5533_v17, %v15434_v21  ;;  %v15461_v22 = vmul.f32 0.35355338, %v5068_v54 }
 0x268   : > { %v15450_v30 = vmul.f32 0.35355338, %v4999_v23  ;;  %v5538_v23 = vmax.f32 %v5534_v12, %v15441_v42  ;;  %v15467_v55 = vmul.f32 0.35355338, %v5070_v57 }
 0x269   : > { %v5543_v34 = vmax.f32 %v5539_v3, %v15443_v37  ;;  %v5541_v32 = vmax.f32 %v5537_v28, %v15448_v62 }
 0x26a   : > { %v5542_v54 = vmax.f32 %v5538_v23, %v15455_v59 }
 0x26b   : > { %v5545_v12 = vmax.f32 %v5541_v32, %v15461_v22 }
 0x26c   : > { %v5546_v28 = vmax.f32 %v5542_v54, %v15467_v55 }
 0x275   : > { %v5139_v63 = vpop.f32.mrb[74].mxu0 }
 0x276   : > { %v5141_v40 = vpop.f32.mrb[75].mxu0  ;;  %v15457_v9 = vmul.f32 0.35355338, %v5139_v63  ;;  %v5544_v63 = vmax.f32 %v5540_v38, %v15450_v30 }
 0x277   : > { %v15463_v51 = vmul.f32 0.35355338, %v5141_v40 }
 0x278   : > { %v5210_v49 = vpop.f32.mrb[76].mxu1  ;;  %v5547_v40 = vmax.f32 %v5543_v34, %v15457_v9 }
 0x279   : > { %v5212_v10 = vpop.f32.mrb[77].mxu1  ;;  %v15473_v52 = vmul.f32 0.35355338, %v5210_v49  ;;  %v5548_v57 = vmax.f32 %v5544_v63, %v15463_v51 }
 0x27a   : > { %v15479_v29 = vmul.f32 0.35355338, %v5212_v10 }
 0x27b   : > { %v5549_v34 = vmax.f32 %v5545_v12, %v15473_v52 }
 0x27c   : > { %v5550_v32 = vmax.f32 %v5546_v28, %v15479_v29 }
 0x289   : > { %v5281_v6 = vpop.f32.mrb[76].mxu0 }
 0x28a   : > { %v5283_v15 = vpop.f32.mrb[77].mxu0  ;;  %v15469_v45 = vmul.f32 0.35355338, %v5281_v6 }
 0x28b   : > { %v5352_v60 = vpop.f32.mrb[78].mxu1  ;;  %v15475_v17 = vmul.f32 0.35355338, %v5283_v15 }
 0x28c   : > { %v5354_v47 = vpop.f32.mrb[79].mxu1  ;;  %v15483_v6 = vmul.f32 0.35355338, %v5352_v60  ;;  %v5551_v49 = vmax.f32 %v5547_v40, %v15469_v45 }
 0x28d   : > { %v15487_v38 = vmul.f32 0.35355338, %v5354_v47  ;;  %v5552_v10 = vmax.f32 %v5548_v57, %v15475_v17 }
 0x28e   : > { %v5553_v54 = vmax.f32 %v5549_v34, %v15483_v6 }
 0x29b   : > { %v5423_v3 = vpop.f32.mrb[78].mxu0 }
 0x29c   : > { %v15489_v15 = vmul.f32 0.35355338, %v5423_v3  ;;  %v5425_v23 = vpop.f32.mrb[79].mxu0  ;;  %v5554_v3 = vmax.f32 %v5550_v32, %v15487_v38 }
 0x29d   : > { %v15493_v26 = vmul.f32 0.35355338, %v5425_v23  ;;  %v5494_v63 = vpop.f32.mrb[80].mxu1 }
 0x29e   : > { %v5555_v60 = vmax.f32 %v5551_v49, %v15489_v15  ;;  %v15498_v4 = vmul.f32 0.35355338, %v5494_v63  ;;  %v5496_v40 = vpop.f32.mrb[81].mxu1 }
 0x29f   : > { %v5556_v47 = vmax.f32 %v5552_v10, %v15493_v26  ;;  %v15502_v2 = vmul.f32 0.35355338, %v5496_v40 }
 0x2a0   : > { %v5557_v12 = vmax.f32 %v5553_v54, %v15498_v4 }
 0x2a1   : > { %v5558_v57 = vmax.f32 %v5554_v3, %v15502_v2  ;;  %v5559_v23 = vmax.f32 %v5555_v60, %v5556_v47 }
 0x2a3   : > { %v5560_v28 = vmax.f32 %v5557_v12, %v5558_v57 }
 0x2a5   : > { %v5561_v18 = vmax.f32 %v5559_v23, %v5560_v28 }
 0x2a7   : > { %5562 = vmax.xlane.f32.xlu0 %v5561_v18 }
 0x334   : > { %v15506_v49 = vpop.xlane.xlu0 %5562 }
 0x335   : > { %v5564_v34 = vsub.f32 %v15414_v53, %v15506_v49  ;;  %v5565_v10 = vsub.f32 %v15418_v36, %v15506_v49  ;;  %v5566_v32 = vsub.f32 %v15430_v46, %v15506_v49  ;;  %v5567_v63 = vsub.f32 %v15438_v5, %v15506_v49 }
 0x336   : > { %v5568_v60 = vsub.f32 %v15410_v24, %v15506_v49  ;;  %v5569_v47 = vsub.f32 %v15412_v41, %v15506_v49  ;;  %v5570_v36 = vsub.f32 %v15420_v14, %v15506_v49  ;;  %v5571_v5 = vsub.f32 %v15426_v16, %v15506_v49 }
 0x337   : > { %v5596_v54 = vmul.f32 1.442695, %v5564_v34  ;;  %v5598_v40 = vmul.f32 1.442695, %v5565_v10  ;;  %v5600_v18 = vmul.f32 1.442695, %v5566_v32  ;;  %v5572_v24 = vsub.f32 %v15416_v13, %v15506_v49 }
 0x338   : > { %v5602_v53 = vmul.f32 1.442695, %v5567_v63  ;;  %v5604_v46 = vmul.f32 1.442695, %v5568_v60  ;;  %v5606_v3 = vmul.f32 1.442695, %v5569_v47  ;;  %v5573_v41 = vsub.f32 %v15422_v19, %v15506_v49 }
 0x339   : > { %13563 = vpow2.f32 %v5596_v54  ;;  %v5608_v12 = vmul.f32 1.442695, %v5570_v36  ;;  %v5610_v57 = vmul.f32 1.442695, %v5571_v5  ;;  %v5574_v28 = vsub.f32 %v15434_v21, %v15506_v49 }
 0x33a   : > { %13565 = vpow2.f32 %v5598_v40  ;;  %v5612_v16 = vmul.f32 1.442695, %v5572_v24  ;;  %v5575_v10 = vsub.f32 %v15441_v42, %v15506_v49  ;;  %v5614_v19 = vmul.f32 1.442695, %v5573_v41 }
 0x33b   : > { %13567 = vpow2.f32 %v5600_v18  ;;  %v5576_v54 = vsub.f32 %v15428_v56, %v15506_v49  ;;  %v5616_v21 = vmul.f32 1.442695, %v5574_v28  ;;  %v5577_v18 = vsub.f32 %v15436_v43, %v15506_v49 }
 0x33c   : > { %13569 = vpow2.f32 %v5602_v53  ;;  %v5618_v42 = vmul.f32 1.442695, %v5575_v10  ;;  %v5578_v36 = vsub.f32 %v15448_v62, %v15506_v49  ;;  %v5580_v41 = vsub.f32 %v15443_v37, %v15506_v49 }
 0x33d   : > { %13571 = vpow2.f32 %v5604_v46  ;;  %v5620_v56 = vmul.f32 1.442695, %v5576_v54  ;;  %v5622_v43 = vmul.f32 1.442695, %v5577_v18 }
 0x33e   : > { %13573 = vpow2.f32 %v5606_v3  ;;  %v5579_v3 = vsub.f32 %v15455_v59, %v15506_v49  ;;  %v5624_v62 = vmul.f32 1.442695, %v5578_v36  ;;  %v5628_v37 = vmul.f32 1.442695, %v5580_v41 }
 0x33f   : > { %13575 = vpow2.f32 %v5608_v12 }
 0x340   : > { %13577 = vpow2.f32 %v5610_v57  ;;  %v5626_v59 = vmul.f32 1.442695, %v5579_v3 }
 0x341   : > { %13579 = vpow2.f32 %v5612_v16  ;;  %v5581_v16 = vsub.f32 %v15450_v30, %v15506_v49 }
 0x342   : > { %13581 = vpow2.f32 %v5614_v19  ;;  %v5582_v19 = vsub.f32 %v15461_v22, %v15506_v49 }
 0x343   : > { %v15528_v23 = vpop.eup %13563  ;;  %13583 = vpow2.f32 %v5616_v21  ;;  %v5583_v21 = vsub.f32 %v15467_v55, %v15506_v49  ;;  %v5630_v30 = vmul.f32 1.442695, %v5581_v16 }
 0x344   : > { %v15530_v14 = vpop.eup %13565  ;;  %13585 = vpow2.f32 %v5618_v42  ;;  %v5584_v42 = vsub.f32 %v15457_v9, %v15506_v49  ;;  %v5632_v22 = vmul.f32 1.442695, %v5582_v19 }
 0x345   : > { %v5660_v34 = vadd.f32 %v15530_v14, %v15528_v23  ;;  %v15536_v13 = vpop.eup %13567  ;;  %13587 = vpow2.f32 %v5620_v56  ;;  %v5585_v56 = vsub.f32 %v15463_v51, %v15506_v49  ;;  %v5634_v55 = vmul.f32 1.442695, %v5583_v21 }
 0x346   : > { %v15541_v63 = vpop.eup %13569  ;;  %13589 = vpow2.f32 %v5622_v43  ;;  %v5586_v43 = vsub.f32 %v15473_v52, %v15506_v49  ;;  %v5636_v9 = vmul.f32 1.442695, %v5584_v42 }
 0x347   : > { %v5661_v32 = vadd.f32 %v15536_v13, %v5660_v34  ;;  %v15546_v60 = vpop.eup %13571  ;;  %13591 = vpow2.f32 %v5624_v62  ;;  %v5587_v62 = vsub.f32 %v15479_v29, %v15506_v49  ;;  %v5638_v51 = vmul.f32 1.442695, %v5585_v56 }
 0x348   : > { %v15551_v53 = vpop.eup %13573  ;;  %13593 = vpow2.f32 %v5626_v59  ;;  %v5588_v59 = vsub.f32 %v15469_v45, %v15506_v49  ;;  %v5640_v52 = vmul.f32 1.442695, %v5586_v43 }
 0x349   : > { %v5662_v40 = vadd.f32 %v15541_v63, %v5661_v32  ;;  %v15556_v5 = vpop.eup %13575  ;;  %13595 = vpow2.f32 %v5628_v37  ;;  %v5589_v37 = vsub.f32 %v15475_v17, %v15506_v49  ;;  %v5642_v29 = vmul.f32 1.442695, %v5587_v62 }
 0x34a   : > { %v15561_v12 = vpop.eup %13577  ;;  %13597 = vpow2.f32 %v5630_v30  ;;  %v5590_v30 = vsub.f32 %v15483_v6, %v15506_v49  ;;  %v5644_v45 = vmul.f32 1.442695, %v5588_v59 }
 0x34b   : > { %v5663_v47 = vadd.f32 %v15546_v60, %v5662_v40  ;;  %v15566_v28 = vpop.eup %13579  ;;  %13599 = vpow2.f32 %v5632_v22  ;;  %v5591_v22 = vsub.f32 %v15487_v38, %v15506_v49  ;;  %v5646_v17 = vmul.f32 1.442695, %v5589_v37 }
 0x34c   : > { %v15571_v10 = vpop.eup %13581  ;;  %13601 = vpow2.f32 %v5634_v55  ;;  %v5592_v55 = vsub.f32 %v15489_v15, %v15506_v49  ;;  %v5648_v6 = vmul.f32 1.442695, %v5590_v30 }
 0x34d   : > { %v5664_v46 = vadd.f32 %v15551_v53, %v5663_v47  ;;  %v15576_v54 = vpop.eup %13583  ;;  %13603 = vpow2.f32 %v5636_v9  ;;  %v5593_v9 = vsub.f32 %v15493_v26, %v15506_v49  ;;  %v5650_v38 = vmul.f32 1.442695, %v5591_v22 }
 0x34e   : > { %v15581_v18 = vpop.eup %13585  ;;  %13605 = vpow2.f32 %v5638_v51  ;;  %v5594_v51 = vsub.f32 %v15498_v4, %v15506_v49  ;;  %v5652_v15 = vmul.f32 1.442695, %v5592_v55 }
 0x34f   : > { %v5665_v24 = vadd.f32 %v15556_v5, %v5664_v46  ;;  %v15586_v36 = vpop.eup %13587  ;;  %13607 = vpow2.f32 %v5640_v52  ;;  %v5595_v52 = vsub.f32 %v15502_v2, %v15506_v49  ;;  %v5654_v26 = vmul.f32 1.442695, %v5593_v9 }
 0x350   : > { %v15591_v3 = vpop.eup %13589  ;;  %13609 = vpow2.f32 %v5642_v29  ;;  %v5656_v29 = vmul.f32 1.442695, %v5594_v51 }
 0x351   : > { %v5666_v57 = vadd.f32 %v15561_v12, %v5665_v24  ;;  %v15596_v41 = vpop.eup %13591  ;;  %13611 = vpow2.f32 %v5644_v45  ;;  %v5658_v30 = vmul.f32 1.442695, %v5595_v52  ;;  %v1857_v52 = vld [vmem:[%s17421_s8 + $0x8] sm:$0xff]  ;;  %s13829_s8 = sshll.u32 %s13956_s3, 4  ;;  %s13830_s8 = int_to_ptr.vmem [resolvable:$false] %s13829_s8 }
 0x352   : > { %v15601_v16 = vpop.eup %13593  ;;  %13613 = vpow2.f32 %v5646_v17 }
 0x353   : > { %v5667_v34 = vadd.f32 %v15566_v28, %v5666_v57  ;;  %v15606_v19 = vpop.eup %13595  ;;  %13615 = vpow2.f32 %v5648_v6 }
 0x354   : > { %v15611_v21 = vpop.eup %13597  ;;  %13617 = vpow2.f32 %v5650_v38 }
 0x355   : > { %v5668_v32 = vadd.f32 %v15571_v10, %v5667_v34  ;;  %v15616_v42 = vpop.eup %13599  ;;  %13619 = vpow2.f32 %v5652_v15 }
 0x356   : > { %v15621_v56 = vpop.eup %13601  ;;  %13621 = vpow2.f32 %v5654_v26  ;;  %v6846_v26 = vld [vmem:[%s14023_s24] sm:$0xff] }
 0x357   : > { %v5669_v40 = vadd.f32 %v15576_v54, %v5668_v32  ;;  %v15626_v43 = vpop.eup %13603  ;;  %13623 = vpow2.f32 %v5656_v29  ;;  %12930 = vmatpush3.msra.mxu1 %v6846_v26 }
 0x358   : > { %v15631_v62 = vpop.eup %13605  ;;  %13625 = vpow2.f32 %v5658_v30 }
 0x359   : > { %v5670_v47 = vadd.f32 %v15581_v18, %v5669_v40  ;;  %v15636_v59 = vpop.eup %13607 }
 0x35a   : > { %v15641_v37 = vpop.eup %13609 }
 0x35b   : > { %v5671_v46 = vadd.f32 %v15586_v36, %v5670_v47  ;;  %v15644_v4 = vpop.eup %13611 }
 0x35d   : > { %v5672_v24 = vadd.f32 %v15591_v3, %v5671_v46 }
 0x35f   : > { %v5673_v57 = vadd.f32 %v15596_v41, %v5672_v24 }
 0x361   : > { %v5674_v34 = vadd.f32 %v15601_v16, %v5673_v57 }
 0x363   : > { %v5675_v32 = vadd.f32 %v15606_v19, %v5674_v34 }
 0x365   : > { %v5676_v40 = vadd.f32 %v15611_v21, %v5675_v32 }
 0x367   : > { %v5677_v47 = vadd.f32 %v15616_v42, %v5676_v40  ;;  %v15647_v40 = vpop.eup %13613 }
 0x368   : > { %v15650_v49 = vpop.eup %13615 }
 0x369   : > { %v5678_v46 = vadd.f32 %v15621_v56, %v5677_v47  ;;  %v15653_v17 = vpop.eup %13617 }
 0x36a   : > { %v15656_v55 = vpop.eup %13619 }
 0x36b   : > { %v5679_v24 = vadd.f32 %v15626_v43, %v5678_v46  ;;  %v15659_v46 = vpop.eup %13621 }
 0x36c   : > { %v15662_v38 = vpop.eup %13623 }
 0x36d   : > { %v5680_v57 = vadd.f32 %v15631_v62, %v5679_v24  ;;  %v15665_v51 = vpop.eup %13625 }
 0x36f   : > { %v5681_v34 = vadd.f32 %v15636_v59, %v5680_v57  ;;  %v3108_v57 = vld [vmem:[%s14018_s19] sm:$0xff] }
 0x371   : > { %v5682_v32 = vadd.f32 %v15641_v37, %v5681_v34 }
 0x373   : > { %v5683_v45 = vadd.f32 %v15644_v4, %v5682_v32 }
 0x375   : > { %v5684_v2 = vadd.f32 %v15647_v40, %v5683_v45 }
 0x377   : > { %v5685_v22 = vadd.f32 %v15650_v49, %v5684_v2 }
 0x379   : > { %v5686_v47 = vadd.f32 %v15653_v17, %v5685_v22 }
 0x37b   : > { %v5687_v6 = vadd.f32 %v15656_v55, %v5686_v47 }
 0x37d   : > { %v5688_v9 = vadd.f32 %v15659_v46, %v5687_v6 }
 0x37f   : > { %v5689_v24 = vadd.f32 %v15662_v38, %v5688_v9 }
 0x381   : > { %v5690_v15 = vadd.f32 %v15665_v51, %v5689_v24 }
 0x383   : > { %5691 = vadd.xlane.f32.xlu1 %v5690_v15 }
 0x394   : > { %3112 = vperm.xlu1 %13562, %v3108_v57  }
 0x398   : > { %1865 = vperm.xlu1 %13562, %v1857_v52   ;;  %v17604_v52 = vld [vmem:[#allocation168_spill] sm:$0xff] }
 0x39c   : > { %6927 = vrot.lane.b32.xlu1 %v15152_v8, %s13954_s5  ;;  %s17732_s5 = sld [smem:[#allocation13_spill]] }
 0x410   : > { %v5692_v34 = vpop.xlane.xlu1 %5691 }
 0x411   : > { %13627 = vrcp.f32 %v5692_v34  ;;  %v17605_v34 = vld [vmem:[#allocation166_spill] sm:$0xff] }
 0x414   : > { %v15672_v29 = vpop.permute.xlu1 %3112 }
 0x415   : > { %v3195_v32 = vadd.f32 %v15281_v48, %v15672_v29  ;;  %v3193_v30 = vadd.f32 %v15275_v0, %v15672_v29  ;;  %v3272_v45 = vadd.f32 %v15290_v61, %v15672_v29  ;;  %v15686_v22 = vadd.f32 %v15344_v7, %v15672_v29 }
 0x416   : > { %v15690_v48 = vadd.f32 %v15354_v39, %v15672_v29  ;;  %v15694_v0 = vadd.f32 %v15350_v31, %v15672_v29  ;;  %v15698_v61 = vadd.f32 %v15364_v33, %v15672_v29  ;;  %v15702_v47 = vadd.f32 %v15360_v27, %v15672_v29 }
 0x417   : > { %5726 = vmatprep.subr.mxu0 %v3195_v32  ;;  %v15706_v7 = vadd.f32 %v15370_v58, %v15672_v29  ;;  %v15712_v39 = vadd.f32 %v15366_v11, %v15672_v29  ;;  %v15716_v31 = vadd.f32 %v15380_v20, %v15672_v29  ;;  %v15720_v33 = vadd.f32 %v15376_v35, %v15672_v29 }
 0x418   : > { %5727 = vmatpush1.xpose.msra.mxu0 %v3193_v30  ;;  %v15680_v2 = vpop.permute.xlu1 %1865  ;;  %v15724_v27 = vadd.f32 %v15386_v50, %v15672_v29  ;;  %v3270_v11 = vadd.f32 %v15286_v25, %v15672_v29  ;;  %v3349_v35 = vadd.f32 %v15300_v1, %v15672_v29  ;;  %v17599_v50 = vld [vmem:[#allocation159_spill] sm:$0xff]  ;;  %v17603_v1 = vld [vmem:[#allocation130_spill] sm:$0xff]  ;;  %v15754_v26 = vadd.f32 %v17604_v52, %v15672_v29 }
 0x419   : > { %5796 = vmatprep.subr.mxu0 %v3272_v45  ;;  %v1949_v8 = vadd.f32 %v15134_v44, %v15680_v2  ;;  %v17601_v25 = vld [vmem:[#allocation163_spill] sm:$0xff]  ;;  %v3426_v57 = vadd.f32 %v17603_v1, %v15672_v29  ;;  %v15758_v32 = vadd.f32 %v17605_v34, %v15672_v29  ;;  %v17614_v34 = vld [vmem:[#allocation98_spill] sm:$0xff] }
 0x41a   : > { %v15746_v24 = vadd.f32 %v17601_v25, %v15672_v29  ;;  %v17612_v1 = vld [vmem:[#allocation95_spill] sm:$0xff] }
 0x41b   : > { %v15708_v44 = vpop.eup %13627  ;;  %6931 = vmatprep.subr.mxu1 %v1949_v8  ;;  %v17606_v8 = vld [vmem:[#allocation122_spill] sm:$0xff]  ;;  %v15790_v52 = vadd.f32 %v17612_v1, %v15680_v2 }
 0x41c   : > { %v5695_v58 = vmul.f32 %v15708_v44, %v15530_v14  ;;  %v5694_v6 = vmul.f32 %v15708_v44, %v15528_v23  ;;  %v5697_v20 = vmul.f32 %v15708_v44, %v15541_v63  ;;  %v15738_v14 = vadd.f32 %v17599_v50, %v15672_v29  ;;  %v17600_v23 = vld [vmem:[#allocation165_spill] sm:$0xff]  ;;  %v17602_v63 = vld [vmem:[#allocation126_spill] sm:$0xff] }
 0x41d   : > { %v15742_v9 = vadd.f32 %v17600_v23, %v15672_v29  ;;  %v3347_v15 = vadd.f32 %v17602_v63, %v15672_v29  ;;  %v5696_v30 = vmul.f32 %v15708_v44, %v15536_v13  ;;  %v5699_v45 = vmul.f32 %v15708_v44, %v15551_v53  ;;  %v17609_v50 = vld [vmem:[#allocation94_spill] sm:$0xff]  ;;  %v17610_v13 = vld [vmem:[#allocation93_spill] sm:$0xff]  ;;  %v17611_v53 = vld [vmem:[#allocation96_spill] sm:$0xff]  ;;  %17613 = vst [vmem:[#allocation159_spill] sm:$0xff] %v15790_v52 }
 0x41e   : > { %5790 = vmatprep.mubr.f32.mxu0 %v5695_v58  ;;  %v15766_v58 = vadd.f32 %v17606_v8, %v15680_v2  ;;  %v15778_v23 = vadd.f32 %v17609_v50, %v15680_v2  ;;  %v15782_v25 = vadd.f32 %v17610_v13, %v15680_v2  ;;  %v15786_v63 = vadd.f32 %v17611_v53, %v15680_v2  ;;  %v17618_v50 = vld [vmem:[#allocation100_spill] sm:$0xff]  ;;  %v17620_v1 = vld [vmem:[#allocation102_spill] sm:$0xff] }
 0x41f   : > { %5791 = vmatmul.mubr.f32.vlgmr.msra.gmra.mrb[80].mxu0 %v5694_v6  ;;  %v17607_v6 = vld [vmem:[#allocation121_spill] sm:$0xff]  ;;  %v15794_v8 = vadd.f32 %v17614_v34, %v15680_v2  ;;  %v15802_v13 = vadd.f32 %v17618_v50, %v15680_v2  ;;  %v15810_v52 = vadd.f32 %v17620_v1, %v15680_v2  ;;  %v17628_v50 = vld [vmem:[#allocation106_spill] sm:$0xff] }
 0x420   : > { %5797 = vmatpush1.xpose.msra.mxu0 %v3270_v11  ;;  %5860 = vmatprep.mubr.f32.mxu0 %v5697_v20  ;;  %v15770_v11 = vadd.f32 %v17607_v6, %v15680_v2  ;;  %v17608_v20 = vld [vmem:[#allocation92_spill] sm:$0xff]  ;;  %v17616_v6 = vld [vmem:[#allocation97_spill] sm:$0xff] }
 0x421   : > { %5866 = vmatprep.subr.mxu0 %v3349_v35  ;;  %v15774_v35 = vadd.f32 %v17608_v20, %v15680_v2  ;;  %17615 = vst [vmem:[#allocation165_spill] sm:$0xff] %v15794_v8  ;;  %v15798_v20 = vadd.f32 %v17616_v6, %v15680_v2  ;;  %17621 = vst [vmem:[#allocation126_spill] sm:$0xff] %v15810_v52  ;;  %v17622_v34 = vld [vmem:[#allocation101_spill] sm:$0xff]  ;;  %v17624_v6 = vld [vmem:[#allocation104_spill] sm:$0xff] }
 0x422   : > { %v15814_v8 = vadd.f32 %v17622_v34, %v15680_v2  ;;  %v17630_v1 = vld [vmem:[#allocation105_spill] sm:$0xff]  ;;  %v17632_v34 = vld [vmem:[#allocation108_spill] sm:$0xff] }
 0x423   : > { %17617 = vst [vmem:[#allocation163_spill] sm:$0xff] %v15798_v20  ;;  %v15818_v20 = vadd.f32 %v17624_v6, %v15680_v2  ;;  %v15830_v52 = vadd.f32 %v17630_v1, %v15680_v2 }
 0x424   : > { %17623 = vst [vmem:[#allocation130_spill] sm:$0xff] %v15814_v8  ;;  %v15834_v8 = vadd.f32 %v17632_v34, %v15680_v2 }
 0x425   : > { %17625 = vst [vmem:[#allocation168_spill] sm:$0xff] %v15818_v20  ;;  %17631 = vst [vmem:[#allocation121_spill] sm:$0xff] %v15830_v52  ;;  %v17636_v20 = vld [vmem:[#allocation110_spill] sm:$0xff]  ;;  %v17642_v52 = vld [vmem:[#allocation111_spill] sm:$0xff] }
 0x426   : > { %17633 = vst [vmem:[#allocation92_spill] sm:$0xff] %v15834_v8  ;;  %v15854_v34 = vadd.f32 %v17642_v52, %v15680_v2  ;;  %v17644_v8 = vld [vmem:[#allocation114_spill] sm:$0xff] }
 0x427   : > { %5861 = vmatmul.mubr.f32.vlgmr.msra.gmra.mrb[80].mxu0 %v5696_v30  ;;  %v17619_v30 = vld [vmem:[#allocation99_spill] sm:$0xff] }
 0x428   : > { %5867 = vmatpush1.xpose.msra.mxu0 %v3347_v15  ;;  %5930 = vmatprep.mubr.f32.mxu0 %v5699_v45  ;;  %v15806_v53 = vadd.f32 %v17619_v30, %v15680_v2  ;;  %v17626_v15 = vld [vmem:[#allocation103_spill] sm:$0xff]  ;;  %v15826_v30 = vadd.f32 %v17628_v50, %v15680_v2  ;;  %17643 = vst [vmem:[#allocation98_spill] sm:$0xff] %v15854_v34  ;;  %v17653_v34 = vld [vmem:[#allocation117_spill] sm:$0xff] }
 0x429   : > { %5936 = vmatprep.subr.mxu0 %v3426_v57  ;;  %v15822_v45 = vadd.f32 %v17626_v15, %v15680_v2  ;;  %v17634_v57 = vld [vmem:[#allocation107_spill] sm:$0xff]  ;;  %v15842_v15 = vadd.f32 %v17636_v20, %v15680_v2 }
 0x42a   : > { %17629 = vst [vmem:[#allocation122_spill] sm:$0xff] %v15826_v30  ;;  %v15838_v6 = vadd.f32 %v17634_v57, %v15680_v2  ;;  %v17640_v30 = vld [vmem:[#allocation112_spill] sm:$0xff]  ;;  %v15858_v57 = vadd.f32 %v17644_v8, %v15680_v2  ;;  %v15878_v8 = vadd.f32 %v17653_v34, %v15680_v2  ;;  %v17658_v34 = vld [vmem:[#allocation135_spill] sm:$0xff] }
 0x42b   : > { %17627 = vst [vmem:[#allocation166_spill] sm:$0xff] %v15822_v45  ;;  %17637 = vst [vmem:[#allocation93_spill] sm:$0xff] %v15842_v15  ;;  %v17638_v45 = vld [vmem:[#allocation109_spill] sm:$0xff]  ;;  %v15850_v1 = vadd.f32 %v17640_v30, %v15680_v2  ;;  %v17648_v15 = vld [vmem:[#allocation116_spill] sm:$0xff] }
 0x42c   : > { %17635 = vst [vmem:[#allocation94_spill] sm:$0xff] %v15838_v6  ;;  %v15846_v50 = vadd.f32 %v17638_v45, %v15680_v2  ;;  %17645 = vst [vmem:[#allocation97_spill] sm:$0xff] %v15858_v57  ;;  %v17646_v6 = vld [vmem:[#allocation113_spill] sm:$0xff]  ;;  %v15866_v45 = vadd.f32 %v17648_v15, %v15680_v2  ;;  %v17656_v15 = vld [vmem:[#allocation119_spill] sm:$0xff] }
 0x42d   : > { %17641 = vst [vmem:[#allocation95_spill] sm:$0xff] %v15850_v1  ;;  %v15862_v20 = vadd.f32 %v17646_v6, %v15680_v2  ;;  %v17652_v1 = vld [vmem:[#allocation118_spill] sm:$0xff]  ;;  %17654 = vst [vmem:[#allocation101_spill] sm:$0xff] %v15878_v8  ;;  %v5698_v6 = vmul.f32 %v15708_v44, %v15546_v60  ;;  %v3503_v8 = vadd.f32 %v17658_v34, %v15672_v29 }
 0x42e   : > { %17639 = vst [vmem:[#allocation96_spill] sm:$0xff] %v15846_v50  ;;  %17649 = vst [vmem:[#allocation99_spill] sm:$0xff] %v15866_v45  ;;  %v17650_v50 = vld [vmem:[#allocation115_spill] sm:$0xff]  ;;  %v15874_v52 = vadd.f32 %v17652_v1, %v15680_v2  ;;  %v15888_v45 = vadd.f32 %v17656_v15, %v15680_v2  ;;  %v5701_v1 = vmul.f32 %v15708_v44, %v15561_v12 }
 0x42f   : > { %17647 = vst [vmem:[#allocation100_spill] sm:$0xff] %v15862_v20  ;;  %v15870_v30 = vadd.f32 %v17650_v50, %v15680_v2  ;;  %v17655_v20 = vld [vmem:[#allocation120_spill] sm:$0xff]  ;;  %5931 = vmatmul.mubr.f32.vlgmr.msra.gmra.mrb[80].mxu0 %v5698_v6  ;;  %v5700_v60 = vmul.f32 %v15708_v44, %v15556_v5  ;;  %v5703_v15 = vmul.f32 %v15708_v44, %v15571_v10 }
 0x430   : > { %v15884_v57 = vadd.f32 %v17655_v20, %v15680_v2  ;;  %v17657_v50 = vld [vmem:[#allocation128_spill] sm:$0xff]  ;;  %6000 = vmatprep.mubr.f32.mxu0 %v5701_v1  ;;  %v17659_v20 = vld [vmem:[#allocation133_spill] sm:$0xff]  ;;  %v5705_v5 = vmul.f32 %v15708_v44, %v15581_v18  ;;  %v17662_v1 = vld [vmem:[#allocation143_spill] sm:$0xff]  ;;  %v5704_v34 = vmul.f32 %v15708_v44, %v15576_v54  ;;  %v5709_v54 = vmul.f32 %v15708_v44, %v15601_v16 }
 0x431   : > { %17651 = vst [vmem:[#allocation102_spill] sm:$0xff] %v15870_v30  ;;  %v3424_v30 = vadd.f32 %v17657_v50, %v15672_v29  ;;  %v3501_v2 = vadd.f32 %v17659_v20, %v15672_v29  ;;  %v17660_v50 = vld [vmem:[#allocation138_spill] sm:$0xff]  ;;  %v3657_v10 = vadd.f32 %v17662_v1, %v15672_v29  ;;  %v5713_v16 = vmul.f32 %v15708_v44, %v15621_v56 }
 0x432   : > { %v3580_v12 = vadd.f32 %v17660_v50, %v15672_v29  ;;  %v17665_v50 = vld [vmem:[#allocation144_spill] sm:$0xff]  ;;  %v5717_v56 = vmul.f32 %v15708_v44, %v15641_v37  ;;  %v5721_v37 = vmul.f32 %v15708_v44, %v15653_v17  ;;  %v5725_v17 = vmul.f32 %v15708_v44, %v15665_v51 }
 0x433   : > { %5937 = vmatpush1.xpose.msra.mxu0 %v3424_v30  ;;  %v5702_v30 = vmul.f32 %v15708_v44, %v15566_v28  ;;  %v5707_v28 = vmul.f32 %v15708_v44, %v15591_v3 }
 0x434   : > { %6006 = vmatprep.subr.mxu0 %v3503_v8  ;;  %v17661_v8 = vld [vmem:[#allocation136_spill] sm:$0xff] }
 0x435   : > { %v3578_v6 = vadd.f32 %v17661_v8, %v15672_v29  ;;  %v5708_v8 = vmul.f32 %v15708_v44, %v15596_v41  ;;  %v5712_v41 = vmul.f32 %v15708_v44, %v15616_v42  ;;  %v5716_v42 = vmul.f32 %v15708_v44, %v15636_v59 }
 0x436   : > { %v5720_v59 = vmul.f32 %v15708_v44, %v15650_v49  ;;  %v5724_v49 = vmul.f32 %v15708_v44, %v15662_v38 }
 0x437   : > { %6001 = vmatmul.mubr.f32.vlgmr.msra.gmra.mrb[80].mxu0 %v5700_v60  ;;  %v17663_v60 = vld [vmem:[#allocation141_spill] sm:$0xff] }
 0x438   : > { %6007 = vmatpush1.xpose.msra.mxu0 %v3501_v2  ;;  %6070 = vmatprep.mubr.f32.mxu0 %v5703_v15  ;;  %v3655_v20 = vadd.f32 %v17663_v60, %v15672_v29  ;;  %v17664_v2 = vld [vmem:[#allocation146_spill] sm:$0xff]  ;;  %v5706_v15 = vmul.f32 %v15708_v44, %v15586_v36  ;;  %v5710_v36 = vmul.f32 %v15708_v44, %v15606_v19 }
 0x439   : > { %6076 = vmatprep.subr.mxu0 %v3580_v12  ;;  %v3734_v18 = vadd.f32 %v17664_v2, %v15672_v29  ;;  %v3732_v12 = vadd.f32 %v17665_v50, %v15672_v29  ;;  %v5714_v19 = vmul.f32 %v15708_v44, %v15626_v43  ;;  %v5718_v43 = vmul.f32 %v15708_v44, %v15644_v4 }
 0x43a   : > { %v5722_v4 = vmul.f32 %v15708_v44, %v15656_v55  ;;  %v15981_v55 = vpop.permute.xlu1 %6927 }
 0x43f   : > { %6071 = vmatmul.mubr.f32.vlgmr.msra.gmra.mrb[80].mxu0 %v5702_v30  ;;  %v17666_v30 = vld [vmem:[#allocation150_spill] sm:$0xff] }
 0x440   : > { %6077 = vmatpush1.xpose.msra.mxu0 %v3578_v6  ;;  %6140 = vmatprep.mubr.f32.mxu0 %v5705_v5  ;;  %v3811_v3 = vadd.f32 %v17666_v30, %v15672_v29  ;;  %v5711_v6 = vmul.f32 %v15708_v44, %v15611_v21  ;;  %v5715_v21 = vmul.f32 %v15708_v44, %v15631_v62  ;;  %v17668_v29 = vmov 0.0|0.0  }
 0x441   : > { %6146 = vmatprep.subr.mxu0 %v3657_v10  ;;  %v5719_v62 = vmul.f32 %v15708_v44, %v15647_v40  ;;  %v5723_v40 = vmul.f32 %v15708_v44, %v15659_v46  ;;  %v17667_v46 = vmov 0.0   ;;  %v17673_v44 = vld [vmem:[#allocation130_spill] sm:$0xff] }
 0x447   : > { %6141 = vmatmul.mubr.f32.vlgmr.msra.gmra.mrb[80].mxu0 %v5704_v34 }
 0x448   : > { %6147 = vmatpush1.xpose.msra.mxu0 %v3655_v20  ;;  %6210 = vmatprep.mubr.f32.mxu0 %v5707_v28 }
 0x449   : > { %6216 = vmatprep.subr.mxu0 %v3734_v18 }
 0x44f   : > { %6211 = vmatmul.mubr.f32.vlgmr.msra.gmra.mrb[80].mxu0 %v5706_v15 }
 0x450   : > { %6217 = vmatpush1.xpose.msra.mxu0 %v3732_v12  ;;  %6280 = vmatprep.mubr.f32.mxu0 %v5709_v54 }
 0x451   : > { %6286 = vmatprep.subr.mxu0 %v3811_v3 }
 0x457   : > { %6281 = vmatmul.mubr.f32.vlgmr.msra.gmra.mrb[80].mxu0 %v5708_v8 }
 0x458   : > { %6287 = vmatpush1.xpose.msra.mxu0 %v15686_v22  ;;  %6350 = vmatprep.mubr.f32.mxu0 %v5711_v6 }
 0x459   : > { %6356 = vmatprep.subr.mxu0 %v15690_v48 }
 0x45f   : > { %6351 = vmatmul.mubr.f32.vlgmr.msra.gmra.mrb[80].mxu0 %v5710_v36 }
 0x460   : > { %6357 = vmatpush1.xpose.msra.mxu0 %v15694_v0  ;;  %6420 = vmatprep.mubr.f32.mxu0 %v5713_v16  ;;  %v17669_v0 = vld [vmem:[#allocation159_spill] sm:$0xff] }
 0x461   : > { %6426 = vmatprep.subr.mxu0 %v15698_v61  ;;  %v17670_v61 = vld [vmem:[#allocation165_spill] sm:$0xff] }
 0x467   : > { %6421 = vmatmul.mubr.f32.vlgmr.msra.gmra.mrb[80].mxu0 %v5712_v41 }
 0x468   : > { %6427 = vmatpush1.xpose.msra.mxu0 %v15702_v47  ;;  %6490 = vmatprep.mubr.f32.mxu0 %v5715_v21  ;;  %v17671_v47 = vld [vmem:[#allocation163_spill] sm:$0xff] }
 0x469   : > { %6496 = vmatprep.subr.mxu0 %v15706_v7  ;;  %v17672_v7 = vld [vmem:[#allocation126_spill] sm:$0xff] }
 0x46f   : > { %6491 = vmatmul.mubr.f32.vlgmr.msra.gmra.mrb[80].mxu0 %v5714_v19 }
 0x470   : > { %6497 = vmatpush1.xpose.msra.mxu0 %v15712_v39  ;;  %6560 = vmatprep.mubr.f32.mxu0 %v5717_v56  ;;  %v17674_v39 = vld [vmem:[#allocation168_spill] sm:$0xff] }
 0x471   : > { %6566 = vmatprep.subr.mxu0 %v15716_v31  ;;  %v17675_v31 = vld [vmem:[#allocation166_spill] sm:$0xff] }
 0x477   : > { %6561 = vmatmul.mubr.f32.vlgmr.msra.gmra.mrb[80].mxu0 %v5716_v42 }
 0x478   : > { %6567 = vmatpush1.xpose.msra.mxu0 %v15720_v33  ;;  %6630 = vmatprep.mubr.f32.mxu0 %v5719_v62  ;;  %v17676_v33 = vld [vmem:[#allocation122_spill] sm:$0xff] }
 0x479   : > { %6636 = vmatprep.subr.mxu0 %v15724_v27  ;;  %v17677_v27 = vld [vmem:[#allocation121_spill] sm:$0xff] }
 0x47f   : > { %6631 = vmatmul.mubr.f32.vlgmr.msra.gmra.mrb[80].mxu0 %v5718_v43 }
 0x480   : > { %6637 = vmatpush1.xpose.msra.mxu0 %v15738_v14  ;;  %6700 = vmatprep.mubr.f32.mxu0 %v5721_v37  ;;  %v17678_v14 = vld [vmem:[#allocation92_spill] sm:$0xff] }
 0x481   : > { %6706 = vmatprep.subr.mxu0 %v15742_v9  ;;  %v17679_v9 = vld [vmem:[#allocation94_spill] sm:$0xff] }
 0x487   : > { %6701 = vmatmul.mubr.f32.vlgmr.msra.gmra.mrb[80].mxu0 %v5720_v59 }
 0x488   : > { %6707 = vmatpush1.xpose.msra.mxu0 %v15746_v24  ;;  %6770 = vmatprep.mubr.f32.mxu0 %v5723_v40  ;;  %v17680_v24 = vld [vmem:[#allocation93_spill] sm:$0xff] }
 0x489   : > { %6776 = vmatprep.subr.mxu0 %v15754_v26  ;;  %v17681_v26 = vld [vmem:[#allocation96_spill] sm:$0xff] }
 0x48f   : > { %6771 = vmatmul.mubr.f32.vlgmr.msra.gmra.mrb[80].mxu0 %v5722_v4 }
 0x490   : > { %6777 = vmatpush1.xpose.msra.mxu0 %v15758_v32  ;;  %6840 = vmatprep.mubr.f32.mxu0 %v5725_v17  ;;  %v17682_v32 = vld [vmem:[#allocation95_spill] sm:$0xff] }
 0x491   : > { %7996 = vmatprep.subr.mxu0 %v15766_v58  ;;  %v17683_v58 = vld [vmem:[#allocation98_spill] sm:$0xff] }
 0x497   : > { %6841 = vmatmul.mubr.f32.vlgmr.msra.gmra.mrb[80].mxu0 %v5724_v49 }
 0x498   : > { %7997 = vmatpush1.msra.mxu0 %v15770_v11  ;;  %8060 = vmatprep.mubr.f32.mxu0 %v17667_v46  ;;  %v17684_v11 = vld [vmem:[#allocation97_spill] sm:$0xff] }
 0x499   : > { %13265 = vmatprep.subr.bf16.mxu0 %v17668_v29 }
 0x49b   : > { %12796 = vmatmul.mubr.msk.f32.vlgmr.msra.gmra.mrb[82].mxu0 %vm4359_vm2, %v15981_v55 }
 0x49c   : > { %12947 = vmatprep.mubr.msk.f32.mxu0 %vm13951_vm0, %v17667_v46 }
 0x56a   : > { %v6842_v51 = vpop.f32.mrb[80].mxu0 }
 0x56b   : > { %v6844_v22 = vpop.f32.mrb[81].mxu0  ;;  %12932 = vmatmul.mubr.msk.f32.vlgmr.msra.gmra.mrb[82].mxu1 %vm4359_vm2, %v6842_v51 }
 0x56c   : > { %6932 = vmatpush1.msra.mxu1 %v15774_v35  ;;  %6995 = vmatprep.mubr.f32.mxu1 %v17667_v46  ;;  %v17685_v35 = vld [vmem:[#allocation100_spill] sm:$0xff] }
 0x56d   : > { %7002 = vmatprep.subr.mxu1 %v15778_v23  ;;  %v17686_v23 = vld [vmem:[#allocation99_spill] sm:$0xff] }
 0x56e   : > { %v15991_v38 = vpop.f32.mrb[82].mxu0 }
 0x56f   : > { %12781 = vmatmul.mubr.msk.f32.vlgmr.msra.gmra.mrb[84].mxu1 %vm4359_vm2, %v15981_v55  ;;  %v15995_v48 = vpop.f32.mrb[83].mxu0 }
 0x570   : > { %7003 = vmatpush1.msra.mxu1 %v15782_v25  ;;  %7066 = vmatprep.mubr.f32.mxu1 %v17667_v46  ;;  %v17687_v25 = vld [vmem:[#allocation102_spill] sm:$0xff] }
 0x571   : > { %7073 = vmatprep.subr.mxu1 %v15786_v63  ;;  %v17688_v63 = vld [vmem:[#allocation101_spill] sm:$0xff] }
 0x573   : > { %12782 = vmatmul.mubr.msk.f32.vlgmr.msra.gmra.mrb[86].mxu1 %vm4359_vm2, %v15981_v55 }
 0x574   : > { %7074 = vmatpush1.msra.mxu1 %v17669_v0  ;;  %7137 = vmatprep.mubr.f32.mxu1 %v17667_v46 }
 0x575   : > { %7144 = vmatprep.subr.mxu1 %v17670_v61 }
 0x577   : > { %12783 = vmatmul.mubr.msk.f32.vlgmr.msra.gmra.mrb[88].mxu1 %vm4359_vm2, %v15981_v55 }
 0x578   : > { %7145 = vmatpush1.msra.mxu1 %v17671_v47  ;;  %7208 = vmatprep.mubr.f32.mxu1 %v17667_v46 }
 0x579   : > { %7215 = vmatprep.subr.mxu1 %v15802_v13 }
 0x57b   : > { %12784 = vmatmul.mubr.msk.f32.vlgmr.msra.gmra.mrb[90].mxu1 %vm4359_vm2, %v15981_v55 }
 0x57c   : > { %7216 = vmatpush1.msra.mxu1 %v15806_v53  ;;  %7279 = vmatprep.mubr.f32.mxu1 %v17667_v46 }
 0x57d   : > { %7286 = vmatprep.subr.mxu1 %v17672_v7 }
 0x57f   : > { %12785 = vmatmul.mubr.msk.f32.vlgmr.msra.gmra.mrb[92].mxu1 %vm4359_vm2, %v15981_v55 }
 0x580   : > { %7287 = vmatpush1.msra.mxu1 %v17673_v44  ;;  %7350 = vmatprep.mubr.f32.mxu1 %v17667_v46 }
 0x581   : > { %7357 = vmatprep.subr.mxu1 %v17674_v39 }
 0x583   : > { %12786 = vmatmul.mubr.msk.f32.vlgmr.msra.gmra.mrb[94].mxu1 %vm4359_vm2, %v15981_v55 }
 0x584   : > { %7358 = vmatpush1.msra.mxu1 %v17675_v31  ;;  %7421 = vmatprep.mubr.f32.mxu1 %v17667_v46 }
 0x585   : > { %7428 = vmatprep.subr.mxu1 %v17676_v33 }
 0x587   : > { %12787 = vmatmul.mubr.msk.f32.vlgmr.msra.gmra.mrb[96].mxu1 %vm4359_vm2, %v15981_v55 }
 0x588   : > { %7429 = vmatpush1.msra.mxu1 %v17677_v27  ;;  %7492 = vmatprep.mubr.f32.mxu1 %v17667_v46 }
 0x589   : > { %7499 = vmatprep.subr.mxu1 %v17678_v14 }
 0x58b   : > { %12788 = vmatmul.mubr.msk.f32.vlgmr.msra.gmra.mrb[98].mxu1 %vm4359_vm2, %v15981_v55 }
 0x58c   : > { %7500 = vmatpush1.msra.mxu1 %v17679_v9  ;;  %7563 = vmatprep.mubr.f32.mxu1 %v17667_v46 }
 0x58d   : > { %7570 = vmatprep.subr.mxu1 %v17680_v24 }
 0x58f   : > { %12789 = vmatmul.mubr.msk.f32.vlgmr.msra.gmra.mrb[100].mxu1 %vm4359_vm2, %v15981_v55 }
 0x590   : > { %7571 = vmatpush1.msra.mxu1 %v17681_v26  ;;  %7634 = vmatprep.mubr.f32.mxu1 %v17667_v46 }
 0x591   : > { %7641 = vmatprep.subr.mxu1 %v17682_v32 }
 0x593   : > { %12790 = vmatmul.mubr.msk.f32.vlgmr.msra.gmra.mrb[102].mxu1 %vm4359_vm2, %v15981_v55 }
 0x594   : > { %7642 = vmatpush1.msra.mxu1 %v17683_v58  ;;  %7705 = vmatprep.mubr.f32.mxu1 %v17667_v46 }
 0x595   : > { %7712 = vmatprep.subr.mxu1 %v17684_v11 }
 0x597   : > { %12791 = vmatmul.mubr.msk.f32.vlgmr.msra.gmra.mrb[104].mxu1 %vm4359_vm2, %v15981_v55 }
 0x598   : > { %7713 = vmatpush1.msra.mxu1 %v17685_v35  ;;  %7776 = vmatprep.mubr.f32.mxu1 %v17667_v46 }
 0x599   : > { %7783 = vmatprep.subr.mxu1 %v17686_v23 }
 0x59b   : > { %12792 = vmatmul.mubr.msk.f32.vlgmr.msra.gmra.mrb[106].mxu1 %vm4359_vm2, %v15981_v55 }
 0x59c   : > { %7784 = vmatpush1.msra.mxu1 %v17687_v25  ;;  %7847 = vmatprep.mubr.f32.mxu1 %v17667_v46 }
 0x59d   : > { %7854 = vmatprep.subr.mxu1 %v15874_v52 }
 0x59f   : > { %12793 = vmatmul.mubr.msk.f32.vlgmr.msra.gmra.mrb[108].mxu1 %vm4359_vm2, %v15981_v55 }
 0x5a0   : > { %7855 = vmatpush1.msra.mxu1 %v17688_v63  ;;  %7918 = vmatprep.mubr.f32.mxu1 %v17667_v46 }
 0x5a1   : > { %7925 = vmatprep.subr.mxu1 %v15884_v57 }
 0x5a3   : > { %12794 = vmatmul.mubr.msk.f32.vlgmr.msra.gmra.mrb[110].mxu1 %vm4359_vm2, %v15981_v55 }
 0x5a4   : > { %7926 = vmatpush1.msra.mxu1 %v15888_v45  ;;  %7989 = vmatprep.mubr.f32.mxu1 %v17667_v46 }
 0x5a7   : > { %12795 = vmatmul.mubr.msk.f32.vlgmr.msra.gmra.mrb[112].mxu1 %vm4359_vm2, %v15981_v55 }
 0x642   : > { %v6997_v13 = vpop.f32.mrb[84].mxu1 }
 0x643   : > { %v6999_v53 = vpop.f32.mrb[85].mxu1  ;;  %v16068_v16 = vmul.f32 0.35355338, %v6997_v13 }
 0x644   : > { %v16090_v49 = vmul.f32 0.35355338, %v6999_v53 }
 0x646   : > { %v7068_v52 = vpop.f32.mrb[86].mxu1 }
 0x647   : > { %v7070_v5 = vpop.f32.mrb[87].mxu1  ;;  %v16070_v41 = vmul.f32 0.35355338, %v7068_v52 }
 0x648   : > { %v16074_v19 = vmul.f32 0.35355338, %v7070_v5 }
 0x64a   : > { %v7139_v1 = vpop.f32.mrb[88].mxu1 }
 0x64b   : > { %v7141_v10 = vpop.f32.mrb[89].mxu1  ;;  %v16076_v56 = vmul.f32 0.35355338, %v7139_v1 }
 0x64c   : > { %v16080_v62 = vmul.f32 0.35355338, %v7141_v10 }
 0x64d   : > { %v8099_v0 = vmax.f32 %v16068_v16, %v16076_v56 }
 0x64e   : > { %v7210_v34 = vpop.f32.mrb[90].mxu1  ;;  %v8100_v44 = vmax.f32 %v16090_v49, %v16080_v62 }
 0x64f   : > { %v7212_v60 = vpop.f32.mrb[91].mxu1  ;;  %v16066_v6 = vmul.f32 0.35355338, %v7210_v34 }
 0x650   : > { %v16072_v21 = vmul.f32 0.35355338, %v7212_v60 }
 0x651   : > { %v8101_v59 = vmax.f32 %v16070_v41, %v16066_v6 }
 0x652   : > { %v7281_v20 = vpop.f32.mrb[92].mxu1  ;;  %v8102_v55 = vmax.f32 %v16074_v19, %v16072_v21 }
 0x653   : > { %v7283_v57 = vpop.f32.mrb[93].mxu1  ;;  %v16086_v40 = vmul.f32 0.35355338, %v7281_v20 }
 0x654   : > { %v16094_v51 = vmul.f32 0.35355338, %v7283_v57 }
 0x655   : > { %v8103_v14 = vmax.f32 %v8099_v0, %v16086_v40 }
 0x656   : > { %v7352_v28 = vpop.f32.mrb[94].mxu1  ;;  %v8104_v58 = vmax.f32 %v8100_v44, %v16094_v51 }
 0x657   : > { %v7354_v2 = vpop.f32.mrb[95].mxu1  ;;  %v16078_v42 = vmul.f32 0.35355338, %v7352_v28 }
 0x658   : > { %v16082_v43 = vmul.f32 0.35355338, %v7354_v2 }
 0x659   : > { %v8105_v61 = vmax.f32 %v8101_v59, %v16078_v42 }
 0x65a   : > { %v7423_v18 = vpop.f32.mrb[96].mxu1  ;;  %v8106_v39 = vmax.f32 %v8102_v55, %v16082_v43 }
 0x65b   : > { %v7425_v15 = vpop.f32.mrb[97].mxu1  ;;  %v16101_v47 = vmul.f32 0.35355338, %v7423_v18 }
 0x65c   : > { %v16108_v31 = vmul.f32 0.35355338, %v7425_v15 }
 0x65d   : > { %v8107_v25 = vmax.f32 %v8103_v14, %v16101_v47 }
 0x65e   : > { %v7494_v45 = vpop.f32.mrb[98].mxu1  ;;  %v8108_v53 = vmax.f32 %v8104_v58, %v16108_v31 }
 0x65f   : > { %v7496_v50 = vpop.f32.mrb[99].mxu1  ;;  %v16088_v4 = vmul.f32 0.35355338, %v7494_v45 }
 0x660   : > { %v16096_v22 = vmul.f32 0.35355338, %v7496_v50 }
 0x661   : > { %v8109_v9 = vmax.f32 %v8105_v61, %v16088_v4 }
 0x662   : > { %v7565_v12 = vpop.f32.mrb[100].mxu1  ;;  %v8110_v11 = vmax.f32 %v8106_v39, %v16096_v22 }
 0x663   : > { %v7567_v54 = vpop.f32.mrb[101].mxu1  ;;  %v16114_v24 = vmul.f32 0.35355338, %v7565_v12  ;;  %v16147_v12 = vmul.f32 0.35355338, %v15991_v38 }
 0x664   : > { %v16120_v35 = vmul.f32 0.35355338, %v7567_v54  ;;  %v16150_v54 = vmul.f32 0.35355338, %v15995_v48 }
 0x665   : > { %v8111_v10 = vmax.f32 %v8107_v25, %v16114_v24 }
 0x666   : > { %v7636_v30 = vpop.f32.mrb[102].mxu1  ;;  %v8112_v28 = vmax.f32 %v8108_v53, %v16120_v35 }
 0x667   : > { %v7638_v3 = vpop.f32.mrb[103].mxu1  ;;  %v16103_v7 = vmul.f32 0.35355338, %v7636_v30 }
 0x668   : > { %v16110_v33 = vmul.f32 0.35355338, %v7638_v3 }
 0x669   : > { %v8113_v63 = vmax.f32 %v8109_v9, %v16103_v7 }
 0x66a   : > { %v7707_v8 = vpop.f32.mrb[104].mxu1  ;;  %v8114_v52 = vmax.f32 %v8110_v11, %v16110_v33 }
 0x66b   : > { %v7709_v36 = vpop.f32.mrb[105].mxu1  ;;  %v16126_v13 = vmul.f32 0.35355338, %v7707_v8 }
 0x66c   : > { %v16130_v5 = vmul.f32 0.35355338, %v7709_v36 }
 0x66d   : > { %v8115_v45 = vmax.f32 %v8111_v10, %v16126_v13 }
 0x66e   : > { %v7778_v37 = vpop.f32.mrb[106].mxu1  ;;  %v8116_v30 = vmax.f32 %v8112_v28, %v16130_v5 }
 0x66f   : > { %v7780_v17 = vpop.f32.mrb[107].mxu1  ;;  %v16116_v26 = vmul.f32 0.35355338, %v7778_v37 }
 0x670   : > { %v16122_v23 = vmul.f32 0.35355338, %v7780_v17 }
 0x671   : > { %v8117_v34 = vmax.f32 %v8113_v63, %v16116_v26 }
 0x672   : > { %v7849_v27 = vpop.f32.mrb[108].mxu1  ;;  %v8118_v2 = vmax.f32 %v8114_v52, %v16122_v23 }
 0x673   : > { %v7851_v32 = vpop.f32.mrb[109].mxu1  ;;  %v16134_v60 = vmul.f32 0.35355338, %v7849_v27 }
 0x674   : > { %v16140_v18 = vmul.f32 0.35355338, %v7851_v32 }
 0x675   : > { %v8119_v36 = vmax.f32 %v8115_v45, %v16134_v60 }
 0x676   : > { %v7920_v1 = vpop.f32.mrb[110].mxu1  ;;  %v8120_v17 = vmax.f32 %v8116_v30, %v16140_v18 }
 0x677   : > { %v16136_v20 = vmul.f32 0.35355338, %v7920_v1  ;;  %v7922_v57 = vpop.f32.mrb[111].mxu1 }
 0x678   : > { %v16142_v15 = vmul.f32 0.35355338, %v7922_v57 }
 0x679   : > { %v8121_v50 = vmax.f32 %v8117_v34, %v16136_v20 }
 0x67a   : > { %v8122_v3 = vmax.f32 %v8118_v2, %v16142_v15  ;;  %v7991_v8 = vpop.f32.mrb[112].mxu1 }
 0x67b   : > { %v16155_v37 = vmul.f32 0.35355338, %v7991_v8  ;;  %v7993_v59 = vpop.f32.mrb[113].mxu1  ;;  %v8125_v55 = vmax.f32 %v8121_v50, %v16147_v12 }
 0x67c   : > { %v8126_v38 = vmax.f32 %v8122_v3, %v16150_v54  ;;  %v16160_v0 = vmul.f32 0.35355338, %v7993_v59 }
 0x67d   : > { %v8123_v48 = vmax.f32 %v8119_v36, %v16155_v37 }
 0x67e   : > { %v8124_v61 = vmax.f32 %v8120_v17, %v16160_v0  ;;  %v8128_v39 = vmax.f32 %v8125_v55, %v8126_v38 }
 0x680   : > { %v8127_v44 = vmax.f32 %v8123_v48, %v8124_v61 }
 0x682   : > { %v8129_v27 = vmax.f32 %v8127_v44, %v8128_v39 }
 0x684   : > { %8130 = vmax.xlane.f32.xlu1 %v8129_v27 }
 0x711   : > { %v16164_v14 = vpop.xlane.xlu1 %8130 }
 0x712   : > { %v8132_v9 = vsub.f32 %v16068_v16, %v16164_v14  ;;  %v8133_v32 = vsub.f32 %v16090_v49, %v16164_v14  ;;  %v8134_v58 = vsub.f32 %v16070_v41, %v16164_v14  ;;  %v8135_v11 = vsub.f32 %v16074_v19, %v16164_v14 }
 0x713   : > { %v8136_v53 = vsub.f32 %v16076_v56, %v16164_v14  ;;  %v8137_v1 = vsub.f32 %v16080_v62, %v16164_v14  ;;  %v8138_v49 = vsub.f32 %v16066_v6, %v16164_v14  ;;  %v8139_v19 = vsub.f32 %v16072_v21, %v16164_v14 }
 0x714   : > { %v8164_v25 = vmul.f32 1.442695, %v8132_v9  ;;  %v8166_v63 = vmul.f32 1.442695, %v8133_v32  ;;  %v8168_v52 = vmul.f32 1.442695, %v8134_v58  ;;  %v8140_v56 = vsub.f32 %v16086_v40, %v16164_v14 }
 0x715   : > { %v8170_v16 = vmul.f32 1.442695, %v8135_v11  ;;  %v8172_v41 = vmul.f32 1.442695, %v8136_v53  ;;  %v8174_v10 = vmul.f32 1.442695, %v8137_v1  ;;  %v8141_v62 = vsub.f32 %v16094_v51, %v16164_v14 }
 0x716   : > { %13629 = vpow2.f32 %v8164_v25  ;;  %v8176_v34 = vmul.f32 1.442695, %v8138_v49  ;;  %v8178_v57 = vmul.f32 1.442695, %v8139_v19  ;;  %v8142_v2 = vsub.f32 %v16078_v42, %v16164_v14 }
 0x717   : > { %13631 = vpow2.f32 %v8166_v63  ;;  %v8180_v21 = vmul.f32 1.442695, %v8140_v56  ;;  %v8143_v50 = vsub.f32 %v16082_v43, %v16164_v14  ;;  %v8182_v51 = vmul.f32 1.442695, %v8141_v62 }
 0x718   : > { %13633 = vpow2.f32 %v8168_v52  ;;  %v8144_v8 = vsub.f32 %v16101_v47, %v16164_v14  ;;  %v8184_v42 = vmul.f32 1.442695, %v8142_v2  ;;  %v8145_v17 = vsub.f32 %v16108_v31, %v16164_v14 }
 0x719   : > { %13635 = vpow2.f32 %v8170_v16  ;;  %v8186_v43 = vmul.f32 1.442695, %v8143_v50  ;;  %v8146_v48 = vsub.f32 %v16088_v4, %v16164_v14  ;;  %v8147_v39 = vsub.f32 %v16096_v22, %v16164_v14 }
 0x71a   : > { %13637 = vpow2.f32 %v8172_v41  ;;  %v8188_v47 = vmul.f32 1.442695, %v8144_v8  ;;  %v8190_v31 = vmul.f32 1.442695, %v8145_v17  ;;  %v8148_v32 = vsub.f32 %v16114_v24, %v16164_v14 }
 0x71b   : > { %13639 = vpow2.f32 %v8174_v10  ;;  %v8192_v4 = vmul.f32 1.442695, %v8146_v48  ;;  %v8149_v25 = vsub.f32 %v16120_v35, %v16164_v14  ;;  %v8194_v22 = vmul.f32 1.442695, %v8147_v39 }
 0x71c   : > { %13641 = vpow2.f32 %v8176_v34  ;;  %v8150_v52 = vsub.f32 %v16103_v7, %v16164_v14  ;;  %v8196_v24 = vmul.f32 1.442695, %v8148_v32  ;;  %v8151_v49 = vsub.f32 %v16110_v33, %v16164_v14 }
 0x71d   : > { %13643 = vpow2.f32 %v8178_v57  ;;  %v8198_v35 = vmul.f32 1.442695, %v8149_v25  ;;  %v8152_v10 = vsub.f32 %v16126_v13, %v16164_v14  ;;  %v8153_v62 = vsub.f32 %v16130_v5, %v16164_v14 }
 0x71e   : > { %13645 = vpow2.f32 %v8180_v21  ;;  %v8200_v7 = vmul.f32 1.442695, %v8150_v52  ;;  %v8202_v33 = vmul.f32 1.442695, %v8151_v49  ;;  %v8154_v21 = vsub.f32 %v16116_v26, %v16164_v14 }
 0x71f   : > { %13647 = vpow2.f32 %v8182_v51  ;;  %v8204_v13 = vmul.f32 1.442695, %v8152_v10  ;;  %v8155_v51 = vsub.f32 %v16122_v23, %v16164_v14  ;;  %v8206_v5 = vmul.f32 1.442695, %v8153_v62 }
 0x720   : > { %v16186_v28 = vpop.eup %13629  ;;  %13649 = vpow2.f32 %v8184_v42  ;;  %v8156_v42 = vsub.f32 %v16134_v60, %v16164_v14  ;;  %v8208_v26 = vmul.f32 1.442695, %v8154_v21 }
 0x721   : > { %v16188_v6 = vpop.eup %13631  ;;  %13651 = vpow2.f32 %v8186_v43  ;;  %v8157_v43 = vsub.f32 %v16140_v18, %v16164_v14  ;;  %v8210_v23 = vmul.f32 1.442695, %v8155_v51 }
 0x722   : > { %v8228_v45 = vadd.f32 %v16188_v6, %v16186_v28  ;;  %v16194_v40 = vpop.eup %13633  ;;  %13653 = vpow2.f32 %v8188_v47  ;;  %v8158_v47 = vsub.f32 %v16136_v20, %v16164_v14  ;;  %v8212_v60 = vmul.f32 1.442695, %v8156_v42 }
 0x723   : > { %v16199_v3 = vpop.eup %13635  ;;  %13655 = vpow2.f32 %v8190_v31  ;;  %v8159_v31 = vsub.f32 %v16142_v15, %v16164_v14  ;;  %v8214_v18 = vmul.f32 1.442695, %v8157_v43 }
 0x724   : > { %v8229_v30 = vadd.f32 %v16194_v40, %v8228_v45  ;;  %v16204_v59 = vpop.eup %13637  ;;  %13657 = vpow2.f32 %v8192_v4  ;;  %v8160_v4 = vsub.f32 %v16155_v37, %v16164_v14  ;;  %v8216_v20 = vmul.f32 1.442695, %v8158_v47 }
 0x725   : > { %v16209_v38 = vpop.eup %13639  ;;  %13659 = vpow2.f32 %v8194_v22  ;;  %v8161_v22 = vsub.f32 %v16160_v0, %v16164_v14  ;;  %v8218_v15 = vmul.f32 1.442695, %v8159_v31 }
 0x726   : > { %v8230_v36 = vadd.f32 %v16199_v3, %v8229_v30  ;;  %v16214_v44 = vpop.eup %13641  ;;  %13661 = vpow2.f32 %v8196_v24  ;;  %v8162_v24 = vsub.f32 %v16147_v12, %v16164_v14  ;;  %v8220_v37 = vmul.f32 1.442695, %v8160_v4 }
 0x727   : > { %v16219_v9 = vpop.eup %13643  ;;  %13663 = vpow2.f32 %v8198_v35  ;;  %v8163_v35 = vsub.f32 %v16150_v54, %v16164_v14  ;;  %v8222_v0 = vmul.f32 1.442695, %v8161_v22 }
 0x728   : > { %v8231_v55 = vadd.f32 %v16204_v59, %v8230_v36  ;;  %v16224_v11 = vpop.eup %13645  ;;  %13665 = vpow2.f32 %v8200_v7  ;;  %v8224_v7 = vmul.f32 1.442695, %v8162_v24 }
 0x729   : > { %v16229_v53 = vpop.eup %13647  ;;  %13667 = vpow2.f32 %v8202_v33  ;;  %v8226_v62 = vmul.f32 1.442695, %v8163_v35 }
 0x72a   : > { %v8232_v61 = vadd.f32 %v16209_v38, %v8231_v55  ;;  %v16234_v16 = vpop.eup %13649  ;;  %13669 = vpow2.f32 %v8204_v13 }
 0x72b   : > { %v16239_v19 = vpop.eup %13651  ;;  %13671 = vpow2.f32 %v8206_v5 }
 0x72c   : > { %v8233_v27 = vadd.f32 %v16214_v44, %v8232_v61  ;;  %v16244_v34 = vpop.eup %13653  ;;  %13673 = vpow2.f32 %v8208_v26 }
 0x72d   : > { %v16249_v2 = vpop.eup %13655  ;;  %13675 = vpow2.f32 %v8210_v23 }
 0x72e   : > { %v8234_v58 = vadd.f32 %v16219_v9, %v8233_v27  ;;  %v16254_v50 = vpop.eup %13657  ;;  %13677 = vpow2.f32 %v8212_v60 }
 0x72f   : > { %v16259_v8 = vpop.eup %13659  ;;  %13679 = vpow2.f32 %v8214_v18  ;;  %v17690_v18 = vld [vmem:[#allocation123_spill] sm:$0xff] }
 0x730   : > { %v8235_v63 = vadd.f32 %v16224_v11, %v8234_v58  ;;  %v16264_v17 = vpop.eup %13661  ;;  %13681 = vpow2.f32 %v8216_v20  ;;  %v17691_v20 = vld [vmem:[#allocation127_spill] sm:$0xff] }
 0x731   : > { %v16269_v48 = vpop.eup %13663  ;;  %13683 = vpow2.f32 %v8218_v15 }
 0x732   : > { %v8236_v1 = vadd.f32 %v16229_v53, %v8235_v63  ;;  %v16274_v39 = vpop.eup %13665  ;;  %13685 = vpow2.f32 %v8220_v37 }
 0x733   : > { %v16279_v32 = vpop.eup %13667  ;;  %13687 = vpow2.f32 %v8222_v0 }
 0x734   : > { %v8237_v41 = vadd.f32 %v16234_v16, %v8236_v1  ;;  %v16284_v25 = vpop.eup %13669  ;;  %13689 = vpow2.f32 %v8224_v7  ;;  %v17696_v7 = vld [vmem:[#allocation155_spill] sm:$0xff] }
 0x735   : > { %v16289_v52 = vpop.eup %13671  ;;  %13691 = vpow2.f32 %v8226_v62 }
 0x736   : > { %v8238_v56 = vadd.f32 %v16239_v19, %v8237_v41  ;;  %v16294_v49 = vpop.eup %13673 }
 0x737   : > { %v16299_v10 = vpop.eup %13675 }
 0x738   : > { %v8239_v57 = vadd.f32 %v16244_v34, %v8238_v56  ;;  %v16302_v12 = vpop.eup %13677 }
 0x73a   : > { %v8240_v45 = vadd.f32 %v16249_v2, %v8239_v57  ;;  %v16305_v57 = vpop.eup %13679 }
 0x73b   : > { %v16308_v14 = vpop.eup %13681 }
 0x73c   : > { %v8241_v30 = vadd.f32 %v16254_v50, %v8240_v45  ;;  %v16311_v13 = vpop.eup %13683 }
 0x73d   : > { %v16314_v51 = vpop.eup %13685 }
 0x73e   : > { %v8242_v36 = vadd.f32 %v16259_v8, %v8241_v30  ;;  %v16317_v30 = vpop.eup %13687 }
 0x73f   : > { %v16320_v26 = vpop.eup %13689 }
 0x740   : > { %v8243_v55 = vadd.f32 %v16264_v17, %v8242_v36  ;;  %v16323_v43 = vpop.eup %13691 }
 0x742   : > { %v8244_v61 = vadd.f32 %v16269_v48, %v8243_v55  ;;  %v3109_v55 = vld [vmem:[%s14018_s19 + $0x8] sm:$0xff] }
 0x744   : > { %v8245_v27 = vadd.f32 %v16274_v39, %v8244_v61  ;;  %v17689_v61 = vld [vmem:[#allocation124_spill] sm:$0xff] }
 0x746   : > { %v8246_v58 = vadd.f32 %v16279_v32, %v8245_v27 }
 0x748   : > { %v8247_v63 = vadd.f32 %v16284_v25, %v8246_v58 }
 0x74a   : > { %v8248_v1 = vadd.f32 %v16289_v52, %v8247_v63  ;;  %v17692_v63 = vld [vmem:[#allocation125_spill] sm:$0xff] }
 0x74c   : > { %v8249_v41 = vadd.f32 %v16294_v49, %v8248_v1  ;;  %v17693_v1 = vld [vmem:[#allocation131_spill] sm:$0xff] }
 0x74e   : > { %v8250_v56 = vadd.f32 %v16299_v10, %v8249_v41 }
 0x750   : > { %v8251_v33 = vadd.f32 %v16302_v12, %v8250_v56 }
 0x752   : > { %v8252_v54 = vadd.f32 %v16305_v57, %v8251_v33  ;;  %v17698_v33 = vld [vmem:[#allocation157_spill] sm:$0xff] }
 0x754   : > { %v8253_v21 = vadd.f32 %v16308_v14, %v8252_v54 }
 0x756   : > { %v8254_v45 = vadd.f32 %v16311_v13, %v8253_v21 }
 0x758   : > { %v8255_v5 = vadd.f32 %v16314_v51, %v8254_v45  ;;  %v17699_v45 = vld [vmem:[#allocation161_spill] sm:$0xff] }
 0x75a   : > { %v8256_v42 = vadd.f32 %v16317_v30, %v8255_v5 }
 0x75c   : > { %v8257_v36 = vadd.f32 %v16320_v26, %v8256_v42  ;;  %v17700_v42 = vld [vmem:[#allocation160_spill] sm:$0xff] }
 0x75e   : > { %v8258_v23 = vadd.f32 %v16323_v43, %v8257_v36 }
 0x760   : > { %8259 = vadd.xlane.f32.xlu0 %v8258_v23  ;;  %v17701_v23 = vld [vmem:[#allocation129_spill] sm:$0xff] }
 0x776   : > { %3117 = vperm.xlu0 %13561, %v3109_v55  }
 0x7ed   : > { %v8260_v47 = vpop.xlane.xlu0 %8259 }
 0x7ee   : > { %13693 = vrcp.f32 %v8260_v47 }
 0x7f5   : > { %v16327_v60 = vpop.permute.xlu0 %3117 }
 0x7f6   : > { %v3201_v31 = vadd.f32 %v17689_v61, %v16327_v60  ;;  %v3199_v27 = vadd.f32 %v17690_v18, %v16327_v60  ;;  %v3278_v58 = vadd.f32 %v17691_v20, %v16327_v60  ;;  %v3276_v24 = vadd.f32 %v17692_v63, %v16327_v60  ;;  %v17702_v61 = vld [vmem:[#allocation164_spill] sm:$0xff] }
 0x7f7   : > { %v3355_v35 = vadd.f32 %v17693_v1, %v16327_v60  ;;  %v16357_v56 = vadd.f32 %v17696_v7, %v16327_v60  ;;  %v16365_v54 = vadd.f32 %v17698_v33, %v16327_v60  ;;  %v16371_v5 = vadd.f32 %v17699_v45, %v16327_v60  ;;  %v17711_v45 = vld [vmem:[#allocation137_spill] sm:$0xff] }
 0x7f8   : > { %v16333_v4 = vpop.eup %13693  ;;  %8294 = vmatprep.subr.mxu1 %v3201_v31  ;;  %v16375_v36 = vadd.f32 %v17700_v42, %v16327_v60  ;;  %v3353_v55 = vadd.f32 %v17701_v23, %v16327_v60  ;;  %v16383_v31 = vadd.f32 %v17702_v61, %v16327_v60  ;;  %v3507_v42 = vadd.f32 %v17711_v45, %v16327_v60  ;;  %v17712_v23 = vld [vmem:[#allocation142_spill] sm:$0xff] }
 0x7f9   : > { %8295 = vmatpush1.xpose.msra.mxu1 %v3199_v27  ;;  %v8263_v22 = vmul.f32 %v16333_v4, %v16188_v6  ;;  %v8262_v15 = vmul.f32 %v16333_v4, %v16186_v28  ;;  %v8265_v37 = vmul.f32 %v16333_v4, %v16199_v3  ;;  %v17694_v6 = vld [vmem:[#allocation153_spill] sm:$0xff]  ;;  %v17695_v28 = vld [vmem:[#allocation156_spill] sm:$0xff]  ;;  %v17697_v3 = vld [vmem:[#allocation158_spill] sm:$0xff]  ;;  %v8264_v21 = vmul.f32 %v16333_v4, %v16194_v40 }
 0x7fa   : > { %8364 = vmatprep.subr.mxu1 %v3278_v58  ;;  %v16349_v0 = vadd.f32 %v17694_v6, %v16327_v60  ;;  %v16353_v41 = vadd.f32 %v17695_v28, %v16327_v60  ;;  %v16361_v62 = vadd.f32 %v17697_v3, %v16327_v60  ;;  %v8267_v47 = vmul.f32 %v16333_v4, %v16209_v38  ;;  %v17703_v40 = vld [vmem:[#allocation162_spill] sm:$0xff]  ;;  %v17705_v58 = vld [vmem:[#allocation169_spill] sm:$0xff]  ;;  %v17707_v38 = vld [vmem:[#allocation171_spill] sm:$0xff] }
 0x7fb   : > { %8358 = vmatprep.mubr.f32.mxu1 %v8263_v22  ;;  %v16387_v18 = vadd.f32 %v17703_v40, %v16327_v60  ;;  %v17704_v27 = vld [vmem:[#allocation134_spill] sm:$0xff]  ;;  %v16393_v22 = vadd.f32 %v17705_v58, %v16327_v60  ;;  %v17709_v6 = vld [vmem:[#allocation132_spill] sm:$0xff]  ;;  %v8269_v7 = vmul.f32 %v16333_v4, %v16219_v9  ;;  %v17710_v3 = vld [vmem:[#allocation139_spill] sm:$0xff]  ;;  %v3586_v9 = vadd.f32 %v17712_v23, %v16327_v60 }
 0x7fc   : > { %8359 = vmatmul.mubr.f32.vlgmr.msra.gmra.mrb[114].mxu1 %v8262_v15  ;;  %v3432_v20 = vadd.f32 %v17704_v27, %v16327_v60  ;;  %v17706_v15 = vld [vmem:[#allocation167_spill] sm:$0xff]  ;;  %v3430_v28 = vadd.f32 %v17709_v6, %v16327_v60  ;;  %v3509_v33 = vadd.f32 %v17710_v3, %v16327_v60  ;;  %v8272_v27 = vmul.f32 %v16333_v4, %v16234_v16  ;;  %v17718_v6 = vld [vmem:[#allocation152_spill] sm:$0xff] }
 0x7fd   : > { %8365 = vmatpush1.xpose.msra.mxu1 %v3276_v24  ;;  %8428 = vmatprep.mubr.f32.mxu1 %v8265_v37  ;;  %v16397_v63 = vadd.f32 %v17706_v15, %v16327_v60  ;;  %v16401_v24 = vadd.f32 %v17707_v38, %v16327_v60  ;;  %v17708_v37 = vld [vmem:[#allocation170_spill] sm:$0xff]  ;;  %v17714_v40 = vld [vmem:[#allocation147_spill] sm:$0xff]  ;;  %v17716_v15 = vld [vmem:[#allocation149_spill] sm:$0xff]  ;;  %v8274_v38 = vmul.f32 %v16333_v4, %v16244_v34 }
 0x7fe   : > { %8434 = vmatprep.subr.mxu1 %v3355_v35  ;;  %v16405_v1 = vadd.f32 %v17708_v37, %v16327_v60  ;;  %v8266_v35 = vmul.f32 %v16333_v4, %v16204_v59  ;;  %v8271_v59 = vmul.f32 %v16333_v4, %v16229_v53  ;;  %v3663_v53 = vadd.f32 %v17714_v40, %v16327_v60  ;;  %v17717_v37 = vld [vmem:[#allocation148_spill] sm:$0xff] }
 0x7ff   : > { %v8277_v16 = vmul.f32 %v16333_v4, %v16259_v8  ;;  %v8279_v34 = vmul.f32 %v16333_v4, %v16269_v48  ;;  %v8281_v45 = vmul.f32 %v16333_v4, %v16279_v32  ;;  %v8283_v48 = vmul.f32 %v16333_v4, %v16289_v52 }
 0x800   : > { %v8285_v32 = vmul.f32 %v16333_v4, %v16299_v10  ;;  %v8287_v52 = vmul.f32 %v16333_v4, %v16305_v57  ;;  %v8289_v10 = vmul.f32 %v16333_v4, %v16311_v13  ;;  %v8291_v57 = vmul.f32 %v16333_v4, %v16317_v30  ;;  %v9414_v30 = vld [vmem:[%s14023_s24 + $0x8] sm:$0xff] }
 0x801   : > { %v8293_v13 = vmul.f32 %v16333_v4, %v16323_v43 }
 0x804   : > { %8429 = vmatmul.mubr.f32.vlgmr.msra.gmra.mrb[114].mxu1 %v8264_v21  ;;  %v8268_v21 = vmul.f32 %v16333_v4, %v16214_v44  ;;  %v8273_v44 = vmul.f32 %v16333_v4, %v16239_v19  ;;  %v3740_v19 = vadd.f32 %v17716_v15, %v16327_v60 }
 0x805   : > { %8435 = vmatpush1.xpose.msra.mxu1 %v3353_v55  ;;  %8498 = vmatprep.mubr.f32.mxu1 %v8267_v47  ;;  %v8270_v55 = vmul.f32 %v16333_v4, %v16224_v11  ;;  %v17713_v47 = vld [vmem:[#allocation140_spill] sm:$0xff]  ;;  %v8275_v11 = vmul.f32 %v16333_v4, %v16249_v2  ;;  %v3817_v2 = vadd.f32 %v17718_v6, %v16327_v60 }
 0x806   : > { %8504 = vmatprep.subr.mxu1 %v3432_v20  ;;  %v3584_v61 = vadd.f32 %v17713_v47, %v16327_v60  ;;  %v17715_v20 = vld [vmem:[#allocation145_spill] sm:$0xff] }
 0x807   : > { %v3661_v58 = vadd.f32 %v17715_v20, %v16327_v60  ;;  %v9645_v20 = vld [vmem:[%s17728_s11] sm:$0x1]  ;;  %s17735_s11 = sld [smem:[#allocation23_spill]] }
 0x80c   : > { %8499 = vmatmul.mubr.f32.vlgmr.msra.gmra.mrb[114].mxu1 %v8266_v35  ;;  %v3738_v35 = vadd.f32 %v17717_v37, %v16327_v60  ;;  %v9649_v37 = vld [vmem:[%s17730_s26] sm:$0x1]  ;;  %s17738_s26 = sld [smem:[#allocation18_spill]] }
 0x80d   : > { %8505 = vmatpush1.xpose.msra.mxu1 %v3430_v28  ;;  %8568 = vmatprep.mubr.f32.mxu1 %v8269_v7  ;;  %v8276_v28 = vmul.f32 %v16333_v4, %v16254_v50  ;;  %v17719_v7 = vld [vmem:[#allocation151_spill] sm:$0xff]  ;;  %v8280_v50 = vmul.f32 %v16333_v4, %v16274_v39  ;;  %v8284_v39 = vmul.f32 %v16333_v4, %v16294_v49 }
 0x80e   : > { %8574 = vmatprep.subr.mxu1 %v3509_v33  ;;  %v3815_v3 = vadd.f32 %v17719_v7, %v16327_v60  ;;  %v17720_v33 = vld [vmem:[#allocation154_spill] sm:$0xff]  ;;  %v8288_v49 = vmul.f32 %v16333_v4, %v16308_v14  ;;  %v8292_v14 = vmul.f32 %v16333_v4, %v16320_v26 }
 0x80f   : > { %v3894_v8 = vadd.f32 %v17720_v33, %v16327_v60  ;;  %v9495_v60 = vld [vmem:[%s14043_s20 + $0x28] sm:$0xff]  ;;  %v9807_v33 = vld [vmem:[%s17731_s16 + $0x38] sm:$0xff] }
 0x814   : > { %8569 = vmatmul.mubr.f32.vlgmr.msra.gmra.mrb[114].mxu1 %v8268_v21  ;;  %v8278_v21 = vmul.f32 %v16333_v4, %v16264_v17  ;;  %v8282_v17 = vmul.f32 %v16333_v4, %v16284_v25  ;;  %v8286_v25 = vmul.f32 %v16333_v4, %v16302_v12  ;;  %v8290_v12 = vmul.f32 %v16333_v4, %v16314_v51  ;;  %v9494_v51 = vld [vmem:[%s14043_s20 + $0x20] sm:$0xff] }
 0x815   : > { %8575 = vmatpush1.xpose.msra.mxu1 %v3507_v42  ;;  %8638 = vmatprep.mubr.f32.mxu1 %v8271_v59  ;;  %v13266_v43 = vpack.c.bf16 %v9495_v60, %v9494_v51  ;;  %v10030_v60 = vld [vmem:[%s17735_s11] sm:$0xff] }
 0x816   : > { %8644 = vmatprep.subr.mxu1 %v3586_v9  ;;  %v9492_v9 = vld [vmem:[%s14043_s20 + $0x10] sm:$0xff] }
 0x817   : > { %13267 = vmatpush3.bf16.msra.mxu0 %v13266_v43  ;;  %v17737_v43 = vld [vmem:[#allocation28_spill] sm:$0xff] }
 0x818   : > { %13268 = vmatprep.subr.bf16.mxu0 %v17668_v29 }
 0x81c   : > { %8639 = vmatmul.mubr.f32.vlgmr.msra.gmra.mrb[114].mxu1 %v8270_v55  ;;  %v9493_v55 = vld [vmem:[%s14043_s20 + $0x18] sm:$0xff] }
 0x81d   : > { %8645 = vmatpush1.xpose.msra.mxu1 %v3584_v61  ;;  %8708 = vmatprep.mubr.f32.mxu1 %v8273_v44  ;;  %v13275_v47 = vpack.c.bf16 %v9493_v55, %v9492_v9  ;;  %v9489_v61 = vld [vmem:[%s17726_s25] sm:$0x1]  ;;  %s17733_s25 = sld [smem:[#allocation21_spill]] }
 0x81e   : > { %8714 = vmatprep.subr.mxu1 %v3663_v53  ;;  %v9648_v44 = vld [vmem:[%s17727_s10] sm:$0xff]  ;;  %s17734_s10 = sld [smem:[#allocation20_spill]] }
 0x824   : > { %8709 = vmatmul.mubr.f32.vlgmr.msra.gmra.mrb[114].mxu1 %v8272_v27 }
 0x825   : > { %8715 = vmatpush1.xpose.msra.mxu1 %v3661_v58  ;;  %8778 = vmatprep.mubr.f32.mxu1 %v8275_v11 }
 0x826   : > { %8784 = vmatprep.subr.mxu1 %v3740_v19 }
 0x82c   : > { %8779 = vmatmul.mubr.f32.vlgmr.msra.gmra.mrb[114].mxu1 %v8274_v38  ;;  %v9724_v38 = vld [vmem:[%s17729_s18] sm:$0xff]  ;;  %s17736_s18 = sld [smem:[#allocation22_spill]] }
 0x82d   : > { %8785 = vmatpush1.xpose.msra.mxu1 %v3738_v35  ;;  %8848 = vmatprep.mubr.f32.mxu1 %v8277_v16  ;;  %v9804_v35 = vld [vmem:[%s17731_s16 + $0x20] sm:$0xff]  ;;  %v9805_v16 = vld [vmem:[%s17731_s16 + $0x28] sm:$0xff] }
 0x82e   : > { %8854 = vmatprep.subr.mxu1 %v3817_v2  ;;  %v13278_v7 = vpack.c.bf16 %v9805_v16, %v9804_v35  ;;  %v17752_v35 = vld [vmem:[#allocation55_spill] sm:$0xff]  ;;  %v17753_v16 = vld [vmem:[#allocation40_spill] sm:$0xff] }
 0x834   : > { %8849 = vmatmul.mubr.f32.vlgmr.msra.gmra.mrb[114].mxu1 %v8276_v28 }
 0x835   : > { %8855 = vmatpush1.xpose.msra.mxu1 %v3815_v3  ;;  %8918 = vmatprep.mubr.f32.mxu1 %v8279_v34  ;;  %v9806_v34 = vld [vmem:[%s17731_s16 + $0x30] sm:$0xff] }
 0x836   : > { %8924 = vmatprep.subr.mxu1 %v3894_v8  ;;  %v13281_v8 = vpack.c.bf16 %v9807_v33, %v9806_v34  ;;  %v17759_v34 = vld [vmem:[#allocation46_spill] sm:$0xff]  ;;  %v17760_v33 = vld [vmem:[#allocation63_spill] sm:$0xff] }
 0x83c   : > { %8919 = vmatmul.mubr.f32.vlgmr.msra.gmra.mrb[114].mxu1 %v8278_v21  ;;  %v9800_v21 = vld [vmem:[%s17731_s16] sm:$0xff] }
 0x83d   : > { %8925 = vmatpush1.xpose.msra.mxu1 %v16349_v0  ;;  %8988 = vmatprep.mubr.f32.mxu1 %v8281_v45  ;;  %v17721_v0 = vld [vmem:[#allocation37_spill] sm:$0xff]  ;;  %v9801_v45 = vld [vmem:[%s17731_s16 + $0x8] sm:$0xff] }
 0x83e   : > { %8994 = vmatprep.subr.mxu1 %v16353_v41  ;;  %v17722_v41 = vld [vmem:[#allocation39_spill] sm:$0xff] }
 0x844   : > { %8989 = vmatmul.mubr.f32.vlgmr.msra.gmra.mrb[114].mxu1 %v8280_v50  ;;  %v13284_v50 = vpack.c.bf16 %v9801_v45, %v9800_v21  ;;  %v17762_v21 = vld [vmem:[#allocation65_spill] sm:$0xff]  ;;  %v17763_v45 = vld [vmem:[#allocation50_spill] sm:$0xff] }
 0x845   : > { %8995 = vmatpush1.xpose.msra.mxu1 %v16357_v56  ;;  %9058 = vmatprep.mubr.f32.mxu1 %v8283_v48  ;;  %v17723_v56 = vld [vmem:[#allocation41_spill] sm:$0xff]  ;;  %v9802_v48 = vld [vmem:[%s17731_s16 + $0x10] sm:$0xff] }
 0x846   : > { %9064 = vmatprep.subr.mxu1 %v16361_v62  ;;  %v17724_v62 = vld [vmem:[#allocation43_spill] sm:$0xff] }
 0x84c   : > { %9059 = vmatmul.mubr.f32.vlgmr.msra.gmra.mrb[114].mxu1 %v8282_v17  ;;  %v9803_v17 = vld [vmem:[%s17731_s16 + $0x18] sm:$0xff] }
 0x84d   : > { %9065 = vmatpush1.xpose.msra.mxu1 %v16365_v54  ;;  %9128 = vmatprep.mubr.f32.mxu1 %v8285_v32  ;;  %v17725_v54 = vld [vmem:[#allocation45_spill] sm:$0xff]  ;;  %v13287_v32 = vpack.c.bf16 %v9803_v17, %v9802_v48  ;;  %v17765_v48 = vld [vmem:[#allocation52_spill] sm:$0xff] }
 0x84e   : > { %9134 = vmatprep.subr.mxu1 %v16371_v5  ;;  %v9496_v5 = vld [vmem:[%s14043_s20 + $0x30] sm:$0xff]  ;;  %v17766_v17 = vld [vmem:[#allocation69_spill] sm:$0xff] }
 0x854   : > { %9129 = vmatmul.mubr.f32.vlgmr.msra.gmra.mrb[114].mxu1 %v8284_v39  ;;  %v9799_v39 = vld [vmem:[%s17732_s5] sm:$0x1]  ;;  %s12685_s5 = sshll.u32 %s14172_s2, 3 }
 0x855   : > { %9135 = vmatpush1.xpose.msra.mxu1 %v16375_v36  ;;  %9198 = vmatprep.mubr.f32.mxu1 %v8287_v52  ;;  %v9497_v36 = vld [vmem:[%s14043_s20 + $0x38] sm:$0xff]  ;;  %v9954_v52 = vld [vmem:[%s17733_s25] sm:$0xff]  ;;  %s16589_s25 = scalar_lea.vmem [#allocation2], %s12685_s5 }
 0x856   : > { %9204 = vmatprep.subr.mxu1 %v16383_v31  ;;  %v13269_v31 = vpack.c.bf16 %v9497_v36, %v9496_v5  ;;  %v17741_v5 = vld [vmem:[#allocation33_spill] sm:$0xff]  ;;  %v17742_v36 = vld [vmem:[#allocation31_spill] sm:$0xff]  ;;  %s12469_s11 = sshll.u32 %s16589_s25, 4  ;;  %s16714_s11 = int_to_ptr.vmem [resolvable:$true] %s12469_s11 }
 0x857   : > { %s13825_s5 = scalar_lea.vmem %s16714_s11, 128  ;;  %p13832_p0 = scmp.lt.s32.totalorder %s16714_s11, %s13830_s8 }
 0x858   : > { %13270 = vmatpush3.bf16.msra.mxu0 %v13269_v31  ;;  %v11484_v31 = vlaneseq  ;;  %p13826_p11 = scmp.ne.s32.totalorder %s16714_s11, %s13825_s5 }
 0x859   : > { %13271 = vmatprep.subr.bf16.mxu0 %v17668_v29 }
 0x85a   : > { %p13827_p12 = pnand %p13826_p11, %p14153_p5 }
 0x85c   : > { %9199 = vmatmul.mubr.f32.vlgmr.msra.gmra.mrb[114].mxu1 %v8286_v25  ;;  %p13828_p13 = pneg %p13827_p12 }
 0x85d   : > { %9205 = vmatpush1.xpose.msra.mxu1 %v16387_v18  ;;  %9268 = vmatprep.mubr.f32.mxu1 %v8289_v10  ;;  %v12780_v18 = vld [vmem:[%s14028_s30] ss:$0 sm:$0xff] }
 0x85e   : > { %9274 = vmatprep.subr.mxu1 %v16393_v22  ;;  %v9490_v22 = vld [vmem:[%s14043_s20] sm:$0xff] }
 0x864   : > { %9269 = vmatmul.mubr.f32.vlgmr.msra.gmra.mrb[114].mxu1 %v8288_v49 }
 0x865   : > { %9275 = vmatpush1.xpose.msra.mxu1 %v16397_v63  ;;  %9338 = vmatprep.mubr.f32.mxu1 %v8291_v57  ;;  %v9491_v63 = vld [vmem:[%s14043_s20 + $0x8] sm:$0xff] }
 0x866   : > { %9344 = vmatprep.subr.mxu1 %v16401_v24  ;;  %v13272_v59 = vpack.c.bf16 %v9491_v63, %v9490_v22  ;;  %v10031_v22 = vld [vmem:[%s14098_s12] sm:$0x1] }
 0x86c   : > { %9339 = vmatmul.mubr.f32.vlgmr.msra.gmra.mrb[114].mxu1 %v8290_v12  ;;  %v9951_v12 = vld [vmem:[%s17734_s10] sm:$0x1]  ;;  %s12871_s10 = sshll.u32 %s14136_s0, 7 }
 0x86d   : > { %9345 = vmatpush1.xpose.msra.mxu1 %v16405_v1  ;;  %9408 = vmatprep.mubr.f32.mxu1 %v8293_v13 }
 0x86e   : > { %12934 = vmatprep.subr.mxu1 %v17667_v46 }
 0x874   : > { %9409 = vmatmul.mubr.f32.vlgmr.msra.gmra.mrb[114].mxu1 %v8292_v14 }
 0x875   : > { %12936 = vmatprep.mubr.msk.f32.mxu1 %vm13951_vm0, %v17667_v46  ;;  %12935 = vmatpush3.msra.mxu1 %v9414_v30 }
 0x876   : > { %13314 = vmatprep.subr.bf16.mxu1 %v17721_v0  ;;  %v9955_v0 = vld [vmem:[%s17736_s18] sm:$0x1]  ;;  %s16712_s18 = scalar_lea.hbm %s14103_s6, %s12871_s10 }
 0x947   : > { %v9410_v26 = vpop.f32.mrb[114].mxu1 }
 0x948   : > { %v9412_v4 = vpop.f32.mrb[115].mxu1  ;;  %12937 = vmatmul.mubr.msk.f32.vlgmr.msra.gmra.mrb[82].mxu1 %vm4359_vm2, %v9410_v26 }
 0x949   : > { %13316 = vmatpush1.bf16.msra.mxu1 %v17722_v41  ;;  %10394 = vmatprep.mubr.f32.mxu1 %v17667_v46 }
 0x94a   : > { %13318 = vmatprep.subr.bf16.mxu1 %v17723_v56 }
 0x94d   : > { %13320 = vmatpush1.bf16.msra.mxu1 %v17724_v62  ;;  %v17739_v62 = vld [vmem:[#allocation29_spill] sm:$0xff] }
 0x94e   : > { %13330 = vmatprep.subr.bf16.mxu1 %v17725_v54  ;;  %v17740_v54 = vld [vmem:[#allocation30_spill] sm:$0xff] }
 0xa1b   : > { %v9484_v24 = vpop.f32.mrb[82].mxu1 }
 0xa1c   : > { %v16518_v1 = vadd.f32 %v12780_v18, %v9484_v24  ;;  %v12938_v42 = vpop.f32.mrb[83].mxu1  ;;  %v16578_v18 = vshrl.u32 %v11484_v31, 7  ;;  %v9725_v24 = vld [vmem:[%s17738_s26] sm:$0x1]  ;;  %v17791_v31 = vld [vmem:[#allocation80_spill] sm:$0xff]  ;;  %s12446_s26 = scalar_lea.sflag [#allocation3], %s14172_s2 }
 0xa1e   : > { %v9499_v23 = vrot.slane %v16518_v1, 1  ;;  %v12441_v63 = vsub.s32 0, %v16578_v18  ;;  %vm12438_vm4 = vcmp.eq.s32.totalorder %v16578_v18, 1 }
 0xa20   : > { %12948 = vmatmul.mubr.msk.f32.vlgmr.msra.gmra.mrb[84].mxu0 %vm1780_vm1, %v9499_v23 }
 0xa21   : > { %13273 = vmatpush3.bf16.msra.mxu0 %v13272_v59  ;;  %12958 = vmatprep.mubr.msk.f32.mxu0 %vm13951_vm0, %v17667_v46 }
 0xa22   : > { %13274 = vmatprep.subr.bf16.mxu0 %v17668_v29 }
 0xa25   : > { %13276 = vmatpush3.bf16.msra.mxu0 %v13275_v47 }
 0xa26   : > { %12961 = vmatprep.subr.mxu0 %v17667_v46 }
 0xa28   : > { %12959 = vmatmul.mubr.msk.f32.vlgmr.msra.gmra.mrb[86].mxu0 %vm1780_vm1, %v9489_v61  ;;  %v10108_v61 = vrot.slane %v16518_v1, 7 }
 0xa29   : > { %12963 = vmatprep.mubr.msk.f32.mxu0 %vm13951_vm0, %v17667_v46  ;;  %12962 = vmatpush3.msra.mxu0 %v9648_v44 }
 0xa2a   : > { %12966 = vmatprep.subr.mxu0 %v17667_v46 }
 0xaf3   : > { %v9568_v40 = vpop.f32.mrb[84].mxu0 }
 0xaf4   : > { %v12949_v53 = vpop.f32.mrb[85].mxu0 }
 0xafb   : > { %v9641_v27 = vpop.f32.mrb[86].mxu0 }
 0xafc   : > { %v9642_v58 = vadd.f32 %v9641_v27, %v9568_v40  ;;  %v12960_v11 = vpop.f32.mrb[87].mxu0  ;;  %v17743_v27 = vld [vmem:[#allocation32_spill] sm:$0xff] }
 0xafd   : > { %v17747_v11 = vld [vmem:[#allocation35_spill] sm:$0xff] }
 0xafe   : > { %v9646_v15 = vadd.f32 %v9645_v20, %v9642_v58  ;;  %v17744_v20 = vld [vmem:[#allocation47_spill] sm:$0xff]  ;;  %v17745_v58 = vld [vmem:[#allocation34_spill] sm:$0xff] }
 0xb00   : > { %v9647_v19 = vmax.f32 %v9646_v15, 0.0  ;;  %v17748_v15 = vld [vmem:[#allocation51_spill] sm:$0xff] }
 0xb02   : > { %12964 = vmatmul.mubr.msk.f32.vlgmr.msra.gmra.mrb[88].mxu0 %vm4359_vm2, %v9647_v19  ;;  %v17749_v19 = vld [vmem:[#allocation36_spill] sm:$0xff] }
 0xb03   : > { %12968 = vmatprep.mubr.msk.f32.mxu0 %vm13951_vm0, %v17667_v46  ;;  %12967 = vmatpush3.msra.mxu0 %v9724_v38  ;;  %v17750_v38 = vld [vmem:[#allocation53_spill] sm:$0xff] }
 0xb04   : > { %13277 = vmatprep.subr.bf16.mxu0 %v17668_v29 }
 0xbd5   : > { %v9719_v6 = vpop.f32.mrb[88].mxu0 }
 0xbd6   : > { %v9720_v2 = vadd.f32 %v9719_v6, %v9649_v37  ;;  %v12965_v28 = vpop.f32.mrb[89].mxu0  ;;  %v17751_v37 = vld [vmem:[#allocation38_spill] sm:$0xff]  ;;  %v17754_v6 = vld [vmem:[#allocation57_spill] sm:$0xff] }
 0xbd7   : > { %v17756_v28 = vld [vmem:[#allocation59_spill] sm:$0xff] }
 0xbd8   : > { %v9723_v3 = vmax.f32 %v9720_v2, 0.0  ;;  %v17755_v2 = vld [vmem:[#allocation42_spill] sm:$0xff] }
 0xbda   : > { %12969 = vmatmul.mubr.msk.f32.vlgmr.msra.gmra.mrb[90].mxu0 %vm4359_vm2, %v9723_v3  ;;  %v17758_v3 = vld [vmem:[#allocation61_spill] sm:$0xff] }
 0xbdb   : > { %13279 = vmatpush3.bf16.msra.mxu0 %v13278_v7  ;;  %12979 = vmatprep.mubr.msk.f32.mxu0 %vm13951_vm0, %v17667_v46  ;;  %v17757_v7 = vld [vmem:[#allocation44_spill] sm:$0xff] }
 0xbdc   : > { %13280 = vmatprep.subr.bf16.mxu0 %v17668_v29 }
 0xbdf   : > { %13282 = vmatpush3.bf16.msra.mxu0 %v13281_v8  ;;  %v17761_v8 = vld [vmem:[#allocation48_spill] sm:$0xff] }
 0xbe0   : > { %13283 = vmatprep.subr.bf16.mxu0 %v17668_v29 }
 0xbe2   : > { %12980 = vmatmul.mubr.msk.f32.vlgmr.msra.gmra.mrb[92].mxu0 %vm1780_vm1, %v9499_v23 }
 0xbe3   : > { %13285 = vmatpush3.bf16.msra.mxu0 %v13284_v50  ;;  %12990 = vmatprep.mubr.msk.f32.mxu0 %vm13951_vm0, %v17667_v46  ;;  %v17764_v50 = vld [vmem:[#allocation67_spill] sm:$0xff] }
 0xbe4   : > { %13286 = vmatprep.subr.bf16.mxu0 %v17668_v29 }
 0xbe7   : > { %13288 = vmatpush3.bf16.msra.mxu0 %v13287_v32  ;;  %v17767_v32 = vld [vmem:[#allocation54_spill] sm:$0xff] }
 0xbe8   : > { %12993 = vmatprep.subr.mxu0 %v17667_v46 }
 0xbea   : > { %12991 = vmatmul.mubr.msk.f32.vlgmr.msra.gmra.mrb[94].mxu0 %vm1780_vm1, %v9799_v39  ;;  %v17768_v39 = vld [vmem:[#allocation71_spill] sm:$0xff] }
 0xbeb   : > { %12995 = vmatprep.mubr.msk.f32.mxu0 %vm13951_vm0, %v17667_v46  ;;  %12994 = vmatpush3.msra.mxu0 %v9954_v52  ;;  %v17769_v52 = vld [vmem:[#allocation56_spill] sm:$0xff] }
 0xbec   : > { %12998 = vmatprep.subr.mxu0 %v17667_v46 }
 0xcad   : > { %v9795_v25 = vpop.f32.mrb[90].mxu0 }
 0xcae   : > { %v12970_v10 = vpop.f32.mrb[91].mxu0  ;;  %v9796_v9 = vadd.f32 %v9795_v25, %v9725_v24  ;;  %v17770_v25 = vld [vmem:[#allocation73_spill] sm:$0xff]  ;;  %v17794_v24 = vld [vmem:[#allocation86_spill] sm:$0xff] }
 0xcaf   : > { %v17771_v10 = vld [vmem:[#allocation58_spill] sm:$0xff] }
 0xcb5   : > { %v9874_v49 = vpop.f32.mrb[92].mxu0 }
 0xcb6   : > { %v12981_v57 = vpop.f32.mrb[93].mxu0 }
 0xcb7   : > { %v17773_v57 = vld [vmem:[#allocation60_spill] sm:$0xff] }
 0xcbd   : > { %v9947_v29 = vpop.f32.mrb[94].mxu0 }
 0xcbe   : > { %v9948_v13 = vadd.f32 %v9947_v29, %v9874_v49  ;;  %v12992_v14 = vpop.f32.mrb[95].mxu0  ;;  %v17772_v49 = vld [vmem:[#allocation75_spill] sm:$0xff]  ;;  %v17774_v29 = vld [vmem:[#allocation77_spill] sm:$0xff] }
 0xcbf   : > { %v17777_v14 = vld [vmem:[#allocation64_spill] sm:$0xff] }
 0xcc0   : > { %v9952_v30 = vadd.f32 %v9951_v12, %v9948_v13  ;;  %v17775_v12 = vld [vmem:[#allocation62_spill] sm:$0xff]  ;;  %v17776_v13 = vld [vmem:[#allocation79_spill] sm:$0xff] }
 0xcc2   : > { %v9953_v51 = vmax.f32 %v9952_v30, 0.0  ;;  %v17778_v30 = vld [vmem:[#allocation81_spill] sm:$0xff] }
 0xcc4   : > { %12996 = vmatmul.mubr.msk.f32.vlgmr.msra.gmra.mrb[96].mxu0 %vm4359_vm2, %v9953_v51  ;;  %v17779_v51 = vld [vmem:[#allocation66_spill] sm:$0xff] }
 0xcc5   : > { %13000 = vmatprep.mubr.msk.f32.mxu0 %vm13951_vm0, %v17667_v46  ;;  %12999 = vmatpush3.msra.mxu0 %v10030_v60  ;;  %v17780_v60 = vld [vmem:[#allocation83_spill] sm:$0xff] }
 0xcc6   : > { %13290 = vmatprep.subr.bf16.mxu0 %v17737_v43  ;;  %v17781_v43 = vld [vmem:[#allocation68_spill] sm:$0xff] }
 0xd97   : > { %v10025_v26 = vpop.f32.mrb[96].mxu0 }
 0xd98   : > { %v10026_v4 = vadd.f32 %v10025_v26, %v9955_v0  ;;  %v12997_v41 = vpop.f32.mrb[97].mxu0  ;;  %v17782_v0 = vld [vmem:[#allocation85_spill] sm:$0xff]  ;;  %v17783_v26 = vld [vmem:[#allocation70_spill] sm:$0xff] }
 0xd99   : > { %v17785_v41 = vld [vmem:[#allocation72_spill] sm:$0xff] }
 0xd9a   : > { %v10029_v56 = vmax.f32 %v10026_v4, 0.0  ;;  %v17784_v4 = vld [vmem:[#allocation87_spill] sm:$0xff] }
 0xd9c   : > { %13001 = vmatmul.mubr.msk.f32.vlgmr.msra.gmra.mrb[98].mxu0 %vm4359_vm2, %v10029_v56  ;;  %v17786_v56 = vld [vmem:[#allocation90_spill] sm:$0xff] }
 0xd9d   : > { %13292 = vmatpush1.bf16.msra.mxu0 %v17739_v62  ;;  %10181 = vmatprep.mubr.f32.mxu0 %v17667_v46  ;;  %v17787_v62 = vld [vmem:[#allocation74_spill] sm:$0xff] }
 0xd9e   : > { %13294 = vmatprep.subr.bf16.mxu0 %v17740_v54  ;;  %v17788_v54 = vld [vmem:[#allocation91_spill] sm:$0xff] }
 0xda1   : > { %13296 = vmatpush1.bf16.msra.mxu0 %v17741_v5  ;;  %v17789_v5 = vld [vmem:[#allocation76_spill] sm:$0xff] }
 0xda2   : > { %13298 = vmatprep.subr.bf16.mxu0 %v17742_v36  ;;  %v17790_v36 = vld [vmem:[#allocation78_spill] sm:$0xff] }
 0xe6f   : > { %v10101_v42 = vpop.f32.mrb[98].mxu0 }
 0xe70   : > { %v10102_v59 = vadd.f32 %v10101_v42, %v10031_v22  ;;  %v13002_v23 = vpop.f32.mrb[99].mxu0  ;;  %v17792_v22 = vld [vmem:[#allocation82_spill] sm:$0xff]  ;;  %v17795_v42 = vld [vmem:[#allocation88_spill] sm:$0xff] }
 0xe72   : > { %v10106_v55 = vrot.slane %v10102_v59, 7  ;;  %v12442_v47 = vrot.slane %v10102_v59, %v12441_v63  ;;  %v17793_v63 = vld [vmem:[#allocation84_spill] sm:$0xff]  ;;  %v17796_v59 = vld [vmem:[#allocation89_spill] sm:$0xff] }
 0xe74   : > { %v10111_v44 = vsel %vm10110_vm3, %v9796_v9, %v10106_v55  ;;  %v12443_v40 = vsel %vm12438_vm4, %v12442_v47, %v16518_v1  ;;  %v17746_v1 = vld [vmem:[#allocation49_spill] sm:$0xff]  ;;  %v13955_v55 = vmov 1966171168  }
 0xe75   : > { %v16587_v53 = vsel %vm10112_vm5, %v10111_v44, %v10108_v61  ;;  %12444 = vst.msk [vmem:[%s16589_s25] sm:$0xff] %vm1780_vm1, %v12443_v40  ;;  %v11482_v47 = vunpack.c.l.s4 %v13955_v55  ;;  %s13831_s25 = scalar_lea.vmem %s13830_s8, 256 }
 0xe76   : > { %12806 = vmatmul.mubr.msk.f32.vlgmr.msra.gmra.mrb[100].mxu0 %vm1780_vm1, %v16587_v53  ;;  %12809 = vmatmul.mubr.msk.f32.vlgmr.msra.gmra.mrb[116].mxu1 %vm1780_vm1, %v16587_v53  ;;  %p13833_p1 = scmp.lt.s32.totalorder %s13831_s25, %s13825_s5 }
 0xe77   : > { %13300 = vmatpush1.bf16.msra.mxu0 %v17743_v27  ;;  %13332 = vmatpush1.bf16.msra.mxu1 %v17744_v20 }
 0xe78   : > { %13302 = vmatprep.subr.bf16.mxu0 %v17745_v58  ;;  %13334 = vmatprep.subr.bf16.mxu1 %v17746_v1  ;;  %v11483_v1 = vunpack.c.0.s8 %v11482_v47  ;;  %p13834_p2 = por %p13833_p1, %p13832_p0 }
 0xe79   : > { %10252 = vmatprep.mubr.f32.mxu0 %v17667_v46  ;;  %10536 = vmatprep.mubr.f32.mxu1 %v17667_v46 }
 0xe7a   : > { %p13835_p3 = pnand %p13834_p2, %p13828_p13 }
 0xe7b   : > { %13304 = vmatpush1.bf16.msra.mxu0 %v17747_v11  ;;  %13336 = vmatpush1.bf16.msra.mxu1 %v17748_v15 }
 0xe7c   : > { %13306 = vmatprep.subr.bf16.mxu0 %v17749_v19  ;;  %13346 = vmatprep.subr.bf16.mxu1 %v17750_v38 }
 0xe7e   : > { %12807 = vmatmul.mubr.msk.f32.vlgmr.msra.gmra.mrb[102].mxu0 %vm1780_vm1, %v16587_v53  ;;  %12811 = vmatmul.mubr.msk.f32.vlgmr.msra.gmra.mrb[118].mxu1 %vm1780_vm1, %v16587_v53 }
 0xe7f   : > { %13308 = vmatpush1.bf16.msra.mxu0 %v17751_v37  ;;  %13348 = vmatpush1.bf16.msra.mxu1 %v17752_v35 }
 0xe80   : > { %13310 = vmatprep.subr.bf16.mxu0 %v17753_v16  ;;  %13350 = vmatprep.subr.bf16.mxu1 %v17754_v6 }
 0xe81   : > { %10323 = vmatprep.mubr.f32.mxu0 %v17667_v46  ;;  %10678 = vmatprep.mubr.f32.mxu1 %v17667_v46 }
 0xe83   : > { %13312 = vmatpush1.bf16.msra.mxu0 %v17755_v2  ;;  %13352 = vmatpush1.bf16.msra.mxu1 %v17756_v28 }
 0xe84   : > { %13322 = vmatprep.subr.bf16.mxu0 %v17757_v7  ;;  %13362 = vmatprep.subr.bf16.mxu1 %v17758_v3 }
 0xe86   : > { %12808 = vmatmul.mubr.msk.f32.vlgmr.msra.gmra.mrb[104].mxu0 %vm1780_vm1, %v16587_v53  ;;  %12813 = vmatmul.mubr.msk.f32.vlgmr.msra.gmra.mrb[120].mxu1 %vm1780_vm1, %v16587_v53 }
 0xe87   : > { %13324 = vmatpush1.bf16.msra.mxu0 %v17759_v34  ;;  %13364 = vmatpush1.bf16.msra.mxu1 %v17760_v33 }
 0xe88   : > { %13326 = vmatprep.subr.bf16.mxu0 %v17761_v8  ;;  %13366 = vmatprep.subr.bf16.mxu1 %v17762_v21 }
 0xe89   : > { %10465 = vmatprep.mubr.f32.mxu0 %v17667_v46  ;;  %10820 = vmatprep.mubr.f32.mxu1 %v17667_v46 }
 0xe8b   : > { %13328 = vmatpush1.bf16.msra.mxu0 %v17763_v45  ;;  %13368 = vmatpush1.bf16.msra.mxu1 %v17764_v50 }
 0xe8c   : > { %13338 = vmatprep.subr.bf16.mxu0 %v17765_v48  ;;  %13378 = vmatprep.subr.bf16.mxu1 %v17766_v17 }
 0xe8e   : > { %12810 = vmatmul.mubr.msk.f32.vlgmr.msra.gmra.mrb[106].mxu0 %vm1780_vm1, %v16587_v53  ;;  %12815 = vmatmul.mubr.msk.f32.vlgmr.msra.gmra.mrb[122].mxu1 %vm1780_vm1, %v16587_v53 }
 0xe8f   : > { %13340 = vmatpush1.bf16.msra.mxu0 %v17767_v32  ;;  %13380 = vmatpush1.bf16.msra.mxu1 %v17768_v39 }
 0xe90   : > { %13342 = vmatprep.subr.bf16.mxu0 %v17769_v52  ;;  %13382 = vmatprep.subr.bf16.mxu1 %v17770_v25 }
 0xe91   : > { %10607 = vmatprep.mubr.f32.mxu0 %v17667_v46  ;;  %10962 = vmatprep.mubr.f32.mxu1 %v17667_v46 }
 0xe93   : > { %13344 = vmatpush1.bf16.msra.mxu0 %v17771_v10  ;;  %13384 = vmatpush1.bf16.msra.mxu1 %v17772_v49 }
 0xe94   : > { %13354 = vmatprep.subr.bf16.mxu0 %v17773_v57  ;;  %13394 = vmatprep.subr.bf16.mxu1 %v17774_v29 }
 0xe96   : > { %12812 = vmatmul.mubr.msk.f32.vlgmr.msra.gmra.mrb[108].mxu0 %vm1780_vm1, %v16587_v53  ;;  %12817 = vmatmul.mubr.msk.f32.vlgmr.msra.gmra.mrb[124].mxu1 %vm1780_vm1, %v16587_v53 }
 0xe97   : > { %13356 = vmatpush1.bf16.msra.mxu0 %v17775_v12  ;;  %13396 = vmatpush1.bf16.msra.mxu1 %v17776_v13 }
 0xe98   : > { %13358 = vmatprep.subr.bf16.mxu0 %v17777_v14  ;;  %13398 = vmatprep.subr.bf16.mxu1 %v17778_v30 }
 0xe99   : > { %10749 = vmatprep.mubr.f32.mxu0 %v17667_v46  ;;  %11104 = vmatprep.mubr.f32.mxu1 %v17667_v46 }
 0xe9b   : > { %13360 = vmatpush1.bf16.msra.mxu0 %v17779_v51  ;;  %13400 = vmatpush1.bf16.msra.mxu1 %v17780_v60 }
 0xe9c   : > { %13370 = vmatprep.subr.bf16.mxu0 %v17781_v43  ;;  %13410 = vmatprep.subr.bf16.mxu1 %v17782_v0 }
 0xe9e   : > { %12814 = vmatmul.mubr.msk.f32.vlgmr.msra.gmra.mrb[110].mxu0 %vm1780_vm1, %v16587_v53  ;;  %12819 = vmatmul.mubr.msk.f32.vlgmr.msra.gmra.mrb[126].mxu1 %vm1780_vm1, %v16587_v53 }
 0xe9f   : > { %13372 = vmatpush1.bf16.msra.mxu0 %v17783_v26  ;;  %13412 = vmatpush1.bf16.msra.mxu1 %v17784_v4 }
 0xea0   : > { %13374 = vmatprep.subr.bf16.mxu0 %v17785_v41  ;;  %13414 = vmatprep.subr.bf16.mxu1 %v17786_v56 }
 0xea1   : > { %10891 = vmatprep.mubr.f32.mxu0 %v17667_v46  ;;  %11246 = vmatprep.mubr.f32.mxu1 %v17667_v46 }
 0xea3   : > { %13376 = vmatpush1.bf16.msra.mxu0 %v17787_v62  ;;  %13416 = vmatpush1.bf16.msra.mxu1 %v17788_v54 }
 0xea4   : > { %13386 = vmatprep.subr.bf16.mxu0 %v17789_v5 }
 0xea6   : > { %12816 = vmatmul.mubr.msk.f32.vlgmr.msra.gmra.mrb[112].mxu0 %vm1780_vm1, %v16587_v53  ;;  %12821 = vmatmul.mubr.msk.f32.vlgmr.msra.gmra.mrb[128].mxu1 %vm1780_vm1, %v16587_v53 }
 0xea7   : > { %13388 = vmatpush1.bf16.msra.mxu0 %v17790_v36  ;;  %11033 = vmatprep.mubr.f32.mxu0 %v17667_v46 }
 0xea8   : > { %13390 = vmatprep.subr.bf16.mxu0 %v17791_v31 }
 0xeab   : > { %13392 = vmatpush1.bf16.msra.mxu0 %v17792_v22 }
 0xeac   : > { %13402 = vmatprep.subr.bf16.mxu0 %v17793_v63 }
 0xeae   : > { %12818 = vmatmul.mubr.msk.f32.vlgmr.msra.gmra.mrb[114].mxu0 %vm1780_vm1, %v16587_v53 }
 0xeaf   : > { %13404 = vmatpush1.bf16.msra.mxu0 %v17794_v24  ;;  %11175 = vmatprep.mubr.f32.mxu0 %v17667_v46 }
 0xeb0   : > { %13406 = vmatprep.subr.bf16.mxu0 %v17795_v42 }
 0xeb3   : > { %13408 = vmatpush1.bf16.msra.mxu0 %v17796_v59 }
 0xeb6   : > { %12820 = vmatmul.mubr.msk.f32.vlgmr.msra.gmra.mrb[116].mxu0 %vm1780_vm1, %v16587_v53 }
 0xf49   : > { %v16693_v23 = vpop.f32.mrb[100].mxu0  ;;  %v16695_v9 = vpop.f32.mrb[116].mxu1 }
 0xf4a   : > { %v12822_v61 = vmul.f32 -1.442695, %v16693_v23  ;;  %v12828_v46 = vmul.f32 -1.442695, %v16695_v9  ;;  %v16699_v44 = vpop.f32.mrb[101].mxu0  ;;  %v16701_v40 = vpop.f32.mrb[117].mxu1 }
 0xf4b   : > { %v12823_v53 = vmul.f32 -1.442695, %v16699_v44  ;;  %v11716_v27 = vcombine.low %v16693_v23, %v16699_v44  ;;  %v12829_v20 = vmul.f32 -1.442695, %v16701_v40  ;;  %v11719_v58 = vcombine.low %v16695_v9, %v16701_v40 }
 0xf4c   : > { %13695 = vpow2.f32 %v12822_v61 }
 0xf4d   : > { %13697 = vpow2.f32 %v12828_v46 }
 0xf4e   : > { %13699 = vpow2.f32 %v12823_v53 }
 0xf4f   : > { %13701 = vpow2.f32 %v12829_v20 }
 0xf51   : > { %v16716_v11 = vpop.f32.mrb[102].mxu0  ;;  %v16718_v15 = vpop.f32.mrb[118].mxu1 }
 0xf52   : > { %13838 = shalt.err (!%p13835_p3)
}
 0xf53   : > { %s13839_s10 = scalar_lea.hbm %s16712_s18, 128  ;;  %s13843_s3 = scalar_lea.hbm %s14103_s6, 256 }
 0xf54   : > { %p13840_p4 = scmp.ne.s32.totalorder %s16712_s18, %s13839_s10  ;;  %p13844_p9 = scmp.lt.u32.totalorder %s16712_s18, %s14103_s6 }
 0xf55   : > { %p13845_p10 = scmp.lt.u32.totalorder %s13843_s3, %s13839_s10  ;;  %p13847_p12 = scmp.lt.u32.totalorder %s13839_s10, %s16712_s18 }
 0xf56   : > { %p13841_p7 = pnand %p13840_p4, %p14153_p5 }
 0xf57   : > { %p13846_p11 = por %p13845_p10, %p13844_p9 }
 0xf58   : > { %p13842_p8 = pneg %p13841_p7 }
 0xf59   : > { %p13848_p0 = por %p13847_p12, %p13846_p11 }
 0xf5b   : > { %p13849_p13 = pnand %p13848_p0, %p13842_p8 }
 0xf5d   : > { %13852 = shalt.err (!%p13849_p13)
}
 0xf5e   : > { %13480 = dma.vmem_to_hbm [thread:$0]  (%p14153_p5), %s16714_s11, 128, %s16712_s18, %s12446_s26   ;;  %v16739_v19 = vsub.s32 %v11483_v1, %v16578_v18  ;;  %v12824_v38 = vmul.f32 -1.442695, %v16716_v11  ;;  %v12832_v37 = vmul.f32 -1.442695, %v16718_v15  ;;  %v16743_v35 = vpop.f32.mrb[103].mxu0  ;;  %v13696_v7 = vpop.eup %13695 }
 0xf5f   : > { %v16745_v16 = vpop.f32.mrb[119].mxu1  ;;  %s12880_s8 = sshll.u32 %s14136_s0, 14  ;;  %s12482_s5 = sshll.u32 %s14204_s23, 4  ;;  %v12825_v6 = vmul.f32 -1.442695, %v16743_v35  ;;  %v11717_v2 = vcombine.low %v16716_v11, %v16743_v35  ;;  %s16755_s5 = int_to_ptr.vmem [resolvable:$true] %s12482_s5 }
 0xf60   : > { %13703 = vpow2.f32 %v12824_v38  ;;  %s16753_s11 = scalar_lea.hbm %s14108_s27, %s12880_s8  ;;  %v12833_v18 = vmul.f32 -1.442695, %v16745_v16  ;;  %v11766_v28 = vcombine.low %v16718_v15, %v16745_v16  ;;  %v16761_v3 = vrot.slane %v11716_v27, %v16739_v19  ;;  %s12451_s0 = scalar_lea.sflag [#allocation5], %s14172_s2 }
 0xf61   : > { %13705 = vpow2.f32 %v12832_v37  ;;  %v16764_v34 = vrot.slane %v11717_v2, %v16739_v19  ;;  %s13853_s23 = scalar_lea.vmem %s16755_s5, 16384  ;;  %s13957_s18 = smov [#allocation4]  }
 0xf62   : > { %13707 = vpow2.f32 %v12825_v6  ;;  %p13854_p1 = scmp.ne.s32.totalorder %s16755_s5, %s13853_s23  ;;  %s13857_s26 = sshll.u32 %s13957_s18, 4  ;;  %s13858_s26 = int_to_ptr.vmem [resolvable:$false] %s13857_s26 }
 0xf63   : > { %s13859_s25 = scalar_lea.vmem %s13858_s26, 32768  ;;  %p13860_p4 = scmp.lt.s32.totalorder %s16755_s5, %s13858_s26 }
 0xf64   : > { %p13855_p2 = pnand %p13854_p1, %p14153_p5  ;;  %p13861_p7 = scmp.lt.s32.totalorder %s13859_s25, %s13853_s23 }
 0xf66   : > { %p13856_p3 = pneg %p13855_p2  ;;  %p13862_p8 = por %p13861_p7, %p13860_p4 }
 0xf68   : > { %p13863_p9 = pnand %p13862_p8, %p13856_p3 }
 0xf6a   : > { %13866 = shalt.err (!%p13863_p9)
}
 0xf6b   : > { %s13867_s10 = scalar_lea.hbm %s16753_s11, 16384  ;;  %s13871_s3 = scalar_lea.hbm %s14108_s27, 32768 }
 0xf6c   : > { %p13868_p10 = scmp.ne.s32.totalorder %s16753_s11, %s13867_s10  ;;  %p13872_p0 = scmp.lt.u32.totalorder %s16753_s11, %s14108_s27 }
 0xf6d   : > { %p13873_p13 = scmp.lt.u32.totalorder %s13871_s3, %s13867_s10  ;;  %p13875_p2 = scmp.lt.u32.totalorder %s13867_s10, %s16753_s11 }
 0xf6e   : > { %p13869_p11 = pnand %p13868_p10, %p14153_p5 }
 0xf6f   : > { %p13874_p1 = por %p13873_p13, %p13872_p0 }
 0xf70   : > { %p13870_p12 = pneg %p13869_p11 }
 0xf71   : > { %p13876_p4 = por %p13875_p2, %p13874_p1 }
 0xf73   : > { %p13877_p3 = pnand %p13876_p4, %p13870_p12 }
 0xf75   : > { %13880 = shalt.err (!%p13877_p3)
}
 0xf76   : > { %s13958_s8 = smov 4096   ;;  %s13959_s23 = smov 256   ;;  %v13698_v33 = vpop.eup %13697  ;;  %v11349_v8 = vadd.f32 1.0, %v13696_v7  ;;  %13709 = vpow2.f32 %v12833_v18  ;;  %v11748_v50 = vcombine.high %v16761_v3, %v16764_v34  ;;  %v11924_v48 = vcombine.low %v16761_v3, %v16764_v34  ;;  %v16792_v25 = vpop.f32.mrb[104].mxu0 }
 0xf77   : > { %13481 = dma.vmem_to_hbm [thread:$0]  (%p14153_p5), %s16755_s5, 16384, %s16753_s11, %s12451_s0, %s13958_s8, %s13958_s8, %s13959_s23   ;;  %v13700_v21 = vpop.eup %13699  ;;  %v11355_v45 = vadd.f32 1.0, %v13698_v33  ;;  %v12036_v32 = vrot.slane %v16693_v23, 1  ;;  %v12100_v39 = vrot.slane %v16693_v23, 2  ;;  %v16794_v10 = vpop.f32.mrb[120].mxu1  ;;  %v12042_v49 = vrot.slane %v16695_v9, 1 }
 0xf78   : > { %v13702_v17 = vpop.eup %13701  ;;  %13711 = vrcp.f32 %v11349_v8  ;;  %v11350_v52 = vadd.f32 1.0, %v13700_v21  ;;  %v12106_v57 = vrot.slane %v16695_v9, 2  ;;  %v16798_v12 = vpop.f32.mrb[105].mxu0  ;;  %v12037_v14 = vrot.slane %v16699_v44, 1  ;;  %s12879_s28 = sshll.u32 %s14177_s22, 7 }
 0xf79   : > { %13713 = vrcp.f32 %v11355_v45  ;;  %v11356_v29 = vadd.f32 1.0, %v13702_v17  ;;  %v16800_v13 = vpop.f32.mrb[121].mxu1  ;;  %v12101_v30 = vrot.slane %v16699_v44, 2  ;;  %v12826_v51 = vmul.f32 -1.442695, %v16792_v25  ;;  %v13704_v56 = vpop.eup %13703  ;;  %s16840_s2 = scalar_lea.vmem %s14113_s4, %s12879_s28 }
 0xf7a   : > { %13715 = vrcp.f32 %v11350_v52  ;;  %v12043_v60 = vrot.slane %v16701_v40, 1  ;;  %v12107_v43 = vrot.slane %v16701_v40, 2  ;;  %v12836_v0 = vmul.f32 -1.442695, %v16794_v10  ;;  %v13706_v36 = vpop.eup %13705  ;;  %v16824_v27 = vpop.f32.mrb[106].mxu0 }
 0xf7b   : > { %13717 = vrcp.f32 %v11356_v29  ;;  %v11747_v26 = vrot.slane %v11719_v58, %v16739_v19  ;;  %v12827_v4 = vmul.f32 -1.442695, %v16798_v12  ;;  %v11718_v41 = vcombine.low %v16792_v25, %v16798_v12  ;;  %v13708_v24 = vpop.eup %13707  ;;  %v16826_v20 = vpop.f32.mrb[122].mxu1 }
 0xf7c   : > { %13719 = vpow2.f32 %v12826_v51  ;;  %v12038_v62 = vrot.slane %v16716_v11, 1  ;;  %v12837_v54 = vmul.f32 -1.442695, %v16800_v13  ;;  %v11768_v5 = vcombine.low %v16794_v10, %v16800_v13  ;;  %v16830_v37 = vpop.f32.mrb[107].mxu0  ;;  %v16832_v6 = vpop.f32.mrb[123].mxu1 }
 0xf7d   : > { %13721 = vpow2.f32 %v12836_v0  ;;  %v11351_v31 = vadd.f32 1.0, %v13704_v56  ;;  %v12102_v22 = vrot.slane %v16716_v11, 2  ;;  %v11740_v63 = vrot.slane %v11718_v41, %v16739_v19  ;;  %v16880_v41 = vpop.f32.mrb[124].mxu1 }
 0xf7e   : > { %13723 = vpow2.f32 %v12827_v4  ;;  %v11359_v42 = vadd.f32 1.0, %v13706_v36  ;;  %v12046_v59 = vrot.slane %v16718_v15, 1  ;;  %v12110_v55 = vrot.slane %v16718_v15, 2  ;;  %v16878_v4 = vpop.f32.mrb[108].mxu0  ;;  %v16891_v36 = vpop.f32.mrb[125].mxu1 }
 0xf7f   : > { %13725 = vpow2.f32 %v12837_v54  ;;  %v11352_v61 = vadd.f32 1.0, %v13708_v24  ;;  %v11749_v46 = vcombine.high %v11740_v63, %v11747_v26  ;;  %v11925_v53 = vcombine.low %v11740_v63, %v11747_v26  ;;  %v16889_v54 = vpop.f32.mrb[109].mxu0 }
 0xf80   : > { %v13710_v47 = vpop.eup %13709  ;;  %13727 = vrcp.f32 %v11351_v31  ;;  %v11756_v58 = vrot.slane %v11748_v50, %v16739_v19  ;;  %v12830_v38 = vmul.f32 -1.442695, %v16824_v27  ;;  %v11932_v18 = vrot.slane %v11924_v48, %v16739_v19 }
 0xf81   : > { %13729 = vrcp.f32 %v11359_v42  ;;  %v11360_v1 = vadd.f32 1.0, %v13710_v47  ;;  %v11763_v7 = vrot.slane %v11749_v46, %v16739_v19  ;;  %v11939_v3 = vrot.slane %v11925_v53, %v16739_v19 }
 0xf82   : > { %v13712_v2 = vpop.eup %13711  ;;  %13731 = vrcp.f32 %v11352_v61  ;;  %v12039_v33 = vrot.slane %v16743_v35, 1  ;;  %v12840_v8 = vmul.f32 -1.442695, %v16826_v20  ;;  %v12047_v44 = vrot.slane %v16745_v16, 1 }
 0xf83   : > { %v16837_v34 = vpop.eup %13713  ;;  %vm12004_vm6 = vcmp.ge.f32.partialorder %v13712_v2, 0.5  ;;  %13733 = vrcp.f32 %v11360_v1  ;;  %v11764_v50 = vcombine.low %v11756_v58, %v11763_v7  ;;  %v11940_v48 = vcombine.high %v11932_v18, %v11939_v3 }
 0xf84   : > { %v13716_v21 = vpop.eup %13715  ;;  %v16848_v45 = vsel %vm12004_vm6, %v12036_v32, %v12100_v39  ;;  %vm12010_vm7 = vcmp.ge.f32.partialorder %v16837_v34, 0.5  ;;  %13735 = vpow2.f32 %v12830_v38  ;;  %v12103_v39 = vrot.slane %v16743_v35, 2 }
 0xf85   : > { %v16851_v17 = vpop.eup %13717  ;;  %v16857_v52 = vsel %vm12010_vm7, %v12042_v49, %v12106_v57  ;;  %v11477_v29 = vcombine.low %v13712_v2, %v13716_v21  ;;  %vm12005_vm8 = vcmp.ge.f32.partialorder %v13716_v21, 0.5  ;;  %12857 = vst [vmem:[%s16840_s2 + $0x1] ss:$4 sm:$0xff] %v11764_v50  ;;  %12861 = vst [vmem:[%s16840_s2 + $0x2] ss:$4 sm:$0xff] %v11940_v48  ;;  %v12111_v35 = vrot.slane %v16745_v16, 2 }
 0xf86   : > { %v13720_v51 = vpop.eup %13719  ;;  %v12165_v23 = vsel %vm12005_vm8, %v12037_v14, %v12101_v30  ;;  %v11480_v32 = vcombine.low %v16837_v34, %v16851_v17  ;;  %vm12011_vm9 = vcmp.ge.f32.partialorder %v16851_v17, 0.5  ;;  %13737 = vpow2.f32 %v12840_v8  ;;  %v16934_v8 = vpop.f32.mrb[110].mxu0 }
 0xf87   : > { %v13722_v0 = vpop.eup %13721  ;;  %v12228_v9 = vcombine.low %v16848_v45, %v12165_v23  ;;  %v16872_v49 = vsel %vm12011_vm9, %v12043_v60, %v12107_v43  ;;  %v11353_v57 = vadd.f32 1.0, %v13720_v51  ;;  %v16886_v40 = vrot.slane %v11766_v28, %v16739_v19  ;;  %v16936_v21 = vpop.f32.mrb[126].mxu1 }
 0xf88   : > { %v13724_v14 = vpop.eup %13723  ;;  %v12231_v30 = vcombine.low %v16857_v52, %v16872_v49  ;;  %v11363_v26 = vadd.f32 1.0, %v13722_v0  ;;  %v12831_v43 = vmul.f32 -1.442695, %v16830_v37  ;;  %v12040_v63 = vrot.slane %v16792_v25, 1  ;;  %v16947_v51 = vpop.f32.mrb[111].mxu0 }
 0xf89   : > { %v13726_v56 = vpop.eup %13725  ;;  %13739 = vrcp.f32 %v11353_v57  ;;  %v11354_v60 = vadd.f32 1.0, %v13724_v14  ;;  %v11765_v42 = vcombine.low %v16824_v27, %v16830_v37  ;;  %v16899_v16 = vrot.slane %v11477_v29, %v16739_v19  ;;  %v16949_v23 = vpop.f32.mrb[127].mxu1 }
 0xf8a   : > { %v13728_v31 = vpop.eup %13727  ;;  %13741 = vrcp.f32 %v11363_v26  ;;  %v11364_v24 = vadd.f32 1.0, %v13726_v56  ;;  %v12104_v28 = vrot.slane %v16792_v25, 2  ;;  %v12050_v7 = vrot.slane %v16794_v10, 1  ;;  %v16985_v34 = vpop.f32.mrb[112].mxu0 }
 0xf8b   : > { %v16896_v47 = vpop.eup %13729  ;;  %vm12006_vm10 = vcmp.ge.f32.partialorder %v13728_v31, 0.5  ;;  %13743 = vrcp.f32 %v11354_v60  ;;  %v16908_v53 = vrot.slane %v11765_v42, %v16739_v19  ;;  %v12114_v3 = vrot.slane %v16794_v10, 2  ;;  %v16987_v17 = vpop.f32.mrb[128].mxu1 }
 0xf8c   : > { %v13732_v61 = vpop.eup %13731  ;;  %v12166_v46 = vsel %vm12006_vm10, %v12038_v62, %v12102_v22  ;;  %vm12014_vm11 = vcmp.ge.f32.partialorder %v16896_v47, 0.5  ;;  %13745 = vrcp.f32 %v11364_v24  ;;  %v16939_v45 = vrot.slane %v12228_v9, %v16739_v19 }
 0xf8d   : > { %v16910_v58 = vpop.eup %13733  ;;  %v16916_v25 = vsel %vm12014_vm11, %v12046_v59, %v12110_v55  ;;  %v11478_v1 = vcombine.low %v13728_v31, %v13732_v61  ;;  %vm12007_vm12 = vcmp.ge.f32.partialorder %v13732_v61, 0.5  ;;  %13747 = vpow2.f32 %v12831_v43 }
 0xf8e   : > { %v12167_v38 = vsel %vm12007_vm12, %v12039_v33, %v12103_v39  ;;  %v11527_v11 = vcombine.low %v16896_v47, %v16910_v58  ;;  %vm12015_vm13 = vcmp.ge.f32.partialorder %v16910_v58, 0.5  ;;  %v11797_v62 = vcombine.high %v16908_v53, %v16886_v40  ;;  %v13736_v22 = vpop.eup %13735 }
 0xf8f   : > { %v16924_v2 = vrot.slane %v11478_v1, %v16739_v19  ;;  %v12229_v18 = vcombine.low %v12166_v46, %v12167_v38  ;;  %v16926_v15 = vsel %vm12015_vm13, %v12047_v44, %v12111_v35  ;;  %v11941_v59 = vcombine.low %v16908_v53, %v16886_v40 }
 0xf90   : > { %v12278_v55 = vcombine.low %v16916_v25, %v16926_v15  ;;  %v11357_v33 = vadd.f32 1.0, %v13736_v22  ;;  %v12041_v29 = vrot.slane %v16798_v12, 1  ;;  %v13738_v39 = vpop.eup %13737  ;;  %v12105_v0 = vrot.slane %v16798_v12, 2 }
 0xf91   : > { %v11509_v50 = vcombine.low %v16899_v16, %v16924_v2  ;;  %v16944_v48 = vrot.slane %v12229_v18, %v16739_v19  ;;  %v12051_v44 = vrot.slane %v16800_v13, 1  ;;  %v12841_v9 = vmul.f32 -1.442695, %v16832_v6 }
 0xf92   : > { %v11815_v57 = vcombine.low %v16826_v20, %v16832_v6  ;;  %v16962_v26 = vrot.slane %v11768_v5, %v16739_v19  ;;  %v12115_v56 = vrot.slane %v16800_v13, 2  ;;  %13749 = vrcp.f32 %v11357_v33  ;;  %v16995_v33 = vpop.f32.mrb[129].mxu1 }
 0xf93   : > { %v13740_v14 = vpop.eup %13739  ;;  %v12260_v35 = vcombine.low %v16939_v45, %v16944_v48  ;;  %v12044_v60 = vrot.slane %v16824_v27, 1  ;;  %v12108_v43 = vrot.slane %v16824_v27, 2  ;;  %13751 = vpow2.f32 %v12841_v9 }
 0xf94   : > { %v16965_v12 = vpop.eup %13741  ;;  %vm12008_vm14 = vcmp.ge.f32.partialorder %v13740_v14, 0.5  ;;  %v11367_v42 = vadd.f32 1.0, %v13738_v39  ;;  %v12834_v10 = vmul.f32 -1.442695, %v16878_v4  ;;  %v11508_v13 = vrot.slane %v11480_v32, %v16739_v19 }
 0xf95   : > { %v13744_v31 = vpop.eup %13743  ;;  %v12168_v24 = vsel %vm12008_vm14, %v12040_v63, %v12104_v28  ;;  %vm12018_vm15 = vcmp.ge.f32.partialorder %v16965_v12, 0.5  ;;  %v12054_v18 = vrot.slane %v16826_v20, 1  ;;  %v12259_v45 = vrot.slane %v12231_v30, %v16739_v19 }
 0xf96   : > { %v16971_v5 = vpop.eup %13745  ;;  %v16977_v16 = vsel %vm12018_vm15, %v12050_v7, %v12114_v3  ;;  %v11479_v61 = vcombine.low %v13740_v14, %v13744_v31  ;;  %vm12009_vm0 = vcmp.ge.f32.partialorder %v13744_v31, 0.5  ;;  %13753 = vpow2.f32 %v12834_v10  ;;  %v16993_v3 = vpop.f32.mrb[113].mxu0 }
 0xf97   : > { %v13748_v46 = vpop.eup %13747  ;;  %v12169_v1 = vsel %vm12009_vm0, %v12041_v29, %v12105_v0  ;;  %v11529_v63 = vcombine.low %v16965_v12, %v16971_v5  ;;  %vm12019_vm1 = vcmp.ge.f32.partialorder %v16971_v5, 0.5  ;;  %13755 = vrcp.f32 %v11367_v42 }
 0xf98   : > { %v11501_v28 = vrot.slane %v11479_v61, %v16739_v19  ;;  %v12230_v38 = vcombine.low %v12168_v24, %v12169_v1  ;;  %v16983_v22 = vsel %vm12019_vm1, %v12051_v44, %v12115_v56  ;;  %v11358_v2 = vadd.f32 1.0, %v13748_v46  ;;  %v17037_v46 = vpop.f32.mrb[114].mxu0 }
 0xf99   : > { %v12280_v32 = vcombine.low %v16977_v16, %v16983_v22  ;;  %v12844_v7 = vmul.f32 -1.442695, %v16880_v41  ;;  %v12118_v39 = vrot.slane %v16826_v20, 2  ;;  %v12045_v0 = vrot.slane %v16830_v37, 1 }
 0xf9a   : > { %v11510_v48 = vcombine.low %v11501_v28, %v11508_v13  ;;  %v12252_v29 = vrot.slane %v12230_v38, %v16739_v19  ;;  %13757 = vrcp.f32 %v11358_v2  ;;  %v12835_v44 = vmul.f32 -1.442695, %v16889_v54  ;;  %v17042_v28 = vpop.f32.mrb[115].mxu0 }
 0xf9b   : > { %13759 = vpow2.f32 %v12844_v7  ;;  %v11517_v9 = vrot.slane %v11509_v50, %v16739_v19  ;;  %v11767_v52 = vcombine.low %v16878_v4, %v16889_v54  ;;  %v17013_v30 = vrot.slane %v11527_v11, %v16739_v19 }
 0xf9c   : > { %v11524_v14 = vrot.slane %v11510_v48, %v16739_v19  ;;  %v12261_v56 = vcombine.low %v12252_v29, %v12259_v45  ;;  %v13750_v49 = vpop.eup %13749  ;;  %v12109_v31 = vrot.slane %v16830_v37, 2  ;;  %13761 = vpow2.f32 %v12835_v44 }
 0xf9d   : > { %v12845_v24 = vmul.f32 -1.442695, %v16891_v36  ;;  %v13752_v50 = vpop.eup %13751  ;;  %v12268_v42 = vrot.slane %v12260_v35, %v16739_v19  ;;  %v11805_v61 = vrot.slane %v11797_v62, %v16739_v19  ;;  %v11949_v47 = vrot.slane %v11941_v59, %v16739_v19 }
 0xf9e   : > { %v11525_v10 = vcombine.low %v11517_v9, %v11524_v14  ;;  %v12275_v13 = vrot.slane %v12261_v56, %v16739_v19  ;;  %v11368_v37 = vadd.f32 1.0, %v13752_v50  ;;  %v11789_v58 = vrot.slane %v11767_v52, %v16739_v19 }
 0xf9f   : > { %13763 = vpow2.f32 %v12845_v24  ;;  %v17032_v11 = vrot.slane %v12278_v55, %v16739_v19  ;;  %vm12012_vm2 = vcmp.ge.f32.partialorder %v13750_v49, 0.5  ;;  %v11817_v62 = vcombine.low %v16880_v41, %v16891_v36 }
 0xfa0   : > { %11677 = vst [vmem:[%s16840_s2] ss:$4 sm:$0xff] %v11525_v10  ;;  %v12276_v35 = vcombine.low %v12268_v42, %v12275_v13  ;;  %v13754_v40 = vpop.eup %13753  ;;  %13765 = vrcp.f32 %v11368_v37  ;;  %v11798_v53 = vcombine.high %v11789_v58, %v16962_v26  ;;  %v11942_v59 = vcombine.low %v11789_v58, %v16962_v26  ;;  %v17080_v42 = vpop.f32.mrb[116].mxu0 }
 0xfa1   : > { %v12838_v1 = vmul.f32 -1.442695, %v16934_v8  ;;  %v17049_v25 = vrot.slane %v11815_v57, %v16739_v19  ;;  %v12055_v15 = vrot.slane %v16832_v6, 1  ;;  %v12119_v55 = vrot.slane %v16832_v6, 2  ;;  %v17053_v2 = vpop.eup %13755 }
 0xfa2   : > { %12865 = vst [vmem:[%s16840_s2 + $0x3] ss:$4 sm:$0xff] %v12276_v35  ;;  %v11361_v38 = vadd.f32 1.0, %v13754_v40  ;;  %v11812_v26 = vrot.slane %v11798_v53, %v16739_v19  ;;  %v11956_v7 = vrot.slane %v11942_v59, %v16739_v19  ;;  %v12848_v45 = vmul.f32 -1.442695, %v16936_v21 }
 0xfa3   : > { %13767 = vpow2.f32 %v12838_v1  ;;  %v12172_v57 = vsel %vm12012_vm2, %v12044_v60, %v12108_v43  ;;  %v12048_v6 = vrot.slane %v16878_v4, 1  ;;  %v12839_v29 = vmul.f32 -1.442695, %v16947_v51 }
 0xfa4   : > { %v13758_v48 = vpop.eup %13757  ;;  %13769 = vrcp.f32 %v11361_v38  ;;  %v11813_v14 = vcombine.low %v11805_v61, %v11812_v26  ;;  %v11957_v56 = vcombine.high %v11949_v47, %v11956_v7  ;;  %v11814_v27 = vcombine.low %v16934_v8, %v16947_v51  ;;  %v17090_v61 = vpop.f32.mrb[117].mxu0 }
 0xfa5   : > { %v13760_v44 = vpop.eup %13759  ;;  %v11526_v9 = vcombine.low %v13750_v49, %v13758_v48  ;;  %vm12013_vm3 = vcmp.ge.f32.partialorder %v13758_v48, 0.5  ;;  %13771 = vpow2.f32 %v12848_v45  ;;  %v17071_v60 = vrot.slane %v11529_v63, %v16739_v19 }
 0xfa6   : > { %v12173_v52 = vsel %vm12013_vm3, %v12045_v0, %v12109_v31  ;;  %v11371_v24 = vadd.f32 1.0, %v13760_v44  ;;  %v13762_v50 = vpop.eup %13761  ;;  %12858 = vst [vmem:[%s16840_s2 + $0x21] ss:$4 sm:$0xff] %v11813_v14  ;;  %12862 = vst [vmem:[%s16840_s2 + $0x22] ss:$4 sm:$0xff] %v11957_v56  ;;  %13773 = vpow2.f32 %v12839_v29  ;;  %vm12022_vm4 = vcmp.ge.f32.partialorder %v17053_v2, 0.5 }
 0xfa7   : > { %v17074_v43 = vrot.slane %v11526_v9, %v16739_v19  ;;  %v12277_v49 = vcombine.low %v12172_v57, %v12173_v52  ;;  %v11362_v0 = vadd.f32 1.0, %v13762_v50  ;;  %v11824_v31 = vrot.slane %v11814_v27, %v16739_v19 }
 0xfa8   : > { %13775 = vrcp.f32 %v11371_v24  ;;  %v12849_v63 = vmul.f32 -1.442695, %v16949_v23  ;;  %v11864_v13 = vcombine.low %v16936_v21, %v16949_v23  ;;  %v17102_v40 = vsel %vm12022_vm4, %v12054_v18, %v12118_v39 }
 0xfa9   : > { %v13764_v10 = vpop.eup %13763  ;;  %v11558_v12 = vcombine.low %v17074_v43, %v17013_v30  ;;  %v17085_v5 = vrot.slane %v12277_v49, %v16739_v19  ;;  %13777 = vrcp.f32 %v11362_v0  ;;  %v11846_v37 = vcombine.high %v11824_v31, %v17049_v25 }
 0xfaa   : > { %v11372_v47 = vadd.f32 1.0, %v13764_v10  ;;  %v11958_v58 = vcombine.low %v11824_v31, %v17049_v25  ;;  %v17094_v35 = vpop.eup %13765  ;;  %v12112_v59 = vrot.slane %v16878_v4, 2  ;;  %13779 = vpow2.f32 %v12849_v63 }
 0xfab   : > { %v12309_v53 = vcombine.low %v17085_v5, %v17032_v11  ;;  %v11576_v1 = vcombine.low %v17053_v2, %v17094_v35  ;;  %vm12023_vm5 = vcmp.ge.f32.partialorder %v17094_v35, 0.5  ;;  %v12058_v25 = vrot.slane %v16880_v41, 1 }
 0xfac   : > { %13781 = vrcp.f32 %v11372_v47  ;;  %v17115_v20 = vrot.slane %v12280_v32, %v16739_v19  ;;  %v17117_v18 = vsel %vm12023_vm5, %v12055_v15, %v12119_v55  ;;  %v12122_v39 = vrot.slane %v16880_v41, 2 }
 0xfad   : > { %v13768_v38 = vpop.eup %13767  ;;  %v12049_v26 = vrot.slane %v16889_v54, 1  ;;  %v12327_v45 = vcombine.low %v17102_v40, %v17117_v18  ;;  %v12113_v48 = vrot.slane %v16889_v54, 2  ;;  %v12059_v57 = vrot.slane %v16891_v36, 1 }
 0xfae   : > { %v13770_v7 = vpop.eup %13769  ;;  %v11365_v29 = vadd.f32 1.0, %v13768_v38  ;;  %v11845_v16 = vrot.slane %v11817_v62, %v16739_v19  ;;  %v12123_v22 = vrot.slane %v16891_v36, 2  ;;  %v12052_v32 = vrot.slane %v16934_v8, 1 }
 0xfaf   : > { %v12842_v15 = vmul.f32 -1.442695, %v16985_v34  ;;  %v13772_v55 = vpop.eup %13771  ;;  %vm12016_vm6 = vcmp.ge.f32.partialorder %v13770_v7, 0.5  ;;  %v12116_v44 = vrot.slane %v16934_v8, 2  ;;  %v12852_v54 = vmul.f32 -1.442695, %v16987_v17 }
 0xfb0   : > { %13783 = vrcp.f32 %v11365_v29  ;;  %v13774_v9 = vpop.eup %13773  ;;  %v11375_v14 = vadd.f32 1.0, %v13772_v55  ;;  %v12062_v56 = vrot.slane %v16936_v21, 1  ;;  %v11854_v41 = vrot.slane %v11846_v37, %v16739_v19 }
 0xfb1   : > { %13785 = vpow2.f32 %v12842_v15  ;;  %v11366_v36 = vadd.f32 1.0, %v13774_v9  ;;  %v12843_v52 = vmul.f32 -1.442695, %v16993_v3  ;;  %v11816_v24 = vcombine.low %v16985_v34, %v16993_v3 }
 0xfb2   : > { %v17136_v62 = vpop.eup %13775  ;;  %13787 = vpow2.f32 %v12852_v54  ;;  %v12176_v27 = vsel %vm12016_vm6, %v12048_v6, %v12112_v59  ;;  %v11966_v50 = vrot.slane %v11958_v58, %v16739_v19  ;;  %v12853_v10 = vmul.f32 -1.442695, %v16995_v33 }
 0xfb3   : > { %vm12026_vm7 = vcmp.ge.f32.partialorder %v17136_v62, 0.5  ;;  %13789 = vrcp.f32 %v11375_v14  ;;  %v13778_v49 = vpop.eup %13777  ;;  %v11838_v31 = vrot.slane %v11816_v24, %v16739_v19  ;;  %v11866_v4 = vcombine.low %v16987_v17, %v16995_v33 }
 0xfb4   : > { %v17145_v0 = vsel %vm12026_vm7, %v12058_v25, %v12122_v39  ;;  %13791 = vrcp.f32 %v11366_v36  ;;  %v13780_v63 = vpop.eup %13779  ;;  %v11528_v47 = vcombine.low %v13770_v7, %v13778_v49  ;;  %vm12017_vm8 = vcmp.ge.f32.partialorder %v13778_v49, 0.5 }
 0xfb5   : > { %13793 = vpow2.f32 %v12843_v52  ;;  %v12177_v37 = vsel %vm12017_vm8, %v12049_v26, %v12113_v48  ;;  %v11376_v59 = vadd.f32 1.0, %v13780_v63  ;;  %v11847_v58 = vcombine.high %v11838_v31, %v11845_v16 }
 0xfb6   : > { %v17151_v6 = vpop.eup %13781  ;;  %v11959_v38 = vcombine.low %v11838_v31, %v11845_v16  ;;  %v11550_v25 = vrot.slane %v11528_v47, %v16739_v19  ;;  %v12279_v39 = vcombine.low %v12176_v27, %v12177_v37  ;;  %v12126_v54 = vrot.slane %v16936_v21, 2 }
 0xfb7   : > { %v11578_v29 = vcombine.low %v17136_v62, %v17151_v6  ;;  %vm12027_vm9 = vcmp.ge.f32.partialorder %v17151_v6, 0.5  ;;  %13795 = vrcp.f32 %v11376_v59  ;;  %v11861_v15 = vrot.slane %v11847_v58, %v16739_v19 }
 0xfb8   : > { %v17157_v7 = vsel %vm12027_vm9, %v12059_v57, %v12123_v22  ;;  %v11973_v55 = vrot.slane %v11959_v38, %v16739_v19  ;;  %v11559_v26 = vcombine.low %v11550_v25, %v17071_v60  ;;  %v12301_v48 = vrot.slane %v12279_v39, %v16739_v19 }
 0xfb9   : > { %v12329_v16 = vcombine.low %v17145_v0, %v17157_v7  ;;  %v12053_v57 = vrot.slane %v16947_v51, 1  ;;  %v11862_v22 = vcombine.low %v11854_v41, %v11861_v15  ;;  %13797 = vpow2.f32 %v12853_v10 }
 0xfba   : > { %v13784_v9 = vpop.eup %13783  ;;  %v11974_v14 = vcombine.high %v11966_v50, %v11973_v55  ;;  %v11566_v60 = vrot.slane %v11558_v12, %v16739_v19  ;;  %v11573_v52 = vrot.slane %v11559_v26, %v16739_v19  ;;  %v12310_v24 = vcombine.low %v12301_v48, %v17115_v20 }
 0xfbb   : > { %v13786_v36 = vpop.eup %13785  ;;  %vm12020_vm10 = vcmp.ge.f32.partialorder %v13784_v9, 0.5  ;;  %v12317_v49 = vrot.slane %v12309_v53, %v16739_v19  ;;  %v12117_v41 = vrot.slane %v16947_v51, 2  ;;  %v12063_v50 = vrot.slane %v16949_v23, 1  ;;  %12859 = vst [vmem:[%s16840_s2 + $0x41] ss:$4 sm:$0xff] %v11862_v22 }
 0xfbc   : > { %v13788_v27 = vpop.eup %13787  ;;  %v11369_v31 = vadd.f32 1.0, %v13786_v36  ;;  %12863 = vst [vmem:[%s16840_s2 + $0x42] ss:$4 sm:$0xff] %v11974_v14  ;;  %v11574_v43 = vcombine.low %v11566_v60, %v11573_v52  ;;  %v12324_v12 = vrot.slane %v12310_v24, %v16739_v19  ;;  %v12846_v10 = vmul.f32 -1.442695, %v17037_v46 }
 0xfbd   : > { %v17181_v30 = vpop.eup %13789  ;;  %v11379_v20 = vadd.f32 1.0, %v13788_v27  ;;  %v17189_v51 = vrot.slane %v11576_v1, %v16739_v19  ;;  %v12180_v11 = vsel %vm12020_vm10, %v12052_v32, %v12116_v44  ;;  %v12127_v5 = vrot.slane %v16949_v23, 2 }
 0xfbe   : > { %v13792_v63 = vpop.eup %13791  ;;  %13799 = vrcp.f32 %v11369_v31  ;;  %12854 = vst [vmem:[%s16840_s2 + $0x20] ss:$4 sm:$0xff] %v11574_v43  ;;  %v12325_v47 = vcombine.low %v12317_v49, %v12324_v12  ;;  %vm12030_vm11 = vcmp.ge.f32.partialorder %v17181_v30, 0.5  ;;  %v12847_v35 = vmul.f32 -1.442695, %v17042_v28 }
 0xfbf   : > { %v13794_v53 = vpop.eup %13793  ;;  %v11575_v37 = vcombine.low %v13784_v9, %v13792_v63  ;;  %vm12021_vm12 = vcmp.ge.f32.partialorder %v13792_v63, 0.5  ;;  %13801 = vrcp.f32 %v11379_v20  ;;  %v11863_v32 = vcombine.low %v17037_v46, %v17042_v28 }
 0xfc0   : > { %v12181_v59 = vsel %vm12021_vm12, %v12053_v57, %v12117_v41  ;;  %v11370_v2 = vadd.f32 1.0, %v13794_v53  ;;  %12866 = vst [vmem:[%s16840_s2 + $0x23] ss:$4 sm:$0xff] %v12325_v47  ;;  %13803 = vpow2.f32 %v12846_v10  ;;  %v17211_v58 = vrot.slane %v12327_v45, %v16739_v19 }
 0xfc1   : > { %v17201_v1 = vrot.slane %v11575_v37, %v16739_v19  ;;  %v12326_v8 = vcombine.low %v12180_v11, %v12181_v59  ;;  %v17205_v44 = vpop.eup %13795  ;;  %v17215_v38 = vsel %vm12030_vm11, %v12062_v56, %v12126_v54  ;;  %v12850_v25 = vmul.f32 -1.442695, %v17080_v42 }
 0xfc2   : > { %13805 = vrcp.f32 %v11370_v2  ;;  %v11625_v55 = vcombine.low %v17181_v30, %v17205_v44  ;;  %vm12031_vm13 = vcmp.ge.f32.partialorder %v17205_v44, 0.5  ;;  %v11880_v18 = vrot.slane %v11864_v13, %v16739_v19 }
 0xfc3   : > { %v11607_v39 = vcombine.low %v17201_v1, %v17189_v51  ;;  %v17221_v15 = vrot.slane %v12326_v8, %v16739_v19  ;;  %v13798_v40 = vpop.eup %13797  ;;  %v17230_v45 = vsel %vm12031_vm13, %v12063_v50, %v12127_v5  ;;  %13807 = vpow2.f32 %v12847_v35 }
 0xfc4   : > { %v11873_v56 = vrot.slane %v11863_v32, %v16739_v19  ;;  %v12376_v48 = vcombine.low %v17215_v38, %v17230_v45  ;;  %v11380_v54 = vadd.f32 1.0, %v13798_v40  ;;  %13809 = vpow2.f32 %v12850_v25 }
 0xfc5   : > { %v12358_v26 = vcombine.low %v17221_v15, %v17211_v58  ;;  %v12851_v22 = vmul.f32 -1.442695, %v17090_v61  ;;  %v11865_v21 = vcombine.low %v17080_v42, %v17090_v61  ;;  %v12056_v13 = vrot.slane %v16985_v34, 1 }
 0xfc6   : > { %v11895_v9 = vcombine.high %v11873_v56, %v11880_v18  ;;  %v11975_v57 = vcombine.low %v11873_v56, %v11880_v18  ;;  %13811 = vrcp.f32 %v11380_v54  ;;  %v12120_v36 = vrot.slane %v16985_v34, 2 }
 0xfc7   : > { %13813 = vpow2.f32 %v12851_v22  ;;  %v11894_v60 = vrot.slane %v11866_v4, %v16739_v19  ;;  %v11887_v52 = vrot.slane %v11865_v21, %v16739_v19  ;;  %v11606_v27 = vrot.slane %v11578_v29, %v16739_v19 }
 0xfc8   : > { %v13800_v14 = vpop.eup %13799  ;;  %v12066_v49 = vrot.slane %v16987_v17, 1  ;;  %v12057_v41 = vrot.slane %v16993_v3, 1  ;;  %v12121_v50 = vrot.slane %v16993_v3, 2  ;;  %v11903_v10 = vrot.slane %v11895_v9, %v16739_v19 }
 0xfc9   : > { %vm12024_vm14 = vcmp.ge.f32.partialorder %v13800_v14, 0.5  ;;  %v17240_v23 = vpop.eup %13801  ;;  %v11896_v12 = vcombine.high %v11887_v52, %v11894_v60  ;;  %v11976_v20 = vcombine.low %v11887_v52, %v11894_v60  ;;  %v11983_v63 = vrot.slane %v11975_v57, %v16739_v19 }
 0xfca   : > { %v13804_v24 = vpop.eup %13803  ;;  %v12184_v31 = vsel %vm12024_vm14, %v12056_v13, %v12120_v36  ;;  %vm12034_vm0 = vcmp.ge.f32.partialorder %v17240_v23, 0.5  ;;  %v12357_v47 = vrot.slane %v12329_v16, %v16739_v19  ;;  %v12130_v37 = vrot.slane %v16987_v17, 2 }
 0xfcb   : > { %v11373_v43 = vadd.f32 1.0, %v13804_v24  ;;  %v11910_v6 = vrot.slane %v11896_v12, %v16739_v19  ;;  %v11990_v29 = vrot.slane %v11976_v20, %v16739_v19  ;;  %v11615_v25 = vrot.slane %v11607_v39, %v16739_v19 }
 0xfcc   : > { %v13806_v34 = vpop.eup %13805  ;;  %v12067_v40 = vrot.slane %v16995_v33, 1  ;;  %v12131_v18 = vrot.slane %v16995_v33, 2  ;;  %v12194_v56 = vsel %vm12034_vm0, %v12066_v49, %v12130_v37  ;;  %v12366_v33 = vrot.slane %v12358_v26, %v16739_v19 }
 0xfcd   : > { %v11577_v4 = vcombine.low %v13800_v14, %v13806_v34  ;;  %vm12025_vm15 = vcmp.ge.f32.partialorder %v13806_v34, 0.5  ;;  %v13808_v51 = vpop.eup %13807  ;;  %13815 = vrcp.f32 %v11373_v43  ;;  %v11911_v59 = vcombine.low %v11903_v10, %v11910_v6 }
 0xfce   : > { %v12185_v62 = vsel %vm12025_vm15, %v12057_v41, %v12121_v50  ;;  %v11374_v5 = vadd.f32 1.0, %v13808_v51  ;;  %v13810_v53 = vpop.eup %13809  ;;  %v11991_v2 = vcombine.high %v11983_v63, %v11990_v29  ;;  %v12124_v13 = vrot.slane %v17037_v46, 2 }
 0xfcf   : > { %v11599_v3 = vrot.slane %v11577_v4, %v16739_v19  ;;  %v12328_v11 = vcombine.low %v12184_v31, %v12185_v62  ;;  %v11377_v8 = vadd.f32 1.0, %v13810_v53  ;;  %12860 = vst [vmem:[%s16840_s2 + $0x61] ss:$4 sm:$0xff] %v11911_v59  ;;  %v12061_v52 = vrot.slane %v17042_v28, 1 }
 0xfd0   : > { %13817 = vrcp.f32 %v11374_v5  ;;  %v13812_v32 = vpop.eup %13811  ;;  %12864 = vst [vmem:[%s16840_s2 + $0x62] ss:$4 sm:$0xff] %v11991_v2  ;;  %v12125_v58 = vrot.slane %v17042_v28, 2  ;;  %v12064_v24 = vrot.slane %v17080_v42, 1  ;;  %v11641_v49 = vrot.slane %v11625_v55, %v16739_v19 }
 0xfd1   : > { %v11608_v35 = vcombine.low %v11599_v3, %v11606_v27  ;;  %v12350_v1 = vrot.slane %v12328_v11, %v16739_v19  ;;  %v13814_v0 = vpop.eup %13813  ;;  %v11627_v16 = vcombine.low %v17240_v23, %v13812_v32  ;;  %vm12035_vm1 = vcmp.ge.f32.partialorder %v13812_v32, 0.5 }
 0xfd2   : > { %v12195_v54 = vsel %vm12035_vm1, %v12067_v40, %v12131_v18  ;;  %13819 = vrcp.f32 %v11377_v8  ;;  %v11378_v9 = vadd.f32 1.0, %v13814_v0  ;;  %v12060_v23 = vrot.slane %v17037_v46, 1 }
 0xfd3   : > { %v11622_v17 = vrot.slane %v11608_v35, %v16739_v19  ;;  %v12359_v7 = vcombine.low %v12350_v1, %v12357_v47  ;;  %v12378_v22 = vcombine.low %v12194_v56, %v12195_v54  ;;  %v12128_v50 = vrot.slane %v17080_v42, 2 }
 0xfd4   : > { %13821 = vrcp.f32 %v11378_v9  ;;  %v12392_v28 = vrot.slane %v12376_v48, %v16739_v19  ;;  %v12065_v34 = vrot.slane %v17090_v61, 1  ;;  %v12129_v30 = vrot.slane %v17090_v61, 2 }
 0xfd5   : > { %v11623_v39 = vcombine.low %v11615_v25, %v11622_v17  ;;  %v12373_v57 = vrot.slane %v12359_v7, %v16739_v19  ;;  %v11655_v4 = vrot.slane %v11627_v16, %v16739_v19  ;;  %v12406_v48 = vrot.slane %v12378_v22, %v16739_v19 }
 0xfd7   : > { %12855 = vst [vmem:[%s16840_s2 + $0x40] ss:$4 sm:$0xff] %v11623_v39  ;;  %v12374_v14 = vcombine.low %v12366_v33, %v12373_v57  ;;  %v13816_v21 = vpop.eup %13815 }
 0xfd8   : > { %vm12028_vm2 = vcmp.ge.f32.partialorder %v13816_v21, 0.5 }
 0xfd9   : > { %12867 = vst [vmem:[%s16840_s2 + $0x43] ss:$4 sm:$0xff] %v12374_v14  ;;  %v12188_v60 = vsel %vm12028_vm2, %v12060_v23, %v12124_v13 }
 0xfda   : > { %v13818_v36 = vpop.eup %13817 }
 0xfdb   : > { %v11624_v15 = vcombine.low %v13816_v21, %v13818_v36  ;;  %vm12029_vm3 = vcmp.ge.f32.partialorder %v13818_v36, 0.5 }
 0xfdc   : > { %v12189_v26 = vsel %vm12029_vm3, %v12061_v52, %v12125_v58  ;;  %v13820_v27 = vpop.eup %13819 }
 0xfdd   : > { %v11634_v41 = vrot.slane %v11624_v15, %v16739_v19  ;;  %v12375_v46 = vcombine.low %v12188_v60, %v12189_v26  ;;  %vm12032_vm4 = vcmp.ge.f32.partialorder %v13820_v27, 0.5 }
 0xfde   : > { %v13822_v31 = vpop.eup %13821  ;;  %v12192_v44 = vsel %vm12032_vm4, %v12064_v24, %v12128_v50 }
 0xfdf   : > { %v11656_v43 = vcombine.low %v11634_v41, %v11641_v49  ;;  %v12385_v12 = vrot.slane %v12375_v46, %v16739_v19  ;;  %v11626_v55 = vcombine.low %v13820_v27, %v13822_v31  ;;  %vm12033_vm5 = vcmp.ge.f32.partialorder %v13822_v31, 0.5 }
 0xfe0   : > { %v12193_v42 = vsel %vm12033_vm5, %v12065_v34, %v12129_v30 }
 0xfe1   : > { %v12407_v20 = vcombine.low %v12385_v12, %v12392_v28  ;;  %v11648_v38 = vrot.slane %v11626_v55, %v16739_v19  ;;  %v12377_v45 = vcombine.low %v12192_v44, %v12193_v42  ;;  %v11664_v51 = vrot.slane %v11656_v43, %v16739_v19 }
 0xfe3   : > { %v11657_v10 = vcombine.low %v11648_v38, %v11655_v4  ;;  %v12399_v63 = vrot.slane %v12377_v45, %v16739_v19  ;;  %v12415_v6 = vrot.slane %v12407_v20, %v16739_v19 }
 0xfe5   : > { %v11671_v61 = vrot.slane %v11657_v10, %v16739_v19  ;;  %v12408_v62 = vcombine.low %v12399_v63, %v12406_v48 }
 0xfe7   : > { %v11672_v29 = vcombine.low %v11664_v51, %v11671_v61  ;;  %v12422_v3 = vrot.slane %v12408_v62, %v16739_v19 }
 0xfe9   : > { %12856 = vst [vmem:[%s16840_s2 + $0x60] ss:$4 sm:$0xff] %v11672_v29  ;;  %v12423_v11 = vcombine.low %v12415_v6, %v12422_v3 }
 0xfeb   : > { %12868 = vst [vmem:[%s16840_s2 + $0x63] ss:$4 sm:$0xff] %v12423_v11 }
 0xfec PF: > { %p13491_p5 = scmp.ge.s32.totalorder %s13919_s15, 2  ;;  %s12500_s22 = sand.u32 1, %s13907_s7  }
 0xfed   : > { %s12501_s5 = scalar_lea.sflag [#allocation3], %s12500_s22 }
 0xfee   : > { %p13485_p7 = pnand %p13491_p5, %p14157_p6 }
 0xff0   : > { %13898 = dma.done.wait (!%p13485_p7), %s12501_s5, 128  }
 0xff1   : > { %13900 = vsyncadd (!%p13485_p7), %s12501_s5, 4294967168  ;;  %s12510_s11 = scalar_lea.sflag [#allocation5], %s12500_s22 }
 0xff2   : > { %13902 = dma.done.wait (!%p13485_p7), %s12510_s11, 16384  }
 0xff3   : > { %13904 = vsyncadd (!%p13485_p7), %s12510_s11, 4294950912  ;;  %s17797_s15 = sld [smem:[#allocation26_spill]]  ;;  %s17798_s7 = sld [smem:[#allocation24_spill]] }
 0xff4   : > { %s17799_s10 = sld [smem:[#allocation25_spill]]  ;;  %s17800_s11 = sld [smem:[#allocation27_spill]] }
 0xff9   : > { %p73_p8 = scmp.ge.s32.totalorder %s17797_s15, 4  }
 0xffb   :  { %75 = sbr.rel (!%p73_p8) target bundleno = 55 (0x37), region = 248 }
0x1002   :  { %12523 = vsyncpa [#allocation3], 1 }
0x1003   :  { %12525 = vsyncpa [#allocation3 + $0x1], 1 }
0x1004   :  { %12526 = vsyncpa [#allocation5], 1 }
0x1005   :  { %12528 = vsyncpa [#allocation5 + $0x1], 1 }

</bundles_post_ra>
